<compile_context>
chip_gen: v6e
topology: v6e:2x2x1
jax: 0.10.0
libtpu: 0.0.40
codegen_flags: <defaults>
</compile_context>

<pallas_src>
import jax
import jax.numpy as jnp
from jax import lax
from jax.experimental import pallas as pl
from jax.experimental.pallas import tpu as pltpu


# ------------------------------- fused forward kernel -------------------------------

def _tudui_kernel(x_ref, wk1_ref, b1_ref, wk2_ref, b2_ref, wk3_ref, b3_ref,
                  wf1_ref, bf1_ref, wf2_ref, bf2_ref,
                  o_ref,
                  comb1, comb2, comb3, s1, s2, s3, tmp):
    """grid=(N,): one image per grid step; every activation stays in VMEM scratch."""

    def build_comb(src_ref, comb_ref, h_out, cin):
        # comb[h, w, kh*cin + c] = padded_input[h + kh, w, c]  (5 static block copies).
        for kh in range(5):
            comb_ref[:, :, kh * cin:(kh + 1) * cin] = src_ref[kh:kh + h_out, :, :]

    def conv_row(comb_ref, h, w_out, wk_ref, b_ref):
        # One full-width conv output row = 5 MXU matmuls with K = 5*Cin, f32 accumulation.
        row = comb_ref[h]                                            # (w_out+4, 5*cin) f32
        acc = jnp.dot(row[0:w_out, :].astype(jnp.bfloat16), wk_ref[0],
                      preferred_element_type=jnp.float32)
        for kw in range(1, 5):
            acc = acc + jnp.dot(row[kw:kw + w_out, :].astype(jnp.bfloat16), wk_ref[kw],
                                preferred_element_type=jnp.float32)
        return acc + b_ref[...]                                      # (w_out, c_out) f32

    def conv_pool(comb_ref, h_out, w_out, c_out, wk_ref, b_ref, store_pooled):
        w_pool = w_out // 2

        def body(r, carry):
            r0 = conv_row(comb_ref, 2 * r, w_out, wk_ref, b_ref)
            r1 = conv_row(comb_ref, 2 * r + 1, w_out, wk_ref, b_ref)
            tmp[0:w_out, 0:c_out] = jnp.maximum(r0, r1)              # vertical 2x1 max
            pooled = jnp.maximum(tmp[pl.ds(0, w_pool, 2), 0:c_out],  # horizontal 1x2 max
                                 tmp[pl.ds(1, w_pool, 2), 0:c_out])
            store_pooled(r, pooled)                                  # (w_pool, c_out) f32
            return carry

        lax.fori_loop(0, h_out // 2, body, 0)

    # -- stage 1: Conv2d(3->32, 5, pad=2) + MaxPool2d(2) --------------------------------
    s1[...] = jnp.zeros_like(s1)          # zero borders = next layer's spatial padding
    build_comb(x_ref, comb1, 32, 8)

    def store1(r, pooled):                # (16, 32) -> interior of padded s1
        s1[pl.ds(2 + r, 1), 2:18, :] = pooled[None]

    conv_pool(comb1, 32, 32, 32, wk1_ref, b1_ref, store1)

    # -- stage 2: Conv2d(32->32, 5, pad=2) + MaxPool2d(2) -------------------------------
    s2[...] = jnp.zeros_like(s2)
    build_comb(s1, comb2, 16, 32)

    def store2(r, pooled):                # (8, 32) -> interior of padded s2
        s2[pl.ds(2 + r, 1), 2:10, :] = pooled[None]

    conv_pool(comb2, 16, 16, 32, wk2_ref, b2_ref, store2)

    # -- stage 3: Conv2d(32->64, 5, pad=2) + MaxPool2d(2) -------------------------------
    build_comb(s2, comb3, 8, 32)

    def store3(r, pooled):                # (4, 64) -> rows 4r..4r+3 of the flattened s3
        s3[pl.ds(4 * r, 4), :] = pooled

    conv_pool(comb3, 8, 8, 64, wk3_ref, b3_ref, store3)

    # -- Flatten + Linear(1024, 64) + Linear(64, 10 -> padded to 128 lanes) -------------
    h = bf1_ref[...]                                                 # (1, 64) f32
    for p in range(16):                   # 16 spatial positions, K = 64 each
        h = h + jnp.dot(s3[p:p + 1, :].astype(jnp.bfloat16), wf1_ref[p],
                        preferred_element_type=jnp.float32)
    logits = jnp.dot(h.astype(jnp.bfloat16), wf2_ref[...],
                     preferred_element_type=jnp.float32) + bf2_ref[...]
    o_ref[...] = logits                                              # (1, 128) lane-dense


# ------------------------------- wrapper / pallas_call -------------------------------

def tudui_forward(x_nchw, params):
    """x_nchw: (N, 3, 32, 32) f32 (PyTorch layout) -> (N, 10) f32 logits."""
    n = x_nchw.shape[0]
    x = jnp.transpose(x_nchw, (0, 2, 3, 1))                   # NCHW -> NHWC
    xp = jnp.pad(x, ((0, 0), (2, 2), (2, 2), (0, 5)))         # one pad: +-2 spatial, C 3->8

    def resident(shape):
        nd = len(shape)
        return pl.BlockSpec(shape, lambda i, _nd=nd: (0,) * _nd)

    in_specs = [
        pl.BlockSpec((None, 36, 36, 8), lambda i: (i, 0, 0, 0)),   # whole padded image / step
        resident((5, 40, 32)),  resident((1, 32)),                 # conv1 w, b (VMEM-resident)
        resident((5, 160, 32)), resident((1, 32)),                 # conv2 w, b
        resident((5, 160, 64)), resident((1, 64)),                 # conv3 w, b
        resident((16, 64, 64)), resident((1, 64)),                 # fc1 w, b
        resident((64, 128)),    resident((1, 128)),                # fc2 w, b (padded to 128)
    ]
    scratch_shapes = [
        pltpu.VMEM((32, 36, 40), jnp.float32),    # comb1: kh-stacked im2col of padded input
        pltpu.VMEM((16, 20, 160), jnp.float32),   # comb2
        pltpu.VMEM((8, 12, 160), jnp.float32),    # comb3
        pltpu.VMEM((20, 20, 32), jnp.float32),    # s1: pooled conv1, pre-padded for conv2
        pltpu.VMEM((12, 12, 32), jnp.float32),    # s2: pooled conv2, pre-padded for conv3
        pltpu.VMEM((16, 64), jnp.float32),        # s3: pooled conv3, flattened (p = 4*h + w)
        pltpu.VMEM((32, 64), jnp.float32),        # tmp: full-width row buffer for pooling
    ]

    flops = n * (2 * 32 * 32 * 25 * 8 * 32 + 2 * 16 * 16 * 25 * 32 * 32
                 + 2 * 8 * 8 * 25 * 32 * 64 + 2 * 1024 * 64 + 2 * 64 * 128)
    w_bytes = sum(int(params[k].size) * params[k].dtype.itemsize for k in params)
    bytes_accessed = int(xp.size) * 4 + w_bytes + n * 128 * 4

    out = pl.pallas_call(
        _tudui_kernel,
        out_shape=jax.ShapeDtypeStruct((n, 1, 128), jnp.float32),
        grid=(n,),
        in_specs=in_specs,
        out_specs=pl.BlockSpec((None, 1, 128), lambda i: (i, 0, 0)),
        scratch_shapes=scratch_shapes,
        compiler_params=pltpu.CompilerParams(
            dimension_semantics=("parallel",),
            vmem_limit_bytes=32 * 1024 * 1024),
        cost_estimate=pl.CostEstimate(flops=flops, transcendentals=0,
                                      bytes_accessed=bytes_accessed),
    )(xp, params["w1"], params["b1"], params["w2"], params["b2"],
      params["w3"], params["b3"], params["wf1"], params["bf1"],
      params["wf2"], params["bf2"])
    return out[:, 0, :10]


# ------------------------------- parameters (PyTorch-layout aware) -------------------

def init_params(key):
    ks = jax.random.split(key, 10)

    def conv_w(k, cout, cin, cin_pad):
        # torch (Cout, Cin, 5, 5) -> (kw, kh*Cin_pad + c, Cout), Cin zero-padded.
        w = jax.random.normal(k, (cout, cin, 5, 5), jnp.float32) * 0.05
        if cin_pad > cin:
            w = jnp.pad(w, ((0, 0), (0, cin_pad - cin), (0, 0), (0, 0)))
        w = jnp.transpose(w, (3, 2, 1, 0)).reshape(5, 5 * cin_pad, cout)
        return w.astype(jnp.bfloat16)

    def fc1_w(k):
        # torch Linear(1024, 64): weight (64, 1024), input index order (c, h, w).
        # Re-layout to [p = h*4 + w, c, out] so the kernel's (p, c) features feed it directly.
        w = jax.random.normal(k, (64, 1024), jnp.float32) * 0.05
        w = jnp.transpose(w.T.reshape(64, 16, 64), (1, 0, 2))
        return w.astype(jnp.bfloat16)

    def fc2_w(k, n_pad=128):
        # torch Linear(64, 10): weight (10, 64) -> (64, 10), zero-padded to 128 output lanes.
        w = jax.random.normal(k, (10, 64), jnp.float32) * 0.05
        return jnp.pad(w.T, ((0, 0), (0, n_pad - 10))).astype(jnp.bfloat16)

    def bias(k, c, pad_to=None):
        b = jax.random.normal(k, (c,), jnp.float32) * 0.01
        if pad_to is not None and pad_to > c:
            b = jnp.pad(b, (0, pad_to - c))
        return b.reshape(1, -1).astype(jnp.float32)

    return {
        "w1": conv_w(ks[0], 32, 3, 8),   "b1": bias(ks[1], 32),
        "w2": conv_w(ks[2], 32, 32, 32), "b2": bias(ks[3], 32),
        "w3": conv_w(ks[4], 64, 32, 32), "b3": bias(ks[5], 64),
        "wf1": fc1_w(ks[6]),             "bf1": bias(ks[7], 64),
        "wf2": fc2_w(ks[8]),             "bf2": bias(ks[9], 10, pad_to=128),
    }


if __name__ == "__main__":
    key = jax.random.PRNGKey(0)
    pkey, xkey = jax.random.split(key)
    params = init_params(pkey)
    # Linear(1024, 64) after three 2x pools fixes the input at 3x32x32 (CIFAR-10 size).
    x = jax.random.normal(xkey, (2, 3, 32, 32), jnp.float32)

    fwd = jax.jit(tudui_forward)
    out = fwd(x, params)
    jax.block_until_ready(out)
    assert out.shape == (2, 10) and out.dtype == jnp.float32
    print("KERNEL_OK")
</pallas_src>

<mosaic_0001>
module attributes {stable_mosaic.version = 11 : i64} {
  func.func @_tudui_kernel(%arg0: i32, %arg1: memref<1x36x36x8xf32, #tpu.memory_space<vmem>>, %arg2: memref<5x40x32xbf16, #tpu.memory_space<vmem>>, %arg3: memref<1x32xf32, #tpu.memory_space<vmem>>, %arg4: memref<5x160x32xbf16, #tpu.memory_space<vmem>>, %arg5: memref<1x32xf32, #tpu.memory_space<vmem>>, %arg6: memref<5x160x64xbf16, #tpu.memory_space<vmem>>, %arg7: memref<1x64xf32, #tpu.memory_space<vmem>>, %arg8: memref<16x64x64xbf16, #tpu.memory_space<vmem>>, %arg9: memref<1x64xf32, #tpu.memory_space<vmem>>, %arg10: memref<64x128xbf16, #tpu.memory_space<vmem>>, %arg11: memref<1x128xf32, #tpu.memory_space<vmem>>, %arg12: memref<1x1x128xf32, #tpu.memory_space<vmem>>, %arg13: memref<32x36x40xf32, #tpu.memory_space<vmem>>, %arg14: memref<16x20x160xf32, #tpu.memory_space<vmem>>, %arg15: memref<8x12x160xf32, #tpu.memory_space<vmem>>, %arg16: memref<20x20x32xf32, #tpu.memory_space<vmem>>, %arg17: memref<12x12x32xf32, #tpu.memory_space<vmem>>, %arg18: memref<16x64xf32, #tpu.memory_space<vmem>>, %arg19: memref<32x64xf32, #tpu.memory_space<vmem>>) attributes {dimension_semantics = [#tpu.dimension_semantics<parallel>], iteration_bounds = array<i64: 2>, scalar_prefetch = 0 : i64, scratch_operands = 7 : i64, tpu.core_type = #tpu.core_type<tc>, window_params = [{transform_indices = @transform_0, window_bounds = array<i64: 1, 36, 36, 8>}, {pipeline_mode = #tpu.pipeline_mode<synchronous>, transform_indices = @transform_1, window_bounds = array<i64: 5, 40, 32>}, {pipeline_mode = #tpu.pipeline_mode<synchronous>, transform_indices = @transform_2, window_bounds = array<i64: 1, 32>}, {pipeline_mode = #tpu.pipeline_mode<synchronous>, transform_indices = @transform_3, window_bounds = array<i64: 5, 160, 32>}, {pipeline_mode = #tpu.pipeline_mode<synchronous>, transform_indices = @transform_4, window_bounds = array<i64: 1, 32>}, {pipeline_mode = #tpu.pipeline_mode<synchronous>, transform_indices = @transform_5, window_bounds = array<i64: 5, 160, 64>}, {pipeline_mode = #tpu.pipeline_mode<synchronous>, transform_indices = @transform_6, window_bounds = array<i64: 1, 64>}, {pipeline_mode = #tpu.pipeline_mode<synchronous>, transform_indices = @transform_7, window_bounds = array<i64: 16, 64, 64>}, {pipeline_mode = #tpu.pipeline_mode<synchronous>, transform_indices = @transform_8, window_bounds = array<i64: 1, 64>}, {pipeline_mode = #tpu.pipeline_mode<synchronous>, transform_indices = @transform_9, window_bounds = array<i64: 64, 128>}, {pipeline_mode = #tpu.pipeline_mode<synchronous>, transform_indices = @transform_10, window_bounds = array<i64: 1, 128>}, {transform_indices = @transform_11, window_bounds = array<i64: 1, 1, 128>}]} {
    %cst = arith.constant 0.000000e+00 : f32
    %0 = vector.broadcast %cst : f32 to vector<20x20x32xf32>
    %c0 = arith.constant 0 : index
    %c0_0 = arith.constant 0 : index
    %c0_1 = arith.constant 0 : index
    %1 = vector.load %arg16[%c0, %c0_0, %c0_1] : memref<20x20x32xf32, #tpu.memory_space<vmem>>, vector<20x20x32xf32>
    tpu.vector_store %arg16[%c0, %c0_0, %c0_1], %0 {strides = array<i32>} : memref<20x20x32xf32, #tpu.memory_space<vmem>>, vector<20x20x32xf32>,
    %c0_2 = arith.constant 0 : index
    %c0_3 = arith.constant 0 : index
    %c0_4 = arith.constant 0 : index
    %c0_5 = arith.constant 0 : index
    %2 = vector.load %arg1[%c0_2, %c0_3, %c0_4, %c0_5] : memref<1x36x36x8xf32, #tpu.memory_space<vmem>>, vector<1x32x36x8xf32>
    %3 = vector.shape_cast %2 : vector<1x32x36x8xf32> to vector<32x36x8xf32>
    %c0_6 = arith.constant 0 : index
    %c0_7 = arith.constant 0 : index
    %c0_8 = arith.constant 0 : index
    %4 = vector.load %arg13[%c0_6, %c0_7, %c0_8] : memref<32x36x40xf32, #tpu.memory_space<vmem>>, vector<32x36x8xf32>
    tpu.vector_store %arg13[%c0_6, %c0_7, %c0_8], %3 {strides = array<i32>} : memref<32x36x40xf32, #tpu.memory_space<vmem>>, vector<32x36x8xf32>,
    %c0_9 = arith.constant 0 : index
    %c1 = arith.constant 1 : index
    %c0_10 = arith.constant 0 : index
    %c0_11 = arith.constant 0 : index
    %5 = vector.load %arg1[%c0_9, %c1, %c0_10, %c0_11] : memref<1x36x36x8xf32, #tpu.memory_space<vmem>>, vector<1x32x36x8xf32>
    %6 = vector.shape_cast %5 : vector<1x32x36x8xf32> to vector<32x36x8xf32>
    %c0_12 = arith.constant 0 : index
    %c0_13 = arith.constant 0 : index
    %c8 = arith.constant 8 : index
    %7 = vector.load %arg13[%c0_12, %c0_13, %c8] : memref<32x36x40xf32, #tpu.memory_space<vmem>>, vector<32x36x8xf32>
    tpu.vector_store %arg13[%c0_12, %c0_13, %c8], %6 {strides = array<i32>} : memref<32x36x40xf32, #tpu.memory_space<vmem>>, vector<32x36x8xf32>,
    %c0_14 = arith.constant 0 : index
    %c2 = arith.constant 2 : index
    %c0_15 = arith.constant 0 : index
    %c0_16 = arith.constant 0 : index
    %8 = vector.load %arg1[%c0_14, %c2, %c0_15, %c0_16] : memref<1x36x36x8xf32, #tpu.memory_space<vmem>>, vector<1x32x36x8xf32>
    %9 = vector.shape_cast %8 : vector<1x32x36x8xf32> to vector<32x36x8xf32>
    %c0_17 = arith.constant 0 : index
    %c0_18 = arith.constant 0 : index
    %c16 = arith.constant 16 : index
    %10 = vector.load %arg13[%c0_17, %c0_18, %c16] : memref<32x36x40xf32, #tpu.memory_space<vmem>>, vector<32x36x8xf32>
    tpu.vector_store %arg13[%c0_17, %c0_18, %c16], %9 {strides = array<i32>} : memref<32x36x40xf32, #tpu.memory_space<vmem>>, vector<32x36x8xf32>,
    %c0_19 = arith.constant 0 : index
    %c3 = arith.constant 3 : index
    %c0_20 = arith.constant 0 : index
    %c0_21 = arith.constant 0 : index
    %11 = vector.load %arg1[%c0_19, %c3, %c0_20, %c0_21] : memref<1x36x36x8xf32, #tpu.memory_space<vmem>>, vector<1x32x36x8xf32>
    %12 = vector.shape_cast %11 : vector<1x32x36x8xf32> to vector<32x36x8xf32>
    %c0_22 = arith.constant 0 : index
    %c0_23 = arith.constant 0 : index
    %c24 = arith.constant 24 : index
    %13 = vector.load %arg13[%c0_22, %c0_23, %c24] : memref<32x36x40xf32, #tpu.memory_space<vmem>>, vector<32x36x8xf32>
    tpu.vector_store %arg13[%c0_22, %c0_23, %c24], %12 {strides = array<i32>} : memref<32x36x40xf32, #tpu.memory_space<vmem>>, vector<32x36x8xf32>,
    %c0_24 = arith.constant 0 : index
    %c4 = arith.constant 4 : index
    %c0_25 = arith.constant 0 : index
    %c0_26 = arith.constant 0 : index
    %14 = vector.load %arg1[%c0_24, %c4, %c0_25, %c0_26] : memref<1x36x36x8xf32, #tpu.memory_space<vmem>>, vector<1x32x36x8xf32>
    %15 = vector.shape_cast %14 : vector<1x32x36x8xf32> to vector<32x36x8xf32>
    %c0_27 = arith.constant 0 : index
    %c0_28 = arith.constant 0 : index
    %c32 = arith.constant 32 : index
    %16 = vector.load %arg13[%c0_27, %c0_28, %c32] : memref<32x36x40xf32, #tpu.memory_space<vmem>>, vector<32x36x8xf32>
    tpu.vector_store %arg13[%c0_27, %c0_28, %c32], %15 {strides = array<i32>} : memref<32x36x40xf32, #tpu.memory_space<vmem>>, vector<32x36x8xf32>,
    %c0_i32 = arith.constant 0 : i32
    %c16_i32 = arith.constant 16 : i32
    %17 = arith.addi %c0_i32, %c16_i32 : i32
    %c1_i32 = arith.constant 1 : i32
    scf.for %arg20 = %c0_i32 to %17 step %c1_i32  : i32 {
      %c2_i32 = arith.constant 2 : i32
      %147 = arith.muli %c2_i32, %arg20 : i32
      %148 = arith.index_cast %147 : i32 to index
      %c0_193 = arith.constant 0 : index
      %c0_194 = arith.constant 0 : index
      %149 = vector.load %arg13[%148, %c0_193, %c0_194] : memref<32x36x40xf32, #tpu.memory_space<vmem>>, vector<1x36x40xf32>
      %150 = vector.shape_cast %149 : vector<1x36x40xf32> to vector<36x40xf32>
      %151 = vector.extract_strided_slice %150 {offsets = [0, 0], sizes = [32, 40], strides = [1, 1]} : vector<36x40xf32> to vector<32x40xf32>
      %152 = arith.truncf %151 : vector<32x40xf32> to vector<32x40xbf16>
      %c0_195 = arith.constant 0 : index
      %c0_196 = arith.constant 0 : index
      %c0_197 = arith.constant 0 : index
      %153 = vector.load %arg2[%c0_195, %c0_196, %c0_197] : memref<5x40x32xbf16, #tpu.memory_space<vmem>>, vector<1x40x32xbf16>
      %154 = vector.shape_cast %153 : vector<1x40x32xbf16> to vector<40x32xbf16>
      %cst_198 = arith.constant dense<0.000000e+00> : vector<32x32xf32>
      %155 = tpu.matmul %152, %154, %cst_198 {dimension_numbers = #tpu.dot_dimension_numbers<[1], [0], [0], [1], [0, 0, 1, 1], [], []>} : vector<32x40xbf16>, vector<40x32xbf16>, vector<32x32xf32> -> vector<32x32xf32>
      %156 = vector.extract_strided_slice %150 {offsets = [1, 0], sizes = [32, 40], strides = [1, 1]} : vector<36x40xf32> to vector<32x40xf32>
      %157 = arith.truncf %156 : vector<32x40xf32> to vector<32x40xbf16>
      %c1_199 = arith.constant 1 : index
      %c0_200 = arith.constant 0 : index
      %c0_201 = arith.constant 0 : index
      %158 = vector.load %arg2[%c1_199, %c0_200, %c0_201] : memref<5x40x32xbf16, #tpu.memory_space<vmem>>, vector<1x40x32xbf16>
      %159 = vector.shape_cast %158 : vector<1x40x32xbf16> to vector<40x32xbf16>
      %cst_202 = arith.constant dense<0.000000e+00> : vector<32x32xf32>
      %160 = tpu.matmul %157, %159, %cst_202 {dimension_numbers = #tpu.dot_dimension_numbers<[1], [0], [0], [1], [0, 0, 1, 1], [], []>} : vector<32x40xbf16>, vector<40x32xbf16>, vector<32x32xf32> -> vector<32x32xf32>
      %161 = arith.addf %155, %160 : vector<32x32xf32>
      %162 = vector.extract_strided_slice %150 {offsets = [2, 0], sizes = [32, 40], strides = [1, 1]} : vector<36x40xf32> to vector<32x40xf32>
      %163 = arith.truncf %162 : vector<32x40xf32> to vector<32x40xbf16>
      %c2_203 = arith.constant 2 : index
      %c0_204 = arith.constant 0 : index
      %c0_205 = arith.constant 0 : index
      %164 = vector.load %arg2[%c2_203, %c0_204, %c0_205] : memref<5x40x32xbf16, #tpu.memory_space<vmem>>, vector<1x40x32xbf16>
      %165 = vector.shape_cast %164 : vector<1x40x32xbf16> to vector<40x32xbf16>
      %cst_206 = arith.constant dense<0.000000e+00> : vector<32x32xf32>
      %166 = tpu.matmul %163, %165, %cst_206 {dimension_numbers = #tpu.dot_dimension_numbers<[1], [0], [0], [1], [0, 0, 1, 1], [], []>} : vector<32x40xbf16>, vector<40x32xbf16>, vector<32x32xf32> -> vector<32x32xf32>
      %167 = arith.addf %161, %166 : vector<32x32xf32>
      %168 = vector.extract_strided_slice %150 {offsets = [3, 0], sizes = [32, 40], strides = [1, 1]} : vector<36x40xf32> to vector<32x40xf32>
      %169 = arith.truncf %168 : vector<32x40xf32> to vector<32x40xbf16>
      %c3_207 = arith.constant 3 : index
      %c0_208 = arith.constant 0 : index
      %c0_209 = arith.constant 0 : index
      %170 = vector.load %arg2[%c3_207, %c0_208, %c0_209] : memref<5x40x32xbf16, #tpu.memory_space<vmem>>, vector<1x40x32xbf16>
      %171 = vector.shape_cast %170 : vector<1x40x32xbf16> to vector<40x32xbf16>
      %cst_210 = arith.constant dense<0.000000e+00> : vector<32x32xf32>
      %172 = tpu.matmul %169, %171, %cst_210 {dimension_numbers = #tpu.dot_dimension_numbers<[1], [0], [0], [1], [0, 0, 1, 1], [], []>} : vector<32x40xbf16>, vector<40x32xbf16>, vector<32x32xf32> -> vector<32x32xf32>
      %173 = arith.addf %167, %172 : vector<32x32xf32>
      %174 = vector.extract_strided_slice %150 {offsets = [4, 0], sizes = [32, 40], strides = [1, 1]} : vector<36x40xf32> to vector<32x40xf32>
      %175 = arith.truncf %174 : vector<32x40xf32> to vector<32x40xbf16>
      %c4_211 = arith.constant 4 : index
      %c0_212 = arith.constant 0 : index
      %c0_213 = arith.constant 0 : index
      %176 = vector.load %arg2[%c4_211, %c0_212, %c0_213] : memref<5x40x32xbf16, #tpu.memory_space<vmem>>, vector<1x40x32xbf16>
      %177 = vector.shape_cast %176 : vector<1x40x32xbf16> to vector<40x32xbf16>
      %cst_214 = arith.constant dense<0.000000e+00> : vector<32x32xf32>
      %178 = tpu.matmul %175, %177, %cst_214 {dimension_numbers = #tpu.dot_dimension_numbers<[1], [0], [0], [1], [0, 0, 1, 1], [], []>} : vector<32x40xbf16>, vector<40x32xbf16>, vector<32x32xf32> -> vector<32x32xf32>
      %179 = arith.addf %173, %178 : vector<32x32xf32>
      %c0_215 = arith.constant 0 : index
      %c0_216 = arith.constant 0 : index
      %180 = vector.load %arg3[%c0_215, %c0_216] : memref<1x32xf32, #tpu.memory_space<vmem>>, vector<1x32xf32>
      %181 = vector.broadcast %180 : vector<1x32xf32> to vector<32x32xf32>
      %182 = arith.addf %179, %181 : vector<32x32xf32>
      %c2_i32_217 = arith.constant 2 : i32
      %183 = arith.muli %c2_i32_217, %arg20 : i32
      %c1_i32_218 = arith.constant 1 : i32
      %184 = arith.addi %183, %c1_i32_218 : i32
      %185 = arith.index_cast %184 : i32 to index
      %c0_219 = arith.constant 0 : index
      %c0_220 = arith.constant 0 : index
      %186 = vector.load %arg13[%185, %c0_219, %c0_220] : memref<32x36x40xf32, #tpu.memory_space<vmem>>, vector<1x36x40xf32>
      %187 = vector.shape_cast %186 : vector<1x36x40xf32> to vector<36x40xf32>
      %188 = vector.extract_strided_slice %187 {offsets = [0, 0], sizes = [32, 40], strides = [1, 1]} : vector<36x40xf32> to vector<32x40xf32>
      %189 = arith.truncf %188 : vector<32x40xf32> to vector<32x40xbf16>
      %c0_221 = arith.constant 0 : index
      %c0_222 = arith.constant 0 : index
      %c0_223 = arith.constant 0 : index
      %190 = vector.load %arg2[%c0_221, %c0_222, %c0_223] : memref<5x40x32xbf16, #tpu.memory_space<vmem>>, vector<1x40x32xbf16>
      %191 = vector.shape_cast %190 : vector<1x40x32xbf16> to vector<40x32xbf16>
      %cst_224 = arith.constant dense<0.000000e+00> : vector<32x32xf32>
      %192 = tpu.matmul %189, %191, %cst_224 {dimension_numbers = #tpu.dot_dimension_numbers<[1], [0], [0], [1], [0, 0, 1, 1], [], []>} : vector<32x40xbf16>, vector<40x32xbf16>, vector<32x32xf32> -> vector<32x32xf32>
      %193 = vector.extract_strided_slice %187 {offsets = [1, 0], sizes = [32, 40], strides = [1, 1]} : vector<36x40xf32> to vector<32x40xf32>
      %194 = arith.truncf %193 : vector<32x40xf32> to vector<32x40xbf16>
      %c1_225 = arith.constant 1 : index
      %c0_226 = arith.constant 0 : index
      %c0_227 = arith.constant 0 : index
      %195 = vector.load %arg2[%c1_225, %c0_226, %c0_227] : memref<5x40x32xbf16, #tpu.memory_space<vmem>>, vector<1x40x32xbf16>
      %196 = vector.shape_cast %195 : vector<1x40x32xbf16> to vector<40x32xbf16>
      %cst_228 = arith.constant dense<0.000000e+00> : vector<32x32xf32>
      %197 = tpu.matmul %194, %196, %cst_228 {dimension_numbers = #tpu.dot_dimension_numbers<[1], [0], [0], [1], [0, 0, 1, 1], [], []>} : vector<32x40xbf16>, vector<40x32xbf16>, vector<32x32xf32> -> vector<32x32xf32>
      %198 = arith.addf %192, %197 : vector<32x32xf32>
      %199 = vector.extract_strided_slice %187 {offsets = [2, 0], sizes = [32, 40], strides = [1, 1]} : vector<36x40xf32> to vector<32x40xf32>
      %200 = arith.truncf %199 : vector<32x40xf32> to vector<32x40xbf16>
      %c2_229 = arith.constant 2 : index
      %c0_230 = arith.constant 0 : index
      %c0_231 = arith.constant 0 : index
      %201 = vector.load %arg2[%c2_229, %c0_230, %c0_231] : memref<5x40x32xbf16, #tpu.memory_space<vmem>>, vector<1x40x32xbf16>
      %202 = vector.shape_cast %201 : vector<1x40x32xbf16> to vector<40x32xbf16>
      %cst_232 = arith.constant dense<0.000000e+00> : vector<32x32xf32>
      %203 = tpu.matmul %200, %202, %cst_232 {dimension_numbers = #tpu.dot_dimension_numbers<[1], [0], [0], [1], [0, 0, 1, 1], [], []>} : vector<32x40xbf16>, vector<40x32xbf16>, vector<32x32xf32> -> vector<32x32xf32>
      %204 = arith.addf %198, %203 : vector<32x32xf32>
      %205 = vector.extract_strided_slice %187 {offsets = [3, 0], sizes = [32, 40], strides = [1, 1]} : vector<36x40xf32> to vector<32x40xf32>
      %206 = arith.truncf %205 : vector<32x40xf32> to vector<32x40xbf16>
      %c3_233 = arith.constant 3 : index
      %c0_234 = arith.constant 0 : index
      %c0_235 = arith.constant 0 : index
      %207 = vector.load %arg2[%c3_233, %c0_234, %c0_235] : memref<5x40x32xbf16, #tpu.memory_space<vmem>>, vector<1x40x32xbf16>
      %208 = vector.shape_cast %207 : vector<1x40x32xbf16> to vector<40x32xbf16>
      %cst_236 = arith.constant dense<0.000000e+00> : vector<32x32xf32>
      %209 = tpu.matmul %206, %208, %cst_236 {dimension_numbers = #tpu.dot_dimension_numbers<[1], [0], [0], [1], [0, 0, 1, 1], [], []>} : vector<32x40xbf16>, vector<40x32xbf16>, vector<32x32xf32> -> vector<32x32xf32>
      %210 = arith.addf %204, %209 : vector<32x32xf32>
      %211 = vector.extract_strided_slice %187 {offsets = [4, 0], sizes = [32, 40], strides = [1, 1]} : vector<36x40xf32> to vector<32x40xf32>
      %212 = arith.truncf %211 : vector<32x40xf32> to vector<32x40xbf16>
      %c4_237 = arith.constant 4 : index
      %c0_238 = arith.constant 0 : index
      %c0_239 = arith.constant 0 : index
      %213 = vector.load %arg2[%c4_237, %c0_238, %c0_239] : memref<5x40x32xbf16, #tpu.memory_space<vmem>>, vector<1x40x32xbf16>
      %214 = vector.shape_cast %213 : vector<1x40x32xbf16> to vector<40x32xbf16>
      %cst_240 = arith.constant dense<0.000000e+00> : vector<32x32xf32>
      %215 = tpu.matmul %212, %214, %cst_240 {dimension_numbers = #tpu.dot_dimension_numbers<[1], [0], [0], [1], [0, 0, 1, 1], [], []>} : vector<32x40xbf16>, vector<40x32xbf16>, vector<32x32xf32> -> vector<32x32xf32>
      %216 = arith.addf %210, %215 : vector<32x32xf32>
      %c0_241 = arith.constant 0 : index
      %c0_242 = arith.constant 0 : index
      %217 = vector.load %arg3[%c0_241, %c0_242] : memref<1x32xf32, #tpu.memory_space<vmem>>, vector<1x32xf32>
      %218 = vector.broadcast %217 : vector<1x32xf32> to vector<32x32xf32>
      %219 = arith.addf %216, %218 : vector<32x32xf32>
      %220 = arith.maximumf %182, %219 : vector<32x32xf32>
      %c0_243 = arith.constant 0 : index
      %c0_244 = arith.constant 0 : index
      %221 = vector.load %arg19[%c0_243, %c0_244] : memref<32x64xf32, #tpu.memory_space<vmem>>, vector<32x32xf32>
      tpu.vector_store %arg19[%c0_243, %c0_244], %220 {strides = array<i32>} : memref<32x64xf32, #tpu.memory_space<vmem>>, vector<32x32xf32>,
      %c0_245 = arith.constant 0 : index
      %c0_246 = arith.constant 0 : index
      %222 = tpu.strided_load %arg19[%c0_245, %c0_246] {strides = array<i32: 2, 1>} : memref<32x64xf32, #tpu.memory_space<vmem>>, vector<16x32xf32>
      %c1_247 = arith.constant 1 : index
      %c0_248 = arith.constant 0 : index
      %223 = tpu.strided_load %arg19[%c1_247, %c0_248] {strides = array<i32: 2, 1>} : memref<32x64xf32, #tpu.memory_space<vmem>>, vector<16x32xf32>
      %224 = arith.maximumf %222, %223 : vector<16x32xf32>
      %225 = vector.shape_cast %224 : vector<16x32xf32> to vector<1x16x32xf32>
      %c2_i32_249 = arith.constant 2 : i32
      %226 = arith.addi %c2_i32_249, %arg20 : i32
      %227 = arith.index_cast %226 : i32 to index
      %c2_250 = arith.constant 2 : index
      %c0_251 = arith.constant 0 : index
      %228 = vector.load %arg16[%227, %c2_250, %c0_251] : memref<20x20x32xf32, #tpu.memory_space<vmem>>, vector<1x16x32xf32>
      tpu.vector_store %arg16[%227, %c2_250, %c0_251], %225 {strides = array<i32>} : memref<20x20x32xf32, #tpu.memory_space<vmem>>, vector<1x16x32xf32>,
    }
    %c16_i32_29 = arith.constant 16 : i32
    %cst_30 = arith.constant 0.000000e+00 : f32
    %18 = vector.broadcast %cst_30 : f32 to vector<12x12x32xf32>
    %c0_31 = arith.constant 0 : index
    %c0_32 = arith.constant 0 : index
    %c0_33 = arith.constant 0 : index
    %19 = vector.load %arg17[%c0_31, %c0_32, %c0_33] : memref<12x12x32xf32, #tpu.memory_space<vmem>>, vector<12x12x32xf32>
    tpu.vector_store %arg17[%c0_31, %c0_32, %c0_33], %18 {strides = array<i32>} : memref<12x12x32xf32, #tpu.memory_space<vmem>>, vector<12x12x32xf32>,
    %c0_34 = arith.constant 0 : index
    %c0_35 = arith.constant 0 : index
    %c0_36 = arith.constant 0 : index
    %20 = vector.load %arg16[%c0_34, %c0_35, %c0_36] : memref<20x20x32xf32, #tpu.memory_space<vmem>>, vector<16x20x32xf32>
    %c0_37 = arith.constant 0 : index
    %c0_38 = arith.constant 0 : index
    %c0_39 = arith.constant 0 : index
    %21 = vector.load %arg14[%c0_37, %c0_38, %c0_39] : memref<16x20x160xf32, #tpu.memory_space<vmem>>, vector<16x20x32xf32>
    tpu.vector_store %arg14[%c0_37, %c0_38, %c0_39], %20 {strides = array<i32>} : memref<16x20x160xf32, #tpu.memory_space<vmem>>, vector<16x20x32xf32>,
    %c1_40 = arith.constant 1 : index
    %c0_41 = arith.constant 0 : index
    %c0_42 = arith.constant 0 : index
    %22 = vector.load %arg16[%c1_40, %c0_41, %c0_42] : memref<20x20x32xf32, #tpu.memory_space<vmem>>, vector<16x20x32xf32>
    %c0_43 = arith.constant 0 : index
    %c0_44 = arith.constant 0 : index
    %c32_45 = arith.constant 32 : index
    %23 = vector.load %arg14[%c0_43, %c0_44, %c32_45] : memref<16x20x160xf32, #tpu.memory_space<vmem>>, vector<16x20x32xf32>
    tpu.vector_store %arg14[%c0_43, %c0_44, %c32_45], %22 {strides = array<i32>} : memref<16x20x160xf32, #tpu.memory_space<vmem>>, vector<16x20x32xf32>,
    %c2_46 = arith.constant 2 : index
    %c0_47 = arith.constant 0 : index
    %c0_48 = arith.constant 0 : index
    %24 = vector.load %arg16[%c2_46, %c0_47, %c0_48] : memref<20x20x32xf32, #tpu.memory_space<vmem>>, vector<16x20x32xf32>
    %c0_49 = arith.constant 0 : index
    %c0_50 = arith.constant 0 : index
    %c64 = arith.constant 64 : index
    %25 = vector.load %arg14[%c0_49, %c0_50, %c64] : memref<16x20x160xf32, #tpu.memory_space<vmem>>, vector<16x20x32xf32>
    tpu.vector_store %arg14[%c0_49, %c0_50, %c64], %24 {strides = array<i32>} : memref<16x20x160xf32, #tpu.memory_space<vmem>>, vector<16x20x32xf32>,
    %c3_51 = arith.constant 3 : index
    %c0_52 = arith.constant 0 : index
    %c0_53 = arith.constant 0 : index
    %26 = vector.load %arg16[%c3_51, %c0_52, %c0_53] : memref<20x20x32xf32, #tpu.memory_space<vmem>>, vector<16x20x32xf32>
    %c0_54 = arith.constant 0 : index
    %c0_55 = arith.constant 0 : index
    %c96 = arith.constant 96 : index
    %27 = vector.load %arg14[%c0_54, %c0_55, %c96] : memref<16x20x160xf32, #tpu.memory_space<vmem>>, vector<16x20x32xf32>
    tpu.vector_store %arg14[%c0_54, %c0_55, %c96], %26 {strides = array<i32>} : memref<16x20x160xf32, #tpu.memory_space<vmem>>, vector<16x20x32xf32>,
    %c4_56 = arith.constant 4 : index
    %c0_57 = arith.constant 0 : index
    %c0_58 = arith.constant 0 : index
    %28 = vector.load %arg16[%c4_56, %c0_57, %c0_58] : memref<20x20x32xf32, #tpu.memory_space<vmem>>, vector<16x20x32xf32>
    %c0_59 = arith.constant 0 : index
    %c0_60 = arith.constant 0 : index
    %c128 = arith.constant 128 : index
    %29 = vector.load %arg14[%c0_59, %c0_60, %c128] : memref<16x20x160xf32, #tpu.memory_space<vmem>>, vector<16x20x32xf32>
    tpu.vector_store %arg14[%c0_59, %c0_60, %c128], %28 {strides = array<i32>} : memref<16x20x160xf32, #tpu.memory_space<vmem>>, vector<16x20x32xf32>,
    %c0_i32_61 = arith.constant 0 : i32
    %c8_i32 = arith.constant 8 : i32
    %30 = arith.addi %c0_i32_61, %c8_i32 : i32
    %c1_i32_62 = arith.constant 1 : i32
    scf.for %arg20 = %c0_i32_61 to %30 step %c1_i32_62  : i32 {
      %c2_i32 = arith.constant 2 : i32
      %147 = arith.muli %c2_i32, %arg20 : i32
      %148 = arith.index_cast %147 : i32 to index
      %c0_193 = arith.constant 0 : index
      %c0_194 = arith.constant 0 : index
      %149 = vector.load %arg14[%148, %c0_193, %c0_194] : memref<16x20x160xf32, #tpu.memory_space<vmem>>, vector<1x20x160xf32>
      %150 = vector.shape_cast %149 : vector<1x20x160xf32> to vector<20x160xf32>
      %151 = vector.extract_strided_slice %150 {offsets = [0, 0], sizes = [16, 160], strides = [1, 1]} : vector<20x160xf32> to vector<16x160xf32>
      %152 = arith.truncf %151 : vector<16x160xf32> to vector<16x160xbf16>
      %c0_195 = arith.constant 0 : index
      %c0_196 = arith.constant 0 : index
      %c0_197 = arith.constant 0 : index
      %153 = vector.load %arg4[%c0_195, %c0_196, %c0_197] : memref<5x160x32xbf16, #tpu.memory_space<vmem>>, vector<1x160x32xbf16>
      %154 = vector.shape_cast %153 : vector<1x160x32xbf16> to vector<160x32xbf16>
      %cst_198 = arith.constant dense<0.000000e+00> : vector<16x32xf32>
      %155 = tpu.matmul %152, %154, %cst_198 {dimension_numbers = #tpu.dot_dimension_numbers<[1], [0], [0], [1], [0, 0, 1, 1], [], []>} : vector<16x160xbf16>, vector<160x32xbf16>, vector<16x32xf32> -> vector<16x32xf32>
      %156 = vector.extract_strided_slice %150 {offsets = [1, 0], sizes = [16, 160], strides = [1, 1]} : vector<20x160xf32> to vector<16x160xf32>
      %157 = arith.truncf %156 : vector<16x160xf32> to vector<16x160xbf16>
      %c1_199 = arith.constant 1 : index
      %c0_200 = arith.constant 0 : index
      %c0_201 = arith.constant 0 : index
      %158 = vector.load %arg4[%c1_199, %c0_200, %c0_201] : memref<5x160x32xbf16, #tpu.memory_space<vmem>>, vector<1x160x32xbf16>
      %159 = vector.shape_cast %158 : vector<1x160x32xbf16> to vector<160x32xbf16>
      %cst_202 = arith.constant dense<0.000000e+00> : vector<16x32xf32>
      %160 = tpu.matmul %157, %159, %cst_202 {dimension_numbers = #tpu.dot_dimension_numbers<[1], [0], [0], [1], [0, 0, 1, 1], [], []>} : vector<16x160xbf16>, vector<160x32xbf16>, vector<16x32xf32> -> vector<16x32xf32>
      %161 = arith.addf %155, %160 : vector<16x32xf32>
      %162 = vector.extract_strided_slice %150 {offsets = [2, 0], sizes = [16, 160], strides = [1, 1]} : vector<20x160xf32> to vector<16x160xf32>
      %163 = arith.truncf %162 : vector<16x160xf32> to vector<16x160xbf16>
      %c2_203 = arith.constant 2 : index
      %c0_204 = arith.constant 0 : index
      %c0_205 = arith.constant 0 : index
      %164 = vector.load %arg4[%c2_203, %c0_204, %c0_205] : memref<5x160x32xbf16, #tpu.memory_space<vmem>>, vector<1x160x32xbf16>
      %165 = vector.shape_cast %164 : vector<1x160x32xbf16> to vector<160x32xbf16>
      %cst_206 = arith.constant dense<0.000000e+00> : vector<16x32xf32>
      %166 = tpu.matmul %163, %165, %cst_206 {dimension_numbers = #tpu.dot_dimension_numbers<[1], [0], [0], [1], [0, 0, 1, 1], [], []>} : vector<16x160xbf16>, vector<160x32xbf16>, vector<16x32xf32> -> vector<16x32xf32>
      %167 = arith.addf %161, %166 : vector<16x32xf32>
      %168 = vector.extract_strided_slice %150 {offsets = [3, 0], sizes = [16, 160], strides = [1, 1]} : vector<20x160xf32> to vector<16x160xf32>
      %169 = arith.truncf %168 : vector<16x160xf32> to vector<16x160xbf16>
      %c3_207 = arith.constant 3 : index
      %c0_208 = arith.constant 0 : index
      %c0_209 = arith.constant 0 : index
      %170 = vector.load %arg4[%c3_207, %c0_208, %c0_209] : memref<5x160x32xbf16, #tpu.memory_space<vmem>>, vector<1x160x32xbf16>
      %171 = vector.shape_cast %170 : vector<1x160x32xbf16> to vector<160x32xbf16>
      %cst_210 = arith.constant dense<0.000000e+00> : vector<16x32xf32>
      %172 = tpu.matmul %169, %171, %cst_210 {dimension_numbers = #tpu.dot_dimension_numbers<[1], [0], [0], [1], [0, 0, 1, 1], [], []>} : vector<16x160xbf16>, vector<160x32xbf16>, vector<16x32xf32> -> vector<16x32xf32>
      %173 = arith.addf %167, %172 : vector<16x32xf32>
      %174 = vector.extract_strided_slice %150 {offsets = [4, 0], sizes = [16, 160], strides = [1, 1]} : vector<20x160xf32> to vector<16x160xf32>
      %175 = arith.truncf %174 : vector<16x160xf32> to vector<16x160xbf16>
      %c4_211 = arith.constant 4 : index
      %c0_212 = arith.constant 0 : index
      %c0_213 = arith.constant 0 : index
      %176 = vector.load %arg4[%c4_211, %c0_212, %c0_213] : memref<5x160x32xbf16, #tpu.memory_space<vmem>>, vector<1x160x32xbf16>
      %177 = vector.shape_cast %176 : vector<1x160x32xbf16> to vector<160x32xbf16>
      %cst_214 = arith.constant dense<0.000000e+00> : vector<16x32xf32>
      %178 = tpu.matmul %175, %177, %cst_214 {dimension_numbers = #tpu.dot_dimension_numbers<[1], [0], [0], [1], [0, 0, 1, 1], [], []>} : vector<16x160xbf16>, vector<160x32xbf16>, vector<16x32xf32> -> vector<16x32xf32>
      %179 = arith.addf %173, %178 : vector<16x32xf32>
      %c0_215 = arith.constant 0 : index
      %c0_216 = arith.constant 0 : index
      %180 = vector.load %arg5[%c0_215, %c0_216] : memref<1x32xf32, #tpu.memory_space<vmem>>, vector<1x32xf32>
      %181 = vector.broadcast %180 : vector<1x32xf32> to vector<16x32xf32>
      %182 = arith.addf %179, %181 : vector<16x32xf32>
      %c2_i32_217 = arith.constant 2 : i32
      %183 = arith.muli %c2_i32_217, %arg20 : i32
      %c1_i32_218 = arith.constant 1 : i32
      %184 = arith.addi %183, %c1_i32_218 : i32
      %185 = arith.index_cast %184 : i32 to index
      %c0_219 = arith.constant 0 : index
      %c0_220 = arith.constant 0 : index
      %186 = vector.load %arg14[%185, %c0_219, %c0_220] : memref<16x20x160xf32, #tpu.memory_space<vmem>>, vector<1x20x160xf32>
      %187 = vector.shape_cast %186 : vector<1x20x160xf32> to vector<20x160xf32>
      %188 = vector.extract_strided_slice %187 {offsets = [0, 0], sizes = [16, 160], strides = [1, 1]} : vector<20x160xf32> to vector<16x160xf32>
      %189 = arith.truncf %188 : vector<16x160xf32> to vector<16x160xbf16>
      %c0_221 = arith.constant 0 : index
      %c0_222 = arith.constant 0 : index
      %c0_223 = arith.constant 0 : index
      %190 = vector.load %arg4[%c0_221, %c0_222, %c0_223] : memref<5x160x32xbf16, #tpu.memory_space<vmem>>, vector<1x160x32xbf16>
      %191 = vector.shape_cast %190 : vector<1x160x32xbf16> to vector<160x32xbf16>
      %cst_224 = arith.constant dense<0.000000e+00> : vector<16x32xf32>
      %192 = tpu.matmul %189, %191, %cst_224 {dimension_numbers = #tpu.dot_dimension_numbers<[1], [0], [0], [1], [0, 0, 1, 1], [], []>} : vector<16x160xbf16>, vector<160x32xbf16>, vector<16x32xf32> -> vector<16x32xf32>
      %193 = vector.extract_strided_slice %187 {offsets = [1, 0], sizes = [16, 160], strides = [1, 1]} : vector<20x160xf32> to vector<16x160xf32>
      %194 = arith.truncf %193 : vector<16x160xf32> to vector<16x160xbf16>
      %c1_225 = arith.constant 1 : index
      %c0_226 = arith.constant 0 : index
      %c0_227 = arith.constant 0 : index
      %195 = vector.load %arg4[%c1_225, %c0_226, %c0_227] : memref<5x160x32xbf16, #tpu.memory_space<vmem>>, vector<1x160x32xbf16>
      %196 = vector.shape_cast %195 : vector<1x160x32xbf16> to vector<160x32xbf16>
      %cst_228 = arith.constant dense<0.000000e+00> : vector<16x32xf32>
      %197 = tpu.matmul %194, %196, %cst_228 {dimension_numbers = #tpu.dot_dimension_numbers<[1], [0], [0], [1], [0, 0, 1, 1], [], []>} : vector<16x160xbf16>, vector<160x32xbf16>, vector<16x32xf32> -> vector<16x32xf32>
      %198 = arith.addf %192, %197 : vector<16x32xf32>
      %199 = vector.extract_strided_slice %187 {offsets = [2, 0], sizes = [16, 160], strides = [1, 1]} : vector<20x160xf32> to vector<16x160xf32>
      %200 = arith.truncf %199 : vector<16x160xf32> to vector<16x160xbf16>
      %c2_229 = arith.constant 2 : index
      %c0_230 = arith.constant 0 : index
      %c0_231 = arith.constant 0 : index
      %201 = vector.load %arg4[%c2_229, %c0_230, %c0_231] : memref<5x160x32xbf16, #tpu.memory_space<vmem>>, vector<1x160x32xbf16>
      %202 = vector.shape_cast %201 : vector<1x160x32xbf16> to vector<160x32xbf16>
      %cst_232 = arith.constant dense<0.000000e+00> : vector<16x32xf32>
      %203 = tpu.matmul %200, %202, %cst_232 {dimension_numbers = #tpu.dot_dimension_numbers<[1], [0], [0], [1], [0, 0, 1, 1], [], []>} : vector<16x160xbf16>, vector<160x32xbf16>, vector<16x32xf32> -> vector<16x32xf32>
      %204 = arith.addf %198, %203 : vector<16x32xf32>
      %205 = vector.extract_strided_slice %187 {offsets = [3, 0], sizes = [16, 160], strides = [1, 1]} : vector<20x160xf32> to vector<16x160xf32>
      %206 = arith.truncf %205 : vector<16x160xf32> to vector<16x160xbf16>
      %c3_233 = arith.constant 3 : index
      %c0_234 = arith.constant 0 : index
      %c0_235 = arith.constant 0 : index
      %207 = vector.load %arg4[%c3_233, %c0_234, %c0_235] : memref<5x160x32xbf16, #tpu.memory_space<vmem>>, vector<1x160x32xbf16>
      %208 = vector.shape_cast %207 : vector<1x160x32xbf16> to vector<160x32xbf16>
      %cst_236 = arith.constant dense<0.000000e+00> : vector<16x32xf32>
      %209 = tpu.matmul %206, %208, %cst_236 {dimension_numbers = #tpu.dot_dimension_numbers<[1], [0], [0], [1], [0, 0, 1, 1], [], []>} : vector<16x160xbf16>, vector<160x32xbf16>, vector<16x32xf32> -> vector<16x32xf32>
      %210 = arith.addf %204, %209 : vector<16x32xf32>
      %211 = vector.extract_strided_slice %187 {offsets = [4, 0], sizes = [16, 160], strides = [1, 1]} : vector<20x160xf32> to vector<16x160xf32>
      %212 = arith.truncf %211 : vector<16x160xf32> to vector<16x160xbf16>
      %c4_237 = arith.constant 4 : index
      %c0_238 = arith.constant 0 : index
      %c0_239 = arith.constant 0 : index
      %213 = vector.load %arg4[%c4_237, %c0_238, %c0_239] : memref<5x160x32xbf16, #tpu.memory_space<vmem>>, vector<1x160x32xbf16>
      %214 = vector.shape_cast %213 : vector<1x160x32xbf16> to vector<160x32xbf16>
      %cst_240 = arith.constant dense<0.000000e+00> : vector<16x32xf32>
      %215 = tpu.matmul %212, %214, %cst_240 {dimension_numbers = #tpu.dot_dimension_numbers<[1], [0], [0], [1], [0, 0, 1, 1], [], []>} : vector<16x160xbf16>, vector<160x32xbf16>, vector<16x32xf32> -> vector<16x32xf32>
      %216 = arith.addf %210, %215 : vector<16x32xf32>
      %c0_241 = arith.constant 0 : index
      %c0_242 = arith.constant 0 : index
      %217 = vector.load %arg5[%c0_241, %c0_242] : memref<1x32xf32, #tpu.memory_space<vmem>>, vector<1x32xf32>
      %218 = vector.broadcast %217 : vector<1x32xf32> to vector<16x32xf32>
      %219 = arith.addf %216, %218 : vector<16x32xf32>
      %220 = arith.maximumf %182, %219 : vector<16x32xf32>
      %c0_243 = arith.constant 0 : index
      %c0_244 = arith.constant 0 : index
      %221 = vector.load %arg19[%c0_243, %c0_244] : memref<32x64xf32, #tpu.memory_space<vmem>>, vector<16x32xf32>
      tpu.vector_store %arg19[%c0_243, %c0_244], %220 {strides = array<i32>} : memref<32x64xf32, #tpu.memory_space<vmem>>, vector<16x32xf32>,
      %c0_245 = arith.constant 0 : index
      %c0_246 = arith.constant 0 : index
      %222 = tpu.strided_load %arg19[%c0_245, %c0_246] {strides = array<i32: 2, 1>} : memref<32x64xf32, #tpu.memory_space<vmem>>, vector<8x32xf32>
      %c1_247 = arith.constant 1 : index
      %c0_248 = arith.constant 0 : index
      %223 = tpu.strided_load %arg19[%c1_247, %c0_248] {strides = array<i32: 2, 1>} : memref<32x64xf32, #tpu.memory_space<vmem>>, vector<8x32xf32>
      %224 = arith.maximumf %222, %223 : vector<8x32xf32>
      %225 = vector.shape_cast %224 : vector<8x32xf32> to vector<1x8x32xf32>
      %c2_i32_249 = arith.constant 2 : i32
      %226 = arith.addi %c2_i32_249, %arg20 : i32
      %227 = arith.index_cast %226 : i32 to index
      %c2_250 = arith.constant 2 : index
      %c0_251 = arith.constant 0 : index
      %228 = vector.load %arg17[%227, %c2_250, %c0_251] : memref<12x12x32xf32, #tpu.memory_space<vmem>>, vector<1x8x32xf32>
      tpu.vector_store %arg17[%227, %c2_250, %c0_251], %225 {strides = array<i32>} : memref<12x12x32xf32, #tpu.memory_space<vmem>>, vector<1x8x32xf32>,
    }
    %c8_i32_63 = arith.constant 8 : i32
    %c0_64 = arith.constant 0 : index
    %c0_65 = arith.constant 0 : index
    %c0_66 = arith.constant 0 : index
    %31 = vector.load %arg17[%c0_64, %c0_65, %c0_66] : memref<12x12x32xf32, #tpu.memory_space<vmem>>, vector<8x12x32xf32>
    %c0_67 = arith.constant 0 : index
    %c0_68 = arith.constant 0 : index
    %c0_69 = arith.constant 0 : index
    %32 = vector.load %arg15[%c0_67, %c0_68, %c0_69] : memref<8x12x160xf32, #tpu.memory_space<vmem>>, vector<8x12x32xf32>
    tpu.vector_store %arg15[%c0_67, %c0_68, %c0_69], %31 {strides = array<i32>} : memref<8x12x160xf32, #tpu.memory_space<vmem>>, vector<8x12x32xf32>,
    %c1_70 = arith.constant 1 : index
    %c0_71 = arith.constant 0 : index
    %c0_72 = arith.constant 0 : index
    %33 = vector.load %arg17[%c1_70, %c0_71, %c0_72] : memref<12x12x32xf32, #tpu.memory_space<vmem>>, vector<8x12x32xf32>
    %c0_73 = arith.constant 0 : index
    %c0_74 = arith.constant 0 : index
    %c32_75 = arith.constant 32 : index
    %34 = vector.load %arg15[%c0_73, %c0_74, %c32_75] : memref<8x12x160xf32, #tpu.memory_space<vmem>>, vector<8x12x32xf32>
    tpu.vector_store %arg15[%c0_73, %c0_74, %c32_75], %33 {strides = array<i32>} : memref<8x12x160xf32, #tpu.memory_space<vmem>>, vector<8x12x32xf32>,
    %c2_76 = arith.constant 2 : index
    %c0_77 = arith.constant 0 : index
    %c0_78 = arith.constant 0 : index
    %35 = vector.load %arg17[%c2_76, %c0_77, %c0_78] : memref<12x12x32xf32, #tpu.memory_space<vmem>>, vector<8x12x32xf32>
    %c0_79 = arith.constant 0 : index
    %c0_80 = arith.constant 0 : index
    %c64_81 = arith.constant 64 : index
    %36 = vector.load %arg15[%c0_79, %c0_80, %c64_81] : memref<8x12x160xf32, #tpu.memory_space<vmem>>, vector<8x12x32xf32>
    tpu.vector_store %arg15[%c0_79, %c0_80, %c64_81], %35 {strides = array<i32>} : memref<8x12x160xf32, #tpu.memory_space<vmem>>, vector<8x12x32xf32>,
    %c3_82 = arith.constant 3 : index
    %c0_83 = arith.constant 0 : index
    %c0_84 = arith.constant 0 : index
    %37 = vector.load %arg17[%c3_82, %c0_83, %c0_84] : memref<12x12x32xf32, #tpu.memory_space<vmem>>, vector<8x12x32xf32>
    %c0_85 = arith.constant 0 : index
    %c0_86 = arith.constant 0 : index
    %c96_87 = arith.constant 96 : index
    %38 = vector.load %arg15[%c0_85, %c0_86, %c96_87] : memref<8x12x160xf32, #tpu.memory_space<vmem>>, vector<8x12x32xf32>
    tpu.vector_store %arg15[%c0_85, %c0_86, %c96_87], %37 {strides = array<i32>} : memref<8x12x160xf32, #tpu.memory_space<vmem>>, vector<8x12x32xf32>,
    %c4_88 = arith.constant 4 : index
    %c0_89 = arith.constant 0 : index
    %c0_90 = arith.constant 0 : index
    %39 = vector.load %arg17[%c4_88, %c0_89, %c0_90] : memref<12x12x32xf32, #tpu.memory_space<vmem>>, vector<8x12x32xf32>
    %c0_91 = arith.constant 0 : index
    %c0_92 = arith.constant 0 : index
    %c128_93 = arith.constant 128 : index
    %40 = vector.load %arg15[%c0_91, %c0_92, %c128_93] : memref<8x12x160xf32, #tpu.memory_space<vmem>>, vector<8x12x32xf32>
    tpu.vector_store %arg15[%c0_91, %c0_92, %c128_93], %39 {strides = array<i32>} : memref<8x12x160xf32, #tpu.memory_space<vmem>>, vector<8x12x32xf32>,
    %c0_i32_94 = arith.constant 0 : i32
    %c4_i32 = arith.constant 4 : i32
    %41 = arith.addi %c0_i32_94, %c4_i32 : i32
    %c1_i32_95 = arith.constant 1 : i32
    scf.for %arg20 = %c0_i32_94 to %41 step %c1_i32_95  : i32 {
      %c2_i32 = arith.constant 2 : i32
      %147 = arith.muli %c2_i32, %arg20 : i32
      %148 = arith.index_cast %147 : i32 to index
      %c0_193 = arith.constant 0 : index
      %c0_194 = arith.constant 0 : index
      %149 = vector.load %arg15[%148, %c0_193, %c0_194] : memref<8x12x160xf32, #tpu.memory_space<vmem>>, vector<1x12x160xf32>
      %150 = vector.shape_cast %149 : vector<1x12x160xf32> to vector<12x160xf32>
      %151 = vector.extract_strided_slice %150 {offsets = [0, 0], sizes = [8, 160], strides = [1, 1]} : vector<12x160xf32> to vector<8x160xf32>
      %152 = arith.truncf %151 : vector<8x160xf32> to vector<8x160xbf16>
      %c0_195 = arith.constant 0 : index
      %c0_196 = arith.constant 0 : index
      %c0_197 = arith.constant 0 : index
      %153 = vector.load %arg6[%c0_195, %c0_196, %c0_197] : memref<5x160x64xbf16, #tpu.memory_space<vmem>>, vector<1x160x64xbf16>
      %154 = vector.shape_cast %153 : vector<1x160x64xbf16> to vector<160x64xbf16>
      %cst_198 = arith.constant dense<0.000000e+00> : vector<8x64xf32>
      %155 = tpu.matmul %152, %154, %cst_198 {dimension_numbers = #tpu.dot_dimension_numbers<[1], [0], [0], [1], [0, 0, 1, 1], [], []>} : vector<8x160xbf16>, vector<160x64xbf16>, vector<8x64xf32> -> vector<8x64xf32>
      %156 = vector.extract_strided_slice %150 {offsets = [1, 0], sizes = [8, 160], strides = [1, 1]} : vector<12x160xf32> to vector<8x160xf32>
      %157 = arith.truncf %156 : vector<8x160xf32> to vector<8x160xbf16>
      %c1_199 = arith.constant 1 : index
      %c0_200 = arith.constant 0 : index
      %c0_201 = arith.constant 0 : index
      %158 = vector.load %arg6[%c1_199, %c0_200, %c0_201] : memref<5x160x64xbf16, #tpu.memory_space<vmem>>, vector<1x160x64xbf16>
      %159 = vector.shape_cast %158 : vector<1x160x64xbf16> to vector<160x64xbf16>
      %cst_202 = arith.constant dense<0.000000e+00> : vector<8x64xf32>
      %160 = tpu.matmul %157, %159, %cst_202 {dimension_numbers = #tpu.dot_dimension_numbers<[1], [0], [0], [1], [0, 0, 1, 1], [], []>} : vector<8x160xbf16>, vector<160x64xbf16>, vector<8x64xf32> -> vector<8x64xf32>
      %161 = arith.addf %155, %160 : vector<8x64xf32>
      %162 = vector.extract_strided_slice %150 {offsets = [2, 0], sizes = [8, 160], strides = [1, 1]} : vector<12x160xf32> to vector<8x160xf32>
      %163 = arith.truncf %162 : vector<8x160xf32> to vector<8x160xbf16>
      %c2_203 = arith.constant 2 : index
      %c0_204 = arith.constant 0 : index
      %c0_205 = arith.constant 0 : index
      %164 = vector.load %arg6[%c2_203, %c0_204, %c0_205] : memref<5x160x64xbf16, #tpu.memory_space<vmem>>, vector<1x160x64xbf16>
      %165 = vector.shape_cast %164 : vector<1x160x64xbf16> to vector<160x64xbf16>
      %cst_206 = arith.constant dense<0.000000e+00> : vector<8x64xf32>
      %166 = tpu.matmul %163, %165, %cst_206 {dimension_numbers = #tpu.dot_dimension_numbers<[1], [0], [0], [1], [0, 0, 1, 1], [], []>} : vector<8x160xbf16>, vector<160x64xbf16>, vector<8x64xf32> -> vector<8x64xf32>
      %167 = arith.addf %161, %166 : vector<8x64xf32>
      %168 = vector.extract_strided_slice %150 {offsets = [3, 0], sizes = [8, 160], strides = [1, 1]} : vector<12x160xf32> to vector<8x160xf32>
      %169 = arith.truncf %168 : vector<8x160xf32> to vector<8x160xbf16>
      %c3_207 = arith.constant 3 : index
      %c0_208 = arith.constant 0 : index
      %c0_209 = arith.constant 0 : index
      %170 = vector.load %arg6[%c3_207, %c0_208, %c0_209] : memref<5x160x64xbf16, #tpu.memory_space<vmem>>, vector<1x160x64xbf16>
      %171 = vector.shape_cast %170 : vector<1x160x64xbf16> to vector<160x64xbf16>
      %cst_210 = arith.constant dense<0.000000e+00> : vector<8x64xf32>
      %172 = tpu.matmul %169, %171, %cst_210 {dimension_numbers = #tpu.dot_dimension_numbers<[1], [0], [0], [1], [0, 0, 1, 1], [], []>} : vector<8x160xbf16>, vector<160x64xbf16>, vector<8x64xf32> -> vector<8x64xf32>
      %173 = arith.addf %167, %172 : vector<8x64xf32>
      %174 = vector.extract_strided_slice %150 {offsets = [4, 0], sizes = [8, 160], strides = [1, 1]} : vector<12x160xf32> to vector<8x160xf32>
      %175 = arith.truncf %174 : vector<8x160xf32> to vector<8x160xbf16>
      %c4_211 = arith.constant 4 : index
      %c0_212 = arith.constant 0 : index
      %c0_213 = arith.constant 0 : index
      %176 = vector.load %arg6[%c4_211, %c0_212, %c0_213] : memref<5x160x64xbf16, #tpu.memory_space<vmem>>, vector<1x160x64xbf16>
      %177 = vector.shape_cast %176 : vector<1x160x64xbf16> to vector<160x64xbf16>
      %cst_214 = arith.constant dense<0.000000e+00> : vector<8x64xf32>
      %178 = tpu.matmul %175, %177, %cst_214 {dimension_numbers = #tpu.dot_dimension_numbers<[1], [0], [0], [1], [0, 0, 1, 1], [], []>} : vector<8x160xbf16>, vector<160x64xbf16>, vector<8x64xf32> -> vector<8x64xf32>
      %179 = arith.addf %173, %178 : vector<8x64xf32>
      %c0_215 = arith.constant 0 : index
      %c0_216 = arith.constant 0 : index
      %180 = vector.load %arg7[%c0_215, %c0_216] : memref<1x64xf32, #tpu.memory_space<vmem>>, vector<1x64xf32>
      %181 = vector.broadcast %180 : vector<1x64xf32> to vector<8x64xf32>
      %182 = arith.addf %179, %181 : vector<8x64xf32>
      %c2_i32_217 = arith.constant 2 : i32
      %183 = arith.muli %c2_i32_217, %arg20 : i32
      %c1_i32_218 = arith.constant 1 : i32
      %184 = arith.addi %183, %c1_i32_218 : i32
      %185 = arith.index_cast %184 : i32 to index
      %c0_219 = arith.constant 0 : index
      %c0_220 = arith.constant 0 : index
      %186 = vector.load %arg15[%185, %c0_219, %c0_220] : memref<8x12x160xf32, #tpu.memory_space<vmem>>, vector<1x12x160xf32>
      %187 = vector.shape_cast %186 : vector<1x12x160xf32> to vector<12x160xf32>
      %188 = vector.extract_strided_slice %187 {offsets = [0, 0], sizes = [8, 160], strides = [1, 1]} : vector<12x160xf32> to vector<8x160xf32>
      %189 = arith.truncf %188 : vector<8x160xf32> to vector<8x160xbf16>
      %c0_221 = arith.constant 0 : index
      %c0_222 = arith.constant 0 : index
      %c0_223 = arith.constant 0 : index
      %190 = vector.load %arg6[%c0_221, %c0_222, %c0_223] : memref<5x160x64xbf16, #tpu.memory_space<vmem>>, vector<1x160x64xbf16>
      %191 = vector.shape_cast %190 : vector<1x160x64xbf16> to vector<160x64xbf16>
      %cst_224 = arith.constant dense<0.000000e+00> : vector<8x64xf32>
      %192 = tpu.matmul %189, %191, %cst_224 {dimension_numbers = #tpu.dot_dimension_numbers<[1], [0], [0], [1], [0, 0, 1, 1], [], []>} : vector<8x160xbf16>, vector<160x64xbf16>, vector<8x64xf32> -> vector<8x64xf32>
      %193 = vector.extract_strided_slice %187 {offsets = [1, 0], sizes = [8, 160], strides = [1, 1]} : vector<12x160xf32> to vector<8x160xf32>
      %194 = arith.truncf %193 : vector<8x160xf32> to vector<8x160xbf16>
      %c1_225 = arith.constant 1 : index
      %c0_226 = arith.constant 0 : index
      %c0_227 = arith.constant 0 : index
      %195 = vector.load %arg6[%c1_225, %c0_226, %c0_227] : memref<5x160x64xbf16, #tpu.memory_space<vmem>>, vector<1x160x64xbf16>
      %196 = vector.shape_cast %195 : vector<1x160x64xbf16> to vector<160x64xbf16>
      %cst_228 = arith.constant dense<0.000000e+00> : vector<8x64xf32>
      %197 = tpu.matmul %194, %196, %cst_228 {dimension_numbers = #tpu.dot_dimension_numbers<[1], [0], [0], [1], [0, 0, 1, 1], [], []>} : vector<8x160xbf16>, vector<160x64xbf16>, vector<8x64xf32> -> vector<8x64xf32>
      %198 = arith.addf %192, %197 : vector<8x64xf32>
      %199 = vector.extract_strided_slice %187 {offsets = [2, 0], sizes = [8, 160], strides = [1, 1]} : vector<12x160xf32> to vector<8x160xf32>
      %200 = arith.truncf %199 : vector<8x160xf32> to vector<8x160xbf16>
      %c2_229 = arith.constant 2 : index
      %c0_230 = arith.constant 0 : index
      %c0_231 = arith.constant 0 : index
      %201 = vector.load %arg6[%c2_229, %c0_230, %c0_231] : memref<5x160x64xbf16, #tpu.memory_space<vmem>>, vector<1x160x64xbf16>
      %202 = vector.shape_cast %201 : vector<1x160x64xbf16> to vector<160x64xbf16>
      %cst_232 = arith.constant dense<0.000000e+00> : vector<8x64xf32>
      %203 = tpu.matmul %200, %202, %cst_232 {dimension_numbers = #tpu.dot_dimension_numbers<[1], [0], [0], [1], [0, 0, 1, 1], [], []>} : vector<8x160xbf16>, vector<160x64xbf16>, vector<8x64xf32> -> vector<8x64xf32>
      %204 = arith.addf %198, %203 : vector<8x64xf32>
      %205 = vector.extract_strided_slice %187 {offsets = [3, 0], sizes = [8, 160], strides = [1, 1]} : vector<12x160xf32> to vector<8x160xf32>
      %206 = arith.truncf %205 : vector<8x160xf32> to vector<8x160xbf16>
      %c3_233 = arith.constant 3 : index
      %c0_234 = arith.constant 0 : index
      %c0_235 = arith.constant 0 : index
      %207 = vector.load %arg6[%c3_233, %c0_234, %c0_235] : memref<5x160x64xbf16, #tpu.memory_space<vmem>>, vector<1x160x64xbf16>
      %208 = vector.shape_cast %207 : vector<1x160x64xbf16> to vector<160x64xbf16>
      %cst_236 = arith.constant dense<0.000000e+00> : vector<8x64xf32>
      %209 = tpu.matmul %206, %208, %cst_236 {dimension_numbers = #tpu.dot_dimension_numbers<[1], [0], [0], [1], [0, 0, 1, 1], [], []>} : vector<8x160xbf16>, vector<160x64xbf16>, vector<8x64xf32> -> vector<8x64xf32>
      %210 = arith.addf %204, %209 : vector<8x64xf32>
      %211 = vector.extract_strided_slice %187 {offsets = [4, 0], sizes = [8, 160], strides = [1, 1]} : vector<12x160xf32> to vector<8x160xf32>
      %212 = arith.truncf %211 : vector<8x160xf32> to vector<8x160xbf16>
      %c4_237 = arith.constant 4 : index
      %c0_238 = arith.constant 0 : index
      %c0_239 = arith.constant 0 : index
      %213 = vector.load %arg6[%c4_237, %c0_238, %c0_239] : memref<5x160x64xbf16, #tpu.memory_space<vmem>>, vector<1x160x64xbf16>
      %214 = vector.shape_cast %213 : vector<1x160x64xbf16> to vector<160x64xbf16>
      %cst_240 = arith.constant dense<0.000000e+00> : vector<8x64xf32>
      %215 = tpu.matmul %212, %214, %cst_240 {dimension_numbers = #tpu.dot_dimension_numbers<[1], [0], [0], [1], [0, 0, 1, 1], [], []>} : vector<8x160xbf16>, vector<160x64xbf16>, vector<8x64xf32> -> vector<8x64xf32>
      %216 = arith.addf %210, %215 : vector<8x64xf32>
      %c0_241 = arith.constant 0 : index
      %c0_242 = arith.constant 0 : index
      %217 = vector.load %arg7[%c0_241, %c0_242] : memref<1x64xf32, #tpu.memory_space<vmem>>, vector<1x64xf32>
      %218 = vector.broadcast %217 : vector<1x64xf32> to vector<8x64xf32>
      %219 = arith.addf %216, %218 : vector<8x64xf32>
      %220 = arith.maximumf %182, %219 : vector<8x64xf32>
      %c0_243 = arith.constant 0 : index
      %c0_244 = arith.constant 0 : index
      %221 = vector.load %arg19[%c0_243, %c0_244] : memref<32x64xf32, #tpu.memory_space<vmem>>, vector<8x64xf32>
      tpu.vector_store %arg19[%c0_243, %c0_244], %220 {strides = array<i32>} : memref<32x64xf32, #tpu.memory_space<vmem>>, vector<8x64xf32>,
      %c0_245 = arith.constant 0 : index
      %c0_246 = arith.constant 0 : index
      %222 = tpu.strided_load %arg19[%c0_245, %c0_246] {strides = array<i32: 2, 1>} : memref<32x64xf32, #tpu.memory_space<vmem>>, vector<4x64xf32>
      %c1_247 = arith.constant 1 : index
      %c0_248 = arith.constant 0 : index
      %223 = tpu.strided_load %arg19[%c1_247, %c0_248] {strides = array<i32: 2, 1>} : memref<32x64xf32, #tpu.memory_space<vmem>>, vector<4x64xf32>
      %224 = arith.maximumf %222, %223 : vector<4x64xf32>
      %c4_i32_249 = arith.constant 4 : i32
      %225 = arith.muli %c4_i32_249, %arg20 : i32
      %226 = arith.index_cast %225 : i32 to index
      %c0_250 = arith.constant 0 : index
      %227 = vector.load %arg18[%226, %c0_250] : memref<16x64xf32, #tpu.memory_space<vmem>>, vector<4x64xf32>
      tpu.vector_store %arg18[%226, %c0_250], %224 {strides = array<i32>} : memref<16x64xf32, #tpu.memory_space<vmem>>, vector<4x64xf32>,
    }
    %c4_i32_96 = arith.constant 4 : i32
    %c0_97 = arith.constant 0 : index
    %c0_98 = arith.constant 0 : index
    %42 = vector.load %arg9[%c0_97, %c0_98] : memref<1x64xf32, #tpu.memory_space<vmem>>, vector<1x64xf32>
    %c0_99 = arith.constant 0 : index
    %c0_100 = arith.constant 0 : index
    %43 = vector.load %arg18[%c0_99, %c0_100] : memref<16x64xf32, #tpu.memory_space<vmem>>, vector<1x64xf32>
    %44 = arith.truncf %43 : vector<1x64xf32> to vector<1x64xbf16>
    %c0_101 = arith.constant 0 : index
    %c0_102 = arith.constant 0 : index
    %c0_103 = arith.constant 0 : index
    %45 = vector.load %arg8[%c0_101, %c0_102, %c0_103] : memref<16x64x64xbf16, #tpu.memory_space<vmem>>, vector<1x64x64xbf16>
    %46 = vector.shape_cast %45 : vector<1x64x64xbf16> to vector<64x64xbf16>
    %cst_104 = arith.constant dense<0.000000e+00> : vector<1x64xf32>
    %47 = tpu.matmul %44, %46, %cst_104 {dimension_numbers = #tpu.dot_dimension_numbers<[1], [0], [0], [1], [0, 0, 1, 1], [], []>} : vector<1x64xbf16>, vector<64x64xbf16>, vector<1x64xf32> -> vector<1x64xf32>
    %48 = arith.addf %42, %47 : vector<1x64xf32>
    %c1_105 = arith.constant 1 : index
    %c0_106 = arith.constant 0 : index
    %49 = vector.load %arg18[%c1_105, %c0_106] : memref<16x64xf32, #tpu.memory_space<vmem>>, vector<1x64xf32>
    %50 = arith.truncf %49 : vector<1x64xf32> to vector<1x64xbf16>
    %c1_107 = arith.constant 1 : index
    %c0_108 = arith.constant 0 : index
    %c0_109 = arith.constant 0 : index
    %51 = vector.load %arg8[%c1_107, %c0_108, %c0_109] : memref<16x64x64xbf16, #tpu.memory_space<vmem>>, vector<1x64x64xbf16>
    %52 = vector.shape_cast %51 : vector<1x64x64xbf16> to vector<64x64xbf16>
    %cst_110 = arith.constant dense<0.000000e+00> : vector<1x64xf32>
    %53 = tpu.matmul %50, %52, %cst_110 {dimension_numbers = #tpu.dot_dimension_numbers<[1], [0], [0], [1], [0, 0, 1, 1], [], []>} : vector<1x64xbf16>, vector<64x64xbf16>, vector<1x64xf32> -> vector<1x64xf32>
    %54 = arith.addf %48, %53 : vector<1x64xf32>
    %c2_111 = arith.constant 2 : index
    %c0_112 = arith.constant 0 : index
    %55 = vector.load %arg18[%c2_111, %c0_112] : memref<16x64xf32, #tpu.memory_space<vmem>>, vector<1x64xf32>
    %56 = arith.truncf %55 : vector<1x64xf32> to vector<1x64xbf16>
    %c2_113 = arith.constant 2 : index
    %c0_114 = arith.constant 0 : index
    %c0_115 = arith.constant 0 : index
    %57 = vector.load %arg8[%c2_113, %c0_114, %c0_115] : memref<16x64x64xbf16, #tpu.memory_space<vmem>>, vector<1x64x64xbf16>
    %58 = vector.shape_cast %57 : vector<1x64x64xbf16> to vector<64x64xbf16>
    %cst_116 = arith.constant dense<0.000000e+00> : vector<1x64xf32>
    %59 = tpu.matmul %56, %58, %cst_116 {dimension_numbers = #tpu.dot_dimension_numbers<[1], [0], [0], [1], [0, 0, 1, 1], [], []>} : vector<1x64xbf16>, vector<64x64xbf16>, vector<1x64xf32> -> vector<1x64xf32>
    %60 = arith.addf %54, %59 : vector<1x64xf32>
    %c3_117 = arith.constant 3 : index
    %c0_118 = arith.constant 0 : index
    %61 = vector.load %arg18[%c3_117, %c0_118] : memref<16x64xf32, #tpu.memory_space<vmem>>, vector<1x64xf32>
    %62 = arith.truncf %61 : vector<1x64xf32> to vector<1x64xbf16>
    %c3_119 = arith.constant 3 : index
    %c0_120 = arith.constant 0 : index
    %c0_121 = arith.constant 0 : index
    %63 = vector.load %arg8[%c3_119, %c0_120, %c0_121] : memref<16x64x64xbf16, #tpu.memory_space<vmem>>, vector<1x64x64xbf16>
    %64 = vector.shape_cast %63 : vector<1x64x64xbf16> to vector<64x64xbf16>
    %cst_122 = arith.constant dense<0.000000e+00> : vector<1x64xf32>
    %65 = tpu.matmul %62, %64, %cst_122 {dimension_numbers = #tpu.dot_dimension_numbers<[1], [0], [0], [1], [0, 0, 1, 1], [], []>} : vector<1x64xbf16>, vector<64x64xbf16>, vector<1x64xf32> -> vector<1x64xf32>
    %66 = arith.addf %60, %65 : vector<1x64xf32>
    %c4_123 = arith.constant 4 : index
    %c0_124 = arith.constant 0 : index
    %67 = vector.load %arg18[%c4_123, %c0_124] : memref<16x64xf32, #tpu.memory_space<vmem>>, vector<1x64xf32>
    %68 = arith.truncf %67 : vector<1x64xf32> to vector<1x64xbf16>
    %c4_125 = arith.constant 4 : index
    %c0_126 = arith.constant 0 : index
    %c0_127 = arith.constant 0 : index
    %69 = vector.load %arg8[%c4_125, %c0_126, %c0_127] : memref<16x64x64xbf16, #tpu.memory_space<vmem>>, vector<1x64x64xbf16>
    %70 = vector.shape_cast %69 : vector<1x64x64xbf16> to vector<64x64xbf16>
    %cst_128 = arith.constant dense<0.000000e+00> : vector<1x64xf32>
    %71 = tpu.matmul %68, %70, %cst_128 {dimension_numbers = #tpu.dot_dimension_numbers<[1], [0], [0], [1], [0, 0, 1, 1], [], []>} : vector<1x64xbf16>, vector<64x64xbf16>, vector<1x64xf32> -> vector<1x64xf32>
    %72 = arith.addf %66, %71 : vector<1x64xf32>
    %c5 = arith.constant 5 : index
    %c0_129 = arith.constant 0 : index
    %73 = vector.load %arg18[%c5, %c0_129] : memref<16x64xf32, #tpu.memory_space<vmem>>, vector<1x64xf32>
    %74 = arith.truncf %73 : vector<1x64xf32> to vector<1x64xbf16>
    %c5_130 = arith.constant 5 : index
    %c0_131 = arith.constant 0 : index
    %c0_132 = arith.constant 0 : index
    %75 = vector.load %arg8[%c5_130, %c0_131, %c0_132] : memref<16x64x64xbf16, #tpu.memory_space<vmem>>, vector<1x64x64xbf16>
    %76 = vector.shape_cast %75 : vector<1x64x64xbf16> to vector<64x64xbf16>
    %cst_133 = arith.constant dense<0.000000e+00> : vector<1x64xf32>
    %77 = tpu.matmul %74, %76, %cst_133 {dimension_numbers = #tpu.dot_dimension_numbers<[1], [0], [0], [1], [0, 0, 1, 1], [], []>} : vector<1x64xbf16>, vector<64x64xbf16>, vector<1x64xf32> -> vector<1x64xf32>
    %78 = arith.addf %72, %77 : vector<1x64xf32>
    %c6 = arith.constant 6 : index
    %c0_134 = arith.constant 0 : index
    %79 = vector.load %arg18[%c6, %c0_134] : memref<16x64xf32, #tpu.memory_space<vmem>>, vector<1x64xf32>
    %80 = arith.truncf %79 : vector<1x64xf32> to vector<1x64xbf16>
    %c6_135 = arith.constant 6 : index
    %c0_136 = arith.constant 0 : index
    %c0_137 = arith.constant 0 : index
    %81 = vector.load %arg8[%c6_135, %c0_136, %c0_137] : memref<16x64x64xbf16, #tpu.memory_space<vmem>>, vector<1x64x64xbf16>
    %82 = vector.shape_cast %81 : vector<1x64x64xbf16> to vector<64x64xbf16>
    %cst_138 = arith.constant dense<0.000000e+00> : vector<1x64xf32>
    %83 = tpu.matmul %80, %82, %cst_138 {dimension_numbers = #tpu.dot_dimension_numbers<[1], [0], [0], [1], [0, 0, 1, 1], [], []>} : vector<1x64xbf16>, vector<64x64xbf16>, vector<1x64xf32> -> vector<1x64xf32>
    %84 = arith.addf %78, %83 : vector<1x64xf32>
    %c7 = arith.constant 7 : index
    %c0_139 = arith.constant 0 : index
    %85 = vector.load %arg18[%c7, %c0_139] : memref<16x64xf32, #tpu.memory_space<vmem>>, vector<1x64xf32>
    %86 = arith.truncf %85 : vector<1x64xf32> to vector<1x64xbf16>
    %c7_140 = arith.constant 7 : index
    %c0_141 = arith.constant 0 : index
    %c0_142 = arith.constant 0 : index
    %87 = vector.load %arg8[%c7_140, %c0_141, %c0_142] : memref<16x64x64xbf16, #tpu.memory_space<vmem>>, vector<1x64x64xbf16>
    %88 = vector.shape_cast %87 : vector<1x64x64xbf16> to vector<64x64xbf16>
    %cst_143 = arith.constant dense<0.000000e+00> : vector<1x64xf32>
    %89 = tpu.matmul %86, %88, %cst_143 {dimension_numbers = #tpu.dot_dimension_numbers<[1], [0], [0], [1], [0, 0, 1, 1], [], []>} : vector<1x64xbf16>, vector<64x64xbf16>, vector<1x64xf32> -> vector<1x64xf32>
    %90 = arith.addf %84, %89 : vector<1x64xf32>
    %c8_144 = arith.constant 8 : index
    %c0_145 = arith.constant 0 : index
    %91 = vector.load %arg18[%c8_144, %c0_145] : memref<16x64xf32, #tpu.memory_space<vmem>>, vector<1x64xf32>
    %92 = arith.truncf %91 : vector<1x64xf32> to vector<1x64xbf16>
    %c8_146 = arith.constant 8 : index
    %c0_147 = arith.constant 0 : index
    %c0_148 = arith.constant 0 : index
    %93 = vector.load %arg8[%c8_146, %c0_147, %c0_148] : memref<16x64x64xbf16, #tpu.memory_space<vmem>>, vector<1x64x64xbf16>
    %94 = vector.shape_cast %93 : vector<1x64x64xbf16> to vector<64x64xbf16>
    %cst_149 = arith.constant dense<0.000000e+00> : vector<1x64xf32>
    %95 = tpu.matmul %92, %94, %cst_149 {dimension_numbers = #tpu.dot_dimension_numbers<[1], [0], [0], [1], [0, 0, 1, 1], [], []>} : vector<1x64xbf16>, vector<64x64xbf16>, vector<1x64xf32> -> vector<1x64xf32>
    %96 = arith.addf %90, %95 : vector<1x64xf32>
    %c9 = arith.constant 9 : index
    %c0_150 = arith.constant 0 : index
    %97 = vector.load %arg18[%c9, %c0_150] : memref<16x64xf32, #tpu.memory_space<vmem>>, vector<1x64xf32>
    %98 = arith.truncf %97 : vector<1x64xf32> to vector<1x64xbf16>
    %c9_151 = arith.constant 9 : index
    %c0_152 = arith.constant 0 : index
    %c0_153 = arith.constant 0 : index
    %99 = vector.load %arg8[%c9_151, %c0_152, %c0_153] : memref<16x64x64xbf16, #tpu.memory_space<vmem>>, vector<1x64x64xbf16>
    %100 = vector.shape_cast %99 : vector<1x64x64xbf16> to vector<64x64xbf16>
    %cst_154 = arith.constant dense<0.000000e+00> : vector<1x64xf32>
    %101 = tpu.matmul %98, %100, %cst_154 {dimension_numbers = #tpu.dot_dimension_numbers<[1], [0], [0], [1], [0, 0, 1, 1], [], []>} : vector<1x64xbf16>, vector<64x64xbf16>, vector<1x64xf32> -> vector<1x64xf32>
    %102 = arith.addf %96, %101 : vector<1x64xf32>
    %c10 = arith.constant 10 : index
    %c0_155 = arith.constant 0 : index
    %103 = vector.load %arg18[%c10, %c0_155] : memref<16x64xf32, #tpu.memory_space<vmem>>, vector<1x64xf32>
    %104 = arith.truncf %103 : vector<1x64xf32> to vector<1x64xbf16>
    %c10_156 = arith.constant 10 : index
    %c0_157 = arith.constant 0 : index
    %c0_158 = arith.constant 0 : index
    %105 = vector.load %arg8[%c10_156, %c0_157, %c0_158] : memref<16x64x64xbf16, #tpu.memory_space<vmem>>, vector<1x64x64xbf16>
    %106 = vector.shape_cast %105 : vector<1x64x64xbf16> to vector<64x64xbf16>
    %cst_159 = arith.constant dense<0.000000e+00> : vector<1x64xf32>
    %107 = tpu.matmul %104, %106, %cst_159 {dimension_numbers = #tpu.dot_dimension_numbers<[1], [0], [0], [1], [0, 0, 1, 1], [], []>} : vector<1x64xbf16>, vector<64x64xbf16>, vector<1x64xf32> -> vector<1x64xf32>
    %108 = arith.addf %102, %107 : vector<1x64xf32>
    %c11 = arith.constant 11 : index
    %c0_160 = arith.constant 0 : index
    %109 = vector.load %arg18[%c11, %c0_160] : memref<16x64xf32, #tpu.memory_space<vmem>>, vector<1x64xf32>
    %110 = arith.truncf %109 : vector<1x64xf32> to vector<1x64xbf16>
    %c11_161 = arith.constant 11 : index
    %c0_162 = arith.constant 0 : index
    %c0_163 = arith.constant 0 : index
    %111 = vector.load %arg8[%c11_161, %c0_162, %c0_163] : memref<16x64x64xbf16, #tpu.memory_space<vmem>>, vector<1x64x64xbf16>
    %112 = vector.shape_cast %111 : vector<1x64x64xbf16> to vector<64x64xbf16>
    %cst_164 = arith.constant dense<0.000000e+00> : vector<1x64xf32>
    %113 = tpu.matmul %110, %112, %cst_164 {dimension_numbers = #tpu.dot_dimension_numbers<[1], [0], [0], [1], [0, 0, 1, 1], [], []>} : vector<1x64xbf16>, vector<64x64xbf16>, vector<1x64xf32> -> vector<1x64xf32>
    %114 = arith.addf %108, %113 : vector<1x64xf32>
    %c12 = arith.constant 12 : index
    %c0_165 = arith.constant 0 : index
    %115 = vector.load %arg18[%c12, %c0_165] : memref<16x64xf32, #tpu.memory_space<vmem>>, vector<1x64xf32>
    %116 = arith.truncf %115 : vector<1x64xf32> to vector<1x64xbf16>
    %c12_166 = arith.constant 12 : index
    %c0_167 = arith.constant 0 : index
    %c0_168 = arith.constant 0 : index
    %117 = vector.load %arg8[%c12_166, %c0_167, %c0_168] : memref<16x64x64xbf16, #tpu.memory_space<vmem>>, vector<1x64x64xbf16>
    %118 = vector.shape_cast %117 : vector<1x64x64xbf16> to vector<64x64xbf16>
    %cst_169 = arith.constant dense<0.000000e+00> : vector<1x64xf32>
    %119 = tpu.matmul %116, %118, %cst_169 {dimension_numbers = #tpu.dot_dimension_numbers<[1], [0], [0], [1], [0, 0, 1, 1], [], []>} : vector<1x64xbf16>, vector<64x64xbf16>, vector<1x64xf32> -> vector<1x64xf32>
    %120 = arith.addf %114, %119 : vector<1x64xf32>
    %c13 = arith.constant 13 : index
    %c0_170 = arith.constant 0 : index
    %121 = vector.load %arg18[%c13, %c0_170] : memref<16x64xf32, #tpu.memory_space<vmem>>, vector<1x64xf32>
    %122 = arith.truncf %121 : vector<1x64xf32> to vector<1x64xbf16>
    %c13_171 = arith.constant 13 : index
    %c0_172 = arith.constant 0 : index
    %c0_173 = arith.constant 0 : index
    %123 = vector.load %arg8[%c13_171, %c0_172, %c0_173] : memref<16x64x64xbf16, #tpu.memory_space<vmem>>, vector<1x64x64xbf16>
    %124 = vector.shape_cast %123 : vector<1x64x64xbf16> to vector<64x64xbf16>
    %cst_174 = arith.constant dense<0.000000e+00> : vector<1x64xf32>
    %125 = tpu.matmul %122, %124, %cst_174 {dimension_numbers = #tpu.dot_dimension_numbers<[1], [0], [0], [1], [0, 0, 1, 1], [], []>} : vector<1x64xbf16>, vector<64x64xbf16>, vector<1x64xf32> -> vector<1x64xf32>
    %126 = arith.addf %120, %125 : vector<1x64xf32>
    %c14 = arith.constant 14 : index
    %c0_175 = arith.constant 0 : index
    %127 = vector.load %arg18[%c14, %c0_175] : memref<16x64xf32, #tpu.memory_space<vmem>>, vector<1x64xf32>
    %128 = arith.truncf %127 : vector<1x64xf32> to vector<1x64xbf16>
    %c14_176 = arith.constant 14 : index
    %c0_177 = arith.constant 0 : index
    %c0_178 = arith.constant 0 : index
    %129 = vector.load %arg8[%c14_176, %c0_177, %c0_178] : memref<16x64x64xbf16, #tpu.memory_space<vmem>>, vector<1x64x64xbf16>
    %130 = vector.shape_cast %129 : vector<1x64x64xbf16> to vector<64x64xbf16>
    %cst_179 = arith.constant dense<0.000000e+00> : vector<1x64xf32>
    %131 = tpu.matmul %128, %130, %cst_179 {dimension_numbers = #tpu.dot_dimension_numbers<[1], [0], [0], [1], [0, 0, 1, 1], [], []>} : vector<1x64xbf16>, vector<64x64xbf16>, vector<1x64xf32> -> vector<1x64xf32>
    %132 = arith.addf %126, %131 : vector<1x64xf32>
    %c15 = arith.constant 15 : index
    %c0_180 = arith.constant 0 : index
    %133 = vector.load %arg18[%c15, %c0_180] : memref<16x64xf32, #tpu.memory_space<vmem>>, vector<1x64xf32>
    %134 = arith.truncf %133 : vector<1x64xf32> to vector<1x64xbf16>
    %c15_181 = arith.constant 15 : index
    %c0_182 = arith.constant 0 : index
    %c0_183 = arith.constant 0 : index
    %135 = vector.load %arg8[%c15_181, %c0_182, %c0_183] : memref<16x64x64xbf16, #tpu.memory_space<vmem>>, vector<1x64x64xbf16>
    %136 = vector.shape_cast %135 : vector<1x64x64xbf16> to vector<64x64xbf16>
    %cst_184 = arith.constant dense<0.000000e+00> : vector<1x64xf32>
    %137 = tpu.matmul %134, %136, %cst_184 {dimension_numbers = #tpu.dot_dimension_numbers<[1], [0], [0], [1], [0, 0, 1, 1], [], []>} : vector<1x64xbf16>, vector<64x64xbf16>, vector<1x64xf32> -> vector<1x64xf32>
    %138 = arith.addf %132, %137 : vector<1x64xf32>
    %139 = arith.truncf %138 : vector<1x64xf32> to vector<1x64xbf16>
    %c0_185 = arith.constant 0 : index
    %c0_186 = arith.constant 0 : index
    %140 = vector.load %arg10[%c0_185, %c0_186] : memref<64x128xbf16, #tpu.memory_space<vmem>>, vector<64x128xbf16>
    %cst_187 = arith.constant dense<0.000000e+00> : vector<1x128xf32>
    %141 = tpu.matmul %139, %140, %cst_187 {dimension_numbers = #tpu.dot_dimension_numbers<[1], [0], [0], [1], [0, 0, 1, 1], [], []>} : vector<1x64xbf16>, vector<64x128xbf16>, vector<1x128xf32> -> vector<1x128xf32>
    %c0_188 = arith.constant 0 : index
    %c0_189 = arith.constant 0 : index
    %142 = vector.load %arg11[%c0_188, %c0_189] : memref<1x128xf32, #tpu.memory_space<vmem>>, vector<1x128xf32>
    %143 = arith.addf %141, %142 : vector<1x128xf32>
    %c0_190 = arith.constant 0 : index
    %c0_191 = arith.constant 0 : index
    %c0_192 = arith.constant 0 : index
    %144 = vector.load %arg12[%c0_190, %c0_191, %c0_192] : memref<1x1x128xf32, #tpu.memory_space<vmem>>, vector<1x1x128xf32>
    %145 = vector.shape_cast %144 : vector<1x1x128xf32> to vector<1x128xf32>
    %146 = vector.shape_cast %143 : vector<1x128xf32> to vector<1x1x128xf32>
    tpu.vector_store %arg12[%c0_190, %c0_191, %c0_192], %146 {strides = array<i32>} : memref<1x1x128xf32, #tpu.memory_space<vmem>>, vector<1x1x128xf32>,
    return
  }
  func.func @transform_0(%arg0: i32) -> (i32, i32, i32, i32) {
    %c0_i32 = arith.constant 0 : i32
    %c0_i32_0 = arith.constant 0 : i32
    %c0_i32_1 = arith.constant 0 : i32
    %c0_i32_2 = arith.constant 0 : i32
    return %arg0, %c0_i32, %c0_i32_0, %c0_i32_1 : i32, i32, i32, i32
  }
  func.func @transform_1(%arg0: i32) -> (i32, i32, i32) {
    %c0_i32 = arith.constant 0 : i32
    %c0_i32_0 = arith.constant 0 : i32
    %c0_i32_1 = arith.constant 0 : i32
    %c0_i32_2 = arith.constant 0 : i32
    return %c0_i32, %c0_i32_0, %c0_i32_1 : i32, i32, i32
  }
  func.func @transform_2(%arg0: i32) -> (i32, i32) {
    %c0_i32 = arith.constant 0 : i32
    %c0_i32_0 = arith.constant 0 : i32
    %c0_i32_1 = arith.constant 0 : i32
    return %c0_i32, %c0_i32_0 : i32, i32
  }
  func.func @transform_3(%arg0: i32) -> (i32, i32, i32) {
    %c0_i32 = arith.constant 0 : i32
    %c0_i32_0 = arith.constant 0 : i32
    %c0_i32_1 = arith.constant 0 : i32
    %c0_i32_2 = arith.constant 0 : i32
    return %c0_i32, %c0_i32_0, %c0_i32_1 : i32, i32, i32
  }
  func.func @transform_4(%arg0: i32) -> (i32, i32) {
    %c0_i32 = arith.constant 0 : i32
    %c0_i32_0 = arith.constant 0 : i32
    %c0_i32_1 = arith.constant 0 : i32
    return %c0_i32, %c0_i32_0 : i32, i32
  }
  func.func @transform_5(%arg0: i32) -> (i32, i32, i32) {
    %c0_i32 = arith.constant 0 : i32
    %c0_i32_0 = arith.constant 0 : i32
    %c0_i32_1 = arith.constant 0 : i32
    %c0_i32_2 = arith.constant 0 : i32
    return %c0_i32, %c0_i32_0, %c0_i32_1 : i32, i32, i32
  }
  func.func @transform_6(%arg0: i32) -> (i32, i32) {
    %c0_i32 = arith.constant 0 : i32
    %c0_i32_0 = arith.constant 0 : i32
    %c0_i32_1 = arith.constant 0 : i32
    return %c0_i32, %c0_i32_0 : i32, i32
  }
  func.func @transform_7(%arg0: i32) -> (i32, i32, i32) {
    %c0_i32 = arith.constant 0 : i32
    %c0_i32_0 = arith.constant 0 : i32
    %c0_i32_1 = arith.constant 0 : i32
    %c0_i32_2 = arith.constant 0 : i32
    return %c0_i32, %c0_i32_0, %c0_i32_1 : i32, i32, i32
  }
  func.func @transform_8(%arg0: i32) -> (i32, i32) {
    %c0_i32 = arith.constant 0 : i32
    %c0_i32_0 = arith.constant 0 : i32
    %c0_i32_1 = arith.constant 0 : i32
    return %c0_i32, %c0_i32_0 : i32, i32
  }
  func.func @transform_9(%arg0: i32) -> (i32, i32) {
    %c0_i32 = arith.constant 0 : i32
    %c0_i32_0 = arith.constant 0 : i32
    %c0_i32_1 = arith.constant 0 : i32
    return %c0_i32, %c0_i32_0 : i32, i32
  }
  func.func @transform_10(%arg0: i32) -> (i32, i32) {
    %c0_i32 = arith.constant 0 : i32
    %c0_i32_0 = arith.constant 0 : i32
    %c0_i32_1 = arith.constant 0 : i32
    return %c0_i32, %c0_i32_0 : i32, i32
  }
  func.func @transform_11(%arg0: i32) -> (i32, i32, i32) {
    %c0_i32 = arith.constant 0 : i32
    %c0_i32_0 = arith.constant 0 : i32
    %c0_i32_1 = arith.constant 0 : i32
    return %arg0, %c0_i32, %c0_i32_0 : i32, i32, i32
  }
}

</mosaic_0001>

<bundles_post_ra>
// kernel: tudui_forward.1
= control target key start
LH: loop header
LB: loop body
LE: loop exit
PB: predicated region body
PF: predicated region fallthrough
CT: control target
= control target key end

     0   :  { %s17814_s0 = inlined_call_operand.vmem [shape: f32[2,36,36,8], index: 0, kind: input, shape index: {}]   ;;  %s17815_s1 = inlined_call_operand.vmem [shape: bf16[5,40,32], index: 1, kind: input, shape index: {}]   ;;  %s17816_s2 = inlined_call_operand.vmem [shape: f32[1,32], index: 2, kind: input, shape index: {}]   ;;  %s17817_s3 = inlined_call_operand.vmem [shape: bf16[5,160,32], index: 3, kind: input, shape index: {}]   ;;  %s17818_s4 = inlined_call_operand.vmem [shape: f32[1,32], index: 4, kind: input, shape index: {}]   ;;  %s17819_s5 = inlined_call_operand.vmem [shape: bf16[5,160,64], index: 5, kind: input, shape index: {}]   ;;  %s17820_s6 = inlined_call_operand.vmem [shape: f32[1,64], index: 6, kind: input, shape index: {}]   ;;  %s17821_s7 = inlined_call_operand.vmem [shape: bf16[16,64,64], index: 7, kind: input, shape index: {}]   ;;  %s17822_s8 = inlined_call_operand.vmem [shape: f32[1,64], index: 8, kind: input, shape index: {}]   ;;  %s17823_s9 = inlined_call_operand.vmem [shape: bf16[64,128], index: 9, kind: input, shape index: {}]   ;;  %s17824_s10 = inlined_call_operand.vmem [shape: f32[1,128], index: 10, kind: input, shape index: {}]   ;;  %s17825_s11 = inlined_call_operand.hbm [shape: f32[2,1,128], index: 11, kind: output, shape index: {}]  }
   0x1   :  { %17846 = sst [smem:[#allocation18_spill]] %s17814_s0 }
   0x2   :  { %16 = vsyncpa [#allocation10], 0 }
   0x3   :  { %18 = vsyncpa [#allocation10 + $0x1], 0  ;;  %s12452_s17 = smov 0   ;;  %s12454_s18 = smov 0  }
   0x4   :  { %s12456_s19 = smov 0   ;;  %s12458_s20 = smov 0  }
   0x5 LB: > { %s12473_s21 = sadd.s32 4294967295, %s12367_s20   ;;  %s10360_s22 = sadd.s32 4294967294, %s12367_s20   ;;  %s12367_s20 = sphi %s12458_s20, %s17876_s20   ;;  %s12363_s19 = sphi %s12456_s19, %s17875_s19   ;;  %s12359_s18 = sphi %s12454_s18, %s17874_s18   ;;  %s12355_s17 = sphi %s12452_s17, %s17873_s17  }
   0x6   : > { %s12477_s23 = sadd.s32 1, %s12367_s20   ;;  %s267_s24 = sadd.s32 1, %s12363_s19 }
   0x7   : > { %s264_s25 = ssub.s32 %s12367_s20, %s12477_s23  ;;  %p277_p0 = scmp.ne.s32.totalorder %s12363_s19, %s12359_s18 }
   0x8   : > { %p265_p1 = scmp.eq.s32.totalorder %s264_s25, 0  ;;  %p278_p2 = scmp.eq.s32.totalorder %s12473_s21, 1 }
   0x9   : > { %p283_p3 = scmp.ne.s32.totalorder %s12359_s18, %s12355_s17  ;;  %p284_p4 = scmp.eq.s32.totalorder %s10360_s22, 1 }
   0xa   : > { %s12488_s26 = scalar_select %p265_p1, %s12363_s19, %s267_s24  }
   0xb   : > { %p12490_p5 = por %p278_p2, %p277_p0  ;;  %p12494_p6 = por %p284_p4, %p283_p3 }
   0xc   : > { %p10363_p7 = scmp.ge.s32.totalorder %s12367_s20, 1  ;;  %p340_p8 = scmp.lt.s32.totalorder %s12367_s20, 3 }
   0xe   : > { %p341_p9 = pnand %p10363_p7, %p340_p8 }
   0xf   : > { %p379_p10 = scmp.lt.s32.totalorder (!%p341_p9), %s12473_s21, 1  ;;  %s17849_s0 = sld [smem:[#allocation18_spill]] (!%p341_p9) }
  0x10   : > { %344 = sbr.rel (%p341_p9) target bundleno = 3686 (0xe66), region = 64  ;;  %s12381_s15 = smov (!%p341_p9), 8  }
  0x11   : > { %s12382_s16 = smov (!%p341_p9), 16   ;;  %s12383_s22 = smov (!%p341_p9), 24  }
  0x12   : > { %s12384_s24 = smov (!%p341_p9), 32   ;;  %s17826_s25 = sand.u32 (!%p341_p9), 1, %s12359_s18  }
  0x15   : > { %s380_s29 = scalar_select %p379_p10, %s12473_s21, 1  ;;  %vm607_vm0 = vcmask 64512   ;;  %vm612_vm1 = vcmask 60416   ;;  %vm1570_vm2 = vcmask 130112   ;;  %vm1575_vm3 = vcmask 126016  }
  0x16   : > { %vm2533_vm4 = vcmask 195712   ;;  %vm2538_vm5 = vcmask 191616   ;;  %vm3496_vm6 = vcmask 261312   ;;  %vm3501_vm7 = vcmask 257216  }
  0x17   : > { %s12038_s30 = smul.u32 1440, %s380_s29  ;;  %vm4459_vm8 = vcmask 326912   ;;  %vm4464_vm9 = vcmask 322816   ;;  %vm385_vm10 = vcmask 261120   ;;  %vm388_vm11 = vcmask 257024   ;;  %s15220_s29 = scalar_lea.vmem [#allocation9], %s17826_s25 }
  0x19   : > { %s12505_s14 = scalar_lea.vmem %s17849_s0, %s12038_s30  ;;  %s15222_s30 = smov 0  }
  0x1a   : > { %v10367_v0 = vld [vmem:[%s12505_s14 + $0x38] sm:$0xff]  ;;  %v10365_v1 = vld [vmem:[%s12505_s14 + $0x28] sm:$0xff]  ;;  %v10368_v2 = vld [vmem:[%s12505_s14 + $0x40] sm:$0xff] }
  0x1b   : > { %1094 = vrot.lane.b32.xlu1 %v10367_v0, %s12381_s15  ;;  %1090 = vrot.lane.b32.xlu0 %v10365_v1, %s12381_s15  ;;  %v10366_v3 = vld [vmem:[%s12505_s14 + $0x30] sm:$0xff]  ;;  %614 = vst.msk [vmem:[#allocation2 + $0x28] sm:$0xff] %vm607_vm0, %v10365_v1  ;;  %616 = vst.msk [vmem:[#allocation2 + $0x38] sm:$0xff] %vm607_vm0, %v10367_v0  ;;  %v10372_v5 = vld [vmem:[%s12505_s14 + $0x60] sm:$0xff] }
  0x1c   : > { %v10370_v4 = vld [vmem:[%s12505_s14 + $0x50] sm:$0xff]  ;;  %617 = vst.msk [vmem:[#allocation2 + $0x40] sm:$0xff] %vm607_vm0, %v10368_v2  ;;  %v10371_v6 = vld [vmem:[%s12505_s14 + $0x58] sm:$0xff]  ;;  %615 = vst.msk [vmem:[#allocation2 + $0x30] sm:$0xff] %vm607_vm0, %v10366_v3 }
  0x1d   : > { %619 = vst.msk [vmem:[#allocation2 + $0x50] sm:$0xff] %vm607_vm0, %v10370_v4  ;;  %v12522_v7 = vld [vmem:[%s12505_s14 + $0x68] sm:$0xff]  ;;  %v12525_v8 = vld [vmem:[%s12505_s14 + $0x80] sm:$0xff]  ;;  %620 = vst.msk [vmem:[#allocation2 + $0x58] sm:$0xff] %vm607_vm0, %v10371_v6 }
  0x1e   : > { %621 = vst.msk [vmem:[#allocation2 + $0x60] sm:$0xff] %vm607_vm0, %v10372_v5  ;;  %v12530_v9 = vld [vmem:[%s12505_s14 + $0x78] sm:$0xff]  ;;  %v12533_v10 = vld [vmem:[%s12505_s14 + $0x90] sm:$0xff]  ;;  %v12536_v11 = vld [vmem:[%s12505_s14 + $0x88] sm:$0xff] }
  0x1f   : > { %622 = vst.msk [vmem:[#allocation2 + $0x68] sm:$0xff] %vm607_vm0, %v12522_v7  ;;  %625 = vst.msk [vmem:[#allocation2 + $0x80] sm:$0xff] %vm607_vm0, %v12525_v8  ;;  %1096 = vrot.lane.b32.xlu1 %v10368_v2, %s12381_s15  ;;  %1092 = vrot.lane.b32.xlu0 %v10366_v3, %s12381_s15  ;;  %v12545_v12 = vld [vmem:[%s12505_s14 + $0xa0] sm:$0xff]  ;;  %v10369_v13 = vld [vmem:[%s12505_s14 + $0x48] sm:$0xf] }
  0x20   : > { %624 = vst.msk [vmem:[#allocation2 + $0x78] sm:$0xff] %vm607_vm0, %v12530_v9  ;;  %626 = vst.msk [vmem:[#allocation2 + $0x88] sm:$0xff] %vm607_vm0, %v12536_v11  ;;  %v12555_v14 = vld [vmem:[%s12505_s14 + $0xb0] sm:$0xff]  ;;  %v12558_v15 = vld [vmem:[%s12505_s14 + $0xa8] sm:$0xff] }
  0x21   : > { %627 = vst.msk [vmem:[#allocation2 + $0x90] sm:$0xff] %vm607_vm0, %v12533_v10  ;;  %629 = vst.msk [vmem:[#allocation2 + $0xa0] sm:$0xff] %vm607_vm0, %v12545_v12  ;;  %v12563_v16 = vld [vmem:[%s12505_s14 + $0xb8] sm:$0xff]  ;;  %v12566_v17 = vld [vmem:[%s12505_s14 + $0xd0] sm:$0xff] }
  0x22   : > { %v12569_v18 = vld [vmem:[%s12505_s14 + $0xc8] sm:$0xff]  ;;  %630 = vst.msk [vmem:[#allocation2 + $0xa8] sm:$0xff] %vm607_vm0, %v12558_v15  ;;  %631 = vst.msk [vmem:[#allocation2 + $0xb0] sm:$0xff] %vm607_vm0, %v12555_v14  ;;  %v12576_v19 = vld [vmem:[%s12505_s14 + $0xe0] sm:$0xff] }
  0x23   : > { %v12579_v20 = vld [vmem:[%s12505_s14 + $0xd8] sm:$0xff]  ;;  %v12582_v21 = vld [vmem:[%s12505_s14 + $0xf0] sm:$0xff]  ;;  %632 = vst.msk [vmem:[#allocation2 + $0xb8] sm:$0xff] %vm607_vm0, %v12563_v16  ;;  %634 = vst.msk [vmem:[#allocation2 + $0xc8] sm:$0xff] %vm607_vm0, %v12569_v18  ;;  %1100 = vrot.lane.b32.xlu1 %v10370_v4, %s12381_s15  ;;  %1098 = vrot.lane.b32.xlu0 %v10369_v13, %s12381_s15 }
  0x24   : > { %635 = vst.msk [vmem:[#allocation2 + $0xd0] sm:$0xff] %vm607_vm0, %v12566_v17  ;;  %v12593_v22 = vld [vmem:[%s12505_s14 + $0x100] sm:$0xff]  ;;  %636 = vst.msk [vmem:[#allocation2 + $0xd8] sm:$0xff] %vm607_vm0, %v12579_v20  ;;  %v12602_v23 = vld [vmem:[%s12505_s14 + $0xf8] sm:$0xff] }
  0x25   : > { %637 = vst.msk [vmem:[#allocation2 + $0xe0] sm:$0xff] %vm607_vm0, %v12576_v19  ;;  %639 = vst.msk [vmem:[#allocation2 + $0xf0] sm:$0xff] %vm607_vm0, %v12582_v21  ;;  %v12605_v24 = vld [vmem:[%s12505_s14 + $0x108] sm:$0xff]  ;;  %v12610_v25 = vld [vmem:[%s12505_s14 + $0x120] sm:$0xff] }
  0x26   : > { %641 = vst.msk [vmem:[#allocation2 + $0x100] sm:$0xff] %vm607_vm0, %v12593_v22  ;;  %v12613_v26 = vld [vmem:[%s12505_s14 + $0x118] sm:$0xff]  ;;  %v12616_v27 = vld [vmem:[%s12505_s14 + $0x130] sm:$0xff]  ;;  %640 = vst.msk [vmem:[#allocation2 + $0xf8] sm:$0xff] %vm607_vm0, %v12602_v23 }
  0x27   : > { %642 = vst.msk [vmem:[#allocation2 + $0x108] sm:$0xff] %vm607_vm0, %v12605_v24  ;;  %v12623_v28 = vld [vmem:[%s12505_s14 + $0x128] sm:$0xff]  ;;  %v12626_v29 = vld [vmem:[%s12505_s14 + $0x140] sm:$0xff]  ;;  %644 = vst.msk [vmem:[#allocation2 + $0x118] sm:$0xff] %vm607_vm0, %v12613_v26  ;;  %1104 = vrot.lane.b32.xlu1 %v10372_v5, %s12381_s15  ;;  %1102 = vrot.lane.b32.xlu0 %v10371_v6, %s12381_s15 }
  0x28   : > { %645 = vst.msk [vmem:[#allocation2 + $0x120] sm:$0xff] %vm607_vm0, %v12610_v25  ;;  %647 = vst.msk [vmem:[#allocation2 + $0x130] sm:$0xff] %vm607_vm0, %v12616_v27  ;;  %v12637_v30 = vld [vmem:[%s12505_s14 + $0x150] sm:$0xff]  ;;  %v12640_v31 = vld [vmem:[%s12505_s14 + $0x148] sm:$0xff] }
  0x29   : > { %646 = vst.msk [vmem:[#allocation2 + $0x128] sm:$0xff] %vm607_vm0, %v12623_v28  ;;  %649 = vst.msk [vmem:[#allocation2 + $0x140] sm:$0xff] %vm607_vm0, %v12626_v29  ;;  %v10374_v32 = vld [vmem:[%s12505_s14 + $0x70] sm:$0xf]  ;;  %v12648_v33 = vld [vmem:[%s12505_s14 + $0x158] sm:$0xff] }
  0x2a   : > { %v12651_v34 = vld [vmem:[%s12505_s14 + $0x170] sm:$0xff]  ;;  %650 = vst.msk [vmem:[#allocation2 + $0x148] sm:$0xff] %vm607_vm0, %v12640_v31  ;;  %651 = vst.msk [vmem:[#allocation2 + $0x150] sm:$0xff] %vm607_vm0, %v12637_v30  ;;  %v12658_v35 = vld [vmem:[%s12505_s14 + $0x168] sm:$0xff] }
  0x2b   : > { %v12661_v36 = vld [vmem:[%s12505_s14 + $0x180] sm:$0xff]  ;;  %v12664_v37 = vld [vmem:[%s12505_s14 + $0x178] sm:$0xff]  ;;  %652 = vst.msk [vmem:[#allocation2 + $0x158] sm:$0xff] %vm607_vm0, %v12648_v33  ;;  %655 = vst.msk [vmem:[#allocation2 + $0x170] sm:$0xff] %vm607_vm0, %v12651_v34  ;;  %1108 = vrot.lane.b32.xlu1 %v10374_v32, %s12381_s15  ;;  %1106 = vrot.lane.b32.xlu0 %v12522_v7, %s12381_s15 }
  0x2c   : > { %v12671_v38 = vld [vmem:[%s12505_s14 + $0x190] sm:$0xff]  ;;  %v12674_v39 = vld [vmem:[%s12505_s14 + $0x1a0] sm:$0xff]  ;;  %654 = vst.msk [vmem:[#allocation2 + $0x168] sm:$0xff] %vm607_vm0, %v12658_v35  ;;  %656 = vst.msk [vmem:[#allocation2 + $0x178] sm:$0xff] %vm607_vm0, %v12664_v37 }
  0x2d   : > { %657 = vst.msk [vmem:[#allocation2 + $0x180] sm:$0xff] %vm607_vm0, %v12661_v36  ;;  %v12686_v40 = vld [vmem:[%s12505_s14 + $0x198] sm:$0xff]  ;;  %659 = vst.msk [vmem:[#allocation2 + $0x190] sm:$0xff] %vm607_vm0, %v12671_v38  ;;  %v12693_v41 = vld [vmem:[%s12505_s14 + $0x1a8] sm:$0xff] }
  0x2e   : > { %661 = vst.msk [vmem:[#allocation2 + $0x1a0] sm:$0xff] %vm607_vm0, %v12674_v39  ;;  %v12696_v42 = vld [vmem:[%s12505_s14 + $0x1c0] sm:$0xff]  ;;  %v12699_v43 = vld [vmem:[%s12505_s14 + $0x1b8] sm:$0xff]  ;;  %660 = vst.msk [vmem:[#allocation2 + $0x198] sm:$0xff] %vm607_vm0, %v12686_v40 }
  0x2f   : > { %v12704_v44 = vld [vmem:[%s12505_s14 + $0x1d0] sm:$0xff]  ;;  %v12707_v45 = vld [vmem:[%s12505_s14 + $0x1c8] sm:$0xff]  ;;  %v12710_v46 = vld [vmem:[%s12505_s14 + $0x1e0] sm:$0xff]  ;;  %662 = vst.msk [vmem:[#allocation2 + $0x1a8] sm:$0xff] %vm607_vm0, %v12693_v41  ;;  %1112 = vrot.lane.b32.xlu1 %v12525_v8, %s12381_s15 }
  0x30   : > { %664 = vst.msk [vmem:[#allocation2 + $0x1b8] sm:$0xff] %vm607_vm0, %v12699_v43  ;;  %665 = vst.msk [vmem:[#allocation2 + $0x1c0] sm:$0xff] %vm607_vm0, %v12696_v42  ;;  %v12719_v47 = vld [vmem:[%s12505_s14 + $0x1f0] sm:$0xff]  ;;  %v12722_v48 = vld [vmem:[%s12505_s14 + $0x1e8] sm:$0xff]  ;;  %1110 = vrot.lane.b32.xlu0 %v12530_v9, %s12381_s15 }
  0x31   : > { %666 = vst.msk [vmem:[#allocation2 + $0x1c8] sm:$0xff] %vm607_vm0, %v12707_v45  ;;  %667 = vst.msk [vmem:[#allocation2 + $0x1d0] sm:$0xff] %vm607_vm0, %v12704_v44  ;;  %v449_v49 = vld [vmem:[%s12505_s14 + $0x10] sm:$0xff]  ;;  %v447_v50 = vld [vmem:[%s12505_s14] sm:$0xff] }
  0x32   : > { %669 = vst.msk [vmem:[#allocation2 + $0x1e0] sm:$0xff] %vm607_vm0, %v12710_v46  ;;  %670 = vst.msk [vmem:[#allocation2 + $0x1e8] sm:$0xff] %vm607_vm0, %v12722_v48  ;;  %v12743_v51 = vld [vmem:[%s12505_s14 + $0x1f8] sm:$0xff]  ;;  %v448_v53 = vld [vmem:[%s12505_s14 + $0x8] sm:$0xff] }
  0x33   : > { %671 = vst.msk [vmem:[#allocation2 + $0x1f0] sm:$0xff] %vm607_vm0, %v12719_v47  ;;  %610 = vst.msk [vmem:[#allocation2 + $0x10] sm:$0xff] %vm607_vm0, %v449_v49  ;;  %v450_v52 = vld [vmem:[%s12505_s14 + $0x18] sm:$0xff]  ;;  %v12749_v54 = vld [vmem:[%s12505_s14 + $0x210] sm:$0xff]  ;;  %1116 = vrot.lane.b32.xlu1 %v12533_v10, %s12381_s15 }
  0x34   : > { %608 = vst.msk [vmem:[#allocation2] sm:$0xff] %vm607_vm0, %v447_v50  ;;  %611 = vst.msk [vmem:[#allocation2 + $0x18] sm:$0xff] %vm607_vm0, %v450_v52  ;;  %v12752_v55 = vld [vmem:[%s12505_s14 + $0x208] sm:$0xff]  ;;  %v451_v56 = vld [vmem:[%s12505_s14 + $0x20] sm:$0xf]  ;;  %1114 = vrot.lane.b32.xlu0 %v12536_v11, %s12381_s15 }
  0x35   : > { %672 = vst.msk [vmem:[#allocation2 + $0x1f8] sm:$0xff] %vm607_vm0, %v12743_v51  ;;  %609 = vst.msk [vmem:[#allocation2 + $0x8] sm:$0xff] %vm607_vm0, %v448_v53  ;;  %v12759_v57 = vld [vmem:[%s12505_s14 + $0x220] sm:$0xff]  ;;  %v12762_v58 = vld [vmem:[%s12505_s14 + $0x218] sm:$0xff] }
  0x36   : > { %674 = vst.msk [vmem:[#allocation2 + $0x208] sm:$0xff] %vm607_vm0, %v12752_v55  ;;  %675 = vst.msk [vmem:[#allocation2 + $0x210] sm:$0xff] %vm607_vm0, %v12749_v54  ;;  %v10379_v59 = vld [vmem:[%s12505_s14 + $0x98] sm:$0xf]  ;;  %v12775_v60 = vld [vmem:[%s12505_s14 + $0x230] sm:$0xff] }
  0x37   : > { %613 = vst.msk [vmem:[#allocation2 + $0x20] sm:$0xf] %vm612_vm1, %v451_v56  ;;  %v456_v61 = vld [vmem:[%s12505_s14 + $0x48] sm:$0xf]  ;;  %v12783_v62 = vld [vmem:[%s12505_s14 + $0x240] sm:$0xff]  ;;  %v12786_v63 = vld [vmem:[%s12505_s14 + $0x238] sm:$0xff]  ;;  %1120 = vrot.lane.b32.xlu1 %v12545_v12, %s12381_s15 }
  0x38   : > { %676 = vst.msk [vmem:[#allocation2 + $0x218] sm:$0xff] %vm607_vm0, %v12762_v58  ;;  %677 = vst.msk [vmem:[#allocation2 + $0x220] sm:$0xff] %vm607_vm0, %v12759_v57  ;;  %v12792_v0 = vld [vmem:[%s12505_s14 + $0x248] sm:$0xff]  ;;  %v12795_v1 = vld [vmem:[%s12505_s14 + $0x260] sm:$0xff]  ;;  %1118 = vrot.lane.b32.xlu0 %v10379_v59, %s12381_s15 }
  0x39   : > { %679 = vst.msk [vmem:[#allocation2 + $0x230] sm:$0xff] %vm607_vm0, %v12775_v60  ;;  %680 = vst.msk [vmem:[#allocation2 + $0x238] sm:$0xff] %vm607_vm0, %v12786_v63  ;;  %v12802_v2 = vld [vmem:[%s12505_s14 + $0x258] sm:$0xff]  ;;  %v461_v3 = vld [vmem:[%s12505_s14 + $0x70] sm:$0xf] }
  0x3a   : > { %618 = vst.msk [vmem:[#allocation2 + $0x48] sm:$0xf] %vm612_vm1, %v456_v61  ;;  %v12806_v4 = vld [vmem:[%s12505_s14 + $0x270] sm:$0xff]  ;;  %623 = vst.msk [vmem:[#allocation2 + $0x70] sm:$0xf] %vm612_vm1, %v461_v3  ;;  %v12817_v5 = vld [vmem:[%s12505_s14 + $0x268] sm:$0xff] }
  0x3b   : > { %681 = vst.msk [vmem:[#allocation2 + $0x240] sm:$0xff] %vm607_vm0, %v12783_v62  ;;  %682 = vst.msk [vmem:[#allocation2 + $0x248] sm:$0xff] %vm607_vm0, %v12792_v0  ;;  %v12820_v6 = vld [vmem:[%s12505_s14 + $0x280] sm:$0xff]  ;;  %v466_v7 = vld [vmem:[%s12505_s14 + $0x98] sm:$0xf]  ;;  %1124 = vrot.lane.b32.xlu1 %v12555_v14, %s12381_s15 }
  0x3c   : > { %685 = vst.msk [vmem:[#allocation2 + $0x260] sm:$0xff] %vm607_vm0, %v12795_v1  ;;  %684 = vst.msk [vmem:[#allocation2 + $0x258] sm:$0xff] %vm607_vm0, %v12802_v2  ;;  %v12828_v8 = vld [vmem:[%s12505_s14 + $0x290] sm:$0xff]  ;;  %v12836_v9 = vld [vmem:[%s12505_s14 + $0x288] sm:$0xff]  ;;  %1122 = vrot.lane.b32.xlu0 %v12558_v15, %s12381_s15 }
  0x3d   : > { %687 = vst.msk [vmem:[#allocation2 + $0x270] sm:$0xff] %vm607_vm0, %v12806_v4  ;;  %686 = vst.msk [vmem:[#allocation2 + $0x268] sm:$0xff] %vm607_vm0, %v12817_v5  ;;  %v12839_v10 = vld [vmem:[%s12505_s14 + $0x298] sm:$0xff]  ;;  %v12844_v11 = vld [vmem:[%s12505_s14 + $0x2b0] sm:$0xff] }
  0x3e   : > { %689 = vst.msk [vmem:[#allocation2 + $0x280] sm:$0xff] %vm607_vm0, %v12820_v6  ;;  %691 = vst.msk [vmem:[#allocation2 + $0x290] sm:$0xff] %vm607_vm0, %v12828_v8  ;;  %v12847_v12 = vld [vmem:[%s12505_s14 + $0x2a8] sm:$0xff]  ;;  %v10384_v13 = vld [vmem:[%s12505_s14 + $0xc0] sm:$0xf] }
  0x3f   : > { %628 = vst.msk [vmem:[#allocation2 + $0x98] sm:$0xf] %vm612_vm1, %v466_v7  ;;  %v471_v32 = vld [vmem:[%s12505_s14 + $0xc0] sm:$0xf]  ;;  %v12868_v50 = vld [vmem:[%s12505_s14 + $0x2b8] sm:$0xff]  ;;  %1128 = vrot.lane.b32.xlu1 %v10384_v13, %s12381_s15  ;;  %v12878_v14 = vld [vmem:[%s12505_s14 + $0x2d0] sm:$0xff] }
  0x40   : > { %690 = vst.msk [vmem:[#allocation2 + $0x288] sm:$0xff] %vm607_vm0, %v12836_v9  ;;  %692 = vst.msk [vmem:[#allocation2 + $0x298] sm:$0xff] %vm607_vm0, %v12839_v10  ;;  %v12865_v49 = vld [vmem:[%s12505_s14 + $0x2c0] sm:$0xff]  ;;  %1126 = vrot.lane.b32.xlu0 %v12563_v16, %s12381_s15  ;;  %v476_v15 = vld [vmem:[%s12505_s14 + $0xe8] sm:$0xf] }
  0x41   : > { %694 = vst.msk [vmem:[#allocation2 + $0x2a8] sm:$0xff] %vm607_vm0, %v12847_v12  ;;  %695 = vst.msk [vmem:[#allocation2 + $0x2b0] sm:$0xff] %vm607_vm0, %v12844_v11  ;;  %v12889_v16 = vld [vmem:[%s12505_s14 + $0x2e0] sm:$0xff]  ;;  %v12892_v52 = vld [vmem:[%s12505_s14 + $0x2d8] sm:$0xff] }
  0x42   : > { %633 = vst.msk [vmem:[#allocation2 + $0xc0] sm:$0xf] %vm612_vm1, %v471_v32  ;;  %638 = vst.msk [vmem:[#allocation2 + $0xe8] sm:$0xf] %vm612_vm1, %v476_v15  ;;  %v481_v53 = vld [vmem:[%s12505_s14 + $0x110] sm:$0xf] }
  0x43   : > { %696 = vst.msk [vmem:[#allocation2 + $0x2b8] sm:$0xff] %vm607_vm0, %v12868_v50  ;;  %697 = vst.msk [vmem:[#allocation2 + $0x2c0] sm:$0xff] %vm607_vm0, %v12865_v49  ;;  %1132 = vrot.lane.b32.xlu1 %v12566_v17, %s12381_s15  ;;  %v10389_v17 = vld [vmem:[%s12505_s14 + $0xe8] sm:$0xf]  ;;  %v12929_v56 = vld [vmem:[%s12505_s14 + $0x310] sm:$0xff] }
  0x44   : > { %1130 = vrot.lane.b32.xlu0 %v12569_v18, %s12381_s15  ;;  %699 = vst.msk [vmem:[#allocation2 + $0x2d0] sm:$0xff] %vm607_vm0, %v12878_v14  ;;  %700 = vst.msk [vmem:[#allocation2 + $0x2d8] sm:$0xff] %vm607_vm0, %v12892_v52  ;;  %v12904_v18 = vld [vmem:[%s12505_s14 + $0x2e8] sm:$0xff]  ;;  %v491_v3 = vld [vmem:[%s12505_s14 + $0x160] sm:$0xf] }
  0x45   : > { %701 = vst.msk [vmem:[#allocation2 + $0x2e0] sm:$0xff] %vm607_vm0, %v12889_v16  ;;  %702 = vst.msk [vmem:[#allocation2 + $0x2e8] sm:$0xff] %vm607_vm0, %v12904_v18  ;;  %v12932_v59 = vld [vmem:[%s12505_s14 + $0x308] sm:$0xff]  ;;  %v12993_v7 = vld [vmem:[%s12505_s14 + $0x360] sm:$0xff] }
  0x46   : > { %643 = vst.msk [vmem:[#allocation2 + $0x110] sm:$0xf] %vm612_vm1, %v481_v53  ;;  %v12956_v61 = vld [vmem:[%s12505_s14 + $0x328] sm:$0xff]  ;;  %653 = vst.msk [vmem:[#allocation2 + $0x160] sm:$0xf] %vm612_vm1, %v491_v3  ;;  %v12996_v13 = vld [vmem:[%s12505_s14 + $0x358] sm:$0xff] }
  0x47   : > { %1136 = vrot.lane.b32.xlu1 %v12576_v19, %s12381_s15  ;;  %v12912_v19 = vld [vmem:[%s12505_s14 + $0x300] sm:$0xff]  ;;  %706 = vst.msk [vmem:[#allocation2 + $0x308] sm:$0xff] %vm607_vm0, %v12932_v59  ;;  %707 = vst.msk [vmem:[#allocation2 + $0x310] sm:$0xff] %vm607_vm0, %v12929_v56  ;;  %v13020_v32 = vld [vmem:[%s12505_s14 + $0x378] sm:$0xff] }
  0x48   : > { %1134 = vrot.lane.b32.xlu0 %v12579_v20, %s12381_s15  ;;  %v12915_v20 = vld [vmem:[%s12505_s14 + $0x2f8] sm:$0xff]  ;;  %705 = vst.msk [vmem:[#allocation2 + $0x300] sm:$0xff] %vm607_vm0, %v12912_v19  ;;  %710 = vst.msk [vmem:[#allocation2 + $0x328] sm:$0xff] %vm607_vm0, %v12956_v61  ;;  %v501_v15 = vld [vmem:[%s12505_s14 + $0x1b0] sm:$0xf] }
  0x49   : > { %704 = vst.msk [vmem:[#allocation2 + $0x2f8] sm:$0xff] %vm607_vm0, %v12915_v20  ;;  %716 = vst.msk [vmem:[#allocation2 + $0x358] sm:$0xff] %vm607_vm0, %v12996_v13  ;;  %v13084_v53 = vld [vmem:[%s12505_s14 + $0x3c8] sm:$0xff] }
  0x4a   : > { %717 = vst.msk [vmem:[#allocation2 + $0x360] sm:$0xff] %vm607_vm0, %v12993_v7  ;;  %720 = vst.msk [vmem:[#allocation2 + $0x378] sm:$0xff] %vm607_vm0, %v13020_v32 }
  0x4b   : > { %1140 = vrot.lane.b32.xlu1 %v12582_v21, %s12381_s15  ;;  %v10394_v21 = vld [vmem:[%s12505_s14 + $0x110] sm:$0xf]  ;;  %663 = vst.msk [vmem:[#allocation2 + $0x1b0] sm:$0xf] %vm612_vm1, %v501_v15 }
  0x4c   : > { %1138 = vrot.lane.b32.xlu0 %v10389_v17, %s12381_s15  ;;  %v13057_v17 = vld [vmem:[%s12505_s14 + $0x3b0] sm:$0xff]  ;;  %730 = vst.msk [vmem:[#allocation2 + $0x3c8] sm:$0xff] %vm607_vm0, %v13084_v53 }
  0x4d   : > { %727 = vst.msk [vmem:[#allocation2 + $0x3b0] sm:$0xff] %vm607_vm0, %v13057_v17 }
  0x4f   : > { %1144 = vrot.lane.b32.xlu1 %v12593_v22, %s12381_s15  ;;  %v12942_v22 = vld [vmem:[%s12505_s14 + $0x320] sm:$0xff] }
  0x50   : > { %1142 = vrot.lane.b32.xlu0 %v12602_v23, %s12381_s15  ;;  %709 = vst.msk [vmem:[#allocation2 + $0x320] sm:$0xff] %vm607_vm0, %v12942_v22  ;;  %v486_v23 = vld [vmem:[%s12505_s14 + $0x138] sm:$0xf] }
  0x51   : > { %648 = vst.msk [vmem:[#allocation2 + $0x138] sm:$0xf] %vm612_vm1, %v486_v23  ;;  %v511_v23 = vld [vmem:[%s12505_s14 + $0x200] sm:$0xf] }
  0x52   : > { %673 = vst.msk [vmem:[#allocation2 + $0x200] sm:$0xf] %vm612_vm1, %v511_v23 }
  0x53   : > { %1148 = vrot.lane.b32.xlu1 %v10394_v21, %s12381_s15  ;;  %v13060_v21 = vld [vmem:[%s12505_s14 + $0x3a8] sm:$0xff] }
  0x54   : > { %1146 = vrot.lane.b32.xlu0 %v12605_v24, %s12381_s15  ;;  %v12953_v24 = vld [vmem:[%s12505_s14 + $0x330] sm:$0xff]  ;;  %726 = vst.msk [vmem:[#allocation2 + $0x3a8] sm:$0xff] %vm607_vm0, %v13060_v21 }
  0x55   : > { %711 = vst.msk [vmem:[#allocation2 + $0x330] sm:$0xff] %vm607_vm0, %v12953_v24 }
  0x57   : > { %1152 = vrot.lane.b32.xlu1 %v12610_v25, %s12381_s15  ;;  %v10399_v25 = vld [vmem:[%s12505_s14 + $0x138] sm:$0xf] }
  0x58   : > { %1150 = vrot.lane.b32.xlu0 %v12613_v26, %s12381_s15  ;;  %v12968_v26 = vld [vmem:[%s12505_s14 + $0x338] sm:$0xff] }
  0x59   : > { %712 = vst.msk [vmem:[#allocation2 + $0x338] sm:$0xff] %vm607_vm0, %v12968_v26 }
  0x5b   : > { %1156 = vrot.lane.b32.xlu1 %v12616_v27, %s12381_s15  ;;  %v12976_v27 = vld [vmem:[%s12505_s14 + $0x350] sm:$0xff] }
  0x5c   : > { %1154 = vrot.lane.b32.xlu0 %v12623_v28, %s12381_s15  ;;  %v12979_v28 = vld [vmem:[%s12505_s14 + $0x348] sm:$0xff]  ;;  %715 = vst.msk [vmem:[#allocation2 + $0x350] sm:$0xff] %vm607_vm0, %v12976_v27 }
  0x5d   : > { %714 = vst.msk [vmem:[#allocation2 + $0x348] sm:$0xff] %vm607_vm0, %v12979_v28 }
  0x5f   : > { %1160 = vrot.lane.b32.xlu1 %v12626_v29, %s12381_s15  ;;  %v10404_v29 = vld [vmem:[%s12505_s14 + $0x160] sm:$0xf] }
  0x60   : > { %1158 = vrot.lane.b32.xlu0 %v10399_v25, %s12381_s15 }
  0x63   : > { %1164 = vrot.lane.b32.xlu1 %v12637_v30, %s12381_s15  ;;  %v13006_v30 = vld [vmem:[%s12505_s14 + $0x370] sm:$0xff] }
  0x64   : > { %1162 = vrot.lane.b32.xlu0 %v12640_v31, %s12381_s15  ;;  %719 = vst.msk [vmem:[#allocation2 + $0x370] sm:$0xff] %vm607_vm0, %v13006_v30  ;;  %v496_v31 = vld [vmem:[%s12505_s14 + $0x188] sm:$0xf] }
  0x65   : > { %658 = vst.msk [vmem:[#allocation2 + $0x188] sm:$0xf] %vm612_vm1, %v496_v31 }
  0x67   : > { %1168 = vrot.lane.b32.xlu1 %v10404_v29, %s12381_s15 }
  0x68   : > { %1166 = vrot.lane.b32.xlu0 %v12648_v33, %s12381_s15  ;;  %v13017_v33 = vld [vmem:[%s12505_s14 + $0x380] sm:$0xff] }
  0x69   : > { %721 = vst.msk [vmem:[#allocation2 + $0x380] sm:$0xff] %vm607_vm0, %v13017_v33 }
  0x6b   : > { %1172 = vrot.lane.b32.xlu1 %v12651_v34, %s12381_s15  ;;  %v10409_v34 = vld [vmem:[%s12505_s14 + $0x188] sm:$0xf] }
  0x6c   : > { %1170 = vrot.lane.b32.xlu0 %v12658_v35, %s12381_s15  ;;  %v13032_v35 = vld [vmem:[%s12505_s14 + $0x388] sm:$0xff] }
  0x6d   : > { %722 = vst.msk [vmem:[#allocation2 + $0x388] sm:$0xff] %vm607_vm0, %v13032_v35 }
  0x6f   : > { %1176 = vrot.lane.b32.xlu1 %v12661_v36, %s12381_s15  ;;  %v13040_v36 = vld [vmem:[%s12505_s14 + $0x3a0] sm:$0xff] }
  0x70   : > { %1174 = vrot.lane.b32.xlu0 %v12664_v37, %s12381_s15  ;;  %v13043_v37 = vld [vmem:[%s12505_s14 + $0x398] sm:$0xff]  ;;  %725 = vst.msk [vmem:[#allocation2 + $0x3a0] sm:$0xff] %vm607_vm0, %v13040_v36 }
  0x71   : > { %724 = vst.msk [vmem:[#allocation2 + $0x398] sm:$0xff] %vm607_vm0, %v13043_v37 }
  0x73   : > { %1180 = vrot.lane.b32.xlu1 %v12671_v38, %s12381_s15  ;;  %v10414_v38 = vld [vmem:[%s12505_s14 + $0x1b0] sm:$0xf] }
  0x74   : > { %1178 = vrot.lane.b32.xlu0 %v10409_v34, %s12381_s15  ;;  %v13138_v34 = vld [vmem:[%s12505_s14 + $0x410] sm:$0xff] }
  0x75   : > { %739 = vst.msk [vmem:[#allocation2 + $0x410] sm:$0xff] %vm607_vm0, %v13138_v34 }
  0x77   : > { %1184 = vrot.lane.b32.xlu1 %v12674_v39, %s12381_s15  ;;  %v13070_v39 = vld [vmem:[%s12505_s14 + $0x3c0] sm:$0xff] }
  0x78   : > { %1182 = vrot.lane.b32.xlu0 %v12686_v40, %s12381_s15  ;;  %729 = vst.msk [vmem:[#allocation2 + $0x3c0] sm:$0xff] %vm607_vm0, %v13070_v39  ;;  %v506_v40 = vld [vmem:[%s12505_s14 + $0x1d8] sm:$0xf] }
  0x79   : > { %668 = vst.msk [vmem:[#allocation2 + $0x1d8] sm:$0xf] %vm612_vm1, %v506_v40  ;;  %v13151_v40 = vld [vmem:[%s12505_s14 + $0x420] sm:$0xff] }
  0x7a   : > { %741 = vst.msk [vmem:[#allocation2 + $0x420] sm:$0xff] %vm607_vm0, %v13151_v40 }
  0x7b   : > { %1188 = vrot.lane.b32.xlu1 %v10414_v38, %s12381_s15 }
  0x7c   : > { %1186 = vrot.lane.b32.xlu0 %v12693_v41, %s12381_s15  ;;  %v13081_v41 = vld [vmem:[%s12505_s14 + $0x3d0] sm:$0xff] }
  0x7d   : > { %731 = vst.msk [vmem:[#allocation2 + $0x3d0] sm:$0xff] %vm607_vm0, %v13081_v41 }
  0x7f   : > { %1192 = vrot.lane.b32.xlu1 %v12696_v42, %s12381_s15  ;;  %v10419_v42 = vld [vmem:[%s12505_s14 + $0x1d8] sm:$0xf] }
  0x80   : > { %1190 = vrot.lane.b32.xlu0 %v12699_v43, %s12381_s15  ;;  %v13096_v43 = vld [vmem:[%s12505_s14 + $0x3d8] sm:$0xff] }
  0x81   : > { %732 = vst.msk [vmem:[#allocation2 + $0x3d8] sm:$0xff] %vm607_vm0, %v13096_v43 }
  0x83   : > { %1196 = vrot.lane.b32.xlu1 %v12704_v44, %s12381_s15  ;;  %v13104_v44 = vld [vmem:[%s12505_s14 + $0x3f0] sm:$0xff] }
  0x84   : > { %1194 = vrot.lane.b32.xlu0 %v12707_v45, %s12381_s15  ;;  %v13107_v45 = vld [vmem:[%s12505_s14 + $0x3e8] sm:$0xff]  ;;  %735 = vst.msk [vmem:[#allocation2 + $0x3f0] sm:$0xff] %vm607_vm0, %v13104_v44 }
  0x85   : > { %734 = vst.msk [vmem:[#allocation2 + $0x3e8] sm:$0xff] %vm607_vm0, %v13107_v45 }
  0x87   : > { %1200 = vrot.lane.b32.xlu1 %v12710_v46, %s12381_s15  ;;  %v10424_v46 = vld [vmem:[%s12505_s14 + $0x200] sm:$0xf] }
  0x88   : > { %1198 = vrot.lane.b32.xlu0 %v10419_v42, %s12381_s15 }
  0x8b   : > { %1204 = vrot.lane.b32.xlu1 %v12719_v47, %s12381_s15  ;;  %v13123_v47 = vld [vmem:[%s12505_s14 + $0x400] sm:$0xff] }
  0x8c   : > { %1202 = vrot.lane.b32.xlu0 %v12722_v48, %s12381_s15  ;;  %v13126_v48 = vld [vmem:[%s12505_s14 + $0x3f8] sm:$0xff]  ;;  %737 = vst.msk [vmem:[#allocation2 + $0x400] sm:$0xff] %vm607_vm0, %v13123_v47 }
  0x8d   : > { %v1095_v25 = vpop.permute.xlu1 %1094  ;;  %v1091_v29 = vpop.permute.xlu0 %1090  ;;  %736 = vst.msk [vmem:[#allocation2 + $0x3f8] sm:$0xff] %vm607_vm0, %v13126_v48 }
  0x8e   : > { %1573 = vst.msk [vmem:[#allocation2 + $0x10] sm:$0xff] %vm1570_vm2, %v1095_v25  ;;  %1571 = vst.msk [vmem:[#allocation2] sm:$0xff] %vm1570_vm2, %v1091_v29  ;;  %v13178_v25 = vld [vmem:[%s12505_s14 + $0x440] sm:$0xff]  ;;  %v13181_v29 = vld [vmem:[%s12505_s14 + $0x438] sm:$0xff] }
  0x8f   : > { %1208 = vrot.lane.b32.xlu1 %v10424_v46, %s12381_s15  ;;  %744 = vst.msk [vmem:[#allocation2 + $0x438] sm:$0xff] %vm607_vm0, %v13181_v29  ;;  %745 = vst.msk [vmem:[#allocation2 + $0x440] sm:$0xff] %vm607_vm0, %v13178_v25 }
  0x90   : > { %1206 = vrot.lane.b32.xlu0 %v12743_v51, %s12381_s15  ;;  %v516_v51 = vld [vmem:[%s12505_s14 + $0x228] sm:$0xf] }
  0x91   : > { %v1097_v3 = vpop.permute.xlu1 %1096  ;;  %v1093_v31 = vpop.permute.xlu0 %1092  ;;  %678 = vst.msk [vmem:[#allocation2 + $0x228] sm:$0xf] %vm612_vm1, %v516_v51 }
  0x92   : > { %1574 = vst.msk [vmem:[#allocation2 + $0x18] sm:$0xff] %vm1570_vm2, %v1097_v3  ;;  %1572 = vst.msk [vmem:[#allocation2 + $0x8] sm:$0xff] %vm1570_vm2, %v1093_v31  ;;  %v521_v3 = vld [vmem:[%s12505_s14 + $0x250] sm:$0xf] }
  0x93   : > { %1212 = vrot.lane.b32.xlu1 %v12749_v54, %s12381_s15  ;;  %v13154_v54 = vld [vmem:[%s12505_s14 + $0x418] sm:$0xff]  ;;  %683 = vst.msk [vmem:[#allocation2 + $0x250] sm:$0xf] %vm612_vm1, %v521_v3 }
  0x94   : > { %1210 = vrot.lane.b32.xlu0 %v12752_v55, %s12381_s15  ;;  %740 = vst.msk [vmem:[#allocation2 + $0x418] sm:$0xff] %vm607_vm0, %v13154_v54  ;;  %v10429_v55 = vld [vmem:[%s12505_s14 + $0x228] sm:$0xf] }
  0x95   : > { %v1101_v38 = vpop.permute.xlu1 %1100  ;;  %v1099_v15 = vpop.permute.xlu0 %1098 }
  0x96   : > { %1577 = vst.msk [vmem:[#allocation2 + $0x28] sm:$0xff] %vm1570_vm2, %v1101_v38 }
  0x97   : > { %1576 = vst.msk [vmem:[#allocation2 + $0x20] sm:$0xf] %vm1575_vm3, %v1099_v15  ;;  %1216 = vrot.lane.b32.xlu1 %v12759_v57, %s12381_s15  ;;  %v13168_v57 = vld [vmem:[%s12505_s14 + $0x428] sm:$0xff] }
  0x98   : > { %1214 = vrot.lane.b32.xlu0 %v12762_v58, %s12381_s15  ;;  %742 = vst.msk [vmem:[#allocation2 + $0x428] sm:$0xff] %vm607_vm0, %v13168_v57 }
  0x99   : > { %v1105_v42 = vpop.permute.xlu1 %1104  ;;  %v1103_v46 = vpop.permute.xlu0 %1102 }
  0x9a   : > { %1579 = vst.msk [vmem:[#allocation2 + $0x38] sm:$0xff] %vm1570_vm2, %v1105_v42  ;;  %1578 = vst.msk [vmem:[#allocation2 + $0x30] sm:$0xff] %vm1570_vm2, %v1103_v46 }
  0x9b   : > { %1220 = vrot.lane.b32.xlu1 %v12775_v60, %s12381_s15  ;;  %v10434_v60 = vld [vmem:[%s12505_s14 + $0x250] sm:$0xf] }
  0x9c   : > { %1218 = vrot.lane.b32.xlu0 %v10429_v55, %s12381_s15  ;;  %v13212_v55 = vld [vmem:[%s12505_s14 + $0x460] sm:$0xff] }
  0x9d   : > { %v1109_v58 = vpop.permute.xlu1 %1108  ;;  %v1107_v23 = vpop.permute.xlu0 %1106  ;;  %749 = vst.msk [vmem:[#allocation2 + $0x460] sm:$0xff] %vm607_vm0, %v13212_v55 }
  0x9e   : > { %1581 = vst.msk [vmem:[#allocation2 + $0x48] sm:$0xf] %vm1575_vm3, %v1109_v58  ;;  %v13225_v58 = vld [vmem:[%s12505_s14 + $0x470] sm:$0xff] }
  0x9f   : > { %1580 = vst.msk [vmem:[#allocation2 + $0x40] sm:$0xff] %vm1570_vm2, %v1107_v23  ;;  %1224 = vrot.lane.b32.xlu1 %v12783_v62, %s12381_s15  ;;  %v13197_v62 = vld [vmem:[%s12505_s14 + $0x450] sm:$0xff]  ;;  %v13228_v23 = vld [vmem:[%s12505_s14 + $0x468] sm:$0xff] }
  0xa0   : > { %1222 = vrot.lane.b32.xlu0 %v12786_v63, %s12381_s15  ;;  %v13200_v63 = vld [vmem:[%s12505_s14 + $0x448] sm:$0xff]  ;;  %747 = vst.msk [vmem:[#allocation2 + $0x450] sm:$0xff] %vm607_vm0, %v13197_v62  ;;  %750 = vst.msk [vmem:[#allocation2 + $0x468] sm:$0xff] %vm607_vm0, %v13228_v23 }
  0xa1   : > { %v1113_v31 = vpop.permute.xlu1 %1112  ;;  %746 = vst.msk [vmem:[#allocation2 + $0x448] sm:$0xff] %vm607_vm0, %v13200_v63  ;;  %751 = vst.msk [vmem:[#allocation2 + $0x470] sm:$0xff] %vm607_vm0, %v13225_v58 }
  0xa2   : > { %v1111_v51 = vpop.permute.xlu0 %1110  ;;  %1583 = vst.msk [vmem:[#allocation2 + $0x58] sm:$0xff] %vm1570_vm2, %v1113_v31  ;;  %v13252_v31 = vld [vmem:[%s12505_s14 + $0x490] sm:$0xff] }
  0xa3   : > { %1582 = vst.msk [vmem:[#allocation2 + $0x50] sm:$0xff] %vm1570_vm2, %v1111_v51  ;;  %1228 = vrot.lane.b32.xlu1 %v10434_v60, %s12381_s15  ;;  %v13255_v51 = vld [vmem:[%s12505_s14 + $0x488] sm:$0xff] }
  0xa4   : > { %1226 = vrot.lane.b32.xlu0 %v12792_v0, %s12381_s15  ;;  %v526_v0 = vld [vmem:[%s12505_s14 + $0x278] sm:$0xf]  ;;  %754 = vst.msk [vmem:[#allocation2 + $0x488] sm:$0xff] %vm607_vm0, %v13255_v51  ;;  %755 = vst.msk [vmem:[#allocation2 + $0x490] sm:$0xff] %vm607_vm0, %v13252_v31 }
  0xa5   : > { %v1117_v38 = vpop.permute.xlu1 %1116  ;;  %688 = vst.msk [vmem:[#allocation2 + $0x278] sm:$0xf] %vm612_vm1, %v526_v0 }
  0xa6   : > { %v1115_v15 = vpop.permute.xlu0 %1114  ;;  %1585 = vst.msk [vmem:[#allocation2 + $0x68] sm:$0xff] %vm1570_vm2, %v1117_v38  ;;  %v531_v38 = vld [vmem:[%s12505_s14 + $0x2a0] sm:$0xf] }
  0xa7   : > { %1584 = vst.msk [vmem:[#allocation2 + $0x60] sm:$0xff] %vm1570_vm2, %v1115_v15  ;;  %1232 = vrot.lane.b32.xlu1 %v12795_v1, %s12381_s15  ;;  %v10439_v1 = vld [vmem:[%s12505_s14 + $0x278] sm:$0xf] }
  0xa8   : > { %1230 = vrot.lane.b32.xlu0 %v12802_v2, %s12381_s15  ;;  %693 = vst.msk [vmem:[#allocation2 + $0x2a0] sm:$0xf] %vm612_vm1, %v531_v38 }
  0xa9   : > { %v1121_v42 = vpop.permute.xlu1 %1120 }
  0xaa   : > { %v1119_v46 = vpop.permute.xlu0 %1118  ;;  %1587 = vst.msk [vmem:[#allocation2 + $0x78] sm:$0xff] %vm1570_vm2, %v1121_v42 }
  0xab   : > { %1586 = vst.msk [vmem:[#allocation2 + $0x70] sm:$0xf] %vm1575_vm3, %v1119_v46  ;;  %1236 = vrot.lane.b32.xlu1 %v12806_v4, %s12381_s15  ;;  %v13242_v4 = vld [vmem:[%s12505_s14 + $0x478] sm:$0xff] }
  0xac   : > { %1234 = vrot.lane.b32.xlu0 %v12817_v5, %s12381_s15  ;;  %752 = vst.msk [vmem:[#allocation2 + $0x478] sm:$0xff] %vm607_vm0, %v13242_v4 }
  0xad   : > { %v1125_v2 = vpop.permute.xlu1 %1124 }
  0xae   : > { %v1123_v60 = vpop.permute.xlu0 %1122  ;;  %1589 = vst.msk [vmem:[#allocation2 + $0x88] sm:$0xff] %vm1570_vm2, %v1125_v2 }
  0xaf   : > { %1588 = vst.msk [vmem:[#allocation2 + $0x80] sm:$0xff] %vm1570_vm2, %v1123_v60  ;;  %1240 = vrot.lane.b32.xlu1 %v12820_v6, %s12381_s15  ;;  %v10444_v6 = vld [vmem:[%s12505_s14 + $0x2a0] sm:$0xf] }
  0xb0   : > { %1238 = vrot.lane.b32.xlu0 %v10439_v1, %s12381_s15  ;;  %v13286_v1 = vld [vmem:[%s12505_s14 + $0x4b0] sm:$0xff] }
  0xb1   : > { %v1129_v5 = vpop.permute.xlu1 %1128  ;;  %759 = vst.msk [vmem:[#allocation2 + $0x4b0] sm:$0xff] %vm607_vm0, %v13286_v1 }
  0xb2   : > { %v1127_v3 = vpop.permute.xlu0 %1126  ;;  %1591 = vst.msk [vmem:[#allocation2 + $0x98] sm:$0xf] %vm1575_vm3, %v1129_v5  ;;  %v13299_v5 = vld [vmem:[%s12505_s14 + $0x4c0] sm:$0xff] }
  0xb3   : > { %1590 = vst.msk [vmem:[#allocation2 + $0x90] sm:$0xff] %vm1570_vm2, %v1127_v3  ;;  %1244 = vrot.lane.b32.xlu1 %v12828_v8, %s12381_s15  ;;  %v13271_v8 = vld [vmem:[%s12505_s14 + $0x4a0] sm:$0xff]  ;;  %v13302_v3 = vld [vmem:[%s12505_s14 + $0x4b8] sm:$0xff] }
  0xb4   : > { %1242 = vrot.lane.b32.xlu0 %v12836_v9, %s12381_s15  ;;  %v13274_v9 = vld [vmem:[%s12505_s14 + $0x498] sm:$0xff]  ;;  %757 = vst.msk [vmem:[#allocation2 + $0x4a0] sm:$0xff] %vm607_vm0, %v13271_v8  ;;  %760 = vst.msk [vmem:[#allocation2 + $0x4b8] sm:$0xff] %vm607_vm0, %v13302_v3 }
  0xb5   : > { %v1133_v15 = vpop.permute.xlu1 %1132  ;;  %756 = vst.msk [vmem:[#allocation2 + $0x498] sm:$0xff] %vm607_vm0, %v13274_v9  ;;  %761 = vst.msk [vmem:[#allocation2 + $0x4c0] sm:$0xff] %vm607_vm0, %v13299_v5 }
  0xb6   : > { %v1131_v0 = vpop.permute.xlu0 %1130  ;;  %1593 = vst.msk [vmem:[#allocation2 + $0xa8] sm:$0xff] %vm1570_vm2, %v1133_v15  ;;  %v13326_v15 = vld [vmem:[%s12505_s14 + $0x4e0] sm:$0xff] }
  0xb7   : > { %1592 = vst.msk [vmem:[#allocation2 + $0xa0] sm:$0xff] %vm1570_vm2, %v1131_v0  ;;  %1248 = vrot.lane.b32.xlu1 %v10444_v6, %s12381_s15  ;;  %v13329_v0 = vld [vmem:[%s12505_s14 + $0x4d8] sm:$0xff] }
  0xb8   : > { %1246 = vrot.lane.b32.xlu0 %v12839_v10, %s12381_s15  ;;  %v536_v10 = vld [vmem:[%s12505_s14 + $0x2c8] sm:$0xf]  ;;  %764 = vst.msk [vmem:[#allocation2 + $0x4d8] sm:$0xff] %vm607_vm0, %v13329_v0  ;;  %765 = vst.msk [vmem:[#allocation2 + $0x4e0] sm:$0xff] %vm607_vm0, %v13326_v15 }
  0xb9   : > { %v1137_v42 = vpop.permute.xlu1 %1136  ;;  %698 = vst.msk [vmem:[#allocation2 + $0x2c8] sm:$0xf] %vm612_vm1, %v536_v10 }
  0xba   : > { %v1135_v46 = vpop.permute.xlu0 %1134  ;;  %1595 = vst.msk [vmem:[#allocation2 + $0xb8] sm:$0xff] %vm1570_vm2, %v1137_v42  ;;  %v541_v42 = vld [vmem:[%s12505_s14 + $0x2f0] sm:$0xf] }
  0xbb   : > { %1594 = vst.msk [vmem:[#allocation2 + $0xb0] sm:$0xff] %vm1570_vm2, %v1135_v46  ;;  %1252 = vrot.lane.b32.xlu1 %v12844_v11, %s12381_s15  ;;  %v10449_v11 = vld [vmem:[%s12505_s14 + $0x2c8] sm:$0xf] }
  0xbc   : > { %1250 = vrot.lane.b32.xlu0 %v12847_v12, %s12381_s15  ;;  %703 = vst.msk [vmem:[#allocation2 + $0x2f0] sm:$0xf] %vm612_vm1, %v541_v42 }
  0xbd   : > { %v1141_v2 = vpop.permute.xlu1 %1140 }
  0xbe   : > { %v1139_v60 = vpop.permute.xlu0 %1138  ;;  %1597 = vst.msk [vmem:[#allocation2 + $0xc8] sm:$0xff] %vm1570_vm2, %v1141_v2 }
  0xbf   : > { %1596 = vst.msk [vmem:[#allocation2 + $0xc0] sm:$0xf] %vm1575_vm3, %v1139_v60  ;;  %1256 = vrot.lane.b32.xlu1 %v12865_v49, %s12381_s15  ;;  %v13316_v49 = vld [vmem:[%s12505_s14 + $0x4c8] sm:$0xff] }
  0xc0   : > { %1254 = vrot.lane.b32.xlu0 %v12868_v50, %s12381_s15  ;;  %762 = vst.msk [vmem:[#allocation2 + $0x4c8] sm:$0xff] %vm607_vm0, %v13316_v49 }
  0xc1   : > { %v1145_v12 = vpop.permute.xlu1 %1144 }
  0xc2   : > { %v1143_v6 = vpop.permute.xlu0 %1142  ;;  %1599 = vst.msk [vmem:[#allocation2 + $0xd8] sm:$0xff] %vm1570_vm2, %v1145_v12 }
  0xc3   : > { %1598 = vst.msk [vmem:[#allocation2 + $0xd0] sm:$0xff] %vm1570_vm2, %v1143_v6  ;;  %1260 = vrot.lane.b32.xlu1 %v12878_v14, %s12381_s15  ;;  %v10454_v14 = vld [vmem:[%s12505_s14 + $0x2f0] sm:$0xf] }
  0xc4   : > { %1258 = vrot.lane.b32.xlu0 %v10449_v11, %s12381_s15 }
  0xc5   : > { %v1149_v50 = vpop.permute.xlu1 %1148 }
  0xc6   : > { %v1147_v38 = vpop.permute.xlu0 %1146  ;;  %1601 = vst.msk [vmem:[#allocation2 + $0xe8] sm:$0xf] %vm1575_vm3, %v1149_v50 }
  0xc7   : > { %1600 = vst.msk [vmem:[#allocation2 + $0xe0] sm:$0xff] %vm1570_vm2, %v1147_v38  ;;  %1264 = vrot.lane.b32.xlu1 %v12889_v16, %s12381_s15  ;;  %v13345_v16 = vld [vmem:[%s12505_s14 + $0x4f0] sm:$0xff] }
  0xc8   : > { %1262 = vrot.lane.b32.xlu0 %v12892_v52, %s12381_s15  ;;  %v13348_v52 = vld [vmem:[%s12505_s14 + $0x4e8] sm:$0xff]  ;;  %767 = vst.msk [vmem:[#allocation2 + $0x4f0] sm:$0xff] %vm607_vm0, %v13345_v16 }
  0xc9   : > { %v1153_v46 = vpop.permute.xlu1 %1152  ;;  %766 = vst.msk [vmem:[#allocation2 + $0x4e8] sm:$0xff] %vm607_vm0, %v13348_v52 }
  0xca   : > { %v1151_v10 = vpop.permute.xlu0 %1150  ;;  %1603 = vst.msk [vmem:[#allocation2 + $0xf8] sm:$0xff] %vm1570_vm2, %v1153_v46 }
  0xcb   : > { %1602 = vst.msk [vmem:[#allocation2 + $0xf0] sm:$0xff] %vm1570_vm2, %v1151_v10  ;;  %1268 = vrot.lane.b32.xlu1 %v10454_v14, %s12381_s15 }
  0xcc   : > { %1266 = vrot.lane.b32.xlu0 %v12904_v18, %s12381_s15  ;;  %v546_v18 = vld [vmem:[%s12505_s14 + $0x318] sm:$0xf] }
  0xcd   : > { %v1157_v2 = vpop.permute.xlu1 %1156  ;;  %708 = vst.msk [vmem:[#allocation2 + $0x318] sm:$0xf] %vm612_vm1, %v546_v18 }
  0xce   : > { %v1155_v60 = vpop.permute.xlu0 %1154  ;;  %1605 = vst.msk [vmem:[#allocation2 + $0x108] sm:$0xff] %vm1570_vm2, %v1157_v2 }
  0xcf   : > { %1604 = vst.msk [vmem:[#allocation2 + $0x100] sm:$0xff] %vm1570_vm2, %v1155_v60  ;;  %1272 = vrot.lane.b32.xlu1 %v12912_v19, %s12381_s15  ;;  %v10459_v19 = vld [vmem:[%s12505_s14 + $0x318] sm:$0xf] }
  0xd0   : > { %1270 = vrot.lane.b32.xlu0 %v12915_v20, %s12381_s15 }
  0xd1   : > { %v1161_v11 = vpop.permute.xlu1 %1160 }
  0xd2   : > { %v1159_v12 = vpop.permute.xlu0 %1158  ;;  %1607 = vst.msk [vmem:[#allocation2 + $0x118] sm:$0xff] %vm1570_vm2, %v1161_v11 }
  0xd3   : > { %1606 = vst.msk [vmem:[#allocation2 + $0x110] sm:$0xf] %vm1575_vm3, %v1159_v12  ;;  %1276 = vrot.lane.b32.xlu1 %v12929_v56, %s12381_s15  ;;  %v10464_v56 = vld [vmem:[%s12505_s14 + $0x340] sm:$0xf] }
  0xd4   : > { %1274 = vrot.lane.b32.xlu0 %v12932_v59, %s12381_s15  ;;  %v551_v59 = vld [vmem:[%s12505_s14 + $0x340] sm:$0xf] }
  0xd5   : > { %v1165_v6 = vpop.permute.xlu1 %1164  ;;  %713 = vst.msk [vmem:[#allocation2 + $0x340] sm:$0xf] %vm612_vm1, %v551_v59 }
  0xd6   : > { %v1163_v20 = vpop.permute.xlu0 %1162  ;;  %1609 = vst.msk [vmem:[#allocation2 + $0x128] sm:$0xff] %vm1570_vm2, %v1165_v6 }
  0xd7   : > { %1608 = vst.msk [vmem:[#allocation2 + $0x120] sm:$0xff] %vm1570_vm2, %v1163_v20  ;;  %1280 = vrot.lane.b32.xlu1 %v12942_v22, %s12381_s15 }
  0xd8   : > { %1278 = vrot.lane.b32.xlu0 %v10459_v19, %s12381_s15 }
  0xd9   : > { %v1169_v50 = vpop.permute.xlu1 %1168 }
  0xda   : > { %v1167_v38 = vpop.permute.xlu0 %1166  ;;  %1611 = vst.msk [vmem:[#allocation2 + $0x138] sm:$0xf] %vm1575_vm3, %v1169_v50 }
  0xdb   : > { %1610 = vst.msk [vmem:[#allocation2 + $0x130] sm:$0xff] %vm1570_vm2, %v1167_v38  ;;  %1284 = vrot.lane.b32.xlu1 %v12953_v24, %s12381_s15 }
  0xdc   : > { %1282 = vrot.lane.b32.xlu0 %v12956_v61, %s12381_s15  ;;  %v556_v61 = vld [vmem:[%s12505_s14 + $0x368] sm:$0xf] }
  0xdd   : > { %v1173_v14 = vpop.permute.xlu1 %1172  ;;  %718 = vst.msk [vmem:[#allocation2 + $0x368] sm:$0xf] %vm612_vm1, %v556_v61 }
  0xde   : > { %v1171_v42 = vpop.permute.xlu0 %1170  ;;  %1613 = vst.msk [vmem:[#allocation2 + $0x148] sm:$0xff] %vm1570_vm2, %v1173_v14 }
  0xdf   : > { %1612 = vst.msk [vmem:[#allocation2 + $0x140] sm:$0xff] %vm1570_vm2, %v1171_v42  ;;  %1288 = vrot.lane.b32.xlu1 %v10464_v56, %s12381_s15 }
  0xe0   : > { %1286 = vrot.lane.b32.xlu0 %v12968_v26, %s12381_s15  ;;  %v10469_v26 = vld [vmem:[%s12505_s14 + $0x368] sm:$0xf] }
  0xe1   : > { %v1177_v22 = vpop.permute.xlu1 %1176 }
  0xe2   : > { %v1175_v24 = vpop.permute.xlu0 %1174  ;;  %1615 = vst.msk [vmem:[#allocation2 + $0x158] sm:$0xff] %vm1570_vm2, %v1177_v22 }
  0xe3   : > { %1614 = vst.msk [vmem:[#allocation2 + $0x150] sm:$0xff] %vm1570_vm2, %v1175_v24  ;;  %1292 = vrot.lane.b32.xlu1 %v12976_v27, %s12381_s15 }
  0xe4   : > { %1290 = vrot.lane.b32.xlu0 %v12979_v28, %s12381_s15 }
  0xe5   : > { %v1181_v46 = vpop.permute.xlu1 %1180 }
  0xe6   : > { %v1179_v10 = vpop.permute.xlu0 %1178  ;;  %1617 = vst.msk [vmem:[#allocation2 + $0x168] sm:$0xff] %vm1570_vm2, %v1181_v46 }
  0xe7   : > { %1616 = vst.msk [vmem:[#allocation2 + $0x160] sm:$0xf] %vm1575_vm3, %v1179_v10  ;;  %1296 = vrot.lane.b32.xlu1 %v12993_v7, %s12381_s15  ;;  %v10474_v7 = vld [vmem:[%s12505_s14 + $0x390] sm:$0xf] }
  0xe8   : > { %1294 = vrot.lane.b32.xlu0 %v12996_v13, %s12381_s15  ;;  %v561_v13 = vld [vmem:[%s12505_s14 + $0x390] sm:$0xf] }
  0xe9   : > { %v1185_v27 = vpop.permute.xlu1 %1184  ;;  %723 = vst.msk [vmem:[#allocation2 + $0x390] sm:$0xf] %vm612_vm1, %v561_v13 }
  0xea   : > { %v1183_v28 = vpop.permute.xlu0 %1182  ;;  %1619 = vst.msk [vmem:[#allocation2 + $0x178] sm:$0xff] %vm1570_vm2, %v1185_v27 }
  0xeb   : > { %1618 = vst.msk [vmem:[#allocation2 + $0x170] sm:$0xff] %vm1570_vm2, %v1183_v28  ;;  %1300 = vrot.lane.b32.xlu1 %v13006_v30, %s12381_s15 }
  0xec   : > { %1298 = vrot.lane.b32.xlu0 %v10469_v26, %s12381_s15 }
  0xed   : > { %v1189_v2 = vpop.permute.xlu1 %1188 }
  0xee   : > { %v1187_v60 = vpop.permute.xlu0 %1186  ;;  %1621 = vst.msk [vmem:[#allocation2 + $0x188] sm:$0xf] %vm1575_vm3, %v1189_v2 }
  0xef   : > { %1620 = vst.msk [vmem:[#allocation2 + $0x180] sm:$0xff] %vm1570_vm2, %v1187_v60  ;;  %1304 = vrot.lane.b32.xlu1 %v13017_v33, %s12381_s15 }
  0xf0   : > { %1302 = vrot.lane.b32.xlu0 %v13020_v32, %s12381_s15  ;;  %v566_v32 = vld [vmem:[%s12505_s14 + $0x3b8] sm:$0xf] }
  0xf1   : > { %v1193_v18 = vpop.permute.xlu1 %1192  ;;  %728 = vst.msk [vmem:[#allocation2 + $0x3b8] sm:$0xf] %vm612_vm1, %v566_v32 }
  0xf2   : > { %v1191_v11 = vpop.permute.xlu0 %1190  ;;  %1623 = vst.msk [vmem:[#allocation2 + $0x198] sm:$0xff] %vm1570_vm2, %v1193_v18 }
  0xf3   : > { %1622 = vst.msk [vmem:[#allocation2 + $0x190] sm:$0xff] %vm1570_vm2, %v1191_v11  ;;  %1308 = vrot.lane.b32.xlu1 %v10474_v7, %s12381_s15 }
  0xf4   : > { %1306 = vrot.lane.b32.xlu0 %v13032_v35, %s12381_s15  ;;  %v10479_v35 = vld [vmem:[%s12505_s14 + $0x3b8] sm:$0xf] }
  0xf5   : > { %v1197_v30 = vpop.permute.xlu1 %1196 }
  0xf6   : > { %v1195_v33 = vpop.permute.xlu0 %1194  ;;  %1625 = vst.msk [vmem:[#allocation2 + $0x1a8] sm:$0xff] %vm1570_vm2, %v1197_v30 }
  0xf7   : > { %1624 = vst.msk [vmem:[#allocation2 + $0x1a0] sm:$0xff] %vm1570_vm2, %v1195_v33  ;;  %1312 = vrot.lane.b32.xlu1 %v13040_v36, %s12381_s15 }
  0xf8   : > { %1310 = vrot.lane.b32.xlu0 %v13043_v37, %s12381_s15 }
  0xf9   : > { %v1201_v12 = vpop.permute.xlu1 %1200 }
  0xfa   : > { %v1199_v19 = vpop.permute.xlu0 %1198  ;;  %1627 = vst.msk [vmem:[#allocation2 + $0x1b8] sm:$0xff] %vm1570_vm2, %v1201_v12  ;;  %v10522_v12 = vld [vmem:[%s12505_s14 + $0x510] sm:$0xff] }
  0xfb   : > { %1626 = vst.msk [vmem:[#allocation2 + $0x1b0] sm:$0xf] %vm1575_vm3, %v1199_v19  ;;  %1316 = vrot.lane.b32.xlu1 %v13057_v17, %s12381_s15  ;;  %v10484_v17 = vld [vmem:[%s12505_s14 + $0x3e0] sm:$0xf] }
  0xfc   : > { %1314 = vrot.lane.b32.xlu0 %v13060_v21, %s12381_s15  ;;  %v571_v21 = vld [vmem:[%s12505_s14 + $0x3e0] sm:$0xf] }
  0xfd   : > { %v1205_v36 = vpop.permute.xlu1 %1204  ;;  %733 = vst.msk [vmem:[#allocation2 + $0x3e0] sm:$0xf] %vm612_vm1, %v571_v21 }
  0xfe   : > { %v1203_v37 = vpop.permute.xlu0 %1202  ;;  %1629 = vst.msk [vmem:[#allocation2 + $0x1c8] sm:$0xff] %vm1570_vm2, %v1205_v36  ;;  %v10523_v36 = vld [vmem:[%s12505_s14 + $0x518] sm:$0xff] }
  0xff   : > { %1628 = vst.msk [vmem:[#allocation2 + $0x1c0] sm:$0xff] %vm1570_vm2, %v1203_v37  ;;  %1320 = vrot.lane.b32.xlu1 %v13070_v39, %s12381_s15 }
 0x100   : > { %1318 = vrot.lane.b32.xlu0 %v10479_v35, %s12381_s15  ;;  %v10524_v35 = vld [vmem:[%s12505_s14 + $0x520] sm:$0xf] }
 0x101   : > { %v1209_v6 = vpop.permute.xlu1 %1208 }
 0x102   : > { %v1207_v20 = vpop.permute.xlu0 %1206  ;;  %1631 = vst.msk [vmem:[#allocation2 + $0x1d8] sm:$0xf] %vm1575_vm3, %v1209_v6 }
 0x103   : > { %1630 = vst.msk [vmem:[#allocation2 + $0x1d0] sm:$0xff] %vm1570_vm2, %v1207_v20  ;;  %1324 = vrot.lane.b32.xlu1 %v13081_v41, %s12381_s15  ;;  %v10526_v20 = vld [vmem:[%s12505_s14 + $0x58] sm:$0xff] }
 0x104   : > { %1322 = vrot.lane.b32.xlu0 %v13084_v53, %s12381_s15  ;;  %v576_v53 = vld [vmem:[%s12505_s14 + $0x408] sm:$0xf] }
 0x105   : > { %v1213_v50 = vpop.permute.xlu1 %1212  ;;  %738 = vst.msk [vmem:[#allocation2 + $0x408] sm:$0xf] %vm612_vm1, %v576_v53 }
 0x106   : > { %v1211_v38 = vpop.permute.xlu0 %1210  ;;  %1633 = vst.msk [vmem:[#allocation2 + $0x1e8] sm:$0xff] %vm1570_vm2, %v1213_v50 }
 0x107   : > { %1632 = vst.msk [vmem:[#allocation2 + $0x1e0] sm:$0xff] %vm1570_vm2, %v1211_v38  ;;  %1328 = vrot.lane.b32.xlu1 %v10484_v17, %s12381_s15  ;;  %v10525_v17 = vld [vmem:[%s12505_s14 + $0x50] sm:$0xff]  ;;  %v10528_v38 = vld [vmem:[%s12505_s14 + $0x68] sm:$0xff] }
 0x108   : > { %1326 = vrot.lane.b32.xlu0 %v13096_v43, %s12381_s15  ;;  %v10489_v43 = vld [vmem:[%s12505_s14 + $0x408] sm:$0xf] }
 0x109   : > { %v1217_v39 = vpop.permute.xlu1 %1216 }
 0x10a   : > { %v1215_v41 = vpop.permute.xlu0 %1214  ;;  %1635 = vst.msk [vmem:[#allocation2 + $0x1f8] sm:$0xff] %vm1570_vm2, %v1217_v39  ;;  %v10527_v39 = vld [vmem:[%s12505_s14 + $0x60] sm:$0xff] }
 0x10b   : > { %1634 = vst.msk [vmem:[#allocation2 + $0x1f0] sm:$0xff] %vm1570_vm2, %v1215_v41  ;;  %1332 = vrot.lane.b32.xlu1 %v13104_v44, %s12381_s15 }
 0x10c   : > { %1330 = vrot.lane.b32.xlu0 %v13107_v45, %s12381_s15 }
 0x10d   : > { %v1221_v56 = vpop.permute.xlu1 %1220 }
 0x10e   : > { %v1219_v59 = vpop.permute.xlu0 %1218  ;;  %1637 = vst.msk [vmem:[#allocation2 + $0x208] sm:$0xff] %vm1570_vm2, %v1221_v56  ;;  %v10530_v56 = vld [vmem:[%s12505_s14 + $0x78] sm:$0xff] }
 0x10f   : > { %1636 = vst.msk [vmem:[#allocation2 + $0x200] sm:$0xf] %vm1575_vm3, %v1219_v59  ;;  %1336 = vrot.lane.b32.xlu1 %v13123_v47, %s12381_s15  ;;  %v10494_v47 = vld [vmem:[%s12505_s14 + $0x430] sm:$0xf] }
 0x110   : > { %1334 = vrot.lane.b32.xlu0 %v13126_v48, %s12381_s15  ;;  %v581_v48 = vld [vmem:[%s12505_s14 + $0x430] sm:$0xf] }
 0x111   : > { %v1225_v44 = vpop.permute.xlu1 %1224  ;;  %743 = vst.msk [vmem:[#allocation2 + $0x430] sm:$0xf] %vm612_vm1, %v581_v48  ;;  %v10529_v59 = vld [vmem:[%s12505_s14 + $0x70] sm:$0xf]  ;;  %v10534_v48 = vld [vmem:[%s12505_s14 + $0x98] sm:$0xf] }
 0x112   : > { %v1223_v45 = vpop.permute.xlu0 %1222  ;;  %1639 = vst.msk [vmem:[#allocation2 + $0x218] sm:$0xff] %vm1570_vm2, %v1225_v44 }
 0x113   : > { %1638 = vst.msk [vmem:[#allocation2 + $0x210] sm:$0xff] %vm1570_vm2, %v1223_v45  ;;  %1340 = vrot.lane.b32.xlu1 %v13138_v34, %s12381_s15  ;;  %v10532_v45 = vld [vmem:[%s12505_s14 + $0x88] sm:$0xff] }
 0x114   : > { %1338 = vrot.lane.b32.xlu0 %v10489_v43, %s12381_s15 }
 0x115   : > { %v1229_v14 = vpop.permute.xlu1 %1228 }
 0x116   : > { %v1227_v42 = vpop.permute.xlu0 %1226  ;;  %1641 = vst.msk [vmem:[#allocation2 + $0x228] sm:$0xf] %vm1575_vm3, %v1229_v14  ;;  %v10531_v14 = vld [vmem:[%s12505_s14 + $0x80] sm:$0xff] }
 0x117   : > { %1640 = vst.msk [vmem:[#allocation2 + $0x220] sm:$0xff] %vm1570_vm2, %v1227_v42  ;;  %1344 = vrot.lane.b32.xlu1 %v13151_v40, %s12381_s15 }
 0x118   : > { %1342 = vrot.lane.b32.xlu0 %v13154_v54, %s12381_s15  ;;  %v586_v54 = vld [vmem:[%s12505_s14 + $0x458] sm:$0xf] }
 0x119   : > { %v1233_v22 = vpop.permute.xlu1 %1232  ;;  %748 = vst.msk [vmem:[#allocation2 + $0x458] sm:$0xf] %vm612_vm1, %v586_v54  ;;  %v10535_v54 = vld [vmem:[%s12505_s14 + $0xa0] sm:$0xff] }
 0x11a   : > { %v1231_v24 = vpop.permute.xlu0 %1230  ;;  %1643 = vst.msk [vmem:[#allocation2 + $0x238] sm:$0xff] %vm1570_vm2, %v1233_v22  ;;  %v10533_v22 = vld [vmem:[%s12505_s14 + $0x90] sm:$0xff] }
 0x11b   : > { %1642 = vst.msk [vmem:[#allocation2 + $0x230] sm:$0xff] %vm1570_vm2, %v1231_v24  ;;  %1348 = vrot.lane.b32.xlu1 %v10494_v47, %s12381_s15 }
 0x11c   : > { %1346 = vrot.lane.b32.xlu0 %v13168_v57, %s12381_s15  ;;  %v10499_v57 = vld [vmem:[%s12505_s14 + $0x458] sm:$0xf] }
 0x11d   : > { %v1237_v34 = vpop.permute.xlu1 %1236 }
 0x11e   : > { %v1235_v40 = vpop.permute.xlu0 %1234  ;;  %1645 = vst.msk [vmem:[#allocation2 + $0x248] sm:$0xff] %vm1570_vm2, %v1237_v34 }
 0x11f   : > { %1644 = vst.msk [vmem:[#allocation2 + $0x240] sm:$0xff] %vm1570_vm2, %v1235_v40  ;;  %1352 = vrot.lane.b32.xlu1 %v13178_v25, %s12381_s15  ;;  %v10536_v40 = vld [vmem:[%s12505_s14 + $0xa8] sm:$0xff] }
 0x120   : > { %1350 = vrot.lane.b32.xlu0 %v13181_v29, %s12381_s15 }
 0x121   : > { %v1241_v61 = vpop.permute.xlu1 %1240 }
 0x122   : > { %v1239_v46 = vpop.permute.xlu0 %1238  ;;  %1647 = vst.msk [vmem:[#allocation2 + $0x258] sm:$0xff] %vm1570_vm2, %v1241_v61 }
 0x123   : > { %1646 = vst.msk [vmem:[#allocation2 + $0x250] sm:$0xf] %vm1575_vm3, %v1239_v46  ;;  %1356 = vrot.lane.b32.xlu1 %v13197_v62, %s12381_s15  ;;  %v10504_v62 = vld [vmem:[%s12505_s14 + $0x480] sm:$0xf] }
 0x124   : > { %1354 = vrot.lane.b32.xlu0 %v13200_v63, %s12381_s15  ;;  %v591_v63 = vld [vmem:[%s12505_s14 + $0x480] sm:$0xf] }
 0x125   : > { %v1245_v25 = vpop.permute.xlu1 %1244  ;;  %753 = vst.msk [vmem:[#allocation2 + $0x480] sm:$0xf] %vm612_vm1, %v591_v63 }
 0x126   : > { %v1243_v29 = vpop.permute.xlu0 %1242  ;;  %1649 = vst.msk [vmem:[#allocation2 + $0x268] sm:$0xff] %vm1570_vm2, %v1245_v25  ;;  %v10537_v25 = vld [vmem:[%s12505_s14 + $0xb0] sm:$0xff] }
 0x127   : > { %1648 = vst.msk [vmem:[#allocation2 + $0x260] sm:$0xff] %vm1570_vm2, %v1243_v29  ;;  %1360 = vrot.lane.b32.xlu1 %v13212_v55, %s12381_s15 }
 0x128   : > { %1358 = vrot.lane.b32.xlu0 %v10499_v57, %s12381_s15  ;;  %v10538_v57 = vld [vmem:[%s12505_s14 + $0xb8] sm:$0xff] }
 0x129   : > { %v1249_v10 = vpop.permute.xlu1 %1248 }
 0x12a   : > { %v1247_v26 = vpop.permute.xlu0 %1246  ;;  %1651 = vst.msk [vmem:[#allocation2 + $0x278] sm:$0xf] %vm1575_vm3, %v1249_v10 }
 0x12b   : > { %1650 = vst.msk [vmem:[#allocation2 + $0x270] sm:$0xff] %vm1570_vm2, %v1247_v26  ;;  %1364 = vrot.lane.b32.xlu1 %v13225_v58, %s12381_s15  ;;  %v10540_v26 = vld [vmem:[%s12505_s14 + $0xc8] sm:$0xff] }
 0x12c   : > { %1362 = vrot.lane.b32.xlu0 %v13228_v23, %s12381_s15  ;;  %v596_v23 = vld [vmem:[%s12505_s14 + $0x4a8] sm:$0xf] }
 0x12d   : > { %v1253_v27 = vpop.permute.xlu1 %1252  ;;  %758 = vst.msk [vmem:[#allocation2 + $0x4a8] sm:$0xf] %vm612_vm1, %v596_v23 }
 0x12e   : > { %v1251_v28 = vpop.permute.xlu0 %1250  ;;  %1653 = vst.msk [vmem:[#allocation2 + $0x288] sm:$0xff] %vm1570_vm2, %v1253_v27 }
 0x12f   : > { %1652 = vst.msk [vmem:[#allocation2 + $0x280] sm:$0xff] %vm1570_vm2, %v1251_v28  ;;  %1368 = vrot.lane.b32.xlu1 %v10504_v62, %s12381_s15  ;;  %v10539_v62 = vld [vmem:[%s12505_s14 + $0xc0] sm:$0xf]  ;;  %v10542_v28 = vld [vmem:[%s12505_s14 + $0xd8] sm:$0xff] }
 0x130   : > { %1366 = vrot.lane.b32.xlu0 %v13242_v4, %s12381_s15  ;;  %v10509_v4 = vld [vmem:[%s12505_s14 + $0x4a8] sm:$0xf] }
 0x131   : > { %v1257_v55 = vpop.permute.xlu1 %1256 }
 0x132   : > { %v1255_v58 = vpop.permute.xlu0 %1254  ;;  %1655 = vst.msk [vmem:[#allocation2 + $0x298] sm:$0xff] %vm1570_vm2, %v1257_v55  ;;  %v10541_v55 = vld [vmem:[%s12505_s14 + $0xd0] sm:$0xff] }
 0x133   : > { %1654 = vst.msk [vmem:[#allocation2 + $0x290] sm:$0xff] %vm1570_vm2, %v1255_v58  ;;  %1372 = vrot.lane.b32.xlu1 %v13252_v31, %s12381_s15 }
 0x134   : > { %1370 = vrot.lane.b32.xlu0 %v13255_v51, %s12381_s15 }
 0x135   : > { %v1261_v2 = vpop.permute.xlu1 %1260 }
 0x136   : > { %v1259_v60 = vpop.permute.xlu0 %1258  ;;  %1657 = vst.msk [vmem:[#allocation2 + $0x2a8] sm:$0xff] %vm1570_vm2, %v1261_v2  ;;  %v10544_v2 = vld [vmem:[%s12505_s14 + $0xe8] sm:$0xf] }
 0x137   : > { %1656 = vst.msk [vmem:[#allocation2 + $0x2a0] sm:$0xf] %vm1575_vm3, %v1259_v60  ;;  %1376 = vrot.lane.b32.xlu1 %v13271_v8, %s12381_s15  ;;  %v10514_v8 = vld [vmem:[%s12505_s14 + $0x4d0] sm:$0xf]  ;;  %v10543_v60 = vld [vmem:[%s12505_s14 + $0xe0] sm:$0xff] }
 0x138   : > { %1374 = vrot.lane.b32.xlu0 %v13274_v9, %s12381_s15  ;;  %v601_v9 = vld [vmem:[%s12505_s14 + $0x4d0] sm:$0xf] }
 0x139   : > { %v1265_v31 = vpop.permute.xlu1 %1264  ;;  %763 = vst.msk [vmem:[#allocation2 + $0x4d0] sm:$0xf] %vm612_vm1, %v601_v9  ;;  %v10548_v9 = vld [vmem:[%s12505_s14 + $0x108] sm:$0xff] }
 0x13a   : > { %v1263_v51 = vpop.permute.xlu0 %1262  ;;  %1659 = vst.msk [vmem:[#allocation2 + $0x2b8] sm:$0xff] %vm1570_vm2, %v1265_v31 }
 0x13b   : > { %1658 = vst.msk [vmem:[#allocation2 + $0x2b0] sm:$0xff] %vm1570_vm2, %v1263_v51  ;;  %1380 = vrot.lane.b32.xlu1 %v13286_v1, %s12381_s15  ;;  %v10546_v51 = vld [vmem:[%s12505_s14 + $0xf8] sm:$0xff] }
 0x13c   : > { %1378 = vrot.lane.b32.xlu0 %v10509_v4, %s12381_s15 }
 0x13d   : > { %v1269_v7 = vpop.permute.xlu1 %1268 }
 0x13e   : > { %v1267_v13 = vpop.permute.xlu0 %1266  ;;  %1661 = vst.msk [vmem:[#allocation2 + $0x2c8] sm:$0xf] %vm1575_vm3, %v1269_v7  ;;  %v10545_v7 = vld [vmem:[%s12505_s14 + $0xf0] sm:$0xff] }
 0x13f   : > { %1660 = vst.msk [vmem:[#allocation2 + $0x2c0] sm:$0xff] %vm1570_vm2, %v1267_v13  ;;  %1384 = vrot.lane.b32.xlu1 %v13299_v5, %s12381_s15 }
 0x140   : > { %1382 = vrot.lane.b32.xlu0 %v13302_v3, %s12381_s15  ;;  %v606_v3 = vld [vmem:[%s12505_s14 + $0x4f8] sm:$0xf] }
 0x141   : > { %v1273_v18 = vpop.permute.xlu1 %1272  ;;  %768 = vst.msk [vmem:[#allocation2 + $0x4f8] sm:$0xf] %vm612_vm1, %v606_v3  ;;  %v10549_v3 = vld [vmem:[%s12505_s14 + $0x110] sm:$0xf] }
 0x142   : > { %v1271_v11 = vpop.permute.xlu0 %1270  ;;  %1663 = vst.msk [vmem:[#allocation2 + $0x2d8] sm:$0xff] %vm1570_vm2, %v1273_v18  ;;  %v10547_v18 = vld [vmem:[%s12505_s14 + $0x100] sm:$0xff] }
 0x143   : > { %1662 = vst.msk [vmem:[#allocation2 + $0x2d0] sm:$0xff] %vm1570_vm2, %v1271_v11  ;;  %1388 = vrot.lane.b32.xlu1 %v10514_v8, %s12381_s15 }
 0x144   : > { %1386 = vrot.lane.b32.xlu0 %v13316_v49, %s12381_s15  ;;  %v10520_v49 = vld [vmem:[%s12505_s14 + $0x500] sm:$0xff] }
 0x145   : > { %v1277_v1 = vpop.permute.xlu1 %1276 }
 0x146   : > { %v1275_v5 = vpop.permute.xlu0 %1274  ;;  %1665 = vst.msk [vmem:[#allocation2 + $0x2e8] sm:$0xff] %vm1570_vm2, %v1277_v1 }
 0x147   : > { %1664 = vst.msk [vmem:[#allocation2 + $0x2e0] sm:$0xff] %vm1570_vm2, %v1275_v5  ;;  %1392 = vrot.lane.b32.xlu1 %v13326_v15, %s12381_s15  ;;  %v10519_v15 = vld [vmem:[%s12505_s14 + $0x4f8] sm:$0xf] }
 0x148   : > { %1390 = vrot.lane.b32.xlu0 %v13329_v0, %s12381_s15  ;;  %v10550_v5 = vld [vmem:[%s12505_s14 + $0x118] sm:$0xff] }
 0x149   : > { %v1281_v30 = vpop.permute.xlu1 %1280 }
 0x14a   : > { %v1279_v33 = vpop.permute.xlu0 %1278  ;;  %1667 = vst.msk [vmem:[#allocation2 + $0x2f8] sm:$0xff] %vm1570_vm2, %v1281_v30 }
 0x14b   : > { %1666 = vst.msk [vmem:[#allocation2 + $0x2f0] sm:$0xf] %vm1575_vm3, %v1279_v33  ;;  %1396 = vrot.lane.b32.xlu1 %v13345_v16, %s12381_s15  ;;  %v10521_v16 = vld [vmem:[%s12505_s14 + $0x508] sm:$0xff] }
 0x14c   : > { %1394 = vrot.lane.b32.xlu0 %v13348_v52, %s12381_s15 }
 0x14d   : > { %v1285_v0 = vpop.permute.xlu1 %1284 }
 0x14e   : > { %v1283_v32 = vpop.permute.xlu0 %1282  ;;  %1669 = vst.msk [vmem:[#allocation2 + $0x308] sm:$0xff] %vm1570_vm2, %v1285_v0 }
 0x14f   : > { %1668 = vst.msk [vmem:[#allocation2 + $0x300] sm:$0xff] %vm1570_vm2, %v1283_v32  ;;  %1400 = vrot.lane.b32.xlu1 %v10520_v49, %s12381_s15  ;;  %v10552_v49 = vld [vmem:[%s12505_s14 + $0x128] sm:$0xff] }
 0x150   : > { %1398 = vrot.lane.b32.xlu0 %v10519_v15, %s12381_s15  ;;  %v10551_v15 = vld [vmem:[%s12505_s14 + $0x120] sm:$0xff] }
 0x151   : > { %v1289_v19 = vpop.permute.xlu1 %1288 }
 0x152   : > { %v1287_v52 = vpop.permute.xlu0 %1286  ;;  %1671 = vst.msk [vmem:[#allocation2 + $0x318] sm:$0xf] %vm1575_vm3, %v1289_v19 }
 0x153   : > { %1670 = vst.msk [vmem:[#allocation2 + $0x310] sm:$0xff] %vm1570_vm2, %v1287_v52  ;;  %1404 = vrot.lane.b32.xlu1 %v10522_v12, %s12381_s15  ;;  %v10554_v12 = vld [vmem:[%s12505_s14 + $0x138] sm:$0xf] }
 0x154   : > { %1402 = vrot.lane.b32.xlu0 %v10521_v16, %s12381_s15  ;;  %v10553_v16 = vld [vmem:[%s12505_s14 + $0x130] sm:$0xff] }
 0x155   : > { %v1293_v37 = vpop.permute.xlu1 %1292 }
 0x156   : > { %v1291_v6 = vpop.permute.xlu0 %1290  ;;  %1673 = vst.msk [vmem:[#allocation2 + $0x328] sm:$0xff] %vm1570_vm2, %v1293_v37 }
 0x157   : > { %1672 = vst.msk [vmem:[#allocation2 + $0x320] sm:$0xff] %vm1570_vm2, %v1291_v6  ;;  %1408 = vrot.lane.b32.xlu1 %v10524_v35, %s12381_s15  ;;  %v10556_v35 = vld [vmem:[%s12505_s14 + $0x148] sm:$0xff] }
 0x158   : > { %1406 = vrot.lane.b32.xlu0 %v10523_v36, %s12381_s15  ;;  %v10555_v36 = vld [vmem:[%s12505_s14 + $0x140] sm:$0xff] }
 0x159   : > { %v1297_v21 = vpop.permute.xlu1 %1296 }
 0x15a   : > { %v1295_v50 = vpop.permute.xlu0 %1294  ;;  %1675 = vst.msk [vmem:[#allocation2 + $0x338] sm:$0xff] %vm1570_vm2, %v1297_v21 }
 0x15b   : > { %1674 = vst.msk [vmem:[#allocation2 + $0x330] sm:$0xff] %vm1570_vm2, %v1295_v50  ;;  %2055 = vrot.lane.b32.xlu1 %v10526_v20, %s12382_s16  ;;  %v10558_v20 = vld [vmem:[%s12505_s14 + $0x158] sm:$0xff] }
 0x15c   : > { %2053 = vrot.lane.b32.xlu0 %v10525_v17, %s12382_s16  ;;  %v10557_v17 = vld [vmem:[%s12505_s14 + $0x150] sm:$0xff] }
 0x15d   : > { %v1301_v41 = vpop.permute.xlu1 %1300 }
 0x15e   : > { %v1299_v53 = vpop.permute.xlu0 %1298  ;;  %1677 = vst.msk [vmem:[#allocation2 + $0x348] sm:$0xff] %vm1570_vm2, %v1301_v41 }
 0x15f   : > { %1676 = vst.msk [vmem:[#allocation2 + $0x340] sm:$0xf] %vm1575_vm3, %v1299_v53  ;;  %2059 = vrot.lane.b32.xlu1 %v10528_v38, %s12382_s16  ;;  %v10560_v38 = vld [vmem:[%s12505_s14 + $0x168] sm:$0xff] }
 0x160   : > { %2057 = vrot.lane.b32.xlu0 %v10527_v39, %s12382_s16  ;;  %v10559_v39 = vld [vmem:[%s12505_s14 + $0x160] sm:$0xf] }
 0x161   : > { %v1305_v43 = vpop.permute.xlu1 %1304 }
 0x162   : > { %v1303_v44 = vpop.permute.xlu0 %1302  ;;  %1679 = vst.msk [vmem:[#allocation2 + $0x358] sm:$0xff] %vm1570_vm2, %v1305_v43 }
 0x163   : > { %1678 = vst.msk [vmem:[#allocation2 + $0x350] sm:$0xff] %vm1570_vm2, %v1303_v44  ;;  %2063 = vrot.lane.b32.xlu1 %v10530_v56, %s12382_s16  ;;  %v10562_v56 = vld [vmem:[%s12505_s14 + $0x178] sm:$0xff] }
 0x164   : > { %2061 = vrot.lane.b32.xlu0 %v10529_v59, %s12382_s16  ;;  %v10561_v59 = vld [vmem:[%s12505_s14 + $0x170] sm:$0xff] }
 0x165   : > { %v1309_v42 = vpop.permute.xlu1 %1308 }
 0x166   : > { %v1307_v47 = vpop.permute.xlu0 %1306  ;;  %1681 = vst.msk [vmem:[#allocation2 + $0x368] sm:$0xf] %vm1575_vm3, %v1309_v42 }
 0x167   : > { %1680 = vst.msk [vmem:[#allocation2 + $0x360] sm:$0xff] %vm1570_vm2, %v1307_v47  ;;  %2067 = vrot.lane.b32.xlu1 %v10532_v45, %s12382_s16  ;;  %v10564_v45 = vld [vmem:[%s12505_s14 + $0x188] sm:$0xf] }
 0x168   : > { %2065 = vrot.lane.b32.xlu0 %v10531_v14, %s12382_s16  ;;  %v10563_v14 = vld [vmem:[%s12505_s14 + $0x180] sm:$0xff] }
 0x169   : > { %v1313_v24 = vpop.permute.xlu1 %1312 }
 0x16a   : > { %v1311_v34 = vpop.permute.xlu0 %1310  ;;  %1683 = vst.msk [vmem:[#allocation2 + $0x378] sm:$0xff] %vm1570_vm2, %v1313_v24 }
 0x16b   : > { %1682 = vst.msk [vmem:[#allocation2 + $0x370] sm:$0xff] %vm1570_vm2, %v1311_v34  ;;  %2071 = vrot.lane.b32.xlu1 %v10534_v48, %s12382_s16  ;;  %v10566_v48 = vld [vmem:[%s12505_s14 + $0x198] sm:$0xff] }
 0x16c   : > { %2069 = vrot.lane.b32.xlu0 %v10533_v22, %s12382_s16  ;;  %v10565_v22 = vld [vmem:[%s12505_s14 + $0x190] sm:$0xff] }
 0x16d   : > { %v1317_v61 = vpop.permute.xlu1 %1316 }
 0x16e   : > { %v1315_v46 = vpop.permute.xlu0 %1314  ;;  %1685 = vst.msk [vmem:[#allocation2 + $0x388] sm:$0xff] %vm1570_vm2, %v1317_v61 }
 0x16f   : > { %1684 = vst.msk [vmem:[#allocation2 + $0x380] sm:$0xff] %vm1570_vm2, %v1315_v46  ;;  %2075 = vrot.lane.b32.xlu1 %v10536_v40, %s12382_s16  ;;  %v10568_v40 = vld [vmem:[%s12505_s14 + $0x1a8] sm:$0xff] }
 0x170   : > { %2073 = vrot.lane.b32.xlu0 %v10535_v54, %s12382_s16  ;;  %v10567_v54 = vld [vmem:[%s12505_s14 + $0x1a0] sm:$0xff] }
 0x171   : > { %v1321_v29 = vpop.permute.xlu1 %1320 }
 0x172   : > { %v1319_v10 = vpop.permute.xlu0 %1318  ;;  %1687 = vst.msk [vmem:[#allocation2 + $0x398] sm:$0xff] %vm1570_vm2, %v1321_v29 }
 0x173   : > { %1686 = vst.msk [vmem:[#allocation2 + $0x390] sm:$0xf] %vm1575_vm3, %v1319_v10  ;;  %2079 = vrot.lane.b32.xlu1 %v10538_v57, %s12382_s16  ;;  %v10570_v57 = vld [vmem:[%s12505_s14 + $0x1b8] sm:$0xff] }
 0x174   : > { %2077 = vrot.lane.b32.xlu0 %v10537_v25, %s12382_s16  ;;  %v10569_v25 = vld [vmem:[%s12505_s14 + $0x1b0] sm:$0xf] }
 0x175   : > { %v1325_v63 = vpop.permute.xlu1 %1324 }
 0x176   : > { %v1323_v27 = vpop.permute.xlu0 %1322  ;;  %1689 = vst.msk [vmem:[#allocation2 + $0x3a8] sm:$0xff] %vm1570_vm2, %v1325_v63 }
 0x177   : > { %1688 = vst.msk [vmem:[#allocation2 + $0x3a0] sm:$0xff] %vm1570_vm2, %v1323_v27  ;;  %2083 = vrot.lane.b32.xlu1 %v10540_v26, %s12382_s16  ;;  %v10572_v26 = vld [vmem:[%s12505_s14 + $0x1c8] sm:$0xff] }
 0x178   : > { %2081 = vrot.lane.b32.xlu0 %v10539_v62, %s12382_s16  ;;  %v10571_v62 = vld [vmem:[%s12505_s14 + $0x1c0] sm:$0xff] }
 0x179   : > { %v1329_v58 = vpop.permute.xlu1 %1328 }
 0x17a   : > { %v1327_v23 = vpop.permute.xlu0 %1326  ;;  %1691 = vst.msk [vmem:[#allocation2 + $0x3b8] sm:$0xf] %vm1575_vm3, %v1329_v58 }
 0x17b   : > { %1690 = vst.msk [vmem:[#allocation2 + $0x3b0] sm:$0xff] %vm1570_vm2, %v1327_v23  ;;  %2087 = vrot.lane.b32.xlu1 %v10542_v28, %s12382_s16  ;;  %v10574_v28 = vld [vmem:[%s12505_s14 + $0x1d8] sm:$0xf] }
 0x17c   : > { %2085 = vrot.lane.b32.xlu0 %v10541_v55, %s12382_s16  ;;  %v10573_v55 = vld [vmem:[%s12505_s14 + $0x1d0] sm:$0xff] }
 0x17d   : > { %v1333_v4 = vpop.permute.xlu1 %1332 }
 0x17e   : > { %v1331_v31 = vpop.permute.xlu0 %1330  ;;  %1693 = vst.msk [vmem:[#allocation2 + $0x3c8] sm:$0xff] %vm1570_vm2, %v1333_v4 }
 0x17f   : > { %1692 = vst.msk [vmem:[#allocation2 + $0x3c0] sm:$0xff] %vm1570_vm2, %v1331_v31  ;;  %2091 = vrot.lane.b32.xlu1 %v10544_v2, %s12382_s16  ;;  %v10576_v2 = vld [vmem:[%s12505_s14 + $0x1e8] sm:$0xff] }
 0x180   : > { %2089 = vrot.lane.b32.xlu0 %v10543_v60, %s12382_s16  ;;  %v10575_v60 = vld [vmem:[%s12505_s14 + $0x1e0] sm:$0xff] }
 0x181   : > { %v1337_v13 = vpop.permute.xlu1 %1336 }
 0x182   : > { %v1335_v8 = vpop.permute.xlu0 %1334  ;;  %1695 = vst.msk [vmem:[#allocation2 + $0x3d8] sm:$0xff] %vm1570_vm2, %v1337_v13 }
 0x183   : > { %1694 = vst.msk [vmem:[#allocation2 + $0x3d0] sm:$0xff] %vm1570_vm2, %v1335_v8  ;;  %2095 = vrot.lane.b32.xlu1 %v10546_v51, %s12382_s16  ;;  %v10578_v51 = vld [vmem:[%s12505_s14 + $0x1f8] sm:$0xff] }
 0x184   : > { %2093 = vrot.lane.b32.xlu0 %v10545_v7, %s12382_s16  ;;  %v10577_v7 = vld [vmem:[%s12505_s14 + $0x1f0] sm:$0xff] }
 0x185   : > { %v1341_v11 = vpop.permute.xlu1 %1340 }
 0x186   : > { %v1339_v1 = vpop.permute.xlu0 %1338  ;;  %1697 = vst.msk [vmem:[#allocation2 + $0x3e8] sm:$0xff] %vm1570_vm2, %v1341_v11 }
 0x187   : > { %1696 = vst.msk [vmem:[#allocation2 + $0x3e0] sm:$0xf] %vm1575_vm3, %v1339_v1  ;;  %2099 = vrot.lane.b32.xlu1 %v10548_v9, %s12382_s16  ;;  %v10580_v9 = vld [vmem:[%s12505_s14 + $0x208] sm:$0xff] }
 0x188   : > { %2097 = vrot.lane.b32.xlu0 %v10547_v18, %s12382_s16  ;;  %v10579_v18 = vld [vmem:[%s12505_s14 + $0x200] sm:$0xf] }
 0x189   : > { %v1345_v30 = vpop.permute.xlu1 %1344 }
 0x18a   : > { %v1343_v33 = vpop.permute.xlu0 %1342  ;;  %1699 = vst.msk [vmem:[#allocation2 + $0x3f8] sm:$0xff] %vm1570_vm2, %v1345_v30 }
 0x18b   : > { %1698 = vst.msk [vmem:[#allocation2 + $0x3f0] sm:$0xff] %vm1570_vm2, %v1343_v33  ;;  %2103 = vrot.lane.b32.xlu1 %v10550_v5, %s12382_s16  ;;  %v10582_v5 = vld [vmem:[%s12505_s14 + $0x218] sm:$0xff] }
 0x18c   : > { %2101 = vrot.lane.b32.xlu0 %v10549_v3, %s12382_s16  ;;  %v10581_v3 = vld [vmem:[%s12505_s14 + $0x210] sm:$0xff] }
 0x18d   : > { %v1349_v0 = vpop.permute.xlu1 %1348 }
 0x18e   : > { %v1347_v32 = vpop.permute.xlu0 %1346  ;;  %1701 = vst.msk [vmem:[#allocation2 + $0x408] sm:$0xf] %vm1575_vm3, %v1349_v0 }
 0x18f   : > { %1700 = vst.msk [vmem:[#allocation2 + $0x400] sm:$0xff] %vm1570_vm2, %v1347_v32  ;;  %2107 = vrot.lane.b32.xlu1 %v10552_v49, %s12382_s16  ;;  %v10584_v49 = vld [vmem:[%s12505_s14 + $0x228] sm:$0xf] }
 0x190   : > { %2105 = vrot.lane.b32.xlu0 %v10551_v15, %s12382_s16  ;;  %v10583_v15 = vld [vmem:[%s12505_s14 + $0x220] sm:$0xff] }
 0x191   : > { %v1353_v19 = vpop.permute.xlu1 %1352 }
 0x192   : > { %v1351_v52 = vpop.permute.xlu0 %1350  ;;  %1703 = vst.msk [vmem:[#allocation2 + $0x418] sm:$0xff] %vm1570_vm2, %v1353_v19 }
 0x193   : > { %1702 = vst.msk [vmem:[#allocation2 + $0x410] sm:$0xff] %vm1570_vm2, %v1351_v52  ;;  %2111 = vrot.lane.b32.xlu1 %v10554_v12, %s12382_s16  ;;  %v10586_v12 = vld [vmem:[%s12505_s14 + $0x238] sm:$0xff] }
 0x194   : > { %2109 = vrot.lane.b32.xlu0 %v10553_v16, %s12382_s16  ;;  %v10585_v16 = vld [vmem:[%s12505_s14 + $0x230] sm:$0xff] }
 0x195   : > { %v1357_v37 = vpop.permute.xlu1 %1356 }
 0x196   : > { %v1355_v6 = vpop.permute.xlu0 %1354  ;;  %1705 = vst.msk [vmem:[#allocation2 + $0x428] sm:$0xff] %vm1570_vm2, %v1357_v37 }
 0x197   : > { %1704 = vst.msk [vmem:[#allocation2 + $0x420] sm:$0xff] %vm1570_vm2, %v1355_v6  ;;  %2115 = vrot.lane.b32.xlu1 %v10556_v35, %s12382_s16  ;;  %v10588_v35 = vld [vmem:[%s12505_s14 + $0x248] sm:$0xff] }
 0x198   : > { %2113 = vrot.lane.b32.xlu0 %v10555_v36, %s12382_s16  ;;  %v10587_v36 = vld [vmem:[%s12505_s14 + $0x240] sm:$0xff] }
 0x199   : > { %v1361_v21 = vpop.permute.xlu1 %1360 }
 0x19a   : > { %v1359_v50 = vpop.permute.xlu0 %1358  ;;  %1707 = vst.msk [vmem:[#allocation2 + $0x438] sm:$0xff] %vm1570_vm2, %v1361_v21 }
 0x19b   : > { %1706 = vst.msk [vmem:[#allocation2 + $0x430] sm:$0xf] %vm1575_vm3, %v1359_v50  ;;  %2119 = vrot.lane.b32.xlu1 %v10558_v20, %s12382_s16  ;;  %v10590_v20 = vld [vmem:[%s12505_s14 + $0x258] sm:$0xff] }
 0x19c   : > { %2117 = vrot.lane.b32.xlu0 %v10557_v17, %s12382_s16  ;;  %v10589_v17 = vld [vmem:[%s12505_s14 + $0x250] sm:$0xf] }
 0x19d   : > { %v1365_v41 = vpop.permute.xlu1 %1364 }
 0x19e   : > { %v1363_v53 = vpop.permute.xlu0 %1362  ;;  %1709 = vst.msk [vmem:[#allocation2 + $0x448] sm:$0xff] %vm1570_vm2, %v1365_v41 }
 0x19f   : > { %1708 = vst.msk [vmem:[#allocation2 + $0x440] sm:$0xff] %vm1570_vm2, %v1363_v53  ;;  %2123 = vrot.lane.b32.xlu1 %v10560_v38, %s12382_s16  ;;  %v10592_v38 = vld [vmem:[%s12505_s14 + $0x268] sm:$0xff] }
 0x1a0   : > { %2121 = vrot.lane.b32.xlu0 %v10559_v39, %s12382_s16  ;;  %v10591_v39 = vld [vmem:[%s12505_s14 + $0x260] sm:$0xff] }
 0x1a1   : > { %v1369_v43 = vpop.permute.xlu1 %1368 }
 0x1a2   : > { %v1367_v44 = vpop.permute.xlu0 %1366  ;;  %1711 = vst.msk [vmem:[#allocation2 + $0x458] sm:$0xf] %vm1575_vm3, %v1369_v43 }
 0x1a3   : > { %1710 = vst.msk [vmem:[#allocation2 + $0x450] sm:$0xff] %vm1570_vm2, %v1367_v44  ;;  %2127 = vrot.lane.b32.xlu1 %v10562_v56, %s12382_s16  ;;  %v10594_v56 = vld [vmem:[%s12505_s14 + $0x278] sm:$0xf] }
 0x1a4   : > { %2125 = vrot.lane.b32.xlu0 %v10561_v59, %s12382_s16  ;;  %v10593_v59 = vld [vmem:[%s12505_s14 + $0x270] sm:$0xff] }
 0x1a5   : > { %v1373_v42 = vpop.permute.xlu1 %1372 }
 0x1a6   : > { %v1371_v47 = vpop.permute.xlu0 %1370  ;;  %1713 = vst.msk [vmem:[#allocation2 + $0x468] sm:$0xff] %vm1570_vm2, %v1373_v42 }
 0x1a7   : > { %1712 = vst.msk [vmem:[#allocation2 + $0x460] sm:$0xff] %vm1570_vm2, %v1371_v47  ;;  %2131 = vrot.lane.b32.xlu1 %v10564_v45, %s12382_s16  ;;  %v10596_v45 = vld [vmem:[%s12505_s14 + $0x288] sm:$0xff] }
 0x1a8   : > { %2129 = vrot.lane.b32.xlu0 %v10563_v14, %s12382_s16  ;;  %v10595_v14 = vld [vmem:[%s12505_s14 + $0x280] sm:$0xff] }
 0x1a9   : > { %v1377_v24 = vpop.permute.xlu1 %1376 }
 0x1aa   : > { %v1375_v34 = vpop.permute.xlu0 %1374  ;;  %1715 = vst.msk [vmem:[#allocation2 + $0x478] sm:$0xff] %vm1570_vm2, %v1377_v24 }
 0x1ab   : > { %1714 = vst.msk [vmem:[#allocation2 + $0x470] sm:$0xff] %vm1570_vm2, %v1375_v34  ;;  %2135 = vrot.lane.b32.xlu1 %v10566_v48, %s12382_s16  ;;  %v10598_v48 = vld [vmem:[%s12505_s14 + $0x298] sm:$0xff] }
 0x1ac   : > { %2133 = vrot.lane.b32.xlu0 %v10565_v22, %s12382_s16  ;;  %v10597_v22 = vld [vmem:[%s12505_s14 + $0x290] sm:$0xff] }
 0x1ad   : > { %v1381_v61 = vpop.permute.xlu1 %1380 }
 0x1ae   : > { %v1379_v46 = vpop.permute.xlu0 %1378  ;;  %1717 = vst.msk [vmem:[#allocation2 + $0x488] sm:$0xff] %vm1570_vm2, %v1381_v61 }
 0x1af   : > { %1716 = vst.msk [vmem:[#allocation2 + $0x480] sm:$0xf] %vm1575_vm3, %v1379_v46  ;;  %2139 = vrot.lane.b32.xlu1 %v10568_v40, %s12382_s16  ;;  %v10600_v40 = vld [vmem:[%s12505_s14 + $0x2a8] sm:$0xff] }
 0x1b0   : > { %2137 = vrot.lane.b32.xlu0 %v10567_v54, %s12382_s16  ;;  %v10599_v54 = vld [vmem:[%s12505_s14 + $0x2a0] sm:$0xf] }
 0x1b1   : > { %v1385_v29 = vpop.permute.xlu1 %1384 }
 0x1b2   : > { %v1383_v10 = vpop.permute.xlu0 %1382  ;;  %1719 = vst.msk [vmem:[#allocation2 + $0x498] sm:$0xff] %vm1570_vm2, %v1385_v29 }
 0x1b3   : > { %1718 = vst.msk [vmem:[#allocation2 + $0x490] sm:$0xff] %vm1570_vm2, %v1383_v10  ;;  %2143 = vrot.lane.b32.xlu1 %v10570_v57, %s12382_s16  ;;  %v10602_v57 = vld [vmem:[%s12505_s14 + $0x2b8] sm:$0xff] }
 0x1b4   : > { %2141 = vrot.lane.b32.xlu0 %v10569_v25, %s12382_s16  ;;  %v10601_v25 = vld [vmem:[%s12505_s14 + $0x2b0] sm:$0xff] }
 0x1b5   : > { %v1389_v63 = vpop.permute.xlu1 %1388 }
 0x1b6   : > { %v1387_v27 = vpop.permute.xlu0 %1386  ;;  %1721 = vst.msk [vmem:[#allocation2 + $0x4a8] sm:$0xf] %vm1575_vm3, %v1389_v63 }
 0x1b7   : > { %1720 = vst.msk [vmem:[#allocation2 + $0x4a0] sm:$0xff] %vm1570_vm2, %v1387_v27  ;;  %2147 = vrot.lane.b32.xlu1 %v10572_v26, %s12382_s16  ;;  %v10604_v26 = vld [vmem:[%s12505_s14 + $0x2c8] sm:$0xf] }
 0x1b8   : > { %2145 = vrot.lane.b32.xlu0 %v10571_v62, %s12382_s16  ;;  %v10603_v62 = vld [vmem:[%s12505_s14 + $0x2c0] sm:$0xff] }
 0x1b9   : > { %v1393_v58 = vpop.permute.xlu1 %1392 }
 0x1ba   : > { %v1391_v23 = vpop.permute.xlu0 %1390  ;;  %1723 = vst.msk [vmem:[#allocation2 + $0x4b8] sm:$0xff] %vm1570_vm2, %v1393_v58 }
 0x1bb   : > { %1722 = vst.msk [vmem:[#allocation2 + $0x4b0] sm:$0xff] %vm1570_vm2, %v1391_v23  ;;  %2151 = vrot.lane.b32.xlu1 %v10574_v28, %s12382_s16  ;;  %v10606_v28 = vld [vmem:[%s12505_s14 + $0x2d8] sm:$0xff] }
 0x1bc   : > { %2149 = vrot.lane.b32.xlu0 %v10573_v55, %s12382_s16  ;;  %v10605_v55 = vld [vmem:[%s12505_s14 + $0x2d0] sm:$0xff] }
 0x1bd   : > { %v1397_v4 = vpop.permute.xlu1 %1396 }
 0x1be   : > { %v1395_v31 = vpop.permute.xlu0 %1394  ;;  %1725 = vst.msk [vmem:[#allocation2 + $0x4c8] sm:$0xff] %vm1570_vm2, %v1397_v4 }
 0x1bf   : > { %1724 = vst.msk [vmem:[#allocation2 + $0x4c0] sm:$0xff] %vm1570_vm2, %v1395_v31  ;;  %2155 = vrot.lane.b32.xlu1 %v10576_v2, %s12382_s16  ;;  %v10608_v2 = vld [vmem:[%s12505_s14 + $0x2e8] sm:$0xff] }
 0x1c0   : > { %2153 = vrot.lane.b32.xlu0 %v10575_v60, %s12382_s16  ;;  %v10607_v60 = vld [vmem:[%s12505_s14 + $0x2e0] sm:$0xff] }
 0x1c1   : > { %v1401_v13 = vpop.permute.xlu1 %1400 }
 0x1c2   : > { %v1399_v8 = vpop.permute.xlu0 %1398  ;;  %1727 = vst.msk [vmem:[#allocation2 + $0x4d8] sm:$0xff] %vm1570_vm2, %v1401_v13 }
 0x1c3   : > { %1726 = vst.msk [vmem:[#allocation2 + $0x4d0] sm:$0xf] %vm1575_vm3, %v1399_v8  ;;  %2159 = vrot.lane.b32.xlu1 %v10578_v51, %s12382_s16  ;;  %v10610_v51 = vld [vmem:[%s12505_s14 + $0x2f8] sm:$0xff] }
 0x1c4   : > { %2157 = vrot.lane.b32.xlu0 %v10577_v7, %s12382_s16  ;;  %v10609_v7 = vld [vmem:[%s12505_s14 + $0x2f0] sm:$0xf] }
 0x1c5   : > { %v1405_v11 = vpop.permute.xlu1 %1404 }
 0x1c6   : > { %v1403_v1 = vpop.permute.xlu0 %1402  ;;  %1729 = vst.msk [vmem:[#allocation2 + $0x4e8] sm:$0xff] %vm1570_vm2, %v1405_v11 }
 0x1c7   : > { %1728 = vst.msk [vmem:[#allocation2 + $0x4e0] sm:$0xff] %vm1570_vm2, %v1403_v1  ;;  %2163 = vrot.lane.b32.xlu1 %v10580_v9, %s12382_s16  ;;  %v10612_v9 = vld [vmem:[%s12505_s14 + $0x308] sm:$0xff] }
 0x1c8   : > { %2161 = vrot.lane.b32.xlu0 %v10579_v18, %s12382_s16  ;;  %v10611_v18 = vld [vmem:[%s12505_s14 + $0x300] sm:$0xff] }
 0x1c9   : > { %v1409_v30 = vpop.permute.xlu1 %1408 }
 0x1ca   : > { %v1407_v33 = vpop.permute.xlu0 %1406  ;;  %1731 = vst.msk [vmem:[#allocation2 + $0x4f8] sm:$0xf] %vm1575_vm3, %v1409_v30 }
 0x1cb   : > { %1730 = vst.msk [vmem:[#allocation2 + $0x4f0] sm:$0xff] %vm1570_vm2, %v1407_v33  ;;  %2167 = vrot.lane.b32.xlu1 %v10582_v5, %s12382_s16  ;;  %v10614_v5 = vld [vmem:[%s12505_s14 + $0x318] sm:$0xf] }
 0x1cc   : > { %2165 = vrot.lane.b32.xlu0 %v10581_v3, %s12382_s16  ;;  %v10613_v3 = vld [vmem:[%s12505_s14 + $0x310] sm:$0xff] }
 0x1cd   : > { %v2056_v0 = vpop.permute.xlu1 %2055 }
 0x1ce   : > { %v2054_v32 = vpop.permute.xlu0 %2053  ;;  %2535 = vst.msk [vmem:[#allocation2 + $0x8] sm:$0xff] %vm2533_vm4, %v2056_v0 }
 0x1cf   : > { %2534 = vst.msk [vmem:[#allocation2] sm:$0xff] %vm2533_vm4, %v2054_v32  ;;  %2171 = vrot.lane.b32.xlu1 %v10584_v49, %s12382_s16  ;;  %v10616_v49 = vld [vmem:[%s12505_s14 + $0x328] sm:$0xff] }
 0x1d0   : > { %2169 = vrot.lane.b32.xlu0 %v10583_v15, %s12382_s16  ;;  %v10615_v15 = vld [vmem:[%s12505_s14 + $0x320] sm:$0xff] }
 0x1d1   : > { %v2060_v19 = vpop.permute.xlu1 %2059 }
 0x1d2   : > { %v2058_v52 = vpop.permute.xlu0 %2057  ;;  %2537 = vst.msk [vmem:[#allocation2 + $0x18] sm:$0xff] %vm2533_vm4, %v2060_v19 }
 0x1d3   : > { %2536 = vst.msk [vmem:[#allocation2 + $0x10] sm:$0xff] %vm2533_vm4, %v2058_v52  ;;  %2175 = vrot.lane.b32.xlu1 %v10586_v12, %s12382_s16  ;;  %v10618_v12 = vld [vmem:[%s12505_s14 + $0x338] sm:$0xff] }
 0x1d4   : > { %2173 = vrot.lane.b32.xlu0 %v10585_v16, %s12382_s16  ;;  %v10617_v16 = vld [vmem:[%s12505_s14 + $0x330] sm:$0xff] }
 0x1d5   : > { %v2064_v37 = vpop.permute.xlu1 %2063 }
 0x1d6   : > { %v2062_v6 = vpop.permute.xlu0 %2061  ;;  %2540 = vst.msk [vmem:[#allocation2 + $0x28] sm:$0xff] %vm2533_vm4, %v2064_v37 }
 0x1d7   : > { %2539 = vst.msk [vmem:[#allocation2 + $0x20] sm:$0xf] %vm2538_vm5, %v2062_v6  ;;  %2179 = vrot.lane.b32.xlu1 %v10588_v35, %s12382_s16  ;;  %v10620_v35 = vld [vmem:[%s12505_s14 + $0x348] sm:$0xff] }
 0x1d8   : > { %2177 = vrot.lane.b32.xlu0 %v10587_v36, %s12382_s16  ;;  %v10619_v36 = vld [vmem:[%s12505_s14 + $0x340] sm:$0xf] }
 0x1d9   : > { %v2068_v21 = vpop.permute.xlu1 %2067 }
 0x1da   : > { %v2066_v50 = vpop.permute.xlu0 %2065  ;;  %2542 = vst.msk [vmem:[#allocation2 + $0x38] sm:$0xff] %vm2533_vm4, %v2068_v21 }
 0x1db   : > { %2541 = vst.msk [vmem:[#allocation2 + $0x30] sm:$0xff] %vm2533_vm4, %v2066_v50  ;;  %2183 = vrot.lane.b32.xlu1 %v10590_v20, %s12382_s16  ;;  %v10622_v20 = vld [vmem:[%s12505_s14 + $0x358] sm:$0xff] }
 0x1dc   : > { %2181 = vrot.lane.b32.xlu0 %v10589_v17, %s12382_s16  ;;  %v10621_v17 = vld [vmem:[%s12505_s14 + $0x350] sm:$0xff] }
 0x1dd   : > { %v2072_v41 = vpop.permute.xlu1 %2071 }
 0x1de   : > { %v2070_v53 = vpop.permute.xlu0 %2069  ;;  %2544 = vst.msk [vmem:[#allocation2 + $0x48] sm:$0xf] %vm2538_vm5, %v2072_v41 }
 0x1df   : > { %2543 = vst.msk [vmem:[#allocation2 + $0x40] sm:$0xff] %vm2533_vm4, %v2070_v53  ;;  %2187 = vrot.lane.b32.xlu1 %v10592_v38, %s12382_s16  ;;  %v10624_v38 = vld [vmem:[%s12505_s14 + $0x368] sm:$0xf] }
 0x1e0   : > { %2185 = vrot.lane.b32.xlu0 %v10591_v39, %s12382_s16  ;;  %v10623_v39 = vld [vmem:[%s12505_s14 + $0x360] sm:$0xff] }
 0x1e1   : > { %v2076_v43 = vpop.permute.xlu1 %2075 }
 0x1e2   : > { %v2074_v44 = vpop.permute.xlu0 %2073  ;;  %2546 = vst.msk [vmem:[#allocation2 + $0x58] sm:$0xff] %vm2533_vm4, %v2076_v43 }
 0x1e3   : > { %2545 = vst.msk [vmem:[#allocation2 + $0x50] sm:$0xff] %vm2533_vm4, %v2074_v44  ;;  %2191 = vrot.lane.b32.xlu1 %v10594_v56, %s12382_s16  ;;  %v10626_v56 = vld [vmem:[%s12505_s14 + $0x378] sm:$0xff] }
 0x1e4   : > { %2189 = vrot.lane.b32.xlu0 %v10593_v59, %s12382_s16  ;;  %v10625_v59 = vld [vmem:[%s12505_s14 + $0x370] sm:$0xff] }
 0x1e5   : > { %v2080_v42 = vpop.permute.xlu1 %2079 }
 0x1e6   : > { %v2078_v47 = vpop.permute.xlu0 %2077  ;;  %2548 = vst.msk [vmem:[#allocation2 + $0x68] sm:$0xff] %vm2533_vm4, %v2080_v42 }
 0x1e7   : > { %2547 = vst.msk [vmem:[#allocation2 + $0x60] sm:$0xff] %vm2533_vm4, %v2078_v47  ;;  %2195 = vrot.lane.b32.xlu1 %v10596_v45, %s12382_s16  ;;  %v10628_v45 = vld [vmem:[%s12505_s14 + $0x388] sm:$0xff] }
 0x1e8   : > { %2193 = vrot.lane.b32.xlu0 %v10595_v14, %s12382_s16  ;;  %v10627_v14 = vld [vmem:[%s12505_s14 + $0x380] sm:$0xff] }
 0x1e9   : > { %v2084_v24 = vpop.permute.xlu1 %2083 }
 0x1ea   : > { %v2082_v34 = vpop.permute.xlu0 %2081  ;;  %2550 = vst.msk [vmem:[#allocation2 + $0x78] sm:$0xff] %vm2533_vm4, %v2084_v24 }
 0x1eb   : > { %2549 = vst.msk [vmem:[#allocation2 + $0x70] sm:$0xf] %vm2538_vm5, %v2082_v34  ;;  %2199 = vrot.lane.b32.xlu1 %v10598_v48, %s12382_s16  ;;  %v10630_v48 = vld [vmem:[%s12505_s14 + $0x398] sm:$0xff] }
 0x1ec   : > { %2197 = vrot.lane.b32.xlu0 %v10597_v22, %s12382_s16  ;;  %v10629_v22 = vld [vmem:[%s12505_s14 + $0x390] sm:$0xf] }
 0x1ed   : > { %v2088_v61 = vpop.permute.xlu1 %2087 }
 0x1ee   : > { %v2086_v46 = vpop.permute.xlu0 %2085  ;;  %2552 = vst.msk [vmem:[#allocation2 + $0x88] sm:$0xff] %vm2533_vm4, %v2088_v61 }
 0x1ef   : > { %2551 = vst.msk [vmem:[#allocation2 + $0x80] sm:$0xff] %vm2533_vm4, %v2086_v46  ;;  %2203 = vrot.lane.b32.xlu1 %v10600_v40, %s12382_s16  ;;  %v10632_v40 = vld [vmem:[%s12505_s14 + $0x3a8] sm:$0xff] }
 0x1f0   : > { %2201 = vrot.lane.b32.xlu0 %v10599_v54, %s12382_s16  ;;  %v10631_v54 = vld [vmem:[%s12505_s14 + $0x3a0] sm:$0xff] }
 0x1f1   : > { %v2092_v29 = vpop.permute.xlu1 %2091 }
 0x1f2   : > { %v2090_v10 = vpop.permute.xlu0 %2089  ;;  %2554 = vst.msk [vmem:[#allocation2 + $0x98] sm:$0xf] %vm2538_vm5, %v2092_v29 }
 0x1f3   : > { %2553 = vst.msk [vmem:[#allocation2 + $0x90] sm:$0xff] %vm2533_vm4, %v2090_v10  ;;  %2207 = vrot.lane.b32.xlu1 %v10602_v57, %s12382_s16  ;;  %v10634_v57 = vld [vmem:[%s12505_s14 + $0x3b8] sm:$0xf] }
 0x1f4   : > { %2205 = vrot.lane.b32.xlu0 %v10601_v25, %s12382_s16  ;;  %v10633_v25 = vld [vmem:[%s12505_s14 + $0x3b0] sm:$0xff] }
 0x1f5   : > { %v2096_v63 = vpop.permute.xlu1 %2095 }
 0x1f6   : > { %v2094_v27 = vpop.permute.xlu0 %2093  ;;  %2556 = vst.msk [vmem:[#allocation2 + $0xa8] sm:$0xff] %vm2533_vm4, %v2096_v63 }
 0x1f7   : > { %2555 = vst.msk [vmem:[#allocation2 + $0xa0] sm:$0xff] %vm2533_vm4, %v2094_v27  ;;  %2211 = vrot.lane.b32.xlu1 %v10604_v26, %s12382_s16  ;;  %v10636_v26 = vld [vmem:[%s12505_s14 + $0x3c8] sm:$0xff] }
 0x1f8   : > { %2209 = vrot.lane.b32.xlu0 %v10603_v62, %s12382_s16  ;;  %v10635_v62 = vld [vmem:[%s12505_s14 + $0x3c0] sm:$0xff] }
 0x1f9   : > { %v2100_v58 = vpop.permute.xlu1 %2099 }
 0x1fa   : > { %v2098_v23 = vpop.permute.xlu0 %2097  ;;  %2558 = vst.msk [vmem:[#allocation2 + $0xb8] sm:$0xff] %vm2533_vm4, %v2100_v58 }
 0x1fb   : > { %2557 = vst.msk [vmem:[#allocation2 + $0xb0] sm:$0xff] %vm2533_vm4, %v2098_v23  ;;  %2215 = vrot.lane.b32.xlu1 %v10606_v28, %s12382_s16  ;;  %v10638_v28 = vld [vmem:[%s12505_s14 + $0x3d8] sm:$0xff] }
 0x1fc   : > { %2213 = vrot.lane.b32.xlu0 %v10605_v55, %s12382_s16  ;;  %v10637_v55 = vld [vmem:[%s12505_s14 + $0x3d0] sm:$0xff] }
 0x1fd   : > { %v2104_v4 = vpop.permute.xlu1 %2103 }
 0x1fe   : > { %v2102_v31 = vpop.permute.xlu0 %2101  ;;  %2560 = vst.msk [vmem:[#allocation2 + $0xc8] sm:$0xff] %vm2533_vm4, %v2104_v4 }
 0x1ff   : > { %2559 = vst.msk [vmem:[#allocation2 + $0xc0] sm:$0xf] %vm2538_vm5, %v2102_v31  ;;  %2219 = vrot.lane.b32.xlu1 %v10608_v2, %s12382_s16  ;;  %v10640_v2 = vld [vmem:[%s12505_s14 + $0x3e8] sm:$0xff] }
 0x200   : > { %2217 = vrot.lane.b32.xlu0 %v10607_v60, %s12382_s16  ;;  %v10639_v60 = vld [vmem:[%s12505_s14 + $0x3e0] sm:$0xf] }
 0x201   : > { %v2108_v13 = vpop.permute.xlu1 %2107 }
 0x202   : > { %v2106_v8 = vpop.permute.xlu0 %2105  ;;  %2562 = vst.msk [vmem:[#allocation2 + $0xd8] sm:$0xff] %vm2533_vm4, %v2108_v13 }
 0x203   : > { %2561 = vst.msk [vmem:[#allocation2 + $0xd0] sm:$0xff] %vm2533_vm4, %v2106_v8  ;;  %2223 = vrot.lane.b32.xlu1 %v10610_v51, %s12382_s16  ;;  %v10642_v51 = vld [vmem:[%s12505_s14 + $0x3f8] sm:$0xff] }
 0x204   : > { %2221 = vrot.lane.b32.xlu0 %v10609_v7, %s12382_s16  ;;  %v10641_v7 = vld [vmem:[%s12505_s14 + $0x3f0] sm:$0xff] }
 0x205   : > { %v2112_v11 = vpop.permute.xlu1 %2111 }
 0x206   : > { %v2110_v1 = vpop.permute.xlu0 %2109  ;;  %2564 = vst.msk [vmem:[#allocation2 + $0xe8] sm:$0xf] %vm2538_vm5, %v2112_v11 }
 0x207   : > { %2563 = vst.msk [vmem:[#allocation2 + $0xe0] sm:$0xff] %vm2533_vm4, %v2110_v1  ;;  %2227 = vrot.lane.b32.xlu1 %v10612_v9, %s12382_s16  ;;  %v10644_v9 = vld [vmem:[%s12505_s14 + $0x408] sm:$0xf] }
 0x208   : > { %2225 = vrot.lane.b32.xlu0 %v10611_v18, %s12382_s16  ;;  %v10643_v18 = vld [vmem:[%s12505_s14 + $0x400] sm:$0xff] }
 0x209   : > { %v2116_v30 = vpop.permute.xlu1 %2115 }
 0x20a   : > { %v2114_v33 = vpop.permute.xlu0 %2113  ;;  %2566 = vst.msk [vmem:[#allocation2 + $0xf8] sm:$0xff] %vm2533_vm4, %v2116_v30 }
 0x20b   : > { %2565 = vst.msk [vmem:[#allocation2 + $0xf0] sm:$0xff] %vm2533_vm4, %v2114_v33  ;;  %2231 = vrot.lane.b32.xlu1 %v10614_v5, %s12382_s16  ;;  %v10646_v5 = vld [vmem:[%s12505_s14 + $0x418] sm:$0xff] }
 0x20c   : > { %2229 = vrot.lane.b32.xlu0 %v10613_v3, %s12382_s16  ;;  %v10645_v3 = vld [vmem:[%s12505_s14 + $0x410] sm:$0xff] }
 0x20d   : > { %v2120_v0 = vpop.permute.xlu1 %2119 }
 0x20e   : > { %v2118_v32 = vpop.permute.xlu0 %2117  ;;  %2568 = vst.msk [vmem:[#allocation2 + $0x108] sm:$0xff] %vm2533_vm4, %v2120_v0 }
 0x20f   : > { %2567 = vst.msk [vmem:[#allocation2 + $0x100] sm:$0xff] %vm2533_vm4, %v2118_v32  ;;  %2235 = vrot.lane.b32.xlu1 %v10616_v49, %s12382_s16  ;;  %v10648_v49 = vld [vmem:[%s12505_s14 + $0x428] sm:$0xff] }
 0x210   : > { %2233 = vrot.lane.b32.xlu0 %v10615_v15, %s12382_s16  ;;  %v10647_v15 = vld [vmem:[%s12505_s14 + $0x420] sm:$0xff] }
 0x211   : > { %v2124_v19 = vpop.permute.xlu1 %2123 }
 0x212   : > { %v2122_v52 = vpop.permute.xlu0 %2121  ;;  %2570 = vst.msk [vmem:[#allocation2 + $0x118] sm:$0xff] %vm2533_vm4, %v2124_v19 }
 0x213   : > { %2569 = vst.msk [vmem:[#allocation2 + $0x110] sm:$0xf] %vm2538_vm5, %v2122_v52  ;;  %2239 = vrot.lane.b32.xlu1 %v10618_v12, %s12382_s16  ;;  %v10650_v12 = vld [vmem:[%s12505_s14 + $0x438] sm:$0xff] }
 0x214   : > { %2237 = vrot.lane.b32.xlu0 %v10617_v16, %s12382_s16  ;;  %v10649_v16 = vld [vmem:[%s12505_s14 + $0x430] sm:$0xf] }
 0x215   : > { %v2128_v37 = vpop.permute.xlu1 %2127 }
 0x216   : > { %v2126_v6 = vpop.permute.xlu0 %2125  ;;  %2572 = vst.msk [vmem:[#allocation2 + $0x128] sm:$0xff] %vm2533_vm4, %v2128_v37 }
 0x217   : > { %2571 = vst.msk [vmem:[#allocation2 + $0x120] sm:$0xff] %vm2533_vm4, %v2126_v6  ;;  %2243 = vrot.lane.b32.xlu1 %v10620_v35, %s12382_s16  ;;  %v10652_v35 = vld [vmem:[%s12505_s14 + $0x448] sm:$0xff] }
 0x218   : > { %2241 = vrot.lane.b32.xlu0 %v10619_v36, %s12382_s16  ;;  %v10651_v36 = vld [vmem:[%s12505_s14 + $0x440] sm:$0xff] }
 0x219   : > { %v2132_v21 = vpop.permute.xlu1 %2131 }
 0x21a   : > { %v2130_v50 = vpop.permute.xlu0 %2129  ;;  %2574 = vst.msk [vmem:[#allocation2 + $0x138] sm:$0xf] %vm2538_vm5, %v2132_v21 }
 0x21b   : > { %2573 = vst.msk [vmem:[#allocation2 + $0x130] sm:$0xff] %vm2533_vm4, %v2130_v50  ;;  %2247 = vrot.lane.b32.xlu1 %v10622_v20, %s12382_s16  ;;  %v10654_v20 = vld [vmem:[%s12505_s14 + $0x458] sm:$0xf] }
 0x21c   : > { %2245 = vrot.lane.b32.xlu0 %v10621_v17, %s12382_s16  ;;  %v10653_v17 = vld [vmem:[%s12505_s14 + $0x450] sm:$0xff] }
 0x21d   : > { %v2136_v41 = vpop.permute.xlu1 %2135 }
 0x21e   : > { %v2134_v53 = vpop.permute.xlu0 %2133  ;;  %2576 = vst.msk [vmem:[#allocation2 + $0x148] sm:$0xff] %vm2533_vm4, %v2136_v41 }
 0x21f   : > { %2575 = vst.msk [vmem:[#allocation2 + $0x140] sm:$0xff] %vm2533_vm4, %v2134_v53  ;;  %2251 = vrot.lane.b32.xlu1 %v10624_v38, %s12382_s16  ;;  %v10656_v38 = vld [vmem:[%s12505_s14 + $0x468] sm:$0xff] }
 0x220   : > { %2249 = vrot.lane.b32.xlu0 %v10623_v39, %s12382_s16  ;;  %v10655_v39 = vld [vmem:[%s12505_s14 + $0x460] sm:$0xff] }
 0x221   : > { %v2140_v43 = vpop.permute.xlu1 %2139 }
 0x222   : > { %v2138_v44 = vpop.permute.xlu0 %2137  ;;  %2578 = vst.msk [vmem:[#allocation2 + $0x158] sm:$0xff] %vm2533_vm4, %v2140_v43 }
 0x223   : > { %2577 = vst.msk [vmem:[#allocation2 + $0x150] sm:$0xff] %vm2533_vm4, %v2138_v44  ;;  %2255 = vrot.lane.b32.xlu1 %v10626_v56, %s12382_s16  ;;  %v10658_v56 = vld [vmem:[%s12505_s14 + $0x478] sm:$0xff] }
 0x224   : > { %2253 = vrot.lane.b32.xlu0 %v10625_v59, %s12382_s16  ;;  %v10657_v59 = vld [vmem:[%s12505_s14 + $0x470] sm:$0xff] }
 0x225   : > { %v2144_v42 = vpop.permute.xlu1 %2143 }
 0x226   : > { %v2142_v47 = vpop.permute.xlu0 %2141  ;;  %2580 = vst.msk [vmem:[#allocation2 + $0x168] sm:$0xff] %vm2533_vm4, %v2144_v42 }
 0x227   : > { %2579 = vst.msk [vmem:[#allocation2 + $0x160] sm:$0xf] %vm2538_vm5, %v2142_v47  ;;  %2259 = vrot.lane.b32.xlu1 %v10628_v45, %s12382_s16  ;;  %v10660_v45 = vld [vmem:[%s12505_s14 + $0x488] sm:$0xff] }
 0x228   : > { %2257 = vrot.lane.b32.xlu0 %v10627_v14, %s12382_s16  ;;  %v10659_v14 = vld [vmem:[%s12505_s14 + $0x480] sm:$0xf] }
 0x229   : > { %v2148_v24 = vpop.permute.xlu1 %2147 }
 0x22a   : > { %v2146_v34 = vpop.permute.xlu0 %2145  ;;  %2582 = vst.msk [vmem:[#allocation2 + $0x178] sm:$0xff] %vm2533_vm4, %v2148_v24 }
 0x22b   : > { %2581 = vst.msk [vmem:[#allocation2 + $0x170] sm:$0xff] %vm2533_vm4, %v2146_v34  ;;  %2263 = vrot.lane.b32.xlu1 %v10630_v48, %s12382_s16  ;;  %v10662_v48 = vld [vmem:[%s12505_s14 + $0x498] sm:$0xff] }
 0x22c   : > { %2261 = vrot.lane.b32.xlu0 %v10629_v22, %s12382_s16  ;;  %v10661_v22 = vld [vmem:[%s12505_s14 + $0x490] sm:$0xff] }
 0x22d   : > { %v2152_v61 = vpop.permute.xlu1 %2151 }
 0x22e   : > { %v2150_v46 = vpop.permute.xlu0 %2149  ;;  %2584 = vst.msk [vmem:[#allocation2 + $0x188] sm:$0xf] %vm2538_vm5, %v2152_v61 }
 0x22f   : > { %2583 = vst.msk [vmem:[#allocation2 + $0x180] sm:$0xff] %vm2533_vm4, %v2150_v46  ;;  %2267 = vrot.lane.b32.xlu1 %v10632_v40, %s12382_s16  ;;  %v10664_v40 = vld [vmem:[%s12505_s14 + $0x4a8] sm:$0xf] }
 0x230   : > { %2265 = vrot.lane.b32.xlu0 %v10631_v54, %s12382_s16  ;;  %v10663_v54 = vld [vmem:[%s12505_s14 + $0x4a0] sm:$0xff] }
 0x231   : > { %v2156_v29 = vpop.permute.xlu1 %2155 }
 0x232   : > { %v2154_v10 = vpop.permute.xlu0 %2153  ;;  %2586 = vst.msk [vmem:[#allocation2 + $0x198] sm:$0xff] %vm2533_vm4, %v2156_v29 }
 0x233   : > { %2585 = vst.msk [vmem:[#allocation2 + $0x190] sm:$0xff] %vm2533_vm4, %v2154_v10  ;;  %2271 = vrot.lane.b32.xlu1 %v10634_v57, %s12382_s16  ;;  %v10666_v57 = vld [vmem:[%s12505_s14 + $0x4b8] sm:$0xff] }
 0x234   : > { %2269 = vrot.lane.b32.xlu0 %v10633_v25, %s12382_s16  ;;  %v10665_v25 = vld [vmem:[%s12505_s14 + $0x4b0] sm:$0xff] }
 0x235   : > { %v2160_v63 = vpop.permute.xlu1 %2159 }
 0x236   : > { %v2158_v27 = vpop.permute.xlu0 %2157  ;;  %2588 = vst.msk [vmem:[#allocation2 + $0x1a8] sm:$0xff] %vm2533_vm4, %v2160_v63 }
 0x237   : > { %2587 = vst.msk [vmem:[#allocation2 + $0x1a0] sm:$0xff] %vm2533_vm4, %v2158_v27  ;;  %2275 = vrot.lane.b32.xlu1 %v10636_v26, %s12382_s16  ;;  %v10668_v26 = vld [vmem:[%s12505_s14 + $0x4c8] sm:$0xff] }
 0x238   : > { %2273 = vrot.lane.b32.xlu0 %v10635_v62, %s12382_s16  ;;  %v10667_v62 = vld [vmem:[%s12505_s14 + $0x4c0] sm:$0xff] }
 0x239   : > { %v2164_v58 = vpop.permute.xlu1 %2163 }
 0x23a   : > { %v2162_v23 = vpop.permute.xlu0 %2161  ;;  %2590 = vst.msk [vmem:[#allocation2 + $0x1b8] sm:$0xff] %vm2533_vm4, %v2164_v58 }
 0x23b   : > { %2589 = vst.msk [vmem:[#allocation2 + $0x1b0] sm:$0xf] %vm2538_vm5, %v2162_v23  ;;  %2279 = vrot.lane.b32.xlu1 %v10638_v28, %s12382_s16  ;;  %v10670_v28 = vld [vmem:[%s12505_s14 + $0x4d8] sm:$0xff] }
 0x23c   : > { %2277 = vrot.lane.b32.xlu0 %v10637_v55, %s12382_s16  ;;  %v10669_v55 = vld [vmem:[%s12505_s14 + $0x4d0] sm:$0xf] }
 0x23d   : > { %v2168_v4 = vpop.permute.xlu1 %2167 }
 0x23e   : > { %v2166_v31 = vpop.permute.xlu0 %2165  ;;  %2592 = vst.msk [vmem:[#allocation2 + $0x1c8] sm:$0xff] %vm2533_vm4, %v2168_v4 }
 0x23f   : > { %2591 = vst.msk [vmem:[#allocation2 + $0x1c0] sm:$0xff] %vm2533_vm4, %v2166_v31  ;;  %2283 = vrot.lane.b32.xlu1 %v10640_v2, %s12382_s16  ;;  %v10672_v2 = vld [vmem:[%s12505_s14 + $0x4e8] sm:$0xff] }
 0x240   : > { %2281 = vrot.lane.b32.xlu0 %v10639_v60, %s12382_s16  ;;  %v10671_v60 = vld [vmem:[%s12505_s14 + $0x4e0] sm:$0xff] }
 0x241   : > { %v2172_v13 = vpop.permute.xlu1 %2171 }
 0x242   : > { %v2170_v8 = vpop.permute.xlu0 %2169  ;;  %2594 = vst.msk [vmem:[#allocation2 + $0x1d8] sm:$0xf] %vm2538_vm5, %v2172_v13 }
 0x243   : > { %2593 = vst.msk [vmem:[#allocation2 + $0x1d0] sm:$0xff] %vm2533_vm4, %v2170_v8  ;;  %2287 = vrot.lane.b32.xlu1 %v10642_v51, %s12382_s16  ;;  %v10674_v51 = vld [vmem:[%s12505_s14 + $0x4f8] sm:$0xf] }
 0x244   : > { %2285 = vrot.lane.b32.xlu0 %v10641_v7, %s12382_s16  ;;  %v10673_v7 = vld [vmem:[%s12505_s14 + $0x4f0] sm:$0xff] }
 0x245   : > { %v2176_v11 = vpop.permute.xlu1 %2175 }
 0x246   : > { %v2174_v1 = vpop.permute.xlu0 %2173  ;;  %2596 = vst.msk [vmem:[#allocation2 + $0x1e8] sm:$0xff] %vm2533_vm4, %v2176_v11 }
 0x247   : > { %2595 = vst.msk [vmem:[#allocation2 + $0x1e0] sm:$0xff] %vm2533_vm4, %v2174_v1  ;;  %2291 = vrot.lane.b32.xlu1 %v10644_v9, %s12382_s16  ;;  %v10676_v9 = vld [vmem:[%s12505_s14 + $0x508] sm:$0xff] }
 0x248   : > { %2289 = vrot.lane.b32.xlu0 %v10643_v18, %s12382_s16  ;;  %v10675_v18 = vld [vmem:[%s12505_s14 + $0x500] sm:$0xff] }
 0x249   : > { %v2180_v30 = vpop.permute.xlu1 %2179 }
 0x24a   : > { %v2178_v33 = vpop.permute.xlu0 %2177  ;;  %2598 = vst.msk [vmem:[#allocation2 + $0x1f8] sm:$0xff] %vm2533_vm4, %v2180_v30 }
 0x24b   : > { %2597 = vst.msk [vmem:[#allocation2 + $0x1f0] sm:$0xff] %vm2533_vm4, %v2178_v33  ;;  %2295 = vrot.lane.b32.xlu1 %v10646_v5, %s12382_s16  ;;  %v10678_v5 = vld [vmem:[%s12505_s14 + $0x518] sm:$0xff] }
 0x24c   : > { %2293 = vrot.lane.b32.xlu0 %v10645_v3, %s12382_s16  ;;  %v10677_v3 = vld [vmem:[%s12505_s14 + $0x510] sm:$0xff] }
 0x24d   : > { %v2184_v0 = vpop.permute.xlu1 %2183 }
 0x24e   : > { %v2182_v32 = vpop.permute.xlu0 %2181  ;;  %2600 = vst.msk [vmem:[#allocation2 + $0x208] sm:$0xff] %vm2533_vm4, %v2184_v0 }
 0x24f   : > { %2599 = vst.msk [vmem:[#allocation2 + $0x200] sm:$0xf] %vm2538_vm5, %v2182_v32  ;;  %2299 = vrot.lane.b32.xlu1 %v10648_v49, %s12382_s16  ;;  %v10680_v49 = vld [vmem:[%s12505_s14 + $0x528] sm:$0xff] }
 0x250   : > { %2297 = vrot.lane.b32.xlu0 %v10647_v15, %s12382_s16  ;;  %v10679_v15 = vld [vmem:[%s12505_s14 + $0x520] sm:$0xf] }
 0x251   : > { %v2188_v19 = vpop.permute.xlu1 %2187 }
 0x252   : > { %v2186_v52 = vpop.permute.xlu0 %2185  ;;  %2602 = vst.msk [vmem:[#allocation2 + $0x218] sm:$0xff] %vm2533_vm4, %v2188_v19 }
 0x253   : > { %2601 = vst.msk [vmem:[#allocation2 + $0x210] sm:$0xff] %vm2533_vm4, %v2186_v52  ;;  %2303 = vrot.lane.b32.xlu1 %v10650_v12, %s12382_s16  ;;  %v10682_v12 = vld [vmem:[%s12505_s14 + $0x538] sm:$0xff] }
 0x254   : > { %2301 = vrot.lane.b32.xlu0 %v10649_v16, %s12382_s16  ;;  %v10681_v16 = vld [vmem:[%s12505_s14 + $0x530] sm:$0xff] }
 0x255   : > { %v2192_v37 = vpop.permute.xlu1 %2191 }
 0x256   : > { %v2190_v6 = vpop.permute.xlu0 %2189  ;;  %2604 = vst.msk [vmem:[#allocation2 + $0x228] sm:$0xf] %vm2538_vm5, %v2192_v37 }
 0x257   : > { %2603 = vst.msk [vmem:[#allocation2 + $0x220] sm:$0xff] %vm2533_vm4, %v2190_v6  ;;  %2307 = vrot.lane.b32.xlu1 %v10652_v35, %s12382_s16  ;;  %v10684_v35 = vld [vmem:[%s12505_s14 + $0x548] sm:$0xf] }
 0x258   : > { %2305 = vrot.lane.b32.xlu0 %v10651_v36, %s12382_s16  ;;  %v10683_v36 = vld [vmem:[%s12505_s14 + $0x540] sm:$0xff] }
 0x259   : > { %v2196_v21 = vpop.permute.xlu1 %2195 }
 0x25a   : > { %v2194_v50 = vpop.permute.xlu0 %2193  ;;  %2606 = vst.msk [vmem:[#allocation2 + $0x238] sm:$0xff] %vm2533_vm4, %v2196_v21 }
 0x25b   : > { %2605 = vst.msk [vmem:[#allocation2 + $0x230] sm:$0xff] %vm2533_vm4, %v2194_v50  ;;  %2311 = vrot.lane.b32.xlu1 %v10654_v20, %s12382_s16  ;;  %v10686_v20 = vld [vmem:[%s12505_s14 + $0x80] sm:$0xff] }
 0x25c   : > { %2309 = vrot.lane.b32.xlu0 %v10653_v17, %s12382_s16  ;;  %v10685_v17 = vld [vmem:[%s12505_s14 + $0x78] sm:$0xff] }
 0x25d   : > { %v2200_v41 = vpop.permute.xlu1 %2199 }
 0x25e   : > { %v2198_v53 = vpop.permute.xlu0 %2197  ;;  %2608 = vst.msk [vmem:[#allocation2 + $0x248] sm:$0xff] %vm2533_vm4, %v2200_v41 }
 0x25f   : > { %2607 = vst.msk [vmem:[#allocation2 + $0x240] sm:$0xff] %vm2533_vm4, %v2198_v53  ;;  %2315 = vrot.lane.b32.xlu1 %v10656_v38, %s12382_s16  ;;  %v10688_v38 = vld [vmem:[%s12505_s14 + $0x90] sm:$0xff] }
 0x260   : > { %2313 = vrot.lane.b32.xlu0 %v10655_v39, %s12382_s16  ;;  %v10687_v39 = vld [vmem:[%s12505_s14 + $0x88] sm:$0xff] }
 0x261   : > { %v2204_v43 = vpop.permute.xlu1 %2203 }
 0x262   : > { %v2202_v44 = vpop.permute.xlu0 %2201  ;;  %2610 = vst.msk [vmem:[#allocation2 + $0x258] sm:$0xff] %vm2533_vm4, %v2204_v43 }
 0x263   : > { %2609 = vst.msk [vmem:[#allocation2 + $0x250] sm:$0xf] %vm2538_vm5, %v2202_v44  ;;  %2319 = vrot.lane.b32.xlu1 %v10658_v56, %s12382_s16  ;;  %v10690_v56 = vld [vmem:[%s12505_s14 + $0xa0] sm:$0xff] }
 0x264   : > { %2317 = vrot.lane.b32.xlu0 %v10657_v59, %s12382_s16  ;;  %v10689_v59 = vld [vmem:[%s12505_s14 + $0x98] sm:$0xf] }
 0x265   : > { %v2208_v42 = vpop.permute.xlu1 %2207 }
 0x266   : > { %v2206_v47 = vpop.permute.xlu0 %2205  ;;  %2612 = vst.msk [vmem:[#allocation2 + $0x268] sm:$0xff] %vm2533_vm4, %v2208_v42 }
 0x267   : > { %2611 = vst.msk [vmem:[#allocation2 + $0x260] sm:$0xff] %vm2533_vm4, %v2206_v47  ;;  %2323 = vrot.lane.b32.xlu1 %v10660_v45, %s12382_s16  ;;  %v10692_v45 = vld [vmem:[%s12505_s14 + $0xb0] sm:$0xff] }
 0x268   : > { %2321 = vrot.lane.b32.xlu0 %v10659_v14, %s12382_s16  ;;  %v10691_v14 = vld [vmem:[%s12505_s14 + $0xa8] sm:$0xff] }
 0x269   : > { %v2212_v24 = vpop.permute.xlu1 %2211 }
 0x26a   : > { %v2210_v34 = vpop.permute.xlu0 %2209  ;;  %2614 = vst.msk [vmem:[#allocation2 + $0x278] sm:$0xf] %vm2538_vm5, %v2212_v24 }
 0x26b   : > { %2613 = vst.msk [vmem:[#allocation2 + $0x270] sm:$0xff] %vm2533_vm4, %v2210_v34  ;;  %2327 = vrot.lane.b32.xlu1 %v10662_v48, %s12382_s16  ;;  %v10694_v48 = vld [vmem:[%s12505_s14 + $0xc0] sm:$0xf] }
 0x26c   : > { %2325 = vrot.lane.b32.xlu0 %v10661_v22, %s12382_s16  ;;  %v10693_v22 = vld [vmem:[%s12505_s14 + $0xb8] sm:$0xff] }
 0x26d   : > { %v2216_v61 = vpop.permute.xlu1 %2215 }
 0x26e   : > { %v2214_v46 = vpop.permute.xlu0 %2213  ;;  %2616 = vst.msk [vmem:[#allocation2 + $0x288] sm:$0xff] %vm2533_vm4, %v2216_v61 }
 0x26f   : > { %2615 = vst.msk [vmem:[#allocation2 + $0x280] sm:$0xff] %vm2533_vm4, %v2214_v46  ;;  %2331 = vrot.lane.b32.xlu1 %v10664_v40, %s12382_s16  ;;  %v10696_v40 = vld [vmem:[%s12505_s14 + $0xd0] sm:$0xff] }
 0x270   : > { %2329 = vrot.lane.b32.xlu0 %v10663_v54, %s12382_s16  ;;  %v10695_v54 = vld [vmem:[%s12505_s14 + $0xc8] sm:$0xff] }
 0x271   : > { %v2220_v29 = vpop.permute.xlu1 %2219 }
 0x272   : > { %v2218_v10 = vpop.permute.xlu0 %2217  ;;  %2618 = vst.msk [vmem:[#allocation2 + $0x298] sm:$0xff] %vm2533_vm4, %v2220_v29 }
 0x273   : > { %2617 = vst.msk [vmem:[#allocation2 + $0x290] sm:$0xff] %vm2533_vm4, %v2218_v10  ;;  %2335 = vrot.lane.b32.xlu1 %v10666_v57, %s12382_s16  ;;  %v10698_v57 = vld [vmem:[%s12505_s14 + $0xe0] sm:$0xff] }
 0x274   : > { %2333 = vrot.lane.b32.xlu0 %v10665_v25, %s12382_s16  ;;  %v10697_v25 = vld [vmem:[%s12505_s14 + $0xd8] sm:$0xff] }
 0x275   : > { %v2224_v63 = vpop.permute.xlu1 %2223 }
 0x276   : > { %v2222_v27 = vpop.permute.xlu0 %2221  ;;  %2620 = vst.msk [vmem:[#allocation2 + $0x2a8] sm:$0xff] %vm2533_vm4, %v2224_v63 }
 0x277   : > { %2619 = vst.msk [vmem:[#allocation2 + $0x2a0] sm:$0xf] %vm2538_vm5, %v2222_v27  ;;  %2339 = vrot.lane.b32.xlu1 %v10668_v26, %s12382_s16  ;;  %v10700_v26 = vld [vmem:[%s12505_s14 + $0xf0] sm:$0xff] }
 0x278   : > { %2337 = vrot.lane.b32.xlu0 %v10667_v62, %s12382_s16  ;;  %v10699_v62 = vld [vmem:[%s12505_s14 + $0xe8] sm:$0xf] }
 0x279   : > { %v2228_v58 = vpop.permute.xlu1 %2227 }
 0x27a   : > { %v2226_v23 = vpop.permute.xlu0 %2225  ;;  %2622 = vst.msk [vmem:[#allocation2 + $0x2b8] sm:$0xff] %vm2533_vm4, %v2228_v58 }
 0x27b   : > { %2621 = vst.msk [vmem:[#allocation2 + $0x2b0] sm:$0xff] %vm2533_vm4, %v2226_v23  ;;  %2343 = vrot.lane.b32.xlu1 %v10670_v28, %s12382_s16  ;;  %v10702_v28 = vld [vmem:[%s12505_s14 + $0x100] sm:$0xff] }
 0x27c   : > { %2341 = vrot.lane.b32.xlu0 %v10669_v55, %s12382_s16  ;;  %v10701_v55 = vld [vmem:[%s12505_s14 + $0xf8] sm:$0xff] }
 0x27d   : > { %v2232_v4 = vpop.permute.xlu1 %2231 }
 0x27e   : > { %v2230_v31 = vpop.permute.xlu0 %2229  ;;  %2624 = vst.msk [vmem:[#allocation2 + $0x2c8] sm:$0xf] %vm2538_vm5, %v2232_v4 }
 0x27f   : > { %2623 = vst.msk [vmem:[#allocation2 + $0x2c0] sm:$0xff] %vm2533_vm4, %v2230_v31  ;;  %2347 = vrot.lane.b32.xlu1 %v10672_v2, %s12382_s16  ;;  %v10704_v2 = vld [vmem:[%s12505_s14 + $0x110] sm:$0xf] }
 0x280   : > { %2345 = vrot.lane.b32.xlu0 %v10671_v60, %s12382_s16  ;;  %v10703_v60 = vld [vmem:[%s12505_s14 + $0x108] sm:$0xff] }
 0x281   : > { %v2236_v13 = vpop.permute.xlu1 %2235 }
 0x282   : > { %v2234_v8 = vpop.permute.xlu0 %2233  ;;  %2626 = vst.msk [vmem:[#allocation2 + $0x2d8] sm:$0xff] %vm2533_vm4, %v2236_v13 }
 0x283   : > { %2625 = vst.msk [vmem:[#allocation2 + $0x2d0] sm:$0xff] %vm2533_vm4, %v2234_v8  ;;  %2351 = vrot.lane.b32.xlu1 %v10674_v51, %s12382_s16  ;;  %v10706_v51 = vld [vmem:[%s12505_s14 + $0x120] sm:$0xff] }
 0x284   : > { %2349 = vrot.lane.b32.xlu0 %v10673_v7, %s12382_s16  ;;  %v10705_v7 = vld [vmem:[%s12505_s14 + $0x118] sm:$0xff] }
 0x285   : > { %v2240_v11 = vpop.permute.xlu1 %2239 }
 0x286   : > { %v2238_v1 = vpop.permute.xlu0 %2237  ;;  %2628 = vst.msk [vmem:[#allocation2 + $0x2e8] sm:$0xff] %vm2533_vm4, %v2240_v11 }
 0x287   : > { %2627 = vst.msk [vmem:[#allocation2 + $0x2e0] sm:$0xff] %vm2533_vm4, %v2238_v1  ;;  %2355 = vrot.lane.b32.xlu1 %v10676_v9, %s12382_s16  ;;  %v10708_v9 = vld [vmem:[%s12505_s14 + $0x130] sm:$0xff] }
 0x288   : > { %2353 = vrot.lane.b32.xlu0 %v10675_v18, %s12382_s16  ;;  %v10707_v18 = vld [vmem:[%s12505_s14 + $0x128] sm:$0xff] }
 0x289   : > { %v2244_v30 = vpop.permute.xlu1 %2243 }
 0x28a   : > { %v2242_v33 = vpop.permute.xlu0 %2241  ;;  %2630 = vst.msk [vmem:[#allocation2 + $0x2f8] sm:$0xff] %vm2533_vm4, %v2244_v30 }
 0x28b   : > { %2629 = vst.msk [vmem:[#allocation2 + $0x2f0] sm:$0xf] %vm2538_vm5, %v2242_v33  ;;  %2359 = vrot.lane.b32.xlu1 %v10678_v5, %s12382_s16  ;;  %v10710_v5 = vld [vmem:[%s12505_s14 + $0x140] sm:$0xff] }
 0x28c   : > { %2357 = vrot.lane.b32.xlu0 %v10677_v3, %s12382_s16  ;;  %v10709_v3 = vld [vmem:[%s12505_s14 + $0x138] sm:$0xf] }
 0x28d   : > { %v2248_v0 = vpop.permute.xlu1 %2247 }
 0x28e   : > { %v2246_v32 = vpop.permute.xlu0 %2245  ;;  %2632 = vst.msk [vmem:[#allocation2 + $0x308] sm:$0xff] %vm2533_vm4, %v2248_v0 }
 0x28f   : > { %2631 = vst.msk [vmem:[#allocation2 + $0x300] sm:$0xff] %vm2533_vm4, %v2246_v32  ;;  %2363 = vrot.lane.b32.xlu1 %v10680_v49, %s12382_s16  ;;  %v10712_v49 = vld [vmem:[%s12505_s14 + $0x150] sm:$0xff] }
 0x290   : > { %2361 = vrot.lane.b32.xlu0 %v10679_v15, %s12382_s16  ;;  %v10711_v15 = vld [vmem:[%s12505_s14 + $0x148] sm:$0xff] }
 0x291   : > { %v2252_v19 = vpop.permute.xlu1 %2251 }
 0x292   : > { %v2250_v52 = vpop.permute.xlu0 %2249  ;;  %2634 = vst.msk [vmem:[#allocation2 + $0x318] sm:$0xf] %vm2538_vm5, %v2252_v19 }
 0x293   : > { %2633 = vst.msk [vmem:[#allocation2 + $0x310] sm:$0xff] %vm2533_vm4, %v2250_v52  ;;  %2367 = vrot.lane.b32.xlu1 %v10682_v12, %s12382_s16  ;;  %v10714_v12 = vld [vmem:[%s12505_s14 + $0x160] sm:$0xf] }
 0x294   : > { %2365 = vrot.lane.b32.xlu0 %v10681_v16, %s12382_s16  ;;  %v10713_v16 = vld [vmem:[%s12505_s14 + $0x158] sm:$0xff] }
 0x295   : > { %v2256_v37 = vpop.permute.xlu1 %2255 }
 0x296   : > { %v2254_v6 = vpop.permute.xlu0 %2253  ;;  %2636 = vst.msk [vmem:[#allocation2 + $0x328] sm:$0xff] %vm2533_vm4, %v2256_v37 }
 0x297   : > { %2635 = vst.msk [vmem:[#allocation2 + $0x320] sm:$0xff] %vm2533_vm4, %v2254_v6  ;;  %2371 = vrot.lane.b32.xlu1 %v10684_v35, %s12382_s16  ;;  %v10716_v35 = vld [vmem:[%s12505_s14 + $0x170] sm:$0xff] }
 0x298   : > { %2369 = vrot.lane.b32.xlu0 %v10683_v36, %s12382_s16  ;;  %v10715_v36 = vld [vmem:[%s12505_s14 + $0x168] sm:$0xff] }
 0x299   : > { %v2260_v21 = vpop.permute.xlu1 %2259 }
 0x29a   : > { %v2258_v50 = vpop.permute.xlu0 %2257  ;;  %2638 = vst.msk [vmem:[#allocation2 + $0x338] sm:$0xff] %vm2533_vm4, %v2260_v21 }
 0x29b   : > { %2637 = vst.msk [vmem:[#allocation2 + $0x330] sm:$0xff] %vm2533_vm4, %v2258_v50  ;;  %3018 = vrot.lane.b32.xlu1 %v10686_v20, %s12383_s22  ;;  %v10718_v20 = vld [vmem:[%s12505_s14 + $0x180] sm:$0xff] }
 0x29c   : > { %3016 = vrot.lane.b32.xlu0 %v10685_v17, %s12383_s22  ;;  %v10717_v17 = vld [vmem:[%s12505_s14 + $0x178] sm:$0xff] }
 0x29d   : > { %v2264_v41 = vpop.permute.xlu1 %2263 }
 0x29e   : > { %v2262_v53 = vpop.permute.xlu0 %2261  ;;  %2640 = vst.msk [vmem:[#allocation2 + $0x348] sm:$0xff] %vm2533_vm4, %v2264_v41 }
 0x29f   : > { %2639 = vst.msk [vmem:[#allocation2 + $0x340] sm:$0xf] %vm2538_vm5, %v2262_v53  ;;  %3022 = vrot.lane.b32.xlu1 %v10688_v38, %s12383_s22  ;;  %v10720_v38 = vld [vmem:[%s12505_s14 + $0x190] sm:$0xff] }
 0x2a0   : > { %3020 = vrot.lane.b32.xlu0 %v10687_v39, %s12383_s22  ;;  %v10719_v39 = vld [vmem:[%s12505_s14 + $0x188] sm:$0xf] }
 0x2a1   : > { %v2268_v43 = vpop.permute.xlu1 %2267 }
 0x2a2   : > { %v2266_v44 = vpop.permute.xlu0 %2265  ;;  %2642 = vst.msk [vmem:[#allocation2 + $0x358] sm:$0xff] %vm2533_vm4, %v2268_v43 }
 0x2a3   : > { %2641 = vst.msk [vmem:[#allocation2 + $0x350] sm:$0xff] %vm2533_vm4, %v2266_v44  ;;  %3026 = vrot.lane.b32.xlu1 %v10690_v56, %s12383_s22  ;;  %v10722_v56 = vld [vmem:[%s12505_s14 + $0x1a0] sm:$0xff] }
 0x2a4   : > { %3024 = vrot.lane.b32.xlu0 %v10689_v59, %s12383_s22  ;;  %v10721_v59 = vld [vmem:[%s12505_s14 + $0x198] sm:$0xff] }
 0x2a5   : > { %v2272_v42 = vpop.permute.xlu1 %2271 }
 0x2a6   : > { %v2270_v47 = vpop.permute.xlu0 %2269  ;;  %2644 = vst.msk [vmem:[#allocation2 + $0x368] sm:$0xf] %vm2538_vm5, %v2272_v42 }
 0x2a7   : > { %2643 = vst.msk [vmem:[#allocation2 + $0x360] sm:$0xff] %vm2533_vm4, %v2270_v47  ;;  %3030 = vrot.lane.b32.xlu1 %v10692_v45, %s12383_s22  ;;  %v10724_v45 = vld [vmem:[%s12505_s14 + $0x1b0] sm:$0xf] }
 0x2a8   : > { %3028 = vrot.lane.b32.xlu0 %v10691_v14, %s12383_s22  ;;  %v10723_v14 = vld [vmem:[%s12505_s14 + $0x1a8] sm:$0xff] }
 0x2a9   : > { %v2276_v24 = vpop.permute.xlu1 %2275 }
 0x2aa   : > { %v2274_v34 = vpop.permute.xlu0 %2273  ;;  %2646 = vst.msk [vmem:[#allocation2 + $0x378] sm:$0xff] %vm2533_vm4, %v2276_v24 }
 0x2ab   : > { %2645 = vst.msk [vmem:[#allocation2 + $0x370] sm:$0xff] %vm2533_vm4, %v2274_v34  ;;  %3034 = vrot.lane.b32.xlu1 %v10694_v48, %s12383_s22  ;;  %v10726_v48 = vld [vmem:[%s12505_s14 + $0x1c0] sm:$0xff] }
 0x2ac   : > { %3032 = vrot.lane.b32.xlu0 %v10693_v22, %s12383_s22  ;;  %v10725_v22 = vld [vmem:[%s12505_s14 + $0x1b8] sm:$0xff] }
 0x2ad   : > { %v2280_v61 = vpop.permute.xlu1 %2279 }
 0x2ae   : > { %v2278_v46 = vpop.permute.xlu0 %2277  ;;  %2648 = vst.msk [vmem:[#allocation2 + $0x388] sm:$0xff] %vm2533_vm4, %v2280_v61 }
 0x2af   : > { %2647 = vst.msk [vmem:[#allocation2 + $0x380] sm:$0xff] %vm2533_vm4, %v2278_v46  ;;  %3038 = vrot.lane.b32.xlu1 %v10696_v40, %s12383_s22  ;;  %v10728_v40 = vld [vmem:[%s12505_s14 + $0x1d0] sm:$0xff] }
 0x2b0   : > { %3036 = vrot.lane.b32.xlu0 %v10695_v54, %s12383_s22  ;;  %v10727_v54 = vld [vmem:[%s12505_s14 + $0x1c8] sm:$0xff] }
 0x2b1   : > { %v2284_v29 = vpop.permute.xlu1 %2283 }
 0x2b2   : > { %v2282_v10 = vpop.permute.xlu0 %2281  ;;  %2650 = vst.msk [vmem:[#allocation2 + $0x398] sm:$0xff] %vm2533_vm4, %v2284_v29 }
 0x2b3   : > { %2649 = vst.msk [vmem:[#allocation2 + $0x390] sm:$0xf] %vm2538_vm5, %v2282_v10  ;;  %3042 = vrot.lane.b32.xlu1 %v10698_v57, %s12383_s22  ;;  %v10730_v57 = vld [vmem:[%s12505_s14 + $0x1e0] sm:$0xff] }
 0x2b4   : > { %3040 = vrot.lane.b32.xlu0 %v10697_v25, %s12383_s22  ;;  %v10729_v25 = vld [vmem:[%s12505_s14 + $0x1d8] sm:$0xf] }
 0x2b5   : > { %v2288_v63 = vpop.permute.xlu1 %2287 }
 0x2b6   : > { %v2286_v27 = vpop.permute.xlu0 %2285  ;;  %2652 = vst.msk [vmem:[#allocation2 + $0x3a8] sm:$0xff] %vm2533_vm4, %v2288_v63 }
 0x2b7   : > { %2651 = vst.msk [vmem:[#allocation2 + $0x3a0] sm:$0xff] %vm2533_vm4, %v2286_v27  ;;  %3046 = vrot.lane.b32.xlu1 %v10700_v26, %s12383_s22  ;;  %v10732_v26 = vld [vmem:[%s12505_s14 + $0x1f0] sm:$0xff] }
 0x2b8   : > { %3044 = vrot.lane.b32.xlu0 %v10699_v62, %s12383_s22  ;;  %v10731_v62 = vld [vmem:[%s12505_s14 + $0x1e8] sm:$0xff] }
 0x2b9   : > { %v2292_v58 = vpop.permute.xlu1 %2291 }
 0x2ba   : > { %v2290_v23 = vpop.permute.xlu0 %2289  ;;  %2654 = vst.msk [vmem:[#allocation2 + $0x3b8] sm:$0xf] %vm2538_vm5, %v2292_v58 }
 0x2bb   : > { %2653 = vst.msk [vmem:[#allocation2 + $0x3b0] sm:$0xff] %vm2533_vm4, %v2290_v23  ;;  %3050 = vrot.lane.b32.xlu1 %v10702_v28, %s12383_s22  ;;  %v10734_v28 = vld [vmem:[%s12505_s14 + $0x200] sm:$0xf] }
 0x2bc   : > { %3048 = vrot.lane.b32.xlu0 %v10701_v55, %s12383_s22  ;;  %v10733_v55 = vld [vmem:[%s12505_s14 + $0x1f8] sm:$0xff] }
 0x2bd   : > { %v2296_v4 = vpop.permute.xlu1 %2295 }
 0x2be   : > { %v2294_v31 = vpop.permute.xlu0 %2293  ;;  %2656 = vst.msk [vmem:[#allocation2 + $0x3c8] sm:$0xff] %vm2533_vm4, %v2296_v4 }
 0x2bf   : > { %2655 = vst.msk [vmem:[#allocation2 + $0x3c0] sm:$0xff] %vm2533_vm4, %v2294_v31  ;;  %3054 = vrot.lane.b32.xlu1 %v10704_v2, %s12383_s22  ;;  %v10736_v2 = vld [vmem:[%s12505_s14 + $0x210] sm:$0xff] }
 0x2c0   : > { %3052 = vrot.lane.b32.xlu0 %v10703_v60, %s12383_s22  ;;  %v10735_v60 = vld [vmem:[%s12505_s14 + $0x208] sm:$0xff] }
 0x2c1   : > { %v2300_v13 = vpop.permute.xlu1 %2299 }
 0x2c2   : > { %v2298_v8 = vpop.permute.xlu0 %2297  ;;  %2658 = vst.msk [vmem:[#allocation2 + $0x3d8] sm:$0xff] %vm2533_vm4, %v2300_v13 }
 0x2c3   : > { %2657 = vst.msk [vmem:[#allocation2 + $0x3d0] sm:$0xff] %vm2533_vm4, %v2298_v8  ;;  %3058 = vrot.lane.b32.xlu1 %v10706_v51, %s12383_s22  ;;  %v10738_v51 = vld [vmem:[%s12505_s14 + $0x220] sm:$0xff] }
 0x2c4   : > { %3056 = vrot.lane.b32.xlu0 %v10705_v7, %s12383_s22  ;;  %v10737_v7 = vld [vmem:[%s12505_s14 + $0x218] sm:$0xff] }
 0x2c5   : > { %v2304_v11 = vpop.permute.xlu1 %2303 }
 0x2c6   : > { %v2302_v1 = vpop.permute.xlu0 %2301  ;;  %2660 = vst.msk [vmem:[#allocation2 + $0x3e8] sm:$0xff] %vm2533_vm4, %v2304_v11 }
 0x2c7   : > { %2659 = vst.msk [vmem:[#allocation2 + $0x3e0] sm:$0xf] %vm2538_vm5, %v2302_v1  ;;  %3062 = vrot.lane.b32.xlu1 %v10708_v9, %s12383_s22  ;;  %v10740_v9 = vld [vmem:[%s12505_s14 + $0x230] sm:$0xff] }
 0x2c8   : > { %3060 = vrot.lane.b32.xlu0 %v10707_v18, %s12383_s22  ;;  %v10739_v18 = vld [vmem:[%s12505_s14 + $0x228] sm:$0xf] }
 0x2c9   : > { %v2308_v30 = vpop.permute.xlu1 %2307 }
 0x2ca   : > { %v2306_v33 = vpop.permute.xlu0 %2305  ;;  %2662 = vst.msk [vmem:[#allocation2 + $0x3f8] sm:$0xff] %vm2533_vm4, %v2308_v30 }
 0x2cb   : > { %2661 = vst.msk [vmem:[#allocation2 + $0x3f0] sm:$0xff] %vm2533_vm4, %v2306_v33  ;;  %3066 = vrot.lane.b32.xlu1 %v10710_v5, %s12383_s22  ;;  %v10742_v5 = vld [vmem:[%s12505_s14 + $0x240] sm:$0xff] }
 0x2cc   : > { %3064 = vrot.lane.b32.xlu0 %v10709_v3, %s12383_s22  ;;  %v10741_v3 = vld [vmem:[%s12505_s14 + $0x238] sm:$0xff] }
 0x2cd   : > { %v2312_v0 = vpop.permute.xlu1 %2311 }
 0x2ce   : > { %v2310_v32 = vpop.permute.xlu0 %2309  ;;  %2664 = vst.msk [vmem:[#allocation2 + $0x408] sm:$0xf] %vm2538_vm5, %v2312_v0 }
 0x2cf   : > { %2663 = vst.msk [vmem:[#allocation2 + $0x400] sm:$0xff] %vm2533_vm4, %v2310_v32  ;;  %3070 = vrot.lane.b32.xlu1 %v10712_v49, %s12383_s22  ;;  %v10744_v49 = vld [vmem:[%s12505_s14 + $0x250] sm:$0xf] }
 0x2d0   : > { %3068 = vrot.lane.b32.xlu0 %v10711_v15, %s12383_s22  ;;  %v10743_v15 = vld [vmem:[%s12505_s14 + $0x248] sm:$0xff] }
 0x2d1   : > { %v2316_v19 = vpop.permute.xlu1 %2315 }
 0x2d2   : > { %v2314_v52 = vpop.permute.xlu0 %2313  ;;  %2666 = vst.msk [vmem:[#allocation2 + $0x418] sm:$0xff] %vm2533_vm4, %v2316_v19 }
 0x2d3   : > { %2665 = vst.msk [vmem:[#allocation2 + $0x410] sm:$0xff] %vm2533_vm4, %v2314_v52  ;;  %3074 = vrot.lane.b32.xlu1 %v10714_v12, %s12383_s22  ;;  %v10746_v12 = vld [vmem:[%s12505_s14 + $0x260] sm:$0xff] }
 0x2d4   : > { %3072 = vrot.lane.b32.xlu0 %v10713_v16, %s12383_s22  ;;  %v10745_v16 = vld [vmem:[%s12505_s14 + $0x258] sm:$0xff] }
 0x2d5   : > { %v2320_v37 = vpop.permute.xlu1 %2319 }
 0x2d6   : > { %v2318_v6 = vpop.permute.xlu0 %2317  ;;  %2668 = vst.msk [vmem:[#allocation2 + $0x428] sm:$0xff] %vm2533_vm4, %v2320_v37 }
 0x2d7   : > { %2667 = vst.msk [vmem:[#allocation2 + $0x420] sm:$0xff] %vm2533_vm4, %v2318_v6  ;;  %3078 = vrot.lane.b32.xlu1 %v10716_v35, %s12383_s22  ;;  %v10748_v35 = vld [vmem:[%s12505_s14 + $0x270] sm:$0xff] }
 0x2d8   : > { %3076 = vrot.lane.b32.xlu0 %v10715_v36, %s12383_s22  ;;  %v10747_v36 = vld [vmem:[%s12505_s14 + $0x268] sm:$0xff] }
 0x2d9   : > { %v2324_v21 = vpop.permute.xlu1 %2323 }
 0x2da   : > { %v2322_v50 = vpop.permute.xlu0 %2321  ;;  %2670 = vst.msk [vmem:[#allocation2 + $0x438] sm:$0xff] %vm2533_vm4, %v2324_v21 }
 0x2db   : > { %2669 = vst.msk [vmem:[#allocation2 + $0x430] sm:$0xf] %vm2538_vm5, %v2322_v50  ;;  %3082 = vrot.lane.b32.xlu1 %v10718_v20, %s12383_s22  ;;  %v10750_v20 = vld [vmem:[%s12505_s14 + $0x280] sm:$0xff] }
 0x2dc   : > { %3080 = vrot.lane.b32.xlu0 %v10717_v17, %s12383_s22  ;;  %v10749_v17 = vld [vmem:[%s12505_s14 + $0x278] sm:$0xf] }
 0x2dd   : > { %v2328_v41 = vpop.permute.xlu1 %2327 }
 0x2de   : > { %v2326_v53 = vpop.permute.xlu0 %2325  ;;  %2672 = vst.msk [vmem:[#allocation2 + $0x448] sm:$0xff] %vm2533_vm4, %v2328_v41 }
 0x2df   : > { %2671 = vst.msk [vmem:[#allocation2 + $0x440] sm:$0xff] %vm2533_vm4, %v2326_v53  ;;  %3086 = vrot.lane.b32.xlu1 %v10720_v38, %s12383_s22  ;;  %v10752_v38 = vld [vmem:[%s12505_s14 + $0x290] sm:$0xff] }
 0x2e0   : > { %3084 = vrot.lane.b32.xlu0 %v10719_v39, %s12383_s22  ;;  %v10751_v39 = vld [vmem:[%s12505_s14 + $0x288] sm:$0xff] }
 0x2e1   : > { %v2332_v43 = vpop.permute.xlu1 %2331 }
 0x2e2   : > { %v2330_v44 = vpop.permute.xlu0 %2329  ;;  %2674 = vst.msk [vmem:[#allocation2 + $0x458] sm:$0xf] %vm2538_vm5, %v2332_v43 }
 0x2e3   : > { %2673 = vst.msk [vmem:[#allocation2 + $0x450] sm:$0xff] %vm2533_vm4, %v2330_v44  ;;  %3090 = vrot.lane.b32.xlu1 %v10722_v56, %s12383_s22  ;;  %v10754_v56 = vld [vmem:[%s12505_s14 + $0x2a0] sm:$0xf] }
 0x2e4   : > { %3088 = vrot.lane.b32.xlu0 %v10721_v59, %s12383_s22  ;;  %v10753_v59 = vld [vmem:[%s12505_s14 + $0x298] sm:$0xff] }
 0x2e5   : > { %v2336_v42 = vpop.permute.xlu1 %2335 }
 0x2e6   : > { %v2334_v47 = vpop.permute.xlu0 %2333  ;;  %2676 = vst.msk [vmem:[#allocation2 + $0x468] sm:$0xff] %vm2533_vm4, %v2336_v42 }
 0x2e7   : > { %2675 = vst.msk [vmem:[#allocation2 + $0x460] sm:$0xff] %vm2533_vm4, %v2334_v47  ;;  %3094 = vrot.lane.b32.xlu1 %v10724_v45, %s12383_s22  ;;  %v10756_v45 = vld [vmem:[%s12505_s14 + $0x2b0] sm:$0xff] }
 0x2e8   : > { %3092 = vrot.lane.b32.xlu0 %v10723_v14, %s12383_s22  ;;  %v10755_v14 = vld [vmem:[%s12505_s14 + $0x2a8] sm:$0xff] }
 0x2e9   : > { %v2340_v24 = vpop.permute.xlu1 %2339 }
 0x2ea   : > { %v2338_v34 = vpop.permute.xlu0 %2337  ;;  %2678 = vst.msk [vmem:[#allocation2 + $0x478] sm:$0xff] %vm2533_vm4, %v2340_v24 }
 0x2eb   : > { %2677 = vst.msk [vmem:[#allocation2 + $0x470] sm:$0xff] %vm2533_vm4, %v2338_v34  ;;  %3098 = vrot.lane.b32.xlu1 %v10726_v48, %s12383_s22  ;;  %v10758_v48 = vld [vmem:[%s12505_s14 + $0x2c0] sm:$0xff] }
 0x2ec   : > { %3096 = vrot.lane.b32.xlu0 %v10725_v22, %s12383_s22  ;;  %v10757_v22 = vld [vmem:[%s12505_s14 + $0x2b8] sm:$0xff] }
 0x2ed   : > { %v2344_v61 = vpop.permute.xlu1 %2343 }
 0x2ee   : > { %v2342_v46 = vpop.permute.xlu0 %2341  ;;  %2680 = vst.msk [vmem:[#allocation2 + $0x488] sm:$0xff] %vm2533_vm4, %v2344_v61 }
 0x2ef   : > { %2679 = vst.msk [vmem:[#allocation2 + $0x480] sm:$0xf] %vm2538_vm5, %v2342_v46  ;;  %3102 = vrot.lane.b32.xlu1 %v10728_v40, %s12383_s22  ;;  %v10760_v40 = vld [vmem:[%s12505_s14 + $0x2d0] sm:$0xff] }
 0x2f0   : > { %3100 = vrot.lane.b32.xlu0 %v10727_v54, %s12383_s22  ;;  %v10759_v54 = vld [vmem:[%s12505_s14 + $0x2c8] sm:$0xf] }
 0x2f1   : > { %v2348_v29 = vpop.permute.xlu1 %2347 }
 0x2f2   : > { %v2346_v10 = vpop.permute.xlu0 %2345  ;;  %2682 = vst.msk [vmem:[#allocation2 + $0x498] sm:$0xff] %vm2533_vm4, %v2348_v29 }
 0x2f3   : > { %2681 = vst.msk [vmem:[#allocation2 + $0x490] sm:$0xff] %vm2533_vm4, %v2346_v10  ;;  %3106 = vrot.lane.b32.xlu1 %v10730_v57, %s12383_s22  ;;  %v10762_v57 = vld [vmem:[%s12505_s14 + $0x2e0] sm:$0xff] }
 0x2f4   : > { %3104 = vrot.lane.b32.xlu0 %v10729_v25, %s12383_s22  ;;  %v10761_v25 = vld [vmem:[%s12505_s14 + $0x2d8] sm:$0xff] }
 0x2f5   : > { %v2352_v63 = vpop.permute.xlu1 %2351 }
 0x2f6   : > { %v2350_v27 = vpop.permute.xlu0 %2349  ;;  %2684 = vst.msk [vmem:[#allocation2 + $0x4a8] sm:$0xf] %vm2538_vm5, %v2352_v63 }
 0x2f7   : > { %2683 = vst.msk [vmem:[#allocation2 + $0x4a0] sm:$0xff] %vm2533_vm4, %v2350_v27  ;;  %3110 = vrot.lane.b32.xlu1 %v10732_v26, %s12383_s22  ;;  %v10764_v26 = vld [vmem:[%s12505_s14 + $0x2f0] sm:$0xf] }
 0x2f8   : > { %3108 = vrot.lane.b32.xlu0 %v10731_v62, %s12383_s22  ;;  %v10763_v62 = vld [vmem:[%s12505_s14 + $0x2e8] sm:$0xff] }
 0x2f9   : > { %v2356_v58 = vpop.permute.xlu1 %2355 }
 0x2fa   : > { %v2354_v23 = vpop.permute.xlu0 %2353  ;;  %2686 = vst.msk [vmem:[#allocation2 + $0x4b8] sm:$0xff] %vm2533_vm4, %v2356_v58 }
 0x2fb   : > { %2685 = vst.msk [vmem:[#allocation2 + $0x4b0] sm:$0xff] %vm2533_vm4, %v2354_v23  ;;  %3114 = vrot.lane.b32.xlu1 %v10734_v28, %s12383_s22  ;;  %v10766_v28 = vld [vmem:[%s12505_s14 + $0x300] sm:$0xff] }
 0x2fc   : > { %3112 = vrot.lane.b32.xlu0 %v10733_v55, %s12383_s22  ;;  %v10765_v55 = vld [vmem:[%s12505_s14 + $0x2f8] sm:$0xff] }
 0x2fd   : > { %v2360_v4 = vpop.permute.xlu1 %2359 }
 0x2fe   : > { %v2358_v31 = vpop.permute.xlu0 %2357  ;;  %2688 = vst.msk [vmem:[#allocation2 + $0x4c8] sm:$0xff] %vm2533_vm4, %v2360_v4 }
 0x2ff   : > { %2687 = vst.msk [vmem:[#allocation2 + $0x4c0] sm:$0xff] %vm2533_vm4, %v2358_v31  ;;  %3118 = vrot.lane.b32.xlu1 %v10736_v2, %s12383_s22  ;;  %v10768_v2 = vld [vmem:[%s12505_s14 + $0x310] sm:$0xff] }
 0x300   : > { %3116 = vrot.lane.b32.xlu0 %v10735_v60, %s12383_s22  ;;  %v10767_v60 = vld [vmem:[%s12505_s14 + $0x308] sm:$0xff] }
 0x301   : > { %v2364_v13 = vpop.permute.xlu1 %2363 }
 0x302   : > { %v2362_v8 = vpop.permute.xlu0 %2361  ;;  %2690 = vst.msk [vmem:[#allocation2 + $0x4d8] sm:$0xff] %vm2533_vm4, %v2364_v13 }
 0x303   : > { %2689 = vst.msk [vmem:[#allocation2 + $0x4d0] sm:$0xf] %vm2538_vm5, %v2362_v8  ;;  %3122 = vrot.lane.b32.xlu1 %v10738_v51, %s12383_s22  ;;  %v10770_v51 = vld [vmem:[%s12505_s14 + $0x320] sm:$0xff] }
 0x304   : > { %3120 = vrot.lane.b32.xlu0 %v10737_v7, %s12383_s22  ;;  %v10769_v7 = vld [vmem:[%s12505_s14 + $0x318] sm:$0xf] }
 0x305   : > { %v2368_v11 = vpop.permute.xlu1 %2367 }
 0x306   : > { %v2366_v1 = vpop.permute.xlu0 %2365  ;;  %2692 = vst.msk [vmem:[#allocation2 + $0x4e8] sm:$0xff] %vm2533_vm4, %v2368_v11 }
 0x307   : > { %2691 = vst.msk [vmem:[#allocation2 + $0x4e0] sm:$0xff] %vm2533_vm4, %v2366_v1  ;;  %3126 = vrot.lane.b32.xlu1 %v10740_v9, %s12383_s22  ;;  %v10772_v9 = vld [vmem:[%s12505_s14 + $0x330] sm:$0xff] }
 0x308   : > { %3124 = vrot.lane.b32.xlu0 %v10739_v18, %s12383_s22  ;;  %v10771_v18 = vld [vmem:[%s12505_s14 + $0x328] sm:$0xff] }
 0x309   : > { %v2372_v30 = vpop.permute.xlu1 %2371 }
 0x30a   : > { %v2370_v33 = vpop.permute.xlu0 %2369  ;;  %2694 = vst.msk [vmem:[#allocation2 + $0x4f8] sm:$0xf] %vm2538_vm5, %v2372_v30 }
 0x30b   : > { %2693 = vst.msk [vmem:[#allocation2 + $0x4f0] sm:$0xff] %vm2533_vm4, %v2370_v33  ;;  %3130 = vrot.lane.b32.xlu1 %v10742_v5, %s12383_s22  ;;  %v10774_v5 = vld [vmem:[%s12505_s14 + $0x340] sm:$0xf] }
 0x30c   : > { %3128 = vrot.lane.b32.xlu0 %v10741_v3, %s12383_s22  ;;  %v10773_v3 = vld [vmem:[%s12505_s14 + $0x338] sm:$0xff] }
 0x30d   : > { %v3019_v0 = vpop.permute.xlu1 %3018 }
 0x30e   : > { %v3017_v32 = vpop.permute.xlu0 %3016  ;;  %3498 = vst.msk [vmem:[#allocation2 + $0x8] sm:$0xff] %vm3496_vm6, %v3019_v0 }
 0x30f   : > { %3497 = vst.msk [vmem:[#allocation2] sm:$0xff] %vm3496_vm6, %v3017_v32  ;;  %3134 = vrot.lane.b32.xlu1 %v10744_v49, %s12383_s22  ;;  %v10776_v49 = vld [vmem:[%s12505_s14 + $0x350] sm:$0xff] }
 0x310   : > { %3132 = vrot.lane.b32.xlu0 %v10743_v15, %s12383_s22  ;;  %v10775_v15 = vld [vmem:[%s12505_s14 + $0x348] sm:$0xff] }
 0x311   : > { %v3023_v19 = vpop.permute.xlu1 %3022 }
 0x312   : > { %v3021_v52 = vpop.permute.xlu0 %3020  ;;  %3500 = vst.msk [vmem:[#allocation2 + $0x18] sm:$0xff] %vm3496_vm6, %v3023_v19 }
 0x313   : > { %3499 = vst.msk [vmem:[#allocation2 + $0x10] sm:$0xff] %vm3496_vm6, %v3021_v52  ;;  %3138 = vrot.lane.b32.xlu1 %v10746_v12, %s12383_s22  ;;  %v10778_v12 = vld [vmem:[%s12505_s14 + $0x360] sm:$0xff] }
 0x314   : > { %3136 = vrot.lane.b32.xlu0 %v10745_v16, %s12383_s22  ;;  %v10777_v16 = vld [vmem:[%s12505_s14 + $0x358] sm:$0xff] }
 0x315   : > { %v3027_v37 = vpop.permute.xlu1 %3026 }
 0x316   : > { %v3025_v6 = vpop.permute.xlu0 %3024  ;;  %3503 = vst.msk [vmem:[#allocation2 + $0x28] sm:$0xff] %vm3496_vm6, %v3027_v37 }
 0x317   : > { %3502 = vst.msk [vmem:[#allocation2 + $0x20] sm:$0xf] %vm3501_vm7, %v3025_v6  ;;  %3142 = vrot.lane.b32.xlu1 %v10748_v35, %s12383_s22  ;;  %v10780_v35 = vld [vmem:[%s12505_s14 + $0x370] sm:$0xff] }
 0x318   : > { %3140 = vrot.lane.b32.xlu0 %v10747_v36, %s12383_s22  ;;  %v10779_v36 = vld [vmem:[%s12505_s14 + $0x368] sm:$0xf] }
 0x319   : > { %v3031_v21 = vpop.permute.xlu1 %3030 }
 0x31a   : > { %v3029_v50 = vpop.permute.xlu0 %3028  ;;  %3505 = vst.msk [vmem:[#allocation2 + $0x38] sm:$0xff] %vm3496_vm6, %v3031_v21 }
 0x31b   : > { %3504 = vst.msk [vmem:[#allocation2 + $0x30] sm:$0xff] %vm3496_vm6, %v3029_v50  ;;  %3146 = vrot.lane.b32.xlu1 %v10750_v20, %s12383_s22  ;;  %v10782_v20 = vld [vmem:[%s12505_s14 + $0x380] sm:$0xff] }
 0x31c   : > { %3144 = vrot.lane.b32.xlu0 %v10749_v17, %s12383_s22  ;;  %v10781_v17 = vld [vmem:[%s12505_s14 + $0x378] sm:$0xff] }
 0x31d   : > { %v3035_v41 = vpop.permute.xlu1 %3034 }
 0x31e   : > { %v3033_v53 = vpop.permute.xlu0 %3032  ;;  %3507 = vst.msk [vmem:[#allocation2 + $0x48] sm:$0xf] %vm3501_vm7, %v3035_v41 }
 0x31f   : > { %3506 = vst.msk [vmem:[#allocation2 + $0x40] sm:$0xff] %vm3496_vm6, %v3033_v53  ;;  %3150 = vrot.lane.b32.xlu1 %v10752_v38, %s12383_s22  ;;  %v10784_v38 = vld [vmem:[%s12505_s14 + $0x390] sm:$0xf] }
 0x320   : > { %3148 = vrot.lane.b32.xlu0 %v10751_v39, %s12383_s22  ;;  %v10783_v39 = vld [vmem:[%s12505_s14 + $0x388] sm:$0xff] }
 0x321   : > { %v3039_v43 = vpop.permute.xlu1 %3038 }
 0x322   : > { %v3037_v44 = vpop.permute.xlu0 %3036  ;;  %3509 = vst.msk [vmem:[#allocation2 + $0x58] sm:$0xff] %vm3496_vm6, %v3039_v43 }
 0x323   : > { %3508 = vst.msk [vmem:[#allocation2 + $0x50] sm:$0xff] %vm3496_vm6, %v3037_v44  ;;  %3154 = vrot.lane.b32.xlu1 %v10754_v56, %s12383_s22  ;;  %v10786_v56 = vld [vmem:[%s12505_s14 + $0x3a0] sm:$0xff] }
 0x324   : > { %3152 = vrot.lane.b32.xlu0 %v10753_v59, %s12383_s22  ;;  %v10785_v59 = vld [vmem:[%s12505_s14 + $0x398] sm:$0xff] }
 0x325   : > { %v3043_v42 = vpop.permute.xlu1 %3042 }
 0x326   : > { %v3041_v47 = vpop.permute.xlu0 %3040  ;;  %3511 = vst.msk [vmem:[#allocation2 + $0x68] sm:$0xff] %vm3496_vm6, %v3043_v42 }
 0x327   : > { %3510 = vst.msk [vmem:[#allocation2 + $0x60] sm:$0xff] %vm3496_vm6, %v3041_v47  ;;  %3158 = vrot.lane.b32.xlu1 %v10756_v45, %s12383_s22  ;;  %v10788_v45 = vld [vmem:[%s12505_s14 + $0x3b0] sm:$0xff] }
 0x328   : > { %3156 = vrot.lane.b32.xlu0 %v10755_v14, %s12383_s22  ;;  %v10787_v14 = vld [vmem:[%s12505_s14 + $0x3a8] sm:$0xff] }
 0x329   : > { %v3047_v24 = vpop.permute.xlu1 %3046 }
 0x32a   : > { %v3045_v34 = vpop.permute.xlu0 %3044  ;;  %3513 = vst.msk [vmem:[#allocation2 + $0x78] sm:$0xff] %vm3496_vm6, %v3047_v24 }
 0x32b   : > { %3512 = vst.msk [vmem:[#allocation2 + $0x70] sm:$0xf] %vm3501_vm7, %v3045_v34  ;;  %3162 = vrot.lane.b32.xlu1 %v10758_v48, %s12383_s22  ;;  %v10790_v48 = vld [vmem:[%s12505_s14 + $0x3c0] sm:$0xff] }
 0x32c   : > { %3160 = vrot.lane.b32.xlu0 %v10757_v22, %s12383_s22  ;;  %v10789_v22 = vld [vmem:[%s12505_s14 + $0x3b8] sm:$0xf] }
 0x32d   : > { %v3051_v61 = vpop.permute.xlu1 %3050 }
 0x32e   : > { %v3049_v46 = vpop.permute.xlu0 %3048  ;;  %3515 = vst.msk [vmem:[#allocation2 + $0x88] sm:$0xff] %vm3496_vm6, %v3051_v61 }
 0x32f   : > { %3514 = vst.msk [vmem:[#allocation2 + $0x80] sm:$0xff] %vm3496_vm6, %v3049_v46  ;;  %3166 = vrot.lane.b32.xlu1 %v10760_v40, %s12383_s22  ;;  %v10792_v40 = vld [vmem:[%s12505_s14 + $0x3d0] sm:$0xff] }
 0x330   : > { %3164 = vrot.lane.b32.xlu0 %v10759_v54, %s12383_s22  ;;  %v10791_v54 = vld [vmem:[%s12505_s14 + $0x3c8] sm:$0xff] }
 0x331   : > { %v3055_v29 = vpop.permute.xlu1 %3054 }
 0x332   : > { %v3053_v10 = vpop.permute.xlu0 %3052  ;;  %3517 = vst.msk [vmem:[#allocation2 + $0x98] sm:$0xf] %vm3501_vm7, %v3055_v29 }
 0x333   : > { %3516 = vst.msk [vmem:[#allocation2 + $0x90] sm:$0xff] %vm3496_vm6, %v3053_v10  ;;  %3170 = vrot.lane.b32.xlu1 %v10762_v57, %s12383_s22  ;;  %v10794_v57 = vld [vmem:[%s12505_s14 + $0x3e0] sm:$0xf] }
 0x334   : > { %3168 = vrot.lane.b32.xlu0 %v10761_v25, %s12383_s22  ;;  %v10793_v25 = vld [vmem:[%s12505_s14 + $0x3d8] sm:$0xff] }
 0x335   : > { %v3059_v63 = vpop.permute.xlu1 %3058 }
 0x336   : > { %v3057_v27 = vpop.permute.xlu0 %3056  ;;  %3519 = vst.msk [vmem:[#allocation2 + $0xa8] sm:$0xff] %vm3496_vm6, %v3059_v63 }
 0x337   : > { %3518 = vst.msk [vmem:[#allocation2 + $0xa0] sm:$0xff] %vm3496_vm6, %v3057_v27  ;;  %3174 = vrot.lane.b32.xlu1 %v10764_v26, %s12383_s22  ;;  %v10796_v26 = vld [vmem:[%s12505_s14 + $0x3f0] sm:$0xff] }
 0x338   : > { %3172 = vrot.lane.b32.xlu0 %v10763_v62, %s12383_s22  ;;  %v10795_v62 = vld [vmem:[%s12505_s14 + $0x3e8] sm:$0xff] }
 0x339   : > { %v3063_v58 = vpop.permute.xlu1 %3062 }
 0x33a   : > { %v3061_v23 = vpop.permute.xlu0 %3060  ;;  %3521 = vst.msk [vmem:[#allocation2 + $0xb8] sm:$0xff] %vm3496_vm6, %v3063_v58 }
 0x33b   : > { %3520 = vst.msk [vmem:[#allocation2 + $0xb0] sm:$0xff] %vm3496_vm6, %v3061_v23  ;;  %3178 = vrot.lane.b32.xlu1 %v10766_v28, %s12383_s22  ;;  %v10798_v28 = vld [vmem:[%s12505_s14 + $0x400] sm:$0xff] }
 0x33c   : > { %3176 = vrot.lane.b32.xlu0 %v10765_v55, %s12383_s22  ;;  %v10797_v55 = vld [vmem:[%s12505_s14 + $0x3f8] sm:$0xff] }
 0x33d   : > { %v3067_v4 = vpop.permute.xlu1 %3066 }
 0x33e   : > { %v3065_v31 = vpop.permute.xlu0 %3064  ;;  %3523 = vst.msk [vmem:[#allocation2 + $0xc8] sm:$0xff] %vm3496_vm6, %v3067_v4 }
 0x33f   : > { %3522 = vst.msk [vmem:[#allocation2 + $0xc0] sm:$0xf] %vm3501_vm7, %v3065_v31  ;;  %3182 = vrot.lane.b32.xlu1 %v10768_v2, %s12383_s22  ;;  %v10800_v2 = vld [vmem:[%s12505_s14 + $0x410] sm:$0xff] }
 0x340   : > { %3180 = vrot.lane.b32.xlu0 %v10767_v60, %s12383_s22  ;;  %v10799_v60 = vld [vmem:[%s12505_s14 + $0x408] sm:$0xf] }
 0x341   : > { %v3071_v13 = vpop.permute.xlu1 %3070 }
 0x342   : > { %v3069_v8 = vpop.permute.xlu0 %3068  ;;  %3525 = vst.msk [vmem:[#allocation2 + $0xd8] sm:$0xff] %vm3496_vm6, %v3071_v13 }
 0x343   : > { %3524 = vst.msk [vmem:[#allocation2 + $0xd0] sm:$0xff] %vm3496_vm6, %v3069_v8  ;;  %3186 = vrot.lane.b32.xlu1 %v10770_v51, %s12383_s22  ;;  %v10802_v51 = vld [vmem:[%s12505_s14 + $0x420] sm:$0xff] }
 0x344   : > { %3184 = vrot.lane.b32.xlu0 %v10769_v7, %s12383_s22  ;;  %v10801_v7 = vld [vmem:[%s12505_s14 + $0x418] sm:$0xff] }
 0x345   : > { %v3075_v11 = vpop.permute.xlu1 %3074 }
 0x346   : > { %v3073_v1 = vpop.permute.xlu0 %3072  ;;  %3527 = vst.msk [vmem:[#allocation2 + $0xe8] sm:$0xf] %vm3501_vm7, %v3075_v11 }
 0x347   : > { %3526 = vst.msk [vmem:[#allocation2 + $0xe0] sm:$0xff] %vm3496_vm6, %v3073_v1  ;;  %3190 = vrot.lane.b32.xlu1 %v10772_v9, %s12383_s22  ;;  %v10804_v9 = vld [vmem:[%s12505_s14 + $0x430] sm:$0xf] }
 0x348   : > { %3188 = vrot.lane.b32.xlu0 %v10771_v18, %s12383_s22  ;;  %v10803_v18 = vld [vmem:[%s12505_s14 + $0x428] sm:$0xff] }
 0x349   : > { %v3079_v30 = vpop.permute.xlu1 %3078 }
 0x34a   : > { %v3077_v33 = vpop.permute.xlu0 %3076  ;;  %3529 = vst.msk [vmem:[#allocation2 + $0xf8] sm:$0xff] %vm3496_vm6, %v3079_v30 }
 0x34b   : > { %3528 = vst.msk [vmem:[#allocation2 + $0xf0] sm:$0xff] %vm3496_vm6, %v3077_v33  ;;  %3194 = vrot.lane.b32.xlu1 %v10774_v5, %s12383_s22  ;;  %v10806_v5 = vld [vmem:[%s12505_s14 + $0x440] sm:$0xff] }
 0x34c   : > { %3192 = vrot.lane.b32.xlu0 %v10773_v3, %s12383_s22  ;;  %v10805_v3 = vld [vmem:[%s12505_s14 + $0x438] sm:$0xff] }
 0x34d   : > { %v3083_v0 = vpop.permute.xlu1 %3082 }
 0x34e   : > { %v3081_v32 = vpop.permute.xlu0 %3080  ;;  %3531 = vst.msk [vmem:[#allocation2 + $0x108] sm:$0xff] %vm3496_vm6, %v3083_v0 }
 0x34f   : > { %3530 = vst.msk [vmem:[#allocation2 + $0x100] sm:$0xff] %vm3496_vm6, %v3081_v32  ;;  %3198 = vrot.lane.b32.xlu1 %v10776_v49, %s12383_s22  ;;  %v10808_v49 = vld [vmem:[%s12505_s14 + $0x450] sm:$0xff] }
 0x350   : > { %3196 = vrot.lane.b32.xlu0 %v10775_v15, %s12383_s22  ;;  %v10807_v15 = vld [vmem:[%s12505_s14 + $0x448] sm:$0xff] }
 0x351   : > { %v3087_v19 = vpop.permute.xlu1 %3086 }
 0x352   : > { %v3085_v52 = vpop.permute.xlu0 %3084  ;;  %3533 = vst.msk [vmem:[#allocation2 + $0x118] sm:$0xff] %vm3496_vm6, %v3087_v19 }
 0x353   : > { %3532 = vst.msk [vmem:[#allocation2 + $0x110] sm:$0xf] %vm3501_vm7, %v3085_v52  ;;  %3202 = vrot.lane.b32.xlu1 %v10778_v12, %s12383_s22  ;;  %v10810_v12 = vld [vmem:[%s12505_s14 + $0x460] sm:$0xff] }
 0x354   : > { %3200 = vrot.lane.b32.xlu0 %v10777_v16, %s12383_s22  ;;  %v10809_v16 = vld [vmem:[%s12505_s14 + $0x458] sm:$0xf] }
 0x355   : > { %v3091_v37 = vpop.permute.xlu1 %3090 }
 0x356   : > { %v3089_v6 = vpop.permute.xlu0 %3088  ;;  %3535 = vst.msk [vmem:[#allocation2 + $0x128] sm:$0xff] %vm3496_vm6, %v3091_v37 }
 0x357   : > { %3534 = vst.msk [vmem:[#allocation2 + $0x120] sm:$0xff] %vm3496_vm6, %v3089_v6  ;;  %3206 = vrot.lane.b32.xlu1 %v10780_v35, %s12383_s22  ;;  %v10812_v35 = vld [vmem:[%s12505_s14 + $0x470] sm:$0xff] }
 0x358   : > { %3204 = vrot.lane.b32.xlu0 %v10779_v36, %s12383_s22  ;;  %v10811_v36 = vld [vmem:[%s12505_s14 + $0x468] sm:$0xff] }
 0x359   : > { %v3095_v21 = vpop.permute.xlu1 %3094 }
 0x35a   : > { %v3093_v50 = vpop.permute.xlu0 %3092  ;;  %3537 = vst.msk [vmem:[#allocation2 + $0x138] sm:$0xf] %vm3501_vm7, %v3095_v21 }
 0x35b   : > { %3536 = vst.msk [vmem:[#allocation2 + $0x130] sm:$0xff] %vm3496_vm6, %v3093_v50  ;;  %3210 = vrot.lane.b32.xlu1 %v10782_v20, %s12383_s22  ;;  %v10814_v20 = vld [vmem:[%s12505_s14 + $0x480] sm:$0xf] }
 0x35c   : > { %3208 = vrot.lane.b32.xlu0 %v10781_v17, %s12383_s22  ;;  %v10813_v17 = vld [vmem:[%s12505_s14 + $0x478] sm:$0xff] }
 0x35d   : > { %v3099_v41 = vpop.permute.xlu1 %3098 }
 0x35e   : > { %v3097_v53 = vpop.permute.xlu0 %3096  ;;  %3539 = vst.msk [vmem:[#allocation2 + $0x148] sm:$0xff] %vm3496_vm6, %v3099_v41 }
 0x35f   : > { %3538 = vst.msk [vmem:[#allocation2 + $0x140] sm:$0xff] %vm3496_vm6, %v3097_v53  ;;  %3214 = vrot.lane.b32.xlu1 %v10784_v38, %s12383_s22  ;;  %v10816_v38 = vld [vmem:[%s12505_s14 + $0x490] sm:$0xff] }
 0x360   : > { %3212 = vrot.lane.b32.xlu0 %v10783_v39, %s12383_s22  ;;  %v10815_v39 = vld [vmem:[%s12505_s14 + $0x488] sm:$0xff] }
 0x361   : > { %v3103_v43 = vpop.permute.xlu1 %3102 }
 0x362   : > { %v3101_v44 = vpop.permute.xlu0 %3100  ;;  %3541 = vst.msk [vmem:[#allocation2 + $0x158] sm:$0xff] %vm3496_vm6, %v3103_v43 }
 0x363   : > { %3540 = vst.msk [vmem:[#allocation2 + $0x150] sm:$0xff] %vm3496_vm6, %v3101_v44  ;;  %3218 = vrot.lane.b32.xlu1 %v10786_v56, %s12383_s22  ;;  %v10818_v56 = vld [vmem:[%s12505_s14 + $0x4a0] sm:$0xff] }
 0x364   : > { %3216 = vrot.lane.b32.xlu0 %v10785_v59, %s12383_s22  ;;  %v10817_v59 = vld [vmem:[%s12505_s14 + $0x498] sm:$0xff] }
 0x365   : > { %v3107_v42 = vpop.permute.xlu1 %3106 }
 0x366   : > { %v3105_v47 = vpop.permute.xlu0 %3104  ;;  %3543 = vst.msk [vmem:[#allocation2 + $0x168] sm:$0xff] %vm3496_vm6, %v3107_v42 }
 0x367   : > { %3542 = vst.msk [vmem:[#allocation2 + $0x160] sm:$0xf] %vm3501_vm7, %v3105_v47  ;;  %3222 = vrot.lane.b32.xlu1 %v10788_v45, %s12383_s22  ;;  %v10820_v45 = vld [vmem:[%s12505_s14 + $0x4b0] sm:$0xff] }
 0x368   : > { %3220 = vrot.lane.b32.xlu0 %v10787_v14, %s12383_s22  ;;  %v10819_v14 = vld [vmem:[%s12505_s14 + $0x4a8] sm:$0xf] }
 0x369   : > { %v3111_v24 = vpop.permute.xlu1 %3110 }
 0x36a   : > { %v3109_v34 = vpop.permute.xlu0 %3108  ;;  %3545 = vst.msk [vmem:[#allocation2 + $0x178] sm:$0xff] %vm3496_vm6, %v3111_v24 }
 0x36b   : > { %3544 = vst.msk [vmem:[#allocation2 + $0x170] sm:$0xff] %vm3496_vm6, %v3109_v34  ;;  %3226 = vrot.lane.b32.xlu1 %v10790_v48, %s12383_s22  ;;  %v10822_v48 = vld [vmem:[%s12505_s14 + $0x4c0] sm:$0xff] }
 0x36c   : > { %3224 = vrot.lane.b32.xlu0 %v10789_v22, %s12383_s22  ;;  %v10821_v22 = vld [vmem:[%s12505_s14 + $0x4b8] sm:$0xff] }
 0x36d   : > { %v3115_v61 = vpop.permute.xlu1 %3114 }
 0x36e   : > { %v3113_v46 = vpop.permute.xlu0 %3112  ;;  %3547 = vst.msk [vmem:[#allocation2 + $0x188] sm:$0xf] %vm3501_vm7, %v3115_v61 }
 0x36f   : > { %3546 = vst.msk [vmem:[#allocation2 + $0x180] sm:$0xff] %vm3496_vm6, %v3113_v46  ;;  %3230 = vrot.lane.b32.xlu1 %v10792_v40, %s12383_s22  ;;  %v10824_v40 = vld [vmem:[%s12505_s14 + $0x4d0] sm:$0xf] }
 0x370   : > { %3228 = vrot.lane.b32.xlu0 %v10791_v54, %s12383_s22  ;;  %v10823_v54 = vld [vmem:[%s12505_s14 + $0x4c8] sm:$0xff] }
 0x371   : > { %v3119_v29 = vpop.permute.xlu1 %3118 }
 0x372   : > { %v3117_v10 = vpop.permute.xlu0 %3116  ;;  %3549 = vst.msk [vmem:[#allocation2 + $0x198] sm:$0xff] %vm3496_vm6, %v3119_v29 }
 0x373   : > { %3548 = vst.msk [vmem:[#allocation2 + $0x190] sm:$0xff] %vm3496_vm6, %v3117_v10  ;;  %3234 = vrot.lane.b32.xlu1 %v10794_v57, %s12383_s22  ;;  %v10826_v57 = vld [vmem:[%s12505_s14 + $0x4e0] sm:$0xff] }
 0x374   : > { %3232 = vrot.lane.b32.xlu0 %v10793_v25, %s12383_s22  ;;  %v10825_v25 = vld [vmem:[%s12505_s14 + $0x4d8] sm:$0xff] }
 0x375   : > { %v3123_v63 = vpop.permute.xlu1 %3122 }
 0x376   : > { %v3121_v27 = vpop.permute.xlu0 %3120  ;;  %3551 = vst.msk [vmem:[#allocation2 + $0x1a8] sm:$0xff] %vm3496_vm6, %v3123_v63 }
 0x377   : > { %3550 = vst.msk [vmem:[#allocation2 + $0x1a0] sm:$0xff] %vm3496_vm6, %v3121_v27  ;;  %3238 = vrot.lane.b32.xlu1 %v10796_v26, %s12383_s22  ;;  %v10828_v26 = vld [vmem:[%s12505_s14 + $0x4f0] sm:$0xff] }
 0x378   : > { %3236 = vrot.lane.b32.xlu0 %v10795_v62, %s12383_s22  ;;  %v10827_v62 = vld [vmem:[%s12505_s14 + $0x4e8] sm:$0xff] }
 0x379   : > { %v3127_v58 = vpop.permute.xlu1 %3126 }
 0x37a   : > { %v3125_v23 = vpop.permute.xlu0 %3124  ;;  %3553 = vst.msk [vmem:[#allocation2 + $0x1b8] sm:$0xff] %vm3496_vm6, %v3127_v58 }
 0x37b   : > { %3552 = vst.msk [vmem:[#allocation2 + $0x1b0] sm:$0xf] %vm3501_vm7, %v3125_v23  ;;  %3242 = vrot.lane.b32.xlu1 %v10798_v28, %s12383_s22  ;;  %v10830_v28 = vld [vmem:[%s12505_s14 + $0x500] sm:$0xff] }
 0x37c   : > { %3240 = vrot.lane.b32.xlu0 %v10797_v55, %s12383_s22  ;;  %v10829_v55 = vld [vmem:[%s12505_s14 + $0x4f8] sm:$0xf] }
 0x37d   : > { %v3131_v4 = vpop.permute.xlu1 %3130 }
 0x37e   : > { %v3129_v31 = vpop.permute.xlu0 %3128  ;;  %3555 = vst.msk [vmem:[#allocation2 + $0x1c8] sm:$0xff] %vm3496_vm6, %v3131_v4 }
 0x37f   : > { %3554 = vst.msk [vmem:[#allocation2 + $0x1c0] sm:$0xff] %vm3496_vm6, %v3129_v31  ;;  %3246 = vrot.lane.b32.xlu1 %v10800_v2, %s12383_s22  ;;  %v10832_v2 = vld [vmem:[%s12505_s14 + $0x510] sm:$0xff] }
 0x380   : > { %3244 = vrot.lane.b32.xlu0 %v10799_v60, %s12383_s22  ;;  %v10831_v60 = vld [vmem:[%s12505_s14 + $0x508] sm:$0xff] }
 0x381   : > { %v3135_v13 = vpop.permute.xlu1 %3134 }
 0x382   : > { %v3133_v8 = vpop.permute.xlu0 %3132  ;;  %3557 = vst.msk [vmem:[#allocation2 + $0x1d8] sm:$0xf] %vm3501_vm7, %v3135_v13 }
 0x383   : > { %3556 = vst.msk [vmem:[#allocation2 + $0x1d0] sm:$0xff] %vm3496_vm6, %v3133_v8  ;;  %3250 = vrot.lane.b32.xlu1 %v10802_v51, %s12383_s22  ;;  %v10834_v51 = vld [vmem:[%s12505_s14 + $0x520] sm:$0xf] }
 0x384   : > { %3248 = vrot.lane.b32.xlu0 %v10801_v7, %s12383_s22  ;;  %v10833_v7 = vld [vmem:[%s12505_s14 + $0x518] sm:$0xff] }
 0x385   : > { %v3139_v11 = vpop.permute.xlu1 %3138 }
 0x386   : > { %v3137_v1 = vpop.permute.xlu0 %3136  ;;  %3559 = vst.msk [vmem:[#allocation2 + $0x1e8] sm:$0xff] %vm3496_vm6, %v3139_v11 }
 0x387   : > { %3558 = vst.msk [vmem:[#allocation2 + $0x1e0] sm:$0xff] %vm3496_vm6, %v3137_v1  ;;  %3254 = vrot.lane.b32.xlu1 %v10804_v9, %s12383_s22  ;;  %v10836_v9 = vld [vmem:[%s12505_s14 + $0x530] sm:$0xff] }
 0x388   : > { %3252 = vrot.lane.b32.xlu0 %v10803_v18, %s12383_s22  ;;  %v10835_v18 = vld [vmem:[%s12505_s14 + $0x528] sm:$0xff] }
 0x389   : > { %v3143_v30 = vpop.permute.xlu1 %3142 }
 0x38a   : > { %v3141_v33 = vpop.permute.xlu0 %3140  ;;  %3561 = vst.msk [vmem:[#allocation2 + $0x1f8] sm:$0xff] %vm3496_vm6, %v3143_v30 }
 0x38b   : > { %3560 = vst.msk [vmem:[#allocation2 + $0x1f0] sm:$0xff] %vm3496_vm6, %v3141_v33  ;;  %3258 = vrot.lane.b32.xlu1 %v10806_v5, %s12383_s22  ;;  %v10838_v5 = vld [vmem:[%s12505_s14 + $0x540] sm:$0xff] }
 0x38c   : > { %3256 = vrot.lane.b32.xlu0 %v10805_v3, %s12383_s22  ;;  %v10837_v3 = vld [vmem:[%s12505_s14 + $0x538] sm:$0xff] }
 0x38d   : > { %v3147_v0 = vpop.permute.xlu1 %3146 }
 0x38e   : > { %v3145_v32 = vpop.permute.xlu0 %3144  ;;  %3563 = vst.msk [vmem:[#allocation2 + $0x208] sm:$0xff] %vm3496_vm6, %v3147_v0 }
 0x38f   : > { %3562 = vst.msk [vmem:[#allocation2 + $0x200] sm:$0xf] %vm3501_vm7, %v3145_v32  ;;  %3262 = vrot.lane.b32.xlu1 %v10808_v49, %s12383_s22  ;;  %v10840_v49 = vld [vmem:[%s12505_s14 + $0x550] sm:$0xff] }
 0x390   : > { %3260 = vrot.lane.b32.xlu0 %v10807_v15, %s12383_s22  ;;  %v10839_v15 = vld [vmem:[%s12505_s14 + $0x548] sm:$0xf] }
 0x391   : > { %v3151_v19 = vpop.permute.xlu1 %3150 }
 0x392   : > { %v3149_v52 = vpop.permute.xlu0 %3148  ;;  %3565 = vst.msk [vmem:[#allocation2 + $0x218] sm:$0xff] %vm3496_vm6, %v3151_v19 }
 0x393   : > { %3564 = vst.msk [vmem:[#allocation2 + $0x210] sm:$0xff] %vm3496_vm6, %v3149_v52  ;;  %3266 = vrot.lane.b32.xlu1 %v10810_v12, %s12383_s22  ;;  %v10842_v12 = vld [vmem:[%s12505_s14 + $0x560] sm:$0xff] }
 0x394   : > { %3264 = vrot.lane.b32.xlu0 %v10809_v16, %s12383_s22  ;;  %v10841_v16 = vld [vmem:[%s12505_s14 + $0x558] sm:$0xff] }
 0x395   : > { %v3155_v37 = vpop.permute.xlu1 %3154 }
 0x396   : > { %v3153_v6 = vpop.permute.xlu0 %3152  ;;  %3567 = vst.msk [vmem:[#allocation2 + $0x228] sm:$0xf] %vm3501_vm7, %v3155_v37 }
 0x397   : > { %3566 = vst.msk [vmem:[#allocation2 + $0x220] sm:$0xff] %vm3496_vm6, %v3153_v6  ;;  %3270 = vrot.lane.b32.xlu1 %v10812_v35, %s12383_s22  ;;  %v10844_v35 = vld [vmem:[%s12505_s14 + $0x570] sm:$0xf] }
 0x398   : > { %3268 = vrot.lane.b32.xlu0 %v10811_v36, %s12383_s22  ;;  %v10843_v36 = vld [vmem:[%s12505_s14 + $0x568] sm:$0xff] }
 0x399   : > { %v3159_v21 = vpop.permute.xlu1 %3158 }
 0x39a   : > { %v3157_v50 = vpop.permute.xlu0 %3156  ;;  %3569 = vst.msk [vmem:[#allocation2 + $0x238] sm:$0xff] %vm3496_vm6, %v3159_v21 }
 0x39b   : > { %3568 = vst.msk [vmem:[#allocation2 + $0x230] sm:$0xff] %vm3496_vm6, %v3157_v50  ;;  %3274 = vrot.lane.b32.xlu1 %v10814_v20, %s12383_s22  ;;  %v10846_v20 = vld [vmem:[%s12505_s14 + $0xa8] sm:$0xff] }
 0x39c   : > { %3272 = vrot.lane.b32.xlu0 %v10813_v17, %s12383_s22  ;;  %v10845_v17 = vld [vmem:[%s12505_s14 + $0xa0] sm:$0xff] }
 0x39d   : > { %v3163_v41 = vpop.permute.xlu1 %3162 }
 0x39e   : > { %v3161_v53 = vpop.permute.xlu0 %3160  ;;  %3571 = vst.msk [vmem:[#allocation2 + $0x248] sm:$0xff] %vm3496_vm6, %v3163_v41 }
 0x39f   : > { %3570 = vst.msk [vmem:[#allocation2 + $0x240] sm:$0xff] %vm3496_vm6, %v3161_v53  ;;  %3278 = vrot.lane.b32.xlu1 %v10816_v38, %s12383_s22  ;;  %v10848_v38 = vld [vmem:[%s12505_s14 + $0xb8] sm:$0xff] }
 0x3a0   : > { %3276 = vrot.lane.b32.xlu0 %v10815_v39, %s12383_s22  ;;  %v10847_v39 = vld [vmem:[%s12505_s14 + $0xb0] sm:$0xff] }
 0x3a1   : > { %v3167_v43 = vpop.permute.xlu1 %3166 }
 0x3a2   : > { %v3165_v44 = vpop.permute.xlu0 %3164  ;;  %3573 = vst.msk [vmem:[#allocation2 + $0x258] sm:$0xff] %vm3496_vm6, %v3167_v43 }
 0x3a3   : > { %3572 = vst.msk [vmem:[#allocation2 + $0x250] sm:$0xf] %vm3501_vm7, %v3165_v44  ;;  %3282 = vrot.lane.b32.xlu1 %v10818_v56, %s12383_s22  ;;  %v10850_v56 = vld [vmem:[%s12505_s14 + $0xc8] sm:$0xff] }
 0x3a4   : > { %3280 = vrot.lane.b32.xlu0 %v10817_v59, %s12383_s22  ;;  %v10849_v59 = vld [vmem:[%s12505_s14 + $0xc0] sm:$0xf] }
 0x3a5   : > { %v3171_v42 = vpop.permute.xlu1 %3170 }
 0x3a6   : > { %v3169_v47 = vpop.permute.xlu0 %3168  ;;  %3575 = vst.msk [vmem:[#allocation2 + $0x268] sm:$0xff] %vm3496_vm6, %v3171_v42 }
 0x3a7   : > { %3574 = vst.msk [vmem:[#allocation2 + $0x260] sm:$0xff] %vm3496_vm6, %v3169_v47  ;;  %3286 = vrot.lane.b32.xlu1 %v10820_v45, %s12383_s22  ;;  %v10852_v45 = vld [vmem:[%s12505_s14 + $0xd8] sm:$0xff] }
 0x3a8   : > { %3284 = vrot.lane.b32.xlu0 %v10819_v14, %s12383_s22  ;;  %v10851_v14 = vld [vmem:[%s12505_s14 + $0xd0] sm:$0xff] }
 0x3a9   : > { %v3175_v24 = vpop.permute.xlu1 %3174 }
 0x3aa   : > { %v3173_v34 = vpop.permute.xlu0 %3172  ;;  %3577 = vst.msk [vmem:[#allocation2 + $0x278] sm:$0xf] %vm3501_vm7, %v3175_v24 }
 0x3ab   : > { %3576 = vst.msk [vmem:[#allocation2 + $0x270] sm:$0xff] %vm3496_vm6, %v3173_v34  ;;  %3290 = vrot.lane.b32.xlu1 %v10822_v48, %s12383_s22  ;;  %v10854_v48 = vld [vmem:[%s12505_s14 + $0xe8] sm:$0xf] }
 0x3ac   : > { %3288 = vrot.lane.b32.xlu0 %v10821_v22, %s12383_s22  ;;  %v10853_v22 = vld [vmem:[%s12505_s14 + $0xe0] sm:$0xff] }
 0x3ad   : > { %v3179_v61 = vpop.permute.xlu1 %3178 }
 0x3ae   : > { %v3177_v46 = vpop.permute.xlu0 %3176  ;;  %3579 = vst.msk [vmem:[#allocation2 + $0x288] sm:$0xff] %vm3496_vm6, %v3179_v61 }
 0x3af   : > { %3578 = vst.msk [vmem:[#allocation2 + $0x280] sm:$0xff] %vm3496_vm6, %v3177_v46  ;;  %3294 = vrot.lane.b32.xlu1 %v10824_v40, %s12383_s22  ;;  %v10856_v40 = vld [vmem:[%s12505_s14 + $0xf8] sm:$0xff] }
 0x3b0   : > { %3292 = vrot.lane.b32.xlu0 %v10823_v54, %s12383_s22  ;;  %v10855_v54 = vld [vmem:[%s12505_s14 + $0xf0] sm:$0xff] }
 0x3b1   : > { %v3183_v29 = vpop.permute.xlu1 %3182 }
 0x3b2   : > { %v3181_v10 = vpop.permute.xlu0 %3180  ;;  %3581 = vst.msk [vmem:[#allocation2 + $0x298] sm:$0xff] %vm3496_vm6, %v3183_v29 }
 0x3b3   : > { %3580 = vst.msk [vmem:[#allocation2 + $0x290] sm:$0xff] %vm3496_vm6, %v3181_v10  ;;  %3298 = vrot.lane.b32.xlu1 %v10826_v57, %s12383_s22  ;;  %v10858_v57 = vld [vmem:[%s12505_s14 + $0x108] sm:$0xff] }
 0x3b4   : > { %3296 = vrot.lane.b32.xlu0 %v10825_v25, %s12383_s22  ;;  %v10857_v25 = vld [vmem:[%s12505_s14 + $0x100] sm:$0xff] }
 0x3b5   : > { %v3187_v63 = vpop.permute.xlu1 %3186 }
 0x3b6   : > { %v3185_v27 = vpop.permute.xlu0 %3184  ;;  %3583 = vst.msk [vmem:[#allocation2 + $0x2a8] sm:$0xff] %vm3496_vm6, %v3187_v63 }
 0x3b7   : > { %3582 = vst.msk [vmem:[#allocation2 + $0x2a0] sm:$0xf] %vm3501_vm7, %v3185_v27  ;;  %3302 = vrot.lane.b32.xlu1 %v10828_v26, %s12383_s22  ;;  %v10860_v26 = vld [vmem:[%s12505_s14 + $0x118] sm:$0xff] }
 0x3b8   : > { %3300 = vrot.lane.b32.xlu0 %v10827_v62, %s12383_s22  ;;  %v10859_v62 = vld [vmem:[%s12505_s14 + $0x110] sm:$0xf] }
 0x3b9   : > { %v3191_v58 = vpop.permute.xlu1 %3190 }
 0x3ba   : > { %v3189_v23 = vpop.permute.xlu0 %3188  ;;  %3585 = vst.msk [vmem:[#allocation2 + $0x2b8] sm:$0xff] %vm3496_vm6, %v3191_v58 }
 0x3bb   : > { %3584 = vst.msk [vmem:[#allocation2 + $0x2b0] sm:$0xff] %vm3496_vm6, %v3189_v23  ;;  %3306 = vrot.lane.b32.xlu1 %v10830_v28, %s12383_s22  ;;  %v10862_v28 = vld [vmem:[%s12505_s14 + $0x128] sm:$0xff] }
 0x3bc   : > { %3304 = vrot.lane.b32.xlu0 %v10829_v55, %s12383_s22  ;;  %v10861_v55 = vld [vmem:[%s12505_s14 + $0x120] sm:$0xff] }
 0x3bd   : > { %v3195_v4 = vpop.permute.xlu1 %3194 }
 0x3be   : > { %v3193_v31 = vpop.permute.xlu0 %3192  ;;  %3587 = vst.msk [vmem:[#allocation2 + $0x2c8] sm:$0xf] %vm3501_vm7, %v3195_v4 }
 0x3bf   : > { %3586 = vst.msk [vmem:[#allocation2 + $0x2c0] sm:$0xff] %vm3496_vm6, %v3193_v31  ;;  %3310 = vrot.lane.b32.xlu1 %v10832_v2, %s12383_s22  ;;  %v10864_v2 = vld [vmem:[%s12505_s14 + $0x138] sm:$0xf] }
 0x3c0   : > { %3308 = vrot.lane.b32.xlu0 %v10831_v60, %s12383_s22  ;;  %v10863_v60 = vld [vmem:[%s12505_s14 + $0x130] sm:$0xff] }
 0x3c1   : > { %v3199_v13 = vpop.permute.xlu1 %3198 }
 0x3c2   : > { %v3197_v8 = vpop.permute.xlu0 %3196  ;;  %3589 = vst.msk [vmem:[#allocation2 + $0x2d8] sm:$0xff] %vm3496_vm6, %v3199_v13 }
 0x3c3   : > { %3588 = vst.msk [vmem:[#allocation2 + $0x2d0] sm:$0xff] %vm3496_vm6, %v3197_v8  ;;  %3314 = vrot.lane.b32.xlu1 %v10834_v51, %s12383_s22  ;;  %v10866_v51 = vld [vmem:[%s12505_s14 + $0x148] sm:$0xff] }
 0x3c4   : > { %3312 = vrot.lane.b32.xlu0 %v10833_v7, %s12383_s22  ;;  %v10865_v7 = vld [vmem:[%s12505_s14 + $0x140] sm:$0xff] }
 0x3c5   : > { %v3203_v11 = vpop.permute.xlu1 %3202 }
 0x3c6   : > { %v3201_v1 = vpop.permute.xlu0 %3200  ;;  %3591 = vst.msk [vmem:[#allocation2 + $0x2e8] sm:$0xff] %vm3496_vm6, %v3203_v11 }
 0x3c7   : > { %3590 = vst.msk [vmem:[#allocation2 + $0x2e0] sm:$0xff] %vm3496_vm6, %v3201_v1  ;;  %3318 = vrot.lane.b32.xlu1 %v10836_v9, %s12383_s22  ;;  %v10868_v9 = vld [vmem:[%s12505_s14 + $0x158] sm:$0xff] }
 0x3c8   : > { %3316 = vrot.lane.b32.xlu0 %v10835_v18, %s12383_s22  ;;  %v10867_v18 = vld [vmem:[%s12505_s14 + $0x150] sm:$0xff] }
 0x3c9   : > { %v3207_v30 = vpop.permute.xlu1 %3206 }
 0x3ca   : > { %v3205_v33 = vpop.permute.xlu0 %3204  ;;  %3593 = vst.msk [vmem:[#allocation2 + $0x2f8] sm:$0xff] %vm3496_vm6, %v3207_v30 }
 0x3cb   : > { %3592 = vst.msk [vmem:[#allocation2 + $0x2f0] sm:$0xf] %vm3501_vm7, %v3205_v33  ;;  %3322 = vrot.lane.b32.xlu1 %v10838_v5, %s12383_s22  ;;  %v10870_v5 = vld [vmem:[%s12505_s14 + $0x168] sm:$0xff] }
 0x3cc   : > { %3320 = vrot.lane.b32.xlu0 %v10837_v3, %s12383_s22  ;;  %v10869_v3 = vld [vmem:[%s12505_s14 + $0x160] sm:$0xf] }
 0x3cd   : > { %v3211_v0 = vpop.permute.xlu1 %3210 }
 0x3ce   : > { %v3209_v32 = vpop.permute.xlu0 %3208  ;;  %3595 = vst.msk [vmem:[#allocation2 + $0x308] sm:$0xff] %vm3496_vm6, %v3211_v0 }
 0x3cf   : > { %3594 = vst.msk [vmem:[#allocation2 + $0x300] sm:$0xff] %vm3496_vm6, %v3209_v32  ;;  %3326 = vrot.lane.b32.xlu1 %v10840_v49, %s12383_s22  ;;  %v10872_v49 = vld [vmem:[%s12505_s14 + $0x178] sm:$0xff] }
 0x3d0   : > { %3324 = vrot.lane.b32.xlu0 %v10839_v15, %s12383_s22  ;;  %v10871_v15 = vld [vmem:[%s12505_s14 + $0x170] sm:$0xff] }
 0x3d1   : > { %v3215_v19 = vpop.permute.xlu1 %3214 }
 0x3d2   : > { %v3213_v52 = vpop.permute.xlu0 %3212  ;;  %3597 = vst.msk [vmem:[#allocation2 + $0x318] sm:$0xf] %vm3501_vm7, %v3215_v19 }
 0x3d3   : > { %3596 = vst.msk [vmem:[#allocation2 + $0x310] sm:$0xff] %vm3496_vm6, %v3213_v52  ;;  %3330 = vrot.lane.b32.xlu1 %v10842_v12, %s12383_s22  ;;  %v10874_v12 = vld [vmem:[%s12505_s14 + $0x188] sm:$0xf] }
 0x3d4   : > { %3328 = vrot.lane.b32.xlu0 %v10841_v16, %s12383_s22  ;;  %v10873_v16 = vld [vmem:[%s12505_s14 + $0x180] sm:$0xff] }
 0x3d5   : > { %v3219_v37 = vpop.permute.xlu1 %3218 }
 0x3d6   : > { %v3217_v6 = vpop.permute.xlu0 %3216  ;;  %3599 = vst.msk [vmem:[#allocation2 + $0x328] sm:$0xff] %vm3496_vm6, %v3219_v37 }
 0x3d7   : > { %3598 = vst.msk [vmem:[#allocation2 + $0x320] sm:$0xff] %vm3496_vm6, %v3217_v6  ;;  %3334 = vrot.lane.b32.xlu1 %v10844_v35, %s12383_s22  ;;  %v10876_v35 = vld [vmem:[%s12505_s14 + $0x198] sm:$0xff] }
 0x3d8   : > { %3332 = vrot.lane.b32.xlu0 %v10843_v36, %s12383_s22  ;;  %v10875_v36 = vld [vmem:[%s12505_s14 + $0x190] sm:$0xff] }
 0x3d9   : > { %v3223_v21 = vpop.permute.xlu1 %3222 }
 0x3da   : > { %v3221_v50 = vpop.permute.xlu0 %3220  ;;  %3601 = vst.msk [vmem:[#allocation2 + $0x338] sm:$0xff] %vm3496_vm6, %v3223_v21 }
 0x3db   : > { %3600 = vst.msk [vmem:[#allocation2 + $0x330] sm:$0xff] %vm3496_vm6, %v3221_v50  ;;  %3981 = vrot.lane.b32.xlu1 %v10846_v20, %s12384_s24  ;;  %v10878_v20 = vld [vmem:[%s12505_s14 + $0x1a8] sm:$0xff] }
 0x3dc   : > { %3979 = vrot.lane.b32.xlu0 %v10845_v17, %s12384_s24  ;;  %v10877_v17 = vld [vmem:[%s12505_s14 + $0x1a0] sm:$0xff] }
 0x3dd   : > { %v3227_v41 = vpop.permute.xlu1 %3226 }
 0x3de   : > { %v3225_v53 = vpop.permute.xlu0 %3224  ;;  %3603 = vst.msk [vmem:[#allocation2 + $0x348] sm:$0xff] %vm3496_vm6, %v3227_v41 }
 0x3df   : > { %3602 = vst.msk [vmem:[#allocation2 + $0x340] sm:$0xf] %vm3501_vm7, %v3225_v53  ;;  %3985 = vrot.lane.b32.xlu1 %v10848_v38, %s12384_s24  ;;  %v10880_v38 = vld [vmem:[%s12505_s14 + $0x1b8] sm:$0xff] }
 0x3e0   : > { %3983 = vrot.lane.b32.xlu0 %v10847_v39, %s12384_s24  ;;  %v10879_v39 = vld [vmem:[%s12505_s14 + $0x1b0] sm:$0xf] }
 0x3e1   : > { %v3231_v43 = vpop.permute.xlu1 %3230 }
 0x3e2   : > { %v3229_v44 = vpop.permute.xlu0 %3228  ;;  %3605 = vst.msk [vmem:[#allocation2 + $0x358] sm:$0xff] %vm3496_vm6, %v3231_v43 }
 0x3e3   : > { %3604 = vst.msk [vmem:[#allocation2 + $0x350] sm:$0xff] %vm3496_vm6, %v3229_v44  ;;  %3989 = vrot.lane.b32.xlu1 %v10850_v56, %s12384_s24  ;;  %v10882_v56 = vld [vmem:[%s12505_s14 + $0x1c8] sm:$0xff] }
 0x3e4   : > { %3987 = vrot.lane.b32.xlu0 %v10849_v59, %s12384_s24  ;;  %v10881_v59 = vld [vmem:[%s12505_s14 + $0x1c0] sm:$0xff] }
 0x3e5   : > { %v3235_v42 = vpop.permute.xlu1 %3234 }
 0x3e6   : > { %v3233_v47 = vpop.permute.xlu0 %3232  ;;  %3607 = vst.msk [vmem:[#allocation2 + $0x368] sm:$0xf] %vm3501_vm7, %v3235_v42 }
 0x3e7   : > { %3606 = vst.msk [vmem:[#allocation2 + $0x360] sm:$0xff] %vm3496_vm6, %v3233_v47  ;;  %3993 = vrot.lane.b32.xlu1 %v10852_v45, %s12384_s24  ;;  %v10884_v45 = vld [vmem:[%s12505_s14 + $0x1d8] sm:$0xf] }
 0x3e8   : > { %3991 = vrot.lane.b32.xlu0 %v10851_v14, %s12384_s24  ;;  %v10883_v14 = vld [vmem:[%s12505_s14 + $0x1d0] sm:$0xff] }
 0x3e9   : > { %v3239_v24 = vpop.permute.xlu1 %3238 }
 0x3ea   : > { %v3237_v34 = vpop.permute.xlu0 %3236  ;;  %3609 = vst.msk [vmem:[#allocation2 + $0x378] sm:$0xff] %vm3496_vm6, %v3239_v24 }
 0x3eb   : > { %3608 = vst.msk [vmem:[#allocation2 + $0x370] sm:$0xff] %vm3496_vm6, %v3237_v34  ;;  %3997 = vrot.lane.b32.xlu1 %v10854_v48, %s12384_s24  ;;  %v10886_v48 = vld [vmem:[%s12505_s14 + $0x1e8] sm:$0xff] }
 0x3ec   : > { %3995 = vrot.lane.b32.xlu0 %v10853_v22, %s12384_s24  ;;  %v10885_v22 = vld [vmem:[%s12505_s14 + $0x1e0] sm:$0xff] }
 0x3ed   : > { %v3243_v61 = vpop.permute.xlu1 %3242 }
 0x3ee   : > { %v3241_v46 = vpop.permute.xlu0 %3240  ;;  %3611 = vst.msk [vmem:[#allocation2 + $0x388] sm:$0xff] %vm3496_vm6, %v3243_v61 }
 0x3ef   : > { %3610 = vst.msk [vmem:[#allocation2 + $0x380] sm:$0xff] %vm3496_vm6, %v3241_v46  ;;  %4001 = vrot.lane.b32.xlu1 %v10856_v40, %s12384_s24  ;;  %v10888_v40 = vld [vmem:[%s12505_s14 + $0x1f8] sm:$0xff] }
 0x3f0   : > { %3999 = vrot.lane.b32.xlu0 %v10855_v54, %s12384_s24  ;;  %v10887_v54 = vld [vmem:[%s12505_s14 + $0x1f0] sm:$0xff] }
 0x3f1   : > { %v3247_v29 = vpop.permute.xlu1 %3246 }
 0x3f2   : > { %v3245_v10 = vpop.permute.xlu0 %3244  ;;  %3613 = vst.msk [vmem:[#allocation2 + $0x398] sm:$0xff] %vm3496_vm6, %v3247_v29 }
 0x3f3   : > { %3612 = vst.msk [vmem:[#allocation2 + $0x390] sm:$0xf] %vm3501_vm7, %v3245_v10  ;;  %4005 = vrot.lane.b32.xlu1 %v10858_v57, %s12384_s24  ;;  %v10890_v57 = vld [vmem:[%s12505_s14 + $0x208] sm:$0xff] }
 0x3f4   : > { %4003 = vrot.lane.b32.xlu0 %v10857_v25, %s12384_s24  ;;  %v10889_v25 = vld [vmem:[%s12505_s14 + $0x200] sm:$0xf] }
 0x3f5   : > { %v3251_v63 = vpop.permute.xlu1 %3250 }
 0x3f6   : > { %v3249_v27 = vpop.permute.xlu0 %3248  ;;  %3615 = vst.msk [vmem:[#allocation2 + $0x3a8] sm:$0xff] %vm3496_vm6, %v3251_v63 }
 0x3f7   : > { %3614 = vst.msk [vmem:[#allocation2 + $0x3a0] sm:$0xff] %vm3496_vm6, %v3249_v27  ;;  %4009 = vrot.lane.b32.xlu1 %v10860_v26, %s12384_s24  ;;  %v10892_v26 = vld [vmem:[%s12505_s14 + $0x218] sm:$0xff] }
 0x3f8   : > { %4007 = vrot.lane.b32.xlu0 %v10859_v62, %s12384_s24  ;;  %v10891_v62 = vld [vmem:[%s12505_s14 + $0x210] sm:$0xff] }
 0x3f9   : > { %v3255_v58 = vpop.permute.xlu1 %3254 }
 0x3fa   : > { %v3253_v23 = vpop.permute.xlu0 %3252  ;;  %3617 = vst.msk [vmem:[#allocation2 + $0x3b8] sm:$0xf] %vm3501_vm7, %v3255_v58 }
 0x3fb   : > { %3616 = vst.msk [vmem:[#allocation2 + $0x3b0] sm:$0xff] %vm3496_vm6, %v3253_v23  ;;  %4013 = vrot.lane.b32.xlu1 %v10862_v28, %s12384_s24  ;;  %v10894_v28 = vld [vmem:[%s12505_s14 + $0x228] sm:$0xf] }
 0x3fc   : > { %4011 = vrot.lane.b32.xlu0 %v10861_v55, %s12384_s24  ;;  %v10893_v55 = vld [vmem:[%s12505_s14 + $0x220] sm:$0xff] }
 0x3fd   : > { %v3259_v4 = vpop.permute.xlu1 %3258 }
 0x3fe   : > { %v3257_v31 = vpop.permute.xlu0 %3256  ;;  %3619 = vst.msk [vmem:[#allocation2 + $0x3c8] sm:$0xff] %vm3496_vm6, %v3259_v4 }
 0x3ff   : > { %3618 = vst.msk [vmem:[#allocation2 + $0x3c0] sm:$0xff] %vm3496_vm6, %v3257_v31  ;;  %4017 = vrot.lane.b32.xlu1 %v10864_v2, %s12384_s24  ;;  %v10896_v2 = vld [vmem:[%s12505_s14 + $0x238] sm:$0xff] }
 0x400   : > { %4015 = vrot.lane.b32.xlu0 %v10863_v60, %s12384_s24  ;;  %v10895_v60 = vld [vmem:[%s12505_s14 + $0x230] sm:$0xff] }
 0x401   : > { %v3263_v13 = vpop.permute.xlu1 %3262 }
 0x402   : > { %v3261_v8 = vpop.permute.xlu0 %3260  ;;  %3621 = vst.msk [vmem:[#allocation2 + $0x3d8] sm:$0xff] %vm3496_vm6, %v3263_v13 }
 0x403   : > { %3620 = vst.msk [vmem:[#allocation2 + $0x3d0] sm:$0xff] %vm3496_vm6, %v3261_v8  ;;  %4021 = vrot.lane.b32.xlu1 %v10866_v51, %s12384_s24  ;;  %v10898_v51 = vld [vmem:[%s12505_s14 + $0x248] sm:$0xff] }
 0x404   : > { %4019 = vrot.lane.b32.xlu0 %v10865_v7, %s12384_s24  ;;  %v10897_v7 = vld [vmem:[%s12505_s14 + $0x240] sm:$0xff] }
 0x405   : > { %v3267_v11 = vpop.permute.xlu1 %3266 }
 0x406   : > { %v3265_v1 = vpop.permute.xlu0 %3264  ;;  %3623 = vst.msk [vmem:[#allocation2 + $0x3e8] sm:$0xff] %vm3496_vm6, %v3267_v11 }
 0x407   : > { %3622 = vst.msk [vmem:[#allocation2 + $0x3e0] sm:$0xf] %vm3501_vm7, %v3265_v1  ;;  %4025 = vrot.lane.b32.xlu1 %v10868_v9, %s12384_s24  ;;  %v10900_v9 = vld [vmem:[%s12505_s14 + $0x258] sm:$0xff] }
 0x408   : > { %4023 = vrot.lane.b32.xlu0 %v10867_v18, %s12384_s24  ;;  %v10899_v18 = vld [vmem:[%s12505_s14 + $0x250] sm:$0xf] }
 0x409   : > { %v3271_v30 = vpop.permute.xlu1 %3270 }
 0x40a   : > { %v3269_v33 = vpop.permute.xlu0 %3268  ;;  %3625 = vst.msk [vmem:[#allocation2 + $0x3f8] sm:$0xff] %vm3496_vm6, %v3271_v30 }
 0x40b   : > { %3624 = vst.msk [vmem:[#allocation2 + $0x3f0] sm:$0xff] %vm3496_vm6, %v3269_v33  ;;  %4029 = vrot.lane.b32.xlu1 %v10870_v5, %s12384_s24  ;;  %v10902_v5 = vld [vmem:[%s12505_s14 + $0x268] sm:$0xff] }
 0x40c   : > { %4027 = vrot.lane.b32.xlu0 %v10869_v3, %s12384_s24  ;;  %v10901_v3 = vld [vmem:[%s12505_s14 + $0x260] sm:$0xff] }
 0x40d   : > { %v3275_v0 = vpop.permute.xlu1 %3274 }
 0x40e   : > { %v3273_v32 = vpop.permute.xlu0 %3272  ;;  %3627 = vst.msk [vmem:[#allocation2 + $0x408] sm:$0xf] %vm3501_vm7, %v3275_v0 }
 0x40f   : > { %3626 = vst.msk [vmem:[#allocation2 + $0x400] sm:$0xff] %vm3496_vm6, %v3273_v32  ;;  %4033 = vrot.lane.b32.xlu1 %v10872_v49, %s12384_s24  ;;  %v10904_v49 = vld [vmem:[%s12505_s14 + $0x278] sm:$0xf] }
 0x410   : > { %4031 = vrot.lane.b32.xlu0 %v10871_v15, %s12384_s24  ;;  %v10903_v15 = vld [vmem:[%s12505_s14 + $0x270] sm:$0xff] }
 0x411   : > { %v3279_v19 = vpop.permute.xlu1 %3278 }
 0x412   : > { %v3277_v52 = vpop.permute.xlu0 %3276  ;;  %3629 = vst.msk [vmem:[#allocation2 + $0x418] sm:$0xff] %vm3496_vm6, %v3279_v19 }
 0x413   : > { %3628 = vst.msk [vmem:[#allocation2 + $0x410] sm:$0xff] %vm3496_vm6, %v3277_v52  ;;  %4037 = vrot.lane.b32.xlu1 %v10874_v12, %s12384_s24  ;;  %v10906_v12 = vld [vmem:[%s12505_s14 + $0x288] sm:$0xff] }
 0x414   : > { %4035 = vrot.lane.b32.xlu0 %v10873_v16, %s12384_s24  ;;  %v10905_v16 = vld [vmem:[%s12505_s14 + $0x280] sm:$0xff] }
 0x415   : > { %v3283_v37 = vpop.permute.xlu1 %3282 }
 0x416   : > { %v3281_v6 = vpop.permute.xlu0 %3280  ;;  %3631 = vst.msk [vmem:[#allocation2 + $0x428] sm:$0xff] %vm3496_vm6, %v3283_v37 }
 0x417   : > { %3630 = vst.msk [vmem:[#allocation2 + $0x420] sm:$0xff] %vm3496_vm6, %v3281_v6  ;;  %4041 = vrot.lane.b32.xlu1 %v10876_v35, %s12384_s24  ;;  %v10908_v35 = vld [vmem:[%s12505_s14 + $0x298] sm:$0xff] }
 0x418   : > { %4039 = vrot.lane.b32.xlu0 %v10875_v36, %s12384_s24  ;;  %v10907_v36 = vld [vmem:[%s12505_s14 + $0x290] sm:$0xff] }
 0x419   : > { %v3287_v21 = vpop.permute.xlu1 %3286 }
 0x41a   : > { %v3285_v50 = vpop.permute.xlu0 %3284  ;;  %3633 = vst.msk [vmem:[#allocation2 + $0x438] sm:$0xff] %vm3496_vm6, %v3287_v21 }
 0x41b   : > { %3632 = vst.msk [vmem:[#allocation2 + $0x430] sm:$0xf] %vm3501_vm7, %v3285_v50  ;;  %4045 = vrot.lane.b32.xlu1 %v10878_v20, %s12384_s24  ;;  %v10910_v20 = vld [vmem:[%s12505_s14 + $0x2a8] sm:$0xff] }
 0x41c   : > { %4043 = vrot.lane.b32.xlu0 %v10877_v17, %s12384_s24  ;;  %v10909_v17 = vld [vmem:[%s12505_s14 + $0x2a0] sm:$0xf] }
 0x41d   : > { %v3291_v41 = vpop.permute.xlu1 %3290 }
 0x41e   : > { %v3289_v53 = vpop.permute.xlu0 %3288  ;;  %3635 = vst.msk [vmem:[#allocation2 + $0x448] sm:$0xff] %vm3496_vm6, %v3291_v41 }
 0x41f   : > { %3634 = vst.msk [vmem:[#allocation2 + $0x440] sm:$0xff] %vm3496_vm6, %v3289_v53  ;;  %4049 = vrot.lane.b32.xlu1 %v10880_v38, %s12384_s24  ;;  %v10912_v38 = vld [vmem:[%s12505_s14 + $0x2b8] sm:$0xff] }
 0x420   : > { %4047 = vrot.lane.b32.xlu0 %v10879_v39, %s12384_s24  ;;  %v10911_v39 = vld [vmem:[%s12505_s14 + $0x2b0] sm:$0xff] }
 0x421   : > { %v3295_v43 = vpop.permute.xlu1 %3294 }
 0x422   : > { %v3293_v44 = vpop.permute.xlu0 %3292  ;;  %3637 = vst.msk [vmem:[#allocation2 + $0x458] sm:$0xf] %vm3501_vm7, %v3295_v43 }
 0x423   : > { %3636 = vst.msk [vmem:[#allocation2 + $0x450] sm:$0xff] %vm3496_vm6, %v3293_v44  ;;  %4053 = vrot.lane.b32.xlu1 %v10882_v56, %s12384_s24  ;;  %v10914_v56 = vld [vmem:[%s12505_s14 + $0x2c8] sm:$0xf] }
 0x424   : > { %4051 = vrot.lane.b32.xlu0 %v10881_v59, %s12384_s24  ;;  %v10913_v59 = vld [vmem:[%s12505_s14 + $0x2c0] sm:$0xff] }
 0x425   : > { %v3299_v42 = vpop.permute.xlu1 %3298 }
 0x426   : > { %v3297_v47 = vpop.permute.xlu0 %3296  ;;  %3639 = vst.msk [vmem:[#allocation2 + $0x468] sm:$0xff] %vm3496_vm6, %v3299_v42 }
 0x427   : > { %3638 = vst.msk [vmem:[#allocation2 + $0x460] sm:$0xff] %vm3496_vm6, %v3297_v47  ;;  %4057 = vrot.lane.b32.xlu1 %v10884_v45, %s12384_s24  ;;  %v10916_v45 = vld [vmem:[%s12505_s14 + $0x2d8] sm:$0xff] }
 0x428   : > { %4055 = vrot.lane.b32.xlu0 %v10883_v14, %s12384_s24  ;;  %v10915_v14 = vld [vmem:[%s12505_s14 + $0x2d0] sm:$0xff] }
 0x429   : > { %v3303_v24 = vpop.permute.xlu1 %3302 }
 0x42a   : > { %v3301_v34 = vpop.permute.xlu0 %3300  ;;  %3641 = vst.msk [vmem:[#allocation2 + $0x478] sm:$0xff] %vm3496_vm6, %v3303_v24 }
 0x42b   : > { %3640 = vst.msk [vmem:[#allocation2 + $0x470] sm:$0xff] %vm3496_vm6, %v3301_v34  ;;  %4061 = vrot.lane.b32.xlu1 %v10886_v48, %s12384_s24  ;;  %v10918_v48 = vld [vmem:[%s12505_s14 + $0x2e8] sm:$0xff] }
 0x42c   : > { %4059 = vrot.lane.b32.xlu0 %v10885_v22, %s12384_s24  ;;  %v10917_v22 = vld [vmem:[%s12505_s14 + $0x2e0] sm:$0xff] }
 0x42d   : > { %v3307_v61 = vpop.permute.xlu1 %3306 }
 0x42e   : > { %v3305_v46 = vpop.permute.xlu0 %3304  ;;  %3643 = vst.msk [vmem:[#allocation2 + $0x488] sm:$0xff] %vm3496_vm6, %v3307_v61 }
 0x42f   : > { %3642 = vst.msk [vmem:[#allocation2 + $0x480] sm:$0xf] %vm3501_vm7, %v3305_v46  ;;  %4065 = vrot.lane.b32.xlu1 %v10888_v40, %s12384_s24  ;;  %v10920_v40 = vld [vmem:[%s12505_s14 + $0x2f8] sm:$0xff] }
 0x430   : > { %4063 = vrot.lane.b32.xlu0 %v10887_v54, %s12384_s24  ;;  %v10919_v54 = vld [vmem:[%s12505_s14 + $0x2f0] sm:$0xf] }
 0x431   : > { %v3311_v29 = vpop.permute.xlu1 %3310 }
 0x432   : > { %v3309_v10 = vpop.permute.xlu0 %3308  ;;  %3645 = vst.msk [vmem:[#allocation2 + $0x498] sm:$0xff] %vm3496_vm6, %v3311_v29 }
 0x433   : > { %3644 = vst.msk [vmem:[#allocation2 + $0x490] sm:$0xff] %vm3496_vm6, %v3309_v10  ;;  %4069 = vrot.lane.b32.xlu1 %v10890_v57, %s12384_s24  ;;  %v10922_v57 = vld [vmem:[%s12505_s14 + $0x308] sm:$0xff] }
 0x434   : > { %4067 = vrot.lane.b32.xlu0 %v10889_v25, %s12384_s24  ;;  %v10921_v25 = vld [vmem:[%s12505_s14 + $0x300] sm:$0xff] }
 0x435   : > { %v3315_v63 = vpop.permute.xlu1 %3314 }
 0x436   : > { %v3313_v27 = vpop.permute.xlu0 %3312  ;;  %3647 = vst.msk [vmem:[#allocation2 + $0x4a8] sm:$0xf] %vm3501_vm7, %v3315_v63 }
 0x437   : > { %3646 = vst.msk [vmem:[#allocation2 + $0x4a0] sm:$0xff] %vm3496_vm6, %v3313_v27  ;;  %4073 = vrot.lane.b32.xlu1 %v10892_v26, %s12384_s24  ;;  %v10924_v26 = vld [vmem:[%s12505_s14 + $0x318] sm:$0xf] }
 0x438   : > { %4071 = vrot.lane.b32.xlu0 %v10891_v62, %s12384_s24  ;;  %v10923_v62 = vld [vmem:[%s12505_s14 + $0x310] sm:$0xff] }
 0x439   : > { %v3319_v58 = vpop.permute.xlu1 %3318 }
 0x43a   : > { %v3317_v23 = vpop.permute.xlu0 %3316  ;;  %3649 = vst.msk [vmem:[#allocation2 + $0x4b8] sm:$0xff] %vm3496_vm6, %v3319_v58 }
 0x43b   : > { %3648 = vst.msk [vmem:[#allocation2 + $0x4b0] sm:$0xff] %vm3496_vm6, %v3317_v23  ;;  %4077 = vrot.lane.b32.xlu1 %v10894_v28, %s12384_s24  ;;  %v10926_v28 = vld [vmem:[%s12505_s14 + $0x328] sm:$0xff] }
 0x43c   : > { %4075 = vrot.lane.b32.xlu0 %v10893_v55, %s12384_s24  ;;  %v10925_v55 = vld [vmem:[%s12505_s14 + $0x320] sm:$0xff] }
 0x43d   : > { %v3323_v4 = vpop.permute.xlu1 %3322 }
 0x43e   : > { %v3321_v31 = vpop.permute.xlu0 %3320  ;;  %3651 = vst.msk [vmem:[#allocation2 + $0x4c8] sm:$0xff] %vm3496_vm6, %v3323_v4 }
 0x43f   : > { %3650 = vst.msk [vmem:[#allocation2 + $0x4c0] sm:$0xff] %vm3496_vm6, %v3321_v31  ;;  %4081 = vrot.lane.b32.xlu1 %v10896_v2, %s12384_s24  ;;  %v10928_v2 = vld [vmem:[%s12505_s14 + $0x338] sm:$0xff] }
 0x440   : > { %4079 = vrot.lane.b32.xlu0 %v10895_v60, %s12384_s24  ;;  %v10927_v60 = vld [vmem:[%s12505_s14 + $0x330] sm:$0xff] }
 0x441   : > { %v3327_v13 = vpop.permute.xlu1 %3326 }
 0x442   : > { %v3325_v8 = vpop.permute.xlu0 %3324  ;;  %3653 = vst.msk [vmem:[#allocation2 + $0x4d8] sm:$0xff] %vm3496_vm6, %v3327_v13 }
 0x443   : > { %3652 = vst.msk [vmem:[#allocation2 + $0x4d0] sm:$0xf] %vm3501_vm7, %v3325_v8  ;;  %4085 = vrot.lane.b32.xlu1 %v10898_v51, %s12384_s24  ;;  %v10930_v51 = vld [vmem:[%s12505_s14 + $0x348] sm:$0xff] }
 0x444   : > { %4083 = vrot.lane.b32.xlu0 %v10897_v7, %s12384_s24  ;;  %v10929_v7 = vld [vmem:[%s12505_s14 + $0x340] sm:$0xf] }
 0x445   : > { %v3331_v11 = vpop.permute.xlu1 %3330 }
 0x446   : > { %v3329_v1 = vpop.permute.xlu0 %3328  ;;  %3655 = vst.msk [vmem:[#allocation2 + $0x4e8] sm:$0xff] %vm3496_vm6, %v3331_v11 }
 0x447   : > { %3654 = vst.msk [vmem:[#allocation2 + $0x4e0] sm:$0xff] %vm3496_vm6, %v3329_v1  ;;  %4089 = vrot.lane.b32.xlu1 %v10900_v9, %s12384_s24  ;;  %v10932_v9 = vld [vmem:[%s12505_s14 + $0x358] sm:$0xff] }
 0x448   : > { %4087 = vrot.lane.b32.xlu0 %v10899_v18, %s12384_s24  ;;  %v10931_v18 = vld [vmem:[%s12505_s14 + $0x350] sm:$0xff] }
 0x449   : > { %v3335_v30 = vpop.permute.xlu1 %3334 }
 0x44a   : > { %v3333_v33 = vpop.permute.xlu0 %3332  ;;  %3657 = vst.msk [vmem:[#allocation2 + $0x4f8] sm:$0xf] %vm3501_vm7, %v3335_v30 }
 0x44b   : > { %3656 = vst.msk [vmem:[#allocation2 + $0x4f0] sm:$0xff] %vm3496_vm6, %v3333_v33  ;;  %4093 = vrot.lane.b32.xlu1 %v10902_v5, %s12384_s24  ;;  %v10934_v5 = vld [vmem:[%s12505_s14 + $0x368] sm:$0xf] }
 0x44c   : > { %4091 = vrot.lane.b32.xlu0 %v10901_v3, %s12384_s24  ;;  %v10933_v3 = vld [vmem:[%s12505_s14 + $0x360] sm:$0xff] }
 0x44d   : > { %v3982_v0 = vpop.permute.xlu1 %3981 }
 0x44e   : > { %v3980_v32 = vpop.permute.xlu0 %3979  ;;  %4461 = vst.msk [vmem:[#allocation2 + $0x8] sm:$0xff] %vm4459_vm8, %v3982_v0 }
 0x44f   : > { %4460 = vst.msk [vmem:[#allocation2] sm:$0xff] %vm4459_vm8, %v3980_v32  ;;  %4097 = vrot.lane.b32.xlu1 %v10904_v49, %s12384_s24  ;;  %v10936_v49 = vld [vmem:[%s12505_s14 + $0x378] sm:$0xff] }
 0x450   : > { %4095 = vrot.lane.b32.xlu0 %v10903_v15, %s12384_s24  ;;  %v10935_v15 = vld [vmem:[%s12505_s14 + $0x370] sm:$0xff] }
 0x451   : > { %v3986_v19 = vpop.permute.xlu1 %3985 }
 0x452   : > { %v3984_v52 = vpop.permute.xlu0 %3983  ;;  %4463 = vst.msk [vmem:[#allocation2 + $0x18] sm:$0xff] %vm4459_vm8, %v3986_v19 }
 0x453   : > { %4462 = vst.msk [vmem:[#allocation2 + $0x10] sm:$0xff] %vm4459_vm8, %v3984_v52  ;;  %4101 = vrot.lane.b32.xlu1 %v10906_v12, %s12384_s24  ;;  %v10938_v12 = vld [vmem:[%s12505_s14 + $0x388] sm:$0xff] }
 0x454   : > { %4099 = vrot.lane.b32.xlu0 %v10905_v16, %s12384_s24  ;;  %v10937_v16 = vld [vmem:[%s12505_s14 + $0x380] sm:$0xff] }
 0x455   : > { %v3990_v37 = vpop.permute.xlu1 %3989 }
 0x456   : > { %v3988_v6 = vpop.permute.xlu0 %3987  ;;  %4466 = vst.msk [vmem:[#allocation2 + $0x28] sm:$0xff] %vm4459_vm8, %v3990_v37 }
 0x457   : > { %4465 = vst.msk [vmem:[#allocation2 + $0x20] sm:$0xf] %vm4464_vm9, %v3988_v6  ;;  %4105 = vrot.lane.b32.xlu1 %v10908_v35, %s12384_s24  ;;  %v10940_v35 = vld [vmem:[%s12505_s14 + $0x398] sm:$0xff] }
 0x458   : > { %4103 = vrot.lane.b32.xlu0 %v10907_v36, %s12384_s24  ;;  %v10939_v36 = vld [vmem:[%s12505_s14 + $0x390] sm:$0xf] }
 0x459   : > { %v3994_v21 = vpop.permute.xlu1 %3993 }
 0x45a   : > { %v3992_v50 = vpop.permute.xlu0 %3991  ;;  %4468 = vst.msk [vmem:[#allocation2 + $0x38] sm:$0xff] %vm4459_vm8, %v3994_v21 }
 0x45b   : > { %4467 = vst.msk [vmem:[#allocation2 + $0x30] sm:$0xff] %vm4459_vm8, %v3992_v50  ;;  %4109 = vrot.lane.b32.xlu1 %v10910_v20, %s12384_s24  ;;  %v10942_v20 = vld [vmem:[%s12505_s14 + $0x3a8] sm:$0xff] }
 0x45c   : > { %4107 = vrot.lane.b32.xlu0 %v10909_v17, %s12384_s24  ;;  %v10941_v17 = vld [vmem:[%s12505_s14 + $0x3a0] sm:$0xff] }
 0x45d   : > { %v3998_v41 = vpop.permute.xlu1 %3997 }
 0x45e   : > { %v3996_v53 = vpop.permute.xlu0 %3995  ;;  %4470 = vst.msk [vmem:[#allocation2 + $0x48] sm:$0xf] %vm4464_vm9, %v3998_v41 }
 0x45f   : > { %4469 = vst.msk [vmem:[#allocation2 + $0x40] sm:$0xff] %vm4459_vm8, %v3996_v53  ;;  %4113 = vrot.lane.b32.xlu1 %v10912_v38, %s12384_s24  ;;  %v10944_v38 = vld [vmem:[%s12505_s14 + $0x3b8] sm:$0xf] }
 0x460   : > { %4111 = vrot.lane.b32.xlu0 %v10911_v39, %s12384_s24  ;;  %v10943_v39 = vld [vmem:[%s12505_s14 + $0x3b0] sm:$0xff] }
 0x461   : > { %v4002_v43 = vpop.permute.xlu1 %4001 }
 0x462   : > { %v4000_v44 = vpop.permute.xlu0 %3999  ;;  %4472 = vst.msk [vmem:[#allocation2 + $0x58] sm:$0xff] %vm4459_vm8, %v4002_v43 }
 0x463   : > { %4471 = vst.msk [vmem:[#allocation2 + $0x50] sm:$0xff] %vm4459_vm8, %v4000_v44  ;;  %4117 = vrot.lane.b32.xlu1 %v10914_v56, %s12384_s24  ;;  %v10946_v56 = vld [vmem:[%s12505_s14 + $0x3c8] sm:$0xff] }
 0x464   : > { %4115 = vrot.lane.b32.xlu0 %v10913_v59, %s12384_s24  ;;  %v10945_v59 = vld [vmem:[%s12505_s14 + $0x3c0] sm:$0xff] }
 0x465   : > { %v4006_v42 = vpop.permute.xlu1 %4005 }
 0x466   : > { %v4004_v47 = vpop.permute.xlu0 %4003  ;;  %4474 = vst.msk [vmem:[#allocation2 + $0x68] sm:$0xff] %vm4459_vm8, %v4006_v42 }
 0x467   : > { %4473 = vst.msk [vmem:[#allocation2 + $0x60] sm:$0xff] %vm4459_vm8, %v4004_v47  ;;  %4121 = vrot.lane.b32.xlu1 %v10916_v45, %s12384_s24  ;;  %v10948_v45 = vld [vmem:[%s12505_s14 + $0x3d8] sm:$0xff] }
 0x468   : > { %4119 = vrot.lane.b32.xlu0 %v10915_v14, %s12384_s24  ;;  %v10947_v14 = vld [vmem:[%s12505_s14 + $0x3d0] sm:$0xff] }
 0x469   : > { %v4010_v24 = vpop.permute.xlu1 %4009 }
 0x46a   : > { %v4008_v34 = vpop.permute.xlu0 %4007  ;;  %4476 = vst.msk [vmem:[#allocation2 + $0x78] sm:$0xff] %vm4459_vm8, %v4010_v24 }
 0x46b   : > { %4475 = vst.msk [vmem:[#allocation2 + $0x70] sm:$0xf] %vm4464_vm9, %v4008_v34  ;;  %4125 = vrot.lane.b32.xlu1 %v10918_v48, %s12384_s24  ;;  %v10950_v48 = vld [vmem:[%s12505_s14 + $0x3e8] sm:$0xff] }
 0x46c   : > { %4123 = vrot.lane.b32.xlu0 %v10917_v22, %s12384_s24  ;;  %v10949_v22 = vld [vmem:[%s12505_s14 + $0x3e0] sm:$0xf] }
 0x46d   : > { %v4014_v61 = vpop.permute.xlu1 %4013 }
 0x46e   : > { %v4012_v46 = vpop.permute.xlu0 %4011  ;;  %4478 = vst.msk [vmem:[#allocation2 + $0x88] sm:$0xff] %vm4459_vm8, %v4014_v61 }
 0x46f   : > { %4477 = vst.msk [vmem:[#allocation2 + $0x80] sm:$0xff] %vm4459_vm8, %v4012_v46  ;;  %4129 = vrot.lane.b32.xlu1 %v10920_v40, %s12384_s24  ;;  %v10952_v40 = vld [vmem:[%s12505_s14 + $0x3f8] sm:$0xff] }
 0x470   : > { %4127 = vrot.lane.b32.xlu0 %v10919_v54, %s12384_s24  ;;  %v10951_v54 = vld [vmem:[%s12505_s14 + $0x3f0] sm:$0xff] }
 0x471   : > { %v4018_v29 = vpop.permute.xlu1 %4017 }
 0x472   : > { %v4016_v10 = vpop.permute.xlu0 %4015  ;;  %4480 = vst.msk [vmem:[#allocation2 + $0x98] sm:$0xf] %vm4464_vm9, %v4018_v29 }
 0x473   : > { %4479 = vst.msk [vmem:[#allocation2 + $0x90] sm:$0xff] %vm4459_vm8, %v4016_v10  ;;  %4133 = vrot.lane.b32.xlu1 %v10922_v57, %s12384_s24  ;;  %v10954_v57 = vld [vmem:[%s12505_s14 + $0x408] sm:$0xf] }
 0x474   : > { %4131 = vrot.lane.b32.xlu0 %v10921_v25, %s12384_s24  ;;  %v10953_v25 = vld [vmem:[%s12505_s14 + $0x400] sm:$0xff] }
 0x475   : > { %v4022_v63 = vpop.permute.xlu1 %4021 }
 0x476   : > { %v4020_v27 = vpop.permute.xlu0 %4019  ;;  %4482 = vst.msk [vmem:[#allocation2 + $0xa8] sm:$0xff] %vm4459_vm8, %v4022_v63 }
 0x477   : > { %4481 = vst.msk [vmem:[#allocation2 + $0xa0] sm:$0xff] %vm4459_vm8, %v4020_v27  ;;  %4137 = vrot.lane.b32.xlu1 %v10924_v26, %s12384_s24  ;;  %v10956_v26 = vld [vmem:[%s12505_s14 + $0x418] sm:$0xff] }
 0x478   : > { %4135 = vrot.lane.b32.xlu0 %v10923_v62, %s12384_s24  ;;  %v10955_v62 = vld [vmem:[%s12505_s14 + $0x410] sm:$0xff] }
 0x479   : > { %v4026_v58 = vpop.permute.xlu1 %4025 }
 0x47a   : > { %v4024_v23 = vpop.permute.xlu0 %4023  ;;  %4484 = vst.msk [vmem:[#allocation2 + $0xb8] sm:$0xff] %vm4459_vm8, %v4026_v58 }
 0x47b   : > { %4483 = vst.msk [vmem:[#allocation2 + $0xb0] sm:$0xff] %vm4459_vm8, %v4024_v23  ;;  %4141 = vrot.lane.b32.xlu1 %v10926_v28, %s12384_s24  ;;  %v10958_v28 = vld [vmem:[%s12505_s14 + $0x428] sm:$0xff] }
 0x47c   : > { %4139 = vrot.lane.b32.xlu0 %v10925_v55, %s12384_s24  ;;  %v10957_v55 = vld [vmem:[%s12505_s14 + $0x420] sm:$0xff] }
 0x47d   : > { %v4030_v4 = vpop.permute.xlu1 %4029 }
 0x47e   : > { %v4028_v31 = vpop.permute.xlu0 %4027  ;;  %4486 = vst.msk [vmem:[#allocation2 + $0xc8] sm:$0xff] %vm4459_vm8, %v4030_v4 }
 0x47f   : > { %4485 = vst.msk [vmem:[#allocation2 + $0xc0] sm:$0xf] %vm4464_vm9, %v4028_v31  ;;  %4145 = vrot.lane.b32.xlu1 %v10928_v2, %s12384_s24  ;;  %v10960_v2 = vld [vmem:[%s12505_s14 + $0x438] sm:$0xff] }
 0x480   : > { %4143 = vrot.lane.b32.xlu0 %v10927_v60, %s12384_s24  ;;  %v10959_v60 = vld [vmem:[%s12505_s14 + $0x430] sm:$0xf] }
 0x481   : > { %v4034_v13 = vpop.permute.xlu1 %4033 }
 0x482   : > { %v4032_v8 = vpop.permute.xlu0 %4031  ;;  %4488 = vst.msk [vmem:[#allocation2 + $0xd8] sm:$0xff] %vm4459_vm8, %v4034_v13 }
 0x483   : > { %4487 = vst.msk [vmem:[#allocation2 + $0xd0] sm:$0xff] %vm4459_vm8, %v4032_v8  ;;  %4149 = vrot.lane.b32.xlu1 %v10930_v51, %s12384_s24  ;;  %v10962_v51 = vld [vmem:[%s12505_s14 + $0x448] sm:$0xff] }
 0x484   : > { %4147 = vrot.lane.b32.xlu0 %v10929_v7, %s12384_s24  ;;  %v10961_v7 = vld [vmem:[%s12505_s14 + $0x440] sm:$0xff] }
 0x485   : > { %v4038_v11 = vpop.permute.xlu1 %4037 }
 0x486   : > { %v4036_v1 = vpop.permute.xlu0 %4035  ;;  %4490 = vst.msk [vmem:[#allocation2 + $0xe8] sm:$0xf] %vm4464_vm9, %v4038_v11 }
 0x487   : > { %4489 = vst.msk [vmem:[#allocation2 + $0xe0] sm:$0xff] %vm4459_vm8, %v4036_v1  ;;  %4153 = vrot.lane.b32.xlu1 %v10932_v9, %s12384_s24  ;;  %v10964_v9 = vld [vmem:[%s12505_s14 + $0x458] sm:$0xf] }
 0x488   : > { %4151 = vrot.lane.b32.xlu0 %v10931_v18, %s12384_s24  ;;  %v10963_v18 = vld [vmem:[%s12505_s14 + $0x450] sm:$0xff] }
 0x489   : > { %v4042_v30 = vpop.permute.xlu1 %4041 }
 0x48a   : > { %v4040_v33 = vpop.permute.xlu0 %4039  ;;  %4492 = vst.msk [vmem:[#allocation2 + $0xf8] sm:$0xff] %vm4459_vm8, %v4042_v30 }
 0x48b   : > { %4491 = vst.msk [vmem:[#allocation2 + $0xf0] sm:$0xff] %vm4459_vm8, %v4040_v33  ;;  %4157 = vrot.lane.b32.xlu1 %v10934_v5, %s12384_s24  ;;  %v10966_v5 = vld [vmem:[%s12505_s14 + $0x468] sm:$0xff] }
 0x48c   : > { %4155 = vrot.lane.b32.xlu0 %v10933_v3, %s12384_s24  ;;  %v10965_v3 = vld [vmem:[%s12505_s14 + $0x460] sm:$0xff] }
 0x48d   : > { %v4046_v0 = vpop.permute.xlu1 %4045 }
 0x48e   : > { %v4044_v32 = vpop.permute.xlu0 %4043  ;;  %4494 = vst.msk [vmem:[#allocation2 + $0x108] sm:$0xff] %vm4459_vm8, %v4046_v0 }
 0x48f   : > { %4493 = vst.msk [vmem:[#allocation2 + $0x100] sm:$0xff] %vm4459_vm8, %v4044_v32  ;;  %4161 = vrot.lane.b32.xlu1 %v10936_v49, %s12384_s24  ;;  %v10968_v49 = vld [vmem:[%s12505_s14 + $0x478] sm:$0xff] }
 0x490   : > { %4159 = vrot.lane.b32.xlu0 %v10935_v15, %s12384_s24  ;;  %v10967_v15 = vld [vmem:[%s12505_s14 + $0x470] sm:$0xff] }
 0x491   : > { %v4050_v19 = vpop.permute.xlu1 %4049 }
 0x492   : > { %v4048_v52 = vpop.permute.xlu0 %4047  ;;  %4496 = vst.msk [vmem:[#allocation2 + $0x118] sm:$0xff] %vm4459_vm8, %v4050_v19 }
 0x493   : > { %4495 = vst.msk [vmem:[#allocation2 + $0x110] sm:$0xf] %vm4464_vm9, %v4048_v52  ;;  %4165 = vrot.lane.b32.xlu1 %v10938_v12, %s12384_s24  ;;  %v10970_v12 = vld [vmem:[%s12505_s14 + $0x488] sm:$0xff] }
 0x494   : > { %4163 = vrot.lane.b32.xlu0 %v10937_v16, %s12384_s24  ;;  %v10969_v16 = vld [vmem:[%s12505_s14 + $0x480] sm:$0xf] }
 0x495   : > { %v4054_v37 = vpop.permute.xlu1 %4053 }
 0x496   : > { %v4052_v6 = vpop.permute.xlu0 %4051  ;;  %4498 = vst.msk [vmem:[#allocation2 + $0x128] sm:$0xff] %vm4459_vm8, %v4054_v37 }
 0x497   : > { %4497 = vst.msk [vmem:[#allocation2 + $0x120] sm:$0xff] %vm4459_vm8, %v4052_v6  ;;  %4169 = vrot.lane.b32.xlu1 %v10940_v35, %s12384_s24  ;;  %v10972_v35 = vld [vmem:[%s12505_s14 + $0x498] sm:$0xff] }
 0x498   : > { %4167 = vrot.lane.b32.xlu0 %v10939_v36, %s12384_s24  ;;  %v10971_v36 = vld [vmem:[%s12505_s14 + $0x490] sm:$0xff] }
 0x499   : > { %v4058_v21 = vpop.permute.xlu1 %4057 }
 0x49a   : > { %v4056_v50 = vpop.permute.xlu0 %4055  ;;  %4500 = vst.msk [vmem:[#allocation2 + $0x138] sm:$0xf] %vm4464_vm9, %v4058_v21 }
 0x49b   : > { %4499 = vst.msk [vmem:[#allocation2 + $0x130] sm:$0xff] %vm4459_vm8, %v4056_v50  ;;  %4173 = vrot.lane.b32.xlu1 %v10942_v20, %s12384_s24  ;;  %v10974_v20 = vld [vmem:[%s12505_s14 + $0x4a8] sm:$0xf] }
 0x49c   : > { %4171 = vrot.lane.b32.xlu0 %v10941_v17, %s12384_s24  ;;  %v10973_v17 = vld [vmem:[%s12505_s14 + $0x4a0] sm:$0xff] }
 0x49d   : > { %v4062_v41 = vpop.permute.xlu1 %4061 }
 0x49e   : > { %v4060_v53 = vpop.permute.xlu0 %4059  ;;  %4502 = vst.msk [vmem:[#allocation2 + $0x148] sm:$0xff] %vm4459_vm8, %v4062_v41 }
 0x49f   : > { %4501 = vst.msk [vmem:[#allocation2 + $0x140] sm:$0xff] %vm4459_vm8, %v4060_v53  ;;  %4177 = vrot.lane.b32.xlu1 %v10944_v38, %s12384_s24  ;;  %v10976_v38 = vld [vmem:[%s12505_s14 + $0x4b8] sm:$0xff] }
 0x4a0   : > { %4175 = vrot.lane.b32.xlu0 %v10943_v39, %s12384_s24  ;;  %v10975_v39 = vld [vmem:[%s12505_s14 + $0x4b0] sm:$0xff] }
 0x4a1   : > { %v4066_v43 = vpop.permute.xlu1 %4065 }
 0x4a2   : > { %v4064_v44 = vpop.permute.xlu0 %4063  ;;  %4504 = vst.msk [vmem:[#allocation2 + $0x158] sm:$0xff] %vm4459_vm8, %v4066_v43 }
 0x4a3   : > { %4503 = vst.msk [vmem:[#allocation2 + $0x150] sm:$0xff] %vm4459_vm8, %v4064_v44  ;;  %4181 = vrot.lane.b32.xlu1 %v10946_v56, %s12384_s24  ;;  %v10978_v56 = vld [vmem:[%s12505_s14 + $0x4c8] sm:$0xff] }
 0x4a4   : > { %4179 = vrot.lane.b32.xlu0 %v10945_v59, %s12384_s24  ;;  %v10977_v59 = vld [vmem:[%s12505_s14 + $0x4c0] sm:$0xff] }
 0x4a5   : > { %v4070_v42 = vpop.permute.xlu1 %4069 }
 0x4a6   : > { %v4068_v47 = vpop.permute.xlu0 %4067  ;;  %4506 = vst.msk [vmem:[#allocation2 + $0x168] sm:$0xff] %vm4459_vm8, %v4070_v42 }
 0x4a7   : > { %4505 = vst.msk [vmem:[#allocation2 + $0x160] sm:$0xf] %vm4464_vm9, %v4068_v47  ;;  %4185 = vrot.lane.b32.xlu1 %v10948_v45, %s12384_s24  ;;  %v10980_v45 = vld [vmem:[%s12505_s14 + $0x4d8] sm:$0xff] }
 0x4a8   : > { %4183 = vrot.lane.b32.xlu0 %v10947_v14, %s12384_s24  ;;  %v10979_v14 = vld [vmem:[%s12505_s14 + $0x4d0] sm:$0xf] }
 0x4a9   : > { %v4074_v24 = vpop.permute.xlu1 %4073 }
 0x4aa   : > { %v4072_v34 = vpop.permute.xlu0 %4071  ;;  %4508 = vst.msk [vmem:[#allocation2 + $0x178] sm:$0xff] %vm4459_vm8, %v4074_v24 }
 0x4ab   : > { %4507 = vst.msk [vmem:[#allocation2 + $0x170] sm:$0xff] %vm4459_vm8, %v4072_v34  ;;  %4189 = vrot.lane.b32.xlu1 %v10950_v48, %s12384_s24  ;;  %v10982_v48 = vld [vmem:[%s12505_s14 + $0x4e8] sm:$0xff] }
 0x4ac   : > { %4187 = vrot.lane.b32.xlu0 %v10949_v22, %s12384_s24  ;;  %v10981_v22 = vld [vmem:[%s12505_s14 + $0x4e0] sm:$0xff] }
 0x4ad   : > { %v4078_v61 = vpop.permute.xlu1 %4077 }
 0x4ae   : > { %v4076_v46 = vpop.permute.xlu0 %4075  ;;  %4510 = vst.msk [vmem:[#allocation2 + $0x188] sm:$0xf] %vm4464_vm9, %v4078_v61 }
 0x4af   : > { %4509 = vst.msk [vmem:[#allocation2 + $0x180] sm:$0xff] %vm4459_vm8, %v4076_v46  ;;  %4193 = vrot.lane.b32.xlu1 %v10952_v40, %s12384_s24  ;;  %v10984_v40 = vld [vmem:[%s12505_s14 + $0x4f8] sm:$0xf] }
 0x4b0   : > { %4191 = vrot.lane.b32.xlu0 %v10951_v54, %s12384_s24  ;;  %v10983_v54 = vld [vmem:[%s12505_s14 + $0x4f0] sm:$0xff] }
 0x4b1   : > { %v4082_v29 = vpop.permute.xlu1 %4081 }
 0x4b2   : > { %v4080_v10 = vpop.permute.xlu0 %4079  ;;  %4512 = vst.msk [vmem:[#allocation2 + $0x198] sm:$0xff] %vm4459_vm8, %v4082_v29 }
 0x4b3   : > { %4511 = vst.msk [vmem:[#allocation2 + $0x190] sm:$0xff] %vm4459_vm8, %v4080_v10  ;;  %4197 = vrot.lane.b32.xlu1 %v10954_v57, %s12384_s24  ;;  %v10986_v57 = vld [vmem:[%s12505_s14 + $0x508] sm:$0xff] }
 0x4b4   : > { %4195 = vrot.lane.b32.xlu0 %v10953_v25, %s12384_s24  ;;  %v10985_v25 = vld [vmem:[%s12505_s14 + $0x500] sm:$0xff] }
 0x4b5   : > { %v4086_v63 = vpop.permute.xlu1 %4085 }
 0x4b6   : > { %v4084_v27 = vpop.permute.xlu0 %4083  ;;  %4514 = vst.msk [vmem:[#allocation2 + $0x1a8] sm:$0xff] %vm4459_vm8, %v4086_v63 }
 0x4b7   : > { %4513 = vst.msk [vmem:[#allocation2 + $0x1a0] sm:$0xff] %vm4459_vm8, %v4084_v27  ;;  %4201 = vrot.lane.b32.xlu1 %v10956_v26, %s12384_s24  ;;  %v10988_v26 = vld [vmem:[%s12505_s14 + $0x518] sm:$0xff] }
 0x4b8   : > { %4199 = vrot.lane.b32.xlu0 %v10955_v62, %s12384_s24  ;;  %v10987_v62 = vld [vmem:[%s12505_s14 + $0x510] sm:$0xff] }
 0x4b9   : > { %v4090_v58 = vpop.permute.xlu1 %4089 }
 0x4ba   : > { %v4088_v23 = vpop.permute.xlu0 %4087  ;;  %4516 = vst.msk [vmem:[#allocation2 + $0x1b8] sm:$0xff] %vm4459_vm8, %v4090_v58 }
 0x4bb   : > { %4515 = vst.msk [vmem:[#allocation2 + $0x1b0] sm:$0xf] %vm4464_vm9, %v4088_v23  ;;  %4205 = vrot.lane.b32.xlu1 %v10958_v28, %s12384_s24  ;;  %v10990_v28 = vld [vmem:[%s12505_s14 + $0x528] sm:$0xff] }
 0x4bc   : > { %4203 = vrot.lane.b32.xlu0 %v10957_v55, %s12384_s24  ;;  %v10989_v55 = vld [vmem:[%s12505_s14 + $0x520] sm:$0xf] }
 0x4bd   : > { %v4094_v4 = vpop.permute.xlu1 %4093 }
 0x4be   : > { %v4092_v31 = vpop.permute.xlu0 %4091  ;;  %4518 = vst.msk [vmem:[#allocation2 + $0x1c8] sm:$0xff] %vm4459_vm8, %v4094_v4 }
 0x4bf   : > { %4517 = vst.msk [vmem:[#allocation2 + $0x1c0] sm:$0xff] %vm4459_vm8, %v4092_v31  ;;  %4209 = vrot.lane.b32.xlu1 %v10960_v2, %s12384_s24  ;;  %v10992_v2 = vld [vmem:[%s12505_s14 + $0x538] sm:$0xff] }
 0x4c0   : > { %4207 = vrot.lane.b32.xlu0 %v10959_v60, %s12384_s24  ;;  %v10991_v60 = vld [vmem:[%s12505_s14 + $0x530] sm:$0xff] }
 0x4c1   : > { %v4098_v13 = vpop.permute.xlu1 %4097 }
 0x4c2   : > { %v4096_v8 = vpop.permute.xlu0 %4095  ;;  %4520 = vst.msk [vmem:[#allocation2 + $0x1d8] sm:$0xf] %vm4464_vm9, %v4098_v13 }
 0x4c3   : > { %4519 = vst.msk [vmem:[#allocation2 + $0x1d0] sm:$0xff] %vm4459_vm8, %v4096_v8  ;;  %4213 = vrot.lane.b32.xlu1 %v10962_v51, %s12384_s24  ;;  %v10994_v51 = vld [vmem:[%s12505_s14 + $0x548] sm:$0xf] }
 0x4c4   : > { %4211 = vrot.lane.b32.xlu0 %v10961_v7, %s12384_s24  ;;  %v10993_v7 = vld [vmem:[%s12505_s14 + $0x540] sm:$0xff] }
 0x4c5   : > { %v4102_v11 = vpop.permute.xlu1 %4101 }
 0x4c6   : > { %v4100_v1 = vpop.permute.xlu0 %4099  ;;  %4522 = vst.msk [vmem:[#allocation2 + $0x1e8] sm:$0xff] %vm4459_vm8, %v4102_v11 }
 0x4c7   : > { %4521 = vst.msk [vmem:[#allocation2 + $0x1e0] sm:$0xff] %vm4459_vm8, %v4100_v1  ;;  %4217 = vrot.lane.b32.xlu1 %v10964_v9, %s12384_s24  ;;  %v10996_v9 = vld [vmem:[%s12505_s14 + $0x558] sm:$0xff] }
 0x4c8   : > { %4215 = vrot.lane.b32.xlu0 %v10963_v18, %s12384_s24  ;;  %v10995_v18 = vld [vmem:[%s12505_s14 + $0x550] sm:$0xff] }
 0x4c9   : > { %v4106_v30 = vpop.permute.xlu1 %4105 }
 0x4ca   : > { %v4104_v33 = vpop.permute.xlu0 %4103  ;;  %4524 = vst.msk [vmem:[#allocation2 + $0x1f8] sm:$0xff] %vm4459_vm8, %v4106_v30 }
 0x4cb   : > { %4523 = vst.msk [vmem:[#allocation2 + $0x1f0] sm:$0xff] %vm4459_vm8, %v4104_v33  ;;  %4221 = vrot.lane.b32.xlu1 %v10966_v5, %s12384_s24  ;;  %v15010_v5 = vld [vmem:[%s12505_s14 + $0x568] sm:$0xff] }
 0x4cc   : > { %4219 = vrot.lane.b32.xlu0 %v10965_v3, %s12384_s24  ;;  %v15013_v3 = vld [vmem:[%s12505_s14 + $0x560] sm:$0xff] }
 0x4cd   : > { %v4110_v0 = vpop.permute.xlu1 %4109 }
 0x4ce   : > { %v4108_v32 = vpop.permute.xlu0 %4107  ;;  %4526 = vst.msk [vmem:[#allocation2 + $0x208] sm:$0xff] %vm4459_vm8, %v4110_v0  ;;  %v10999_v0 = vld [vmem:[%s12505_s14 + $0x570] sm:$0xf] }
 0x4cf   : > { %4525 = vst.msk [vmem:[#allocation2 + $0x200] sm:$0xf] %vm4464_vm9, %v4108_v32  ;;  %4225 = vrot.lane.b32.xlu1 %v10968_v49, %s12384_s24  ;;  %v17831_v49 = vmov 0.0  }
 0x4d0   : > { %4223 = vrot.lane.b32.xlu0 %v10967_v15, %s12384_s24  ;;  %386 = vst.msk [vmem:[#allocation5] sm:$0xff] %vm385_vm10, %v17831_v49  ;;  %387 = vst.msk [vmem:[#allocation5 + $0x8] sm:$0xff] %vm385_vm10, %v17831_v49  ;;  %v11000_v15 = vld [vmem:[%s12505_s14 + $0x578] sm:$0xff] }
 0x4d1   : > { %v4114_v19 = vpop.permute.xlu1 %4113  ;;  %389 = vst.msk [vmem:[#allocation5 + $0x10] sm:$0xf] %vm388_vm11, %v17831_v49  ;;  %392 = vst.msk [vmem:[#allocation5 + $0x28] sm:$0xf] %vm388_vm11, %v17831_v49 }
 0x4d2   : > { %v4112_v52 = vpop.permute.xlu0 %4111  ;;  %4528 = vst.msk [vmem:[#allocation2 + $0x218] sm:$0xff] %vm4459_vm8, %v4114_v19  ;;  %v11001_v19 = vld [vmem:[%s12505_s14 + $0x580] sm:$0xff] }
 0x4d3   : > { %4527 = vst.msk [vmem:[#allocation2 + $0x210] sm:$0xff] %vm4459_vm8, %v4112_v52  ;;  %4229 = vrot.lane.b32.xlu1 %v10970_v12, %s12384_s24 }
 0x4d4   : > { %4227 = vrot.lane.b32.xlu0 %v10969_v16, %s12384_s24  ;;  %390 = vst.msk [vmem:[#allocation5 + $0x18] sm:$0xff] %vm385_vm10, %v17831_v49  ;;  %391 = vst.msk [vmem:[#allocation5 + $0x20] sm:$0xff] %vm385_vm10, %v17831_v49  ;;  %v11002_v16 = vld [vmem:[%s12505_s14 + $0x588] sm:$0xff] }
 0x4d5   : > { %v4118_v37 = vpop.permute.xlu1 %4117  ;;  %393 = vst.msk [vmem:[#allocation5 + $0x30] sm:$0xff] %vm385_vm10, %v17831_v49  ;;  %394 = vst.msk [vmem:[#allocation5 + $0x38] sm:$0xff] %vm385_vm10, %v17831_v49 }
 0x4d6   : > { %v4116_v6 = vpop.permute.xlu0 %4115  ;;  %4530 = vst.msk [vmem:[#allocation2 + $0x228] sm:$0xf] %vm4464_vm9, %v4118_v37  ;;  %v11003_v37 = vld [vmem:[%s12505_s14 + $0x590] sm:$0xff] }
 0x4d7   : > { %4529 = vst.msk [vmem:[#allocation2 + $0x220] sm:$0xff] %vm4459_vm8, %v4116_v6  ;;  %4233 = vrot.lane.b32.xlu1 %v10972_v35, %s12384_s24 }
 0x4d8   : > { %4231 = vrot.lane.b32.xlu0 %v10971_v36, %s12384_s24  ;;  %395 = vst.msk [vmem:[#allocation5 + $0x40] sm:$0xf] %vm388_vm11, %v17831_v49  ;;  %398 = vst.msk [vmem:[#allocation5 + $0x58] sm:$0xf] %vm388_vm11, %v17831_v49  ;;  %v11004_v36 = vld [vmem:[%s12505_s14 + $0x598] sm:$0xf] }
 0x4d9   : > { %v4122_v21 = vpop.permute.xlu1 %4121  ;;  %396 = vst.msk [vmem:[#allocation5 + $0x48] sm:$0xff] %vm385_vm10, %v17831_v49  ;;  %397 = vst.msk [vmem:[#allocation5 + $0x50] sm:$0xff] %vm385_vm10, %v17831_v49 }
 0x4da   : > { %v4120_v50 = vpop.permute.xlu0 %4119  ;;  %4532 = vst.msk [vmem:[#allocation2 + $0x238] sm:$0xff] %vm4459_vm8, %v4122_v21 }
 0x4db   : > { %4531 = vst.msk [vmem:[#allocation2 + $0x230] sm:$0xff] %vm4459_vm8, %v4120_v50  ;;  %4237 = vrot.lane.b32.xlu1 %v10974_v20, %s12384_s24 }
 0x4dc   : > { %4235 = vrot.lane.b32.xlu0 %v10973_v17, %s12384_s24  ;;  %399 = vst.msk [vmem:[#allocation5 + $0x60] sm:$0xff] %vm385_vm10, %v17831_v49  ;;  %400 = vst.msk [vmem:[#allocation5 + $0x68] sm:$0xff] %vm385_vm10, %v17831_v49 }
 0x4dd   : > { %v4126_v41 = vpop.permute.xlu1 %4125  ;;  %401 = vst.msk [vmem:[#allocation5 + $0x70] sm:$0xf] %vm388_vm11, %v17831_v49  ;;  %404 = vst.msk [vmem:[#allocation5 + $0x88] sm:$0xf] %vm388_vm11, %v17831_v49 }
 0x4de   : > { %v4124_v53 = vpop.permute.xlu0 %4123  ;;  %4534 = vst.msk [vmem:[#allocation2 + $0x248] sm:$0xff] %vm4459_vm8, %v4126_v41 }
 0x4df   : > { %4533 = vst.msk [vmem:[#allocation2 + $0x240] sm:$0xff] %vm4459_vm8, %v4124_v53  ;;  %4241 = vrot.lane.b32.xlu1 %v10976_v38, %s12384_s24 }
 0x4e0   : > { %4239 = vrot.lane.b32.xlu0 %v10975_v39, %s12384_s24  ;;  %402 = vst.msk [vmem:[#allocation5 + $0x78] sm:$0xff] %vm385_vm10, %v17831_v49  ;;  %403 = vst.msk [vmem:[#allocation5 + $0x80] sm:$0xff] %vm385_vm10, %v17831_v49 }
 0x4e1   : > { %v4130_v43 = vpop.permute.xlu1 %4129  ;;  %405 = vst.msk [vmem:[#allocation5 + $0x90] sm:$0xff] %vm385_vm10, %v17831_v49  ;;  %406 = vst.msk [vmem:[#allocation5 + $0x98] sm:$0xff] %vm385_vm10, %v17831_v49 }
 0x4e2   : > { %v4128_v44 = vpop.permute.xlu0 %4127  ;;  %4536 = vst.msk [vmem:[#allocation2 + $0x258] sm:$0xff] %vm4459_vm8, %v4130_v43 }
 0x4e3   : > { %4535 = vst.msk [vmem:[#allocation2 + $0x250] sm:$0xf] %vm4464_vm9, %v4128_v44  ;;  %4245 = vrot.lane.b32.xlu1 %v10978_v56, %s12384_s24 }
 0x4e4   : > { %4243 = vrot.lane.b32.xlu0 %v10977_v59, %s12384_s24  ;;  %407 = vst.msk [vmem:[#allocation5 + $0xa0] sm:$0xf] %vm388_vm11, %v17831_v49  ;;  %410 = vst.msk [vmem:[#allocation5 + $0xb8] sm:$0xf] %vm388_vm11, %v17831_v49 }
 0x4e5   : > { %v4134_v42 = vpop.permute.xlu1 %4133  ;;  %408 = vst.msk [vmem:[#allocation5 + $0xa8] sm:$0xff] %vm385_vm10, %v17831_v49  ;;  %409 = vst.msk [vmem:[#allocation5 + $0xb0] sm:$0xff] %vm385_vm10, %v17831_v49 }
 0x4e6   : > { %v4132_v47 = vpop.permute.xlu0 %4131  ;;  %4538 = vst.msk [vmem:[#allocation2 + $0x268] sm:$0xff] %vm4459_vm8, %v4134_v42 }
 0x4e7   : > { %4537 = vst.msk [vmem:[#allocation2 + $0x260] sm:$0xff] %vm4459_vm8, %v4132_v47  ;;  %4249 = vrot.lane.b32.xlu1 %v10980_v45, %s12384_s24 }
 0x4e8   : > { %4247 = vrot.lane.b32.xlu0 %v10979_v14, %s12384_s24  ;;  %411 = vst.msk [vmem:[#allocation5 + $0xc0] sm:$0xff] %vm385_vm10, %v17831_v49  ;;  %412 = vst.msk [vmem:[#allocation5 + $0xc8] sm:$0xff] %vm385_vm10, %v17831_v49 }
 0x4e9   : > { %v4138_v24 = vpop.permute.xlu1 %4137  ;;  %413 = vst.msk [vmem:[#allocation5 + $0xd0] sm:$0xf] %vm388_vm11, %v17831_v49  ;;  %416 = vst.msk [vmem:[#allocation5 + $0xe8] sm:$0xf] %vm388_vm11, %v17831_v49 }
 0x4ea   : > { %v4136_v34 = vpop.permute.xlu0 %4135  ;;  %4540 = vst.msk [vmem:[#allocation2 + $0x278] sm:$0xf] %vm4464_vm9, %v4138_v24 }
 0x4eb   : > { %4539 = vst.msk [vmem:[#allocation2 + $0x270] sm:$0xff] %vm4459_vm8, %v4136_v34  ;;  %4253 = vrot.lane.b32.xlu1 %v10982_v48, %s12384_s24 }
 0x4ec   : > { %4251 = vrot.lane.b32.xlu0 %v10981_v22, %s12384_s24  ;;  %414 = vst.msk [vmem:[#allocation5 + $0xd8] sm:$0xff] %vm385_vm10, %v17831_v49  ;;  %415 = vst.msk [vmem:[#allocation5 + $0xe0] sm:$0xff] %vm385_vm10, %v17831_v49 }
 0x4ed   : > { %v4142_v61 = vpop.permute.xlu1 %4141  ;;  %417 = vst.msk [vmem:[#allocation5 + $0xf0] sm:$0xff] %vm385_vm10, %v17831_v49  ;;  %418 = vst.msk [vmem:[#allocation5 + $0xf8] sm:$0xff] %vm385_vm10, %v17831_v49 }
 0x4ee   : > { %v4140_v46 = vpop.permute.xlu0 %4139  ;;  %4542 = vst.msk [vmem:[#allocation2 + $0x288] sm:$0xff] %vm4459_vm8, %v4142_v61 }
 0x4ef   : > { %4541 = vst.msk [vmem:[#allocation2 + $0x280] sm:$0xff] %vm4459_vm8, %v4140_v46  ;;  %4257 = vrot.lane.b32.xlu1 %v10984_v40, %s12384_s24 }
 0x4f0   : > { %4255 = vrot.lane.b32.xlu0 %v10983_v54, %s12384_s24  ;;  %419 = vst.msk [vmem:[#allocation5 + $0x100] sm:$0xf] %vm388_vm11, %v17831_v49  ;;  %422 = vst.msk [vmem:[#allocation5 + $0x118] sm:$0xf] %vm388_vm11, %v17831_v49 }
 0x4f1   : > { %v4146_v29 = vpop.permute.xlu1 %4145  ;;  %420 = vst.msk [vmem:[#allocation5 + $0x108] sm:$0xff] %vm385_vm10, %v17831_v49  ;;  %421 = vst.msk [vmem:[#allocation5 + $0x110] sm:$0xff] %vm385_vm10, %v17831_v49 }
 0x4f2   : > { %v4144_v10 = vpop.permute.xlu0 %4143  ;;  %4544 = vst.msk [vmem:[#allocation2 + $0x298] sm:$0xff] %vm4459_vm8, %v4146_v29 }
 0x4f3   : > { %4543 = vst.msk [vmem:[#allocation2 + $0x290] sm:$0xff] %vm4459_vm8, %v4144_v10  ;;  %4261 = vrot.lane.b32.xlu1 %v10986_v57, %s12384_s24 }
 0x4f4   : > { %4259 = vrot.lane.b32.xlu0 %v10985_v25, %s12384_s24  ;;  %423 = vst.msk [vmem:[#allocation5 + $0x120] sm:$0xff] %vm385_vm10, %v17831_v49  ;;  %424 = vst.msk [vmem:[#allocation5 + $0x128] sm:$0xff] %vm385_vm10, %v17831_v49 }
 0x4f5   : > { %v4150_v63 = vpop.permute.xlu1 %4149  ;;  %425 = vst.msk [vmem:[#allocation5 + $0x130] sm:$0xf] %vm388_vm11, %v17831_v49  ;;  %428 = vst.msk [vmem:[#allocation5 + $0x148] sm:$0xf] %vm388_vm11, %v17831_v49 }
 0x4f6   : > { %v4148_v27 = vpop.permute.xlu0 %4147  ;;  %4546 = vst.msk [vmem:[#allocation2 + $0x2a8] sm:$0xff] %vm4459_vm8, %v4150_v63 }
 0x4f7   : > { %4545 = vst.msk [vmem:[#allocation2 + $0x2a0] sm:$0xf] %vm4464_vm9, %v4148_v27  ;;  %4265 = vrot.lane.b32.xlu1 %v10988_v26, %s12384_s24 }
 0x4f8   : > { %4263 = vrot.lane.b32.xlu0 %v10987_v62, %s12384_s24  ;;  %426 = vst.msk [vmem:[#allocation5 + $0x138] sm:$0xff] %vm385_vm10, %v17831_v49  ;;  %427 = vst.msk [vmem:[#allocation5 + $0x140] sm:$0xff] %vm385_vm10, %v17831_v49 }
 0x4f9   : > { %v4154_v58 = vpop.permute.xlu1 %4153  ;;  %429 = vst.msk [vmem:[#allocation5 + $0x150] sm:$0xff] %vm385_vm10, %v17831_v49  ;;  %430 = vst.msk [vmem:[#allocation5 + $0x158] sm:$0xff] %vm385_vm10, %v17831_v49 }
 0x4fa   : > { %v4152_v23 = vpop.permute.xlu0 %4151  ;;  %4548 = vst.msk [vmem:[#allocation2 + $0x2b8] sm:$0xff] %vm4459_vm8, %v4154_v58 }
 0x4fb   : > { %4547 = vst.msk [vmem:[#allocation2 + $0x2b0] sm:$0xff] %vm4459_vm8, %v4152_v23  ;;  %4269 = vrot.lane.b32.xlu1 %v10990_v28, %s12384_s24 }
 0x4fc   : > { %4267 = vrot.lane.b32.xlu0 %v10989_v55, %s12384_s24  ;;  %431 = vst.msk [vmem:[#allocation5 + $0x160] sm:$0xf] %vm388_vm11, %v17831_v49  ;;  %434 = vst.msk [vmem:[#allocation5 + $0x178] sm:$0xf] %vm388_vm11, %v17831_v49 }
 0x4fd   : > { %v4158_v4 = vpop.permute.xlu1 %4157  ;;  %432 = vst.msk [vmem:[#allocation5 + $0x168] sm:$0xff] %vm385_vm10, %v17831_v49  ;;  %433 = vst.msk [vmem:[#allocation5 + $0x170] sm:$0xff] %vm385_vm10, %v17831_v49 }
 0x4fe   : > { %v4156_v31 = vpop.permute.xlu0 %4155  ;;  %4550 = vst.msk [vmem:[#allocation2 + $0x2c8] sm:$0xf] %vm4464_vm9, %v4158_v4 }
 0x4ff   : > { %4549 = vst.msk [vmem:[#allocation2 + $0x2c0] sm:$0xff] %vm4459_vm8, %v4156_v31  ;;  %4273 = vrot.lane.b32.xlu1 %v10992_v2, %s12384_s24 }
 0x500   : > { %4271 = vrot.lane.b32.xlu0 %v10991_v60, %s12384_s24  ;;  %435 = vst.msk [vmem:[#allocation5 + $0x180] sm:$0xff] %vm385_vm10, %v17831_v49  ;;  %436 = vst.msk [vmem:[#allocation5 + $0x188] sm:$0xff] %vm385_vm10, %v17831_v49 }
 0x501   : > { %v4162_v13 = vpop.permute.xlu1 %4161  ;;  %437 = vst.msk [vmem:[#allocation5 + $0x190] sm:$0xf] %vm388_vm11, %v17831_v49  ;;  %440 = vst.msk [vmem:[#allocation5 + $0x1a8] sm:$0xf] %vm388_vm11, %v17831_v49 }
 0x502   : > { %v4160_v8 = vpop.permute.xlu0 %4159  ;;  %4552 = vst.msk [vmem:[#allocation2 + $0x2d8] sm:$0xff] %vm4459_vm8, %v4162_v13 }
 0x503   : > { %4551 = vst.msk [vmem:[#allocation2 + $0x2d0] sm:$0xff] %vm4459_vm8, %v4160_v8  ;;  %4277 = vrot.lane.b32.xlu1 %v10994_v51, %s12384_s24 }
 0x504   : > { %4275 = vrot.lane.b32.xlu0 %v10993_v7, %s12384_s24  ;;  %438 = vst.msk [vmem:[#allocation5 + $0x198] sm:$0xff] %vm385_vm10, %v17831_v49  ;;  %439 = vst.msk [vmem:[#allocation5 + $0x1a0] sm:$0xff] %vm385_vm10, %v17831_v49 }
 0x505   : > { %v4166_v11 = vpop.permute.xlu1 %4165  ;;  %441 = vst.msk [vmem:[#allocation5 + $0x1b0] sm:$0xff] %vm385_vm10, %v17831_v49  ;;  %442 = vst.msk [vmem:[#allocation5 + $0x1b8] sm:$0xff] %vm385_vm10, %v17831_v49 }
 0x506   : > { %v4164_v1 = vpop.permute.xlu0 %4163  ;;  %4554 = vst.msk [vmem:[#allocation2 + $0x2e8] sm:$0xff] %vm4459_vm8, %v4166_v11 }
 0x507   : > { %4553 = vst.msk [vmem:[#allocation2 + $0x2e0] sm:$0xff] %vm4459_vm8, %v4164_v1  ;;  %4281 = vrot.lane.b32.xlu1 %v10996_v9, %s12384_s24 }
 0x508   : > { %4279 = vrot.lane.b32.xlu0 %v10995_v18, %s12384_s24  ;;  %443 = vst.msk [vmem:[#allocation5 + $0x1c0] sm:$0xf] %vm388_vm11, %v17831_v49  ;;  %446 = vst.msk [vmem:[#allocation5 + $0x1d8] sm:$0xf] %vm388_vm11, %v17831_v49 }
 0x509   : > { %v4170_v30 = vpop.permute.xlu1 %4169  ;;  %444 = vst.msk [vmem:[#allocation5 + $0x1c8] sm:$0xff] %vm385_vm10, %v17831_v49  ;;  %445 = vst.msk [vmem:[#allocation5 + $0x1d0] sm:$0xff] %vm385_vm10, %v17831_v49 }
 0x50a   : > { %v4168_v33 = vpop.permute.xlu0 %4167  ;;  %4556 = vst.msk [vmem:[#allocation2 + $0x2f8] sm:$0xff] %vm4459_vm8, %v4170_v30 }
 0x50b   : > { %4555 = vst.msk [vmem:[#allocation2 + $0x2f0] sm:$0xf] %vm4464_vm9, %v4168_v33  ;;  %4285 = vrot.lane.b32.xlu1 %v15010_v5, %s12384_s24 }
 0x50c   : > { %4283 = vrot.lane.b32.xlu0 %v15013_v3, %s12384_s24 }
 0x50d   : > { %v4174_v32 = vpop.permute.xlu1 %4173 }
 0x50e   : > { %v4172_v12 = vpop.permute.xlu0 %4171  ;;  %4558 = vst.msk [vmem:[#allocation2 + $0x308] sm:$0xff] %vm4459_vm8, %v4174_v32 }
 0x50f   : > { %4557 = vst.msk [vmem:[#allocation2 + $0x300] sm:$0xff] %vm4459_vm8, %v4172_v12  ;;  %4289 = vrot.lane.b32.xlu1 %v11000_v15, %s12384_s24 }
 0x510   : > { %4287 = vrot.lane.b32.xlu0 %v10999_v0, %s12384_s24 }
 0x511   : > { %v4178_v52 = vpop.permute.xlu1 %4177 }
 0x512   : > { %v4176_v35 = vpop.permute.xlu0 %4175  ;;  %4560 = vst.msk [vmem:[#allocation2 + $0x318] sm:$0xf] %vm4464_vm9, %v4178_v52 }
 0x513   : > { %4559 = vst.msk [vmem:[#allocation2 + $0x310] sm:$0xff] %vm4459_vm8, %v4176_v35  ;;  %4293 = vrot.lane.b32.xlu1 %v11002_v16, %s12384_s24 }
 0x514   : > { %4291 = vrot.lane.b32.xlu0 %v11001_v19, %s12384_s24 }
 0x515   : > { %v4182_v6 = vpop.permute.xlu1 %4181 }
 0x516   : > { %v4180_v20 = vpop.permute.xlu0 %4179  ;;  %4562 = vst.msk [vmem:[#allocation2 + $0x328] sm:$0xff] %vm4459_vm8, %v4182_v6 }
 0x517   : > { %4561 = vst.msk [vmem:[#allocation2 + $0x320] sm:$0xff] %vm4459_vm8, %v4180_v20  ;;  %4297 = vrot.lane.b32.xlu1 %v11004_v36, %s12384_s24 }
 0x518   : > { %4295 = vrot.lane.b32.xlu0 %v11003_v37, %s12384_s24 }
 0x519   : > { %v4186_v17 = vpop.permute.xlu1 %4185 }
 0x51a   : > { %v4184_v21 = vpop.permute.xlu0 %4183  ;;  %4564 = vst.msk [vmem:[#allocation2 + $0x338] sm:$0xff] %vm4459_vm8, %v4186_v17 }
 0x51b   : > { %4563 = vst.msk [vmem:[#allocation2 + $0x330] sm:$0xff] %vm4459_vm8, %v4184_v21 }
 0x51d   : > { %v4190_v50 = vpop.permute.xlu1 %4189 }
 0x51e   : > { %v4188_v38 = vpop.permute.xlu0 %4187  ;;  %4566 = vst.msk [vmem:[#allocation2 + $0x348] sm:$0xff] %vm4459_vm8, %v4190_v50 }
 0x51f   : > { %4565 = vst.msk [vmem:[#allocation2 + $0x340] sm:$0xf] %vm4464_vm9, %v4188_v38 }
 0x521   : > { %v4194_v39 = vpop.permute.xlu1 %4193 }
 0x522   : > { %v4192_v41 = vpop.permute.xlu0 %4191  ;;  %4568 = vst.msk [vmem:[#allocation2 + $0x358] sm:$0xff] %vm4459_vm8, %v4194_v39 }
 0x523   : > { %4567 = vst.msk [vmem:[#allocation2 + $0x350] sm:$0xff] %vm4459_vm8, %v4192_v41 }
 0x525   : > { %v4198_v53 = vpop.permute.xlu1 %4197 }
 0x526   : > { %v4196_v56 = vpop.permute.xlu0 %4195  ;;  %4570 = vst.msk [vmem:[#allocation2 + $0x368] sm:$0xf] %vm4464_vm9, %v4198_v53 }
 0x527   : > { %4569 = vst.msk [vmem:[#allocation2 + $0x360] sm:$0xff] %vm4459_vm8, %v4196_v56 }
 0x529   : > { %v4202_v59 = vpop.permute.xlu1 %4201 }
 0x52a   : > { %v4200_v43 = vpop.permute.xlu0 %4199  ;;  %4572 = vst.msk [vmem:[#allocation2 + $0x378] sm:$0xff] %vm4459_vm8, %v4202_v59 }
 0x52b   : > { %4571 = vst.msk [vmem:[#allocation2 + $0x370] sm:$0xff] %vm4459_vm8, %v4200_v43 }
 0x52d   : > { %v4206_v44 = vpop.permute.xlu1 %4205 }
 0x52e   : > { %v4204_v45 = vpop.permute.xlu0 %4203  ;;  %4574 = vst.msk [vmem:[#allocation2 + $0x388] sm:$0xff] %vm4459_vm8, %v4206_v44 }
 0x52f   : > { %4573 = vst.msk [vmem:[#allocation2 + $0x380] sm:$0xff] %vm4459_vm8, %v4204_v45 }
 0x531   : > { %v4210_v14 = vpop.permute.xlu1 %4209 }
 0x532   : > { %v4208_v42 = vpop.permute.xlu0 %4207  ;;  %4576 = vst.msk [vmem:[#allocation2 + $0x398] sm:$0xff] %vm4459_vm8, %v4210_v14 }
 0x533   : > { %4575 = vst.msk [vmem:[#allocation2 + $0x390] sm:$0xf] %vm4464_vm9, %v4208_v42 }
 0x535   : > { %v4214_v47 = vpop.permute.xlu1 %4213 }
 0x536   : > { %v4212_v48 = vpop.permute.xlu0 %4211  ;;  %4578 = vst.msk [vmem:[#allocation2 + $0x3a8] sm:$0xff] %vm4459_vm8, %v4214_v47 }
 0x537   : > { %4577 = vst.msk [vmem:[#allocation2 + $0x3a0] sm:$0xff] %vm4459_vm8, %v4212_v48 }
 0x539   : > { %v4218_v22 = vpop.permute.xlu1 %4217 }
 0x53a   : > { %v4216_v24 = vpop.permute.xlu0 %4215  ;;  %4580 = vst.msk [vmem:[#allocation2 + $0x3b8] sm:$0xf] %vm4464_vm9, %v4218_v22 }
 0x53b   : > { %4579 = vst.msk [vmem:[#allocation2 + $0x3b0] sm:$0xff] %vm4459_vm8, %v4216_v24 }
 0x53d   : > { %v4222_v34 = vpop.permute.xlu1 %4221 }
 0x53e   : > { %v4220_v40 = vpop.permute.xlu0 %4219  ;;  %4582 = vst.msk [vmem:[#allocation2 + $0x3c8] sm:$0xff] %vm4459_vm8, %v4222_v34 }
 0x53f   : > { %4581 = vst.msk [vmem:[#allocation2 + $0x3c0] sm:$0xff] %vm4459_vm8, %v4220_v40 }
 0x541   : > { %v4226_v54 = vpop.permute.xlu1 %4225 }
 0x542   : > { %v4224_v61 = vpop.permute.xlu0 %4223  ;;  %4584 = vst.msk [vmem:[#allocation2 + $0x3d8] sm:$0xff] %vm4459_vm8, %v4226_v54 }
 0x543   : > { %4583 = vst.msk [vmem:[#allocation2 + $0x3d0] sm:$0xff] %vm4459_vm8, %v4224_v61 }
 0x545   : > { %v4230_v46 = vpop.permute.xlu1 %4229 }
 0x546   : > { %v4228_v57 = vpop.permute.xlu0 %4227  ;;  %4586 = vst.msk [vmem:[#allocation2 + $0x3e8] sm:$0xff] %vm4459_vm8, %v4230_v46 }
 0x547   : > { %4585 = vst.msk [vmem:[#allocation2 + $0x3e0] sm:$0xf] %vm4464_vm9, %v4228_v57 }
 0x549   : > { %v4234_v25 = vpop.permute.xlu1 %4233 }
 0x54a   : > { %v4232_v29 = vpop.permute.xlu0 %4231  ;;  %4588 = vst.msk [vmem:[#allocation2 + $0x3f8] sm:$0xff] %vm4459_vm8, %v4234_v25 }
 0x54b   : > { %4587 = vst.msk [vmem:[#allocation2 + $0x3f0] sm:$0xff] %vm4459_vm8, %v4232_v29 }
 0x54d   : > { %v4238_v10 = vpop.permute.xlu1 %4237 }
 0x54e   : > { %v4236_v26 = vpop.permute.xlu0 %4235  ;;  %4590 = vst.msk [vmem:[#allocation2 + $0x408] sm:$0xf] %vm4464_vm9, %v4238_v10 }
 0x54f   : > { %4589 = vst.msk [vmem:[#allocation2 + $0x400] sm:$0xff] %vm4459_vm8, %v4236_v26 }
 0x551   : > { %v4242_v62 = vpop.permute.xlu1 %4241 }
 0x552   : > { %v4240_v63 = vpop.permute.xlu0 %4239  ;;  %4592 = vst.msk [vmem:[#allocation2 + $0x418] sm:$0xff] %vm4459_vm8, %v4242_v62 }
 0x553   : > { %4591 = vst.msk [vmem:[#allocation2 + $0x410] sm:$0xff] %vm4459_vm8, %v4240_v63 }
 0x555   : > { %v4246_v27 = vpop.permute.xlu1 %4245 }
 0x556   : > { %v4244_v28 = vpop.permute.xlu0 %4243  ;;  %4594 = vst.msk [vmem:[#allocation2 + $0x428] sm:$0xff] %vm4459_vm8, %v4246_v27 }
 0x557   : > { %4593 = vst.msk [vmem:[#allocation2 + $0x420] sm:$0xff] %vm4459_vm8, %v4244_v28 }
 0x559   : > { %v4250_v55 = vpop.permute.xlu1 %4249 }
 0x55a   : > { %v4248_v58 = vpop.permute.xlu0 %4247  ;;  %4596 = vst.msk [vmem:[#allocation2 + $0x438] sm:$0xff] %vm4459_vm8, %v4250_v55 }
 0x55b   : > { %4595 = vst.msk [vmem:[#allocation2 + $0x430] sm:$0xf] %vm4464_vm9, %v4248_v58 }
 0x55d   : > { %v4254_v23 = vpop.permute.xlu1 %4253 }
 0x55e   : > { %v4252_v2 = vpop.permute.xlu0 %4251  ;;  %4598 = vst.msk [vmem:[#allocation2 + $0x448] sm:$0xff] %vm4459_vm8, %v4254_v23 }
 0x55f   : > { %4597 = vst.msk [vmem:[#allocation2 + $0x440] sm:$0xff] %vm4459_vm8, %v4252_v2 }
 0x561   : > { %v4258_v60 = vpop.permute.xlu1 %4257 }
 0x562   : > { %v4256_v4 = vpop.permute.xlu0 %4255  ;;  %4600 = vst.msk [vmem:[#allocation2 + $0x458] sm:$0xf] %vm4464_vm9, %v4258_v60 }
 0x563   : > { %4599 = vst.msk [vmem:[#allocation2 + $0x450] sm:$0xff] %vm4459_vm8, %v4256_v4 }
 0x565   : > { %v4262_v31 = vpop.permute.xlu1 %4261 }
 0x566   : > { %v4260_v51 = vpop.permute.xlu0 %4259  ;;  %4602 = vst.msk [vmem:[#allocation2 + $0x468] sm:$0xff] %vm4459_vm8, %v4262_v31 }
 0x567   : > { %4601 = vst.msk [vmem:[#allocation2 + $0x460] sm:$0xff] %vm4459_vm8, %v4260_v51 }
 0x569   : > { %v4266_v7 = vpop.permute.xlu1 %4265 }
 0x56a   : > { %v4264_v13 = vpop.permute.xlu0 %4263  ;;  %4604 = vst.msk [vmem:[#allocation2 + $0x478] sm:$0xff] %vm4459_vm8, %v4266_v7 }
 0x56b   : > { %4603 = vst.msk [vmem:[#allocation2 + $0x470] sm:$0xff] %vm4459_vm8, %v4264_v13 }
 0x56d   : > { %v4270_v8 = vpop.permute.xlu1 %4269 }
 0x56e   : > { %v4268_v9 = vpop.permute.xlu0 %4267  ;;  %4606 = vst.msk [vmem:[#allocation2 + $0x488] sm:$0xff] %vm4459_vm8, %v4270_v8 }
 0x56f   : > { %4605 = vst.msk [vmem:[#allocation2 + $0x480] sm:$0xf] %vm4464_vm9, %v4268_v9 }
 0x571   : > { %v4274_v18 = vpop.permute.xlu1 %4273 }
 0x572   : > { %v4272_v11 = vpop.permute.xlu0 %4271  ;;  %4608 = vst.msk [vmem:[#allocation2 + $0x498] sm:$0xff] %vm4459_vm8, %v4274_v18 }
 0x573   : > { %4607 = vst.msk [vmem:[#allocation2 + $0x490] sm:$0xff] %vm4459_vm8, %v4272_v11 }
 0x575   : > { %v4278_v1 = vpop.permute.xlu1 %4277 }
 0x576   : > { %v4276_v5 = vpop.permute.xlu0 %4275  ;;  %4610 = vst.msk [vmem:[#allocation2 + $0x4a8] sm:$0xf] %vm4464_vm9, %v4278_v1 }
 0x577   : > { %4609 = vst.msk [vmem:[#allocation2 + $0x4a0] sm:$0xff] %vm4459_vm8, %v4276_v5 }
 0x579   : > { %v4282_v3 = vpop.permute.xlu1 %4281 }
 0x57a   : > { %v4280_v30 = vpop.permute.xlu0 %4279  ;;  %4612 = vst.msk [vmem:[#allocation2 + $0x4b8] sm:$0xff] %vm4459_vm8, %v4282_v3 }
 0x57b   : > { %4611 = vst.msk [vmem:[#allocation2 + $0x4b0] sm:$0xff] %vm4459_vm8, %v4280_v30 }
 0x57d   : > { %v4286_v33 = vpop.permute.xlu1 %4285 }
 0x57e   : > { %v4284_v15 = vpop.permute.xlu0 %4283  ;;  %4614 = vst.msk [vmem:[#allocation2 + $0x4c8] sm:$0xff] %vm4459_vm8, %v4286_v33 }
 0x57f   : > { %4613 = vst.msk [vmem:[#allocation2 + $0x4c0] sm:$0xff] %vm4459_vm8, %v4284_v15 }
 0x581   : > { %v4290_v0 = vpop.permute.xlu1 %4289 }
 0x582   : > { %v4288_v32 = vpop.permute.xlu0 %4287  ;;  %4616 = vst.msk [vmem:[#allocation2 + $0x4d8] sm:$0xff] %vm4459_vm8, %v4290_v0 }
 0x583   : > { %4615 = vst.msk [vmem:[#allocation2 + $0x4d0] sm:$0xf] %vm4464_vm9, %v4288_v32 }
 0x585   : > { %v4294_v12 = vpop.permute.xlu1 %4293 }
 0x586   : > { %v4292_v16 = vpop.permute.xlu0 %4291  ;;  %4618 = vst.msk [vmem:[#allocation2 + $0x4e8] sm:$0xff] %vm4459_vm8, %v4294_v12 }
 0x587   : > { %4617 = vst.msk [vmem:[#allocation2 + $0x4e0] sm:$0xff] %vm4459_vm8, %v4292_v16 }
 0x589   : > { %v4298_v19 = vpop.permute.xlu1 %4297 }
 0x58a   : > { %v4296_v52 = vpop.permute.xlu0 %4295  ;;  %4620 = vst.msk [vmem:[#allocation2 + $0x4f8] sm:$0xf] %vm4464_vm9, %v4298_v19 }
 0x58b   : > { %4619 = vst.msk [vmem:[#allocation2 + $0x4f0] sm:$0xff] %vm4459_vm8, %v4296_v52 }
 0x58c LB: >> { %v15230_v35 = vld [vmem:[%s17815_s1 + $0x24] ss:$0 sps:$4 sm:$0xff]   ;;  %vm4692_vm12 = vcmask 1043456   ;;  %v15235_v36 = vld [vmem:[%s17815_s1 + $0x1c] sm:$0xff]   ;;  %v15240_v37 = vld [vmem:[%s17815_s1 + $0x10] ss:$0 sps:$4 sm:$0xff]   ;;  %s12371_s30 = sphi %s15222_s30, %s4626_s30  }
 0x58d   : >> { %12028 = vmatprep.subr.msk.bf16.mxu0 %vm4692_vm12, %v15230_v35  ;;  %v15246_v6 = vsel %vm4692_vm12, %v15230_v35, 0  ;;  %v15251_v20 = vld [vmem:[%s17815_s1 + $0x8] sm:$0xff]   ;;  %12029 = vmatprep.subr.msk.bf16.mxu1 %vm4692_vm12, %v15240_v37  ;;  %v15258_v17 = vsel %vm4692_vm12, %v15240_v37, 0  ;;  %v15263_v21 = vld [vmem:[%s17815_s1 + $0x14] sm:$0xff]   ;;  %v15271_v50 = vld [vmem:[%s17815_s1] sm:$0xff]   ;;  %s11006_s12 = smul.u32 80, %s12371_s30 }
 0x58e   : >> { %11725 = vmatpush3.bf16.msra.mxu0 %v15246_v6  ;;  %11735 = vmatpush3.bf16.msra.mxu1 %v15258_v17  ;;  %v15277_v38 = vld [vmem:[%s17815_s1 + $0x38] ss:$0 sps:$4 sm:$0xff]   ;;  %v15283_v39 = vld [vmem:[%s17815_s1 + $0x4c] ss:$0 sps:$4 sm:$0xff]   ;;  %vm4685_vm13 = vcmask 326656   ;;  %v15315_v34 = vld [vmem:[%s17815_s1 + $0x44] sm:$0xff]  }
 0x58f   : >> { %11726 = vmatprep.subr.bf16.mxu0 %v15235_v36  ;;  %11736 = vmatprep.subr.bf16.mxu1 %v15251_v20  ;;  %s15287_s16 = scalar_lea.vmem [#allocation2], %s11006_s12  ;;  %vm4649_vm14 = vsmask.f32 7424  ;;  %v15321_v61 = vsel %vm4692_vm12, %v15277_v38, 0  ;;  %v15325_v46 = vsel %vm4692_vm12, %v15283_v39, 0  ;;  %vm4825_vm15 = vcmask 1046528  }
 0x590   : >> { %v15332_v26 = vld [vmem:[%s17815_s1 + $0x30] sm:$0xff]   ;;  %v15340_v58 = vld [vmem:[%s17815_s1 + $0x3c] sm:$0xff]   ;;  %vm4914_vm0 = vsmask.f32 6400  ;;  %v15364_v33 = vld [vmem:[%s17815_s1 + $0x28] sm:$0xff]   ;;  %vm5011_vm1 = vcmask 1045504  }
 0x591   : >> { %s10298_s12 = smul.u32 24, %s12371_s30  ;;  %s4626_s30 = sadd.s32 1, %s12371_s30  }
 0x592   : >> { %11727 = vmatpush3.bf16.msra.mxu0 %v15235_v36  ;;  %11737 = vmatpush3.bf16.msra.mxu1 %v15251_v20  ;;  %v4630_v41 = vld [vmem:[%s15287_s16] sm:$0xff]  ;;  %v4631_v53 = vld [vmem:[%s15287_s16 + $0x8] sm:$0xff]  ;;  %v4632_v56 = vld [vmem:[%s15287_s16 + $0x10] sm:$0xff]  ;;  %p4623_p11 = scmp.ge.s32.totalorder %s4626_s30, 16  }
 0x593   : >> { %11728 = vmatprep.subr.bf16.mxu0 %v15263_v21  ;;  %11738 = vmatprep.subr.bf16.mxu1 %v15271_v50  ;;  %v15293_v59 = vpack.c.bf16 %v4631_v53, %v4630_v41  ;;  %v4633_v43 = vld [vmem:[%s15287_s16 + $0x18] sm:$0xff]  ;;  %v4634_v44 = vld [vmem:[%s15287_s16 + $0x20] sm:$0xf]  ;;  %v11055_v13 = vld [vmem:[%s15287_s16 + $0x28] sm:$0xff]  ;;  %s10299_s13 = scalar_lea.vmem [#allocation5], %s10298_s12  ;;  %5473 = vst.msk [vmem:[#allocation6] sm:$0xff] (%p4623_p11), %vm385_vm10, %v17831_v49 }
 0x594   : >> { %v15297_v45 = vpack.c.bf16 %v4633_v43, %v4632_v56  ;;  %v15299_v14 = vpack.c.bf16 %v4634_v44, %v4634_v44  ;;  %v11056_v8 = vld [vmem:[%s15287_s16 + $0x30] sm:$0xff]  ;;  %v11057_v18 = vld [vmem:[%s15287_s16 + $0x38] sm:$0xff]  ;;  %v11058_v11 = vld [vmem:[%s15287_s16 + $0x40] sm:$0xff]  ;;  %5474 = vst.msk [vmem:[#allocation6 + $0x8] sm:$0xf] (%p4623_p11), %vm388_vm11, %v17831_v49  ;;  %s17829_s30 = smov (%p4623_p11), 64  }
 0x595   : >> { %11740 = vmatprep.mubr.msk.bf16.mxu1 %vm4685_vm13, %v15293_v59  ;;  %v4651_v42 = vshrl.u32 %v15293_v59, 16  ;;  %v4653_v47 = vshll.u32 %v15293_v59, 16  ;;  %v4826_v62 = vrot.slane %v15293_v59, 1  ;;  %v15353_v1 = vpack.c.bf16 %v11056_v8, %v11055_v13  ;;  %v11059_v32 = vld [vmem:[%s15287_s16 + $0x48] sm:$0xf]  ;;  %5475 = vst.msk [vmem:[#allocation6 + $0x10] sm:$0xff] (%p4623_p11), %vm385_vm10, %v17831_v49 }
 0x596   : >> { %11729 = vmatpush3.bf16.msra.mxu0 %v15263_v21  ;;  %11739 = vmatpush3.bf16.msra.mxu1 %v15271_v50  ;;  %v4658_v48 = vshll.u32 %v15297_v45, 16  ;;  %v4662_v22 = vshrl.u32 %v15297_v45, 16  ;;  %v4666_v24 = vshll.u32 %v15299_v14, 16  ;;  %v4827_v63 = vrot.slane %v15297_v45, 1  ;;  %v12124_v56 = vld [vmem:[%s17815_s1 + $0x60] ss:$0 sps:$4 sm:$0xff]  }
 0x597   : >> { %12030 = vmatprep.subr.msk.bf16.mxu0 %vm4692_vm12, %v15277_v38  ;;  %v4655_v40 = vrot.slane %v4653_v47, 1  ;;  %v4915_v54 = vrot.slane %v4651_v42, 1  ;;  %12031 = vmatprep.subr.msk.bf16.mxu1 %vm4692_vm12, %v15283_v39  ;;  %v4916_v27 = vrot.slane %v4653_v47, 2  ;;  %v4922_v2 = vshrl.u32 %v15299_v14, 16  ;;  %5476 = vst.msk [vmem:[#allocation6 + $0x18] sm:$0xf] (%p4623_p11), %vm388_vm11, %v17831_v49 }
 0x598   : >> { %v4660_v57 = vrot.slane %v4658_v48, 1  ;;  %v4919_v25 = vrot.slane %v4658_v48, 2  ;;  %v4668_v29 = vrot.slane %v4666_v24, 1  ;;  %v4925_v55 = vrot.slane %v4666_v24, 2  ;;  %5477 = vst.msk [vmem:[#allocation6 + $0x20] sm:$0xff] (%p4623_p11), %vm385_vm10, %v17831_v49  ;;  %5479 = vst.msk [vmem:[#allocation6 + $0x30] sm:$0xff] (%p4623_p11), %vm385_vm10, %v17831_v49 }
 0x599   : >> { %v4656_v10 = vor.u32 %v4655_v40, %v4651_v42  ;;  %11741 = vmatmul.mubr.msk.bf16.vlgmr.msra.gmra.mxu1 %vm4685_vm13, %v15297_v45  ;;  %v4918_v23 = vrot.slane %v4662_v22, 1  ;;  %v4917_v4 = vor.u32 %v4916_v27, %v4915_v54  ;;  %v4924_v7 = vrot.slane %v4922_v2, 1  ;;  %v12126_v54 = vld [vmem:[%s17815_s1 + $0x50] sm:$0xff]   ;;  %5478 = vst.msk [vmem:[#allocation6 + $0x28] sm:$0xf] (%p4623_p11), %vm388_vm11, %v17831_v49  ;;  %s17827_s14 = smov (%p4623_p11), 96  }
 0x59a   : >> { %v4664_v28 = vor.u32 %v4662_v22, %v4660_v57  ;;  %11755 = vmatpush3.bf16.msra.mxu1 %v15325_v46  ;;  %v4828_v9 = vsel %vm4825_vm15, %v4826_v62, %v4827_v63  ;;  %v15358_v30 = vpack.c.bf16 %v11058_v11, %v11057_v18  ;;  %v5117_v15 = vshrl.u32 %v15353_v1, 16  ;;  %5480 = vst.msk [vmem:[#allocation6 + $0x38] sm:$0xf] (%p4623_p11), %vm388_vm11, %v17831_v49  ;;  %s16111_s15 = smov (%p4623_p11), 0  }
 0x59b   : >> { %v4661_v60 = vsel %vm4649_vm14, %v4656_v10, %v4660_v57  ;;  %11756 = vmatprep.subr.bf16.mxu1 %v15315_v34  ;;  %v4920_v51 = vor.u32 %v4919_v25, %v4918_v23  ;;  %v4926_v3 = vor.u32 %v4925_v55, %v4924_v7  ;;  %v5119_v0 = vshll.u32 %v15353_v1, 16  ;;  %5481 = vst.msk [vmem:[#allocation6 + $0x40] sm:$0xff] (%p4623_p11), %vm385_vm10, %v17831_v49 }
 0x59c   : >> { %11730 = vmatprep.mubr.msk.bf16.mxu0 %vm4685_vm13, %v4661_v60  ;;  %v4669_v31 = vsel %vm4649_vm14, %v4664_v28, %v4668_v29  ;;  %v5124_v12 = vshll.u32 %v15358_v30, 16  ;;  %v4829_v19 = vrot.slane %v15299_v14, 1  ;;  %v15379_v53 = vpack.c.bf16 %v11059_v32, %v11059_v32  ;;  %5482 = vst.msk [vmem:[#allocation6 + $0x48] sm:$0xf] (%p4623_p11), %vm388_vm11, %v17831_v49  ;;  %5484 = vst.msk [vmem:[#allocation6 + $0x58] sm:$0xf] (%p4623_p11), %vm388_vm11, %v17831_v49 }
 0x59d   : >> { %11731 = vmatmul.mubr.msk.bf16.vlgmr.msra.gmra.mxu0 %vm4685_vm13, %v4669_v31  ;;  %v4921_v5 = vsel %vm4914_vm0, %v4917_v4, %v4920_v51  ;;  %v5121_v16 = vrot.slane %v5119_v0, 1  ;;  %v4927_v52 = vsel %vm4914_vm0, %v4920_v51, %v4926_v3  ;;  %v5012_v44 = vrot.slane %v15293_v59, 2  ;;  %v12125_v59 = vld [vmem:[%s17815_s1 + $0x58] sm:$0xff]   ;;  %5483 = vst.msk [vmem:[#allocation6 + $0x50] sm:$0xff] (%p4623_p11), %vm385_vm10, %v17831_v49  ;;  %5485 = vst.msk [vmem:[#allocation6 + $0x60] sm:$0xff] (%p4623_p11), %vm385_vm10, %v17831_v49 }
 0x59e   : >> { %11745 = vmatpush3.bf16.msra.mxu0 %v15321_v61  ;;  %11757 = vmatpush3.bf16.msra.mxu1 %v15315_v34  ;;  %v5126_v41 = vrot.slane %v5124_v12, 1  ;;  %v5013_v42 = vrot.slane %v15297_v45, 2  ;;  %v4830_v48 = vsel %vm4825_vm15, %v4827_v63, %v4829_v19  ;;  %v5132_v22 = vshll.u32 %v15379_v53, 16  ;;  %5486 = vst.msk [vmem:[#allocation6 + $0x68] sm:$0xf] (%p4623_p11), %vm388_vm11, %v17831_v49 }
 0x59f   : >> { %11746 = vmatprep.subr.bf16.mxu0 %v15332_v26  ;;  %11758 = vmatprep.subr.bf16.mxu1 %v15340_v58  ;;  %v5122_v43 = vor.u32 %v5121_v16, %v5117_v15  ;;  %v5039_v24 = vsel %vm4692_vm12, %v12124_v56, 0  ;;  %v5247_v57 = vrot.slane %v15353_v1, 1  ;;  %v5248_v25 = vrot.slane %v15358_v30, 1  ;;  %5487 = vst.msk [vmem:[#allocation6 + $0x70] sm:$0xff] (%p4623_p11), %vm385_vm10, %v17831_v49  ;;  %5489 = vst.msk [vmem:[#allocation6 + $0x80] sm:$0xff] (%p4623_p11), %vm385_vm10, %v17831_v49 }
 0x5a0   : >> { %11750 = vmatprep.mubr.msk.bf16.mxu0 %vm4685_vm13, %v4828_v9  ;;  %11760 = vmatprep.mubr.msk.bf16.mxu1 %vm4685_vm13, %v4921_v5  ;;  %v5134_v40 = vrot.slane %v5132_v22, 1  ;;  %v5318_v23 = vshrl.u32 %v15379_v53, 16  ;;  %v5386_v60 = vrot.slane %v15379_v53, 2  ;;  %5488 = vst.msk [vmem:[#allocation6 + $0x78] sm:$0xf] (%p4623_p11), %vm388_vm11, %v17831_v49  ;;  %vm5837_vm2 = vcmask (%p4623_p11), 519424  }
 0x5a1   : >> { %v5127_v47 = vsel %vm4649_vm14, %v5122_v43, %v5126_v41  ;;  %v5249_v10 = vsel %vm4825_vm15, %v5247_v57, %v5248_v25  ;;  %5490 = vst.msk [vmem:[#allocation6 + $0x88] sm:$0xf] (%p4623_p11), %vm388_vm11, %v17831_v49  ;;  %5492 = vst.msk [vmem:[#allocation6 + $0x98] sm:$0xf] (%p4623_p11), %vm388_vm11, %v17831_v49  ;;  %vm5834_vm3 = vcmask (%p4623_p11), 523520   ;;  %vm6125_vm4 = vcmask (%p4623_p11), 785920  }
 0x5a2   : >> { %11747 = vmatpush3.bf16.msra.mxu0 %v15332_v26  ;;  %11759 = vmatpush3.bf16.msra.mxu1 %v15340_v58  ;;  %v5320_v2 = vrot.slane %v5318_v23, 1  ;;  %5491 = vst.msk [vmem:[#allocation6 + $0x90] sm:$0xff] (%p4623_p11), %vm385_vm10, %v17831_v49  ;;  %5493 = vst.msk [vmem:[#allocation6 + $0xa0] sm:$0xff] (%p4623_p11), %vm385_vm10, %v17831_v49  ;;  %vm6128_vm5 = vcmask (%p4623_p11), 781824   ;;  %vm6416_vm6 = vcmask (%p4623_p11), 1048320   ;;  %vm6419_vm7 = vcmask (%p4623_p11), 1044224  }
 0x5a3   : >> { %11748 = vmatprep.subr.bf16.mxu0 %v15364_v33  ;;  %12033 = vmatprep.subr.msk.bf16.mxu1 %vm4692_vm12, %v15230_v35  ;;  %v5128_v35 = vshrl.u32 %v15358_v30, 16  ;;  %5494 = vst.msk [vmem:[#allocation6 + $0xa8] sm:$0xf] (%p4623_p11), %vm388_vm11, %v17831_v49  ;;  %5496 = vst.msk [vmem:[#allocation6 + $0xb8] sm:$0xf] (%p4623_p11), %vm388_vm11, %v17831_v49 }
 0x5a4   : > { %5495 = vst.msk [vmem:[#allocation6 + $0xb0] sm:$0xff] (%p4623_p11), %vm385_vm10, %v17831_v49 }
 0x5a5   : >> { %11761 = vmatmul.mubr.msk.bf16.vlgmr.msra.gmra.mxu1 %vm4685_vm13, %v4927_v52  ;;  %v5130_v45 = vor.u32 %v5128_v35, %v5126_v41 }
 0x5a6   : >> { %11749 = vmatpush3.bf16.msra.mxu0 %v15364_v33  ;;  %11775 = vmatpush3.bf16.msra.mxu1 %v15246_v6  ;;  %v5014_v6 = vsel %vm5011_vm1, %v5012_v44, %v5013_v42 }
 0x5a7   : >> { %12032 = vmatprep.subr.msk.bf16.mxu0 %vm4692_vm12, %v12124_v56  ;;  %11776 = vmatprep.subr.bf16.mxu1 %v15235_v36  ;;  %v5135_v29 = vsel %vm4649_vm14, %v5130_v45, %v5134_v40 }
 0x5a8   : >> { %11780 = vmatprep.mubr.msk.bf16.mxu1 %vm4685_vm13, %v5127_v47 }
 0x5a9   : >> { %11751 = vmatmul.mubr.msk.bf16.vlgmr.msra.gmra.mxu0 %vm4685_vm13, %v4830_v48 }
 0x5aa   : >> { %11765 = vmatpush3.bf16.msra.mxu0 %v5039_v24  ;;  %11777 = vmatpush3.bf16.msra.mxu1 %v15235_v36  ;;  %v5015_v36 = vrot.slane %v15299_v14, 2  ;;  %v5314_v14 = vrot.slane %v5128_v35, 1 }
 0x5ab   : >> { %11766 = vmatprep.subr.bf16.mxu0 %v12125_v59  ;;  %11778 = vmatprep.subr.bf16.mxu1 %v15263_v21 }
 0x5ac   : >> { %11770 = vmatprep.mubr.msk.bf16.mxu0 %vm4685_vm13, %v5014_v6  ;;  %v5016_v62 = vsel %vm5011_vm1, %v5013_v42, %v5015_v36 }
 0x5ae   : >> { %11767 = vmatpush3.bf16.msra.mxu0 %v12125_v59  ;;  %11779 = vmatpush3.bf16.msra.mxu1 %v15263_v21  ;;  %v5250_v21 = vrot.slane %v15379_v53, 1 }
 0x5af   : >> { %11768 = vmatprep.subr.bf16.mxu0 %v12126_v54  ;;  %12035 = vmatprep.subr.msk.bf16.mxu1 %vm4692_vm12, %v15277_v38  ;;  %v5312_v38 = vrot.slane %v5119_v0, 2 }
 0x5b0   : >> { %v5251_v63 = vsel %vm4825_vm15, %v5248_v25, %v5250_v21 }
 0x5b1   : >> { %11781 = vmatmul.mubr.msk.bf16.vlgmr.msra.gmra.mxu1 %vm4685_vm13, %v5135_v29 }
 0x5b2   : >> { %11769 = vmatpush3.bf16.msra.mxu0 %v12126_v54  ;;  %11795 = vmatpush3.bf16.msra.mxu1 %v15321_v61  ;;  %v5315_v61 = vrot.slane %v5124_v12, 2 }
 0x5b3   : >> { %12034 = vmatprep.subr.msk.bf16.mxu0 %vm4692_vm12, %v15240_v37  ;;  %11796 = vmatprep.subr.bf16.mxu1 %v15332_v26  ;;  %v5311_v37 = vrot.slane %v5117_v15, 1 }
 0x5b4   : >> { %11800 = vmatprep.mubr.msk.bf16.mxu1 %vm4685_vm13, %v5249_v10  ;;  %v5316_v28 = vor.u32 %v5315_v61, %v5314_v14 }
 0x5b5   : >> { %11771 = vmatmul.mubr.msk.bf16.vlgmr.msra.gmra.mxu0 %vm4685_vm13, %v5016_v62  ;;  %v5313_v27 = vor.u32 %v5312_v38, %v5311_v37 }
 0x5b6   : >> { %11785 = vmatpush3.bf16.msra.mxu0 %v15258_v17  ;;  %11797 = vmatpush3.bf16.msra.mxu1 %v15332_v26  ;;  %v5383_v17 = vrot.slane %v15353_v1, 2  ;;  %v5384_v26 = vrot.slane %v15358_v30, 2 }
 0x5b7   : >> { %11786 = vmatprep.subr.bf16.mxu0 %v15251_v20  ;;  %11798 = vmatprep.subr.bf16.mxu1 %v15364_v33 }
 0x5b8   : >> { %11790 = vmatprep.mubr.msk.bf16.mxu0 %vm4685_vm13, %v15353_v1  ;;  %v5385_v55 = vsel %vm5011_vm1, %v5383_v17, %v5384_v26  ;;  %v5387_v4 = vsel %vm5011_vm1, %v5384_v26, %v5386_v60  ;;  %v11052_v26 = vld [vmem:[%s17816_s2] ss:$0 sm:$0xff] }
 0x5ba   : >> { %11787 = vmatpush3.bf16.msra.mxu0 %v15251_v20  ;;  %11799 = vmatpush3.bf16.msra.mxu1 %v15364_v33  ;;  %v5317_v20 = vsel %vm4914_vm0, %v5313_v27, %v5316_v28 }
 0x5bb   : >> { %11788 = vmatprep.subr.bf16.mxu0 %v15271_v50  ;;  %12037 = vmatprep.subr.msk.bf16.mxu1 %vm4692_vm12, %v12124_v56 }
 0x5bd   : >> { %11801 = vmatmul.mubr.msk.bf16.vlgmr.msra.gmra.mxu1 %vm4685_vm13, %v5251_v63 }
 0x5be   : >> { %11789 = vmatpush3.bf16.msra.mxu0 %v15271_v50  ;;  %11815 = vmatpush3.bf16.msra.mxu1 %v5039_v24  ;;  %v5321_v50 = vrot.slane %v5132_v22, 2 }
 0x5bf   : >> { %12036 = vmatprep.subr.msk.bf16.mxu0 %vm4692_vm12, %v15283_v39  ;;  %11816 = vmatprep.subr.bf16.mxu1 %v12125_v59 }
 0x5c0   : >> { %11820 = vmatprep.mubr.msk.bf16.mxu1 %vm4685_vm13, %v5385_v55  ;;  %v5322_v39 = vor.u32 %v5321_v50, %v5320_v2 }
 0x5c1   : >> { %11791 = vmatmul.mubr.msk.bf16.vlgmr.msra.gmra.mxu0 %vm4685_vm13, %v15358_v30 }
 0x5c2   : >> { %11805 = vmatpush3.bf16.msra.mxu0 %v15325_v46  ;;  %11817 = vmatpush3.bf16.msra.mxu1 %v12125_v59  ;;  %v5323_v46 = vsel %vm4914_vm0, %v5316_v28, %v5322_v39 }
 0x5c3   : >> { %11806 = vmatprep.subr.bf16.mxu0 %v15315_v34  ;;  %11818 = vmatprep.subr.bf16.mxu1 %v12126_v54 }
 0x5c4   : >> { %11810 = vmatprep.mubr.msk.bf16.mxu0 %vm4685_vm13, %v5317_v20 }
 0x5c6   : >> { %11807 = vmatpush3.bf16.msra.mxu0 %v15315_v34  ;;  %11819 = vmatpush3.bf16.msra.mxu1 %v12126_v54 }
 0x5c7   : >> { %11808 = vmatprep.subr.bf16.mxu0 %v15340_v58 }
 0x5c9   : >> { %11821 = vmatmul.mubr.msk.bf16.vlgmr.msra.gmra.mxu1 %vm4685_vm13, %v5387_v4 }
 0x5ca   : >> { %11809 = vmatpush3.bf16.msra.mxu0 %v15340_v58 }
 0x5cd   : >> { %11811 = vmatmul.mubr.msk.bf16.vlgmr.msra.gmra.mxu0 %vm4685_vm13, %v5323_v46 }
 0x659   : >> { %v11742_v31 = vpop.f32.mrf.mxu1 }
 0x65b   : >> { %v4801_v51 = vpop.f32.mrf.mxu1 }
 0x65d   : >> { %v11732_v7 = vpop.f32.mrf.mxu0  ;;  %v11743_v8 = vpop.f32.mrf.mxu1 }
 0x65e   : >> { %v4810_v48 = vadd.f32 %v11742_v31, %v11732_v7 }
 0x65f   : >> { %v4730_v13 = vpop.f32.mrf.mxu0  ;;  %v4804_v9 = vpop.f32.mrf.mxu1 }
 0x660   : >> { %v4802_v35 = vadd.f32 %v4801_v51, %v4730_v13 }
 0x661   : >> { %v11733_v34 = vpop.f32.mrf.mxu0 }
 0x662   : >> { %v4813_v45 = vadd.f32 %v11743_v8, %v11733_v34 }
 0x663   : >> { %v4733_v11 = vpop.f32.mrf.mxu0 }
 0x664   : >> { %v4805_v25 = vadd.f32 %v4804_v9, %v4733_v11 }
 0x665   : >> { %v11762_v18 = vpop.f32.mrf.mxu1 }
 0x667   : >> { %v4986_v1 = vpop.f32.mrf.mxu1 }
 0x669   : >> { %v11752_v5 = vpop.f32.mrf.mxu0  ;;  %v11763_v30 = vpop.f32.mrf.mxu1 }
 0x66a   : >> { %v4906_v22 = vadd.f32 %v11752_v5, %v4810_v48 }
 0x66b   : >> { %v4889_v3 = vpop.f32.mrf.mxu0  ;;  %v4989_v15 = vpop.f32.mrf.mxu1 }
 0x66c   : >> { %v4904_v40 = vadd.f32 %v4889_v3, %v4802_v35  ;;  %v5003_v36 = vadd.f32 %v11762_v18, %v4906_v22 }
 0x66d   : >> { %v11753_v33 = vpop.f32.mrf.mxu0 }
 0x66e   : >> { %v4907_v29 = vadd.f32 %v11753_v33, %v4813_v45  ;;  %v5001_v37 = vadd.f32 %v4986_v1, %v4904_v40 }
 0x66f   : >> { %v4892_v0 = vpop.f32.mrf.mxu0 }
 0x670   : >> { %v4905_v38 = vadd.f32 %v4892_v0, %v4805_v25  ;;  %v5004_v55 = vadd.f32 %v11763_v30, %v4907_v29 }
 0x671   : >> { %v11782_v58 = vpop.f32.mrf.mxu1 }
 0x672   : >> { %v5002_v39 = vadd.f32 %v4989_v15, %v4905_v38 }
 0x673   : >> { %v5176_v32 = vpop.f32.mrf.mxu1 }
 0x675   : >> { %v11772_v12 = vpop.f32.mrf.mxu0  ;;  %v11783_v19 = vpop.f32.mrf.mxu1 }
 0x676   : >> { %v5092_v14 = vadd.f32 %v11772_v12, %v5003_v36 }
 0x677   : >> { %v5075_v16 = vpop.f32.mrf.mxu0  ;;  %v5179_v41 = vpop.f32.mrf.mxu1 }
 0x678   : >> { %v5090_v23 = vadd.f32 %v5075_v16, %v5001_v37  ;;  %v5103_v4 = vadd.f32 %v11052_v26, %v5092_v14 }
 0x679   : >> { %v11773_v52 = vpop.f32.mrf.mxu0 }
 0x67a   : >> { %v5093_v46 = vadd.f32 %v11773_v52, %v5004_v55  ;;  %v5101_v9 = vadd.f32 %v11052_v26, %v5090_v23 }
 0x67b   : >> { %v5078_v56 = vpop.f32.mrf.mxu0 }
 0x67c   : >> { %v5091_v18 = vadd.f32 %v5078_v56, %v5002_v39 }
 0x67d   : >> { %v11802_v53 = vpop.f32.mrf.mxu1 }
 0x67e   : >> { %v5102_v12 = vadd.f32 %v11052_v26, %v5091_v18 }
 0x67f   : >> { %v5292_v43 = vpop.f32.mrf.mxu1 }
 0x681   : >> { %v11792_v44 = vpop.f32.mrf.mxu0  ;;  %v11803_v47 = vpop.f32.mrf.mxu1 }
 0x682   : >> { %v5238_v6 = vadd.f32 %v11792_v44, %v11782_v58  ;;  %v5104_v58 = vadd.f32 %v11052_v26, %v5093_v46 }
 0x683   : >> { %v5229_v42 = vpop.f32.mrf.mxu0  ;;  %v5295_v59 = vpop.f32.mrf.mxu1 }
 0x684   : >> { %v5230_v57 = vadd.f32 %v5229_v42, %v5176_v32  ;;  %v5309_v62 = vadd.f32 %v11802_v53, %v5238_v6 }
 0x685   : >> { %v11793_v24 = vpop.f32.mrf.mxu0 }
 0x686   : >> { %v5241_v21 = vadd.f32 %v11793_v24, %v11783_v19  ;;  %v5307_v63 = vadd.f32 %v5292_v43, %v5230_v57 }
 0x687   : >> { %v5232_v10 = vpop.f32.mrf.mxu0 }
 0x688   : >> { %v5233_v27 = vadd.f32 %v5232_v10, %v5179_v41  ;;  %v5310_v2 = vadd.f32 %v11803_v47, %v5241_v21 }
 0x689   : >> { %v11822_v54 = vpop.f32.mrf.mxu1 }
 0x68a   : >> { %v5308_v7 = vadd.f32 %v5295_v59, %v5233_v27 }
 0x68b   : >> { %v5428_v17 = vpop.f32.mrf.mxu1 }
 0x68d   : >> { %v11812_v61 = vpop.f32.mrf.mxu0  ;;  %v11823_v51 = vpop.f32.mrf.mxu1 }
 0x68e   : >> { %v5381_v28 = vadd.f32 %v11812_v61, %v5309_v62 }
 0x68f   : >> { %v5364_v20 = vpop.f32.mrf.mxu0  ;;  %v5431_v33 = vpop.f32.mrf.mxu1 }
 0x690   : >> { %v5445_v50 = vadd.f32 %v11822_v54, %v5381_v28  ;;  %v5379_v60 = vadd.f32 %v5364_v20, %v5307_v63 }
 0x691   : >> { %v11813_v31 = vpop.f32.mrf.mxu0 }
 0x692   : >> { %v5449_v13 = vadd.f32 %v11052_v26, %v5445_v50  ;;  %v5443_v8 = vadd.f32 %v5428_v17, %v5379_v60  ;;  %v5382_v34 = vadd.f32 %v11813_v31, %v5310_v2 }
 0x693   : >> { %v5367_v11 = vpop.f32.mrf.mxu0 }
 0x694   : >> { %v5453_v1 = vmax.f32 %v5103_v4, %v5449_v13  ;;  %v5447_v5 = vadd.f32 %v11052_v26, %v5443_v8  ;;  %v5446_v3 = vadd.f32 %v11823_v51, %v5382_v34  ;;  %v5380_v30 = vadd.f32 %v5367_v11, %v5308_v7 }
 0x696   : >> { %5457 = vst.msk [vmem:[#allocation8 + $0x10] sm:$0xff] %vm385_vm10, %v5453_v1  ;;  %v5451_v15 = vmax.f32 %v5101_v9, %v5447_v5  ;;  %v5450_v0 = vadd.f32 %v11052_v26, %v5446_v3  ;;  %v5444_v32 = vadd.f32 %v5431_v33, %v5380_v30 }
 0x698   : >> { %5455 = vst.msk [vmem:[#allocation8] sm:$0xff] %vm385_vm10, %v5451_v15  ;;  %v5454_v16 = vmax.f32 %v5104_v58, %v5450_v0  ;;  %v5448_v19 = vadd.f32 %v11052_v26, %v5444_v32 }
 0x69a   : >> { %5458 = vst.msk [vmem:[#allocation8 + $0x18] sm:$0xff] %vm385_vm10, %v5454_v16  ;;  %v5452_v52 = vmax.f32 %v5102_v12, %v5448_v19 }
 0x69c   : >> { %5456 = vst.msk [vmem:[#allocation8 + $0x8] sm:$0xff] %vm385_vm10, %v5452_v52 }
 0x6a1   : >> { %v5461_v41 = vld [vmem:[#allocation8 + $0x10] ss:$2 sm:$0xff]  ;;  %v5465_v53 = vld [vmem:[#allocation8 + $0x11] ss:$2 sm:$0xff] }
 0x6a2   : >> { %v5467_v56 = vmax.f32 %v5461_v41, %v5465_v53  ;;  %4625 = sbr.rel (!%p4623_p11) target bundleno = 1420 (0x58c), region = 173 }
 0x6a3   : >> { %v5459_v43 = vld [vmem:[#allocation8] ss:$2 sm:$0xff]  ;;  %v5463_v44 = vld [vmem:[#allocation8 + $0x1] ss:$2 sm:$0xff] }
 0x6a4   : >> { %11071 = vst.msk [vmem:[%s10299_s13 + $0x3a] sm:$0xff] %vm385_vm10, %v5467_v56  ;;  %v5466_v42 = vmax.f32 %v5459_v43, %v5463_v44 }
 0x6a6   : >> { %11070 = vst.msk [vmem:[%s10299_s13 + $0x32] sm:$0xff] %vm385_vm10, %v5466_v42 }
 0x6ad   : > { %v5596_v47 = vld [vmem:[#allocation5 + $0x28] sm:$0xf]  ;;  %v5594_v48 = vld [vmem:[#allocation5 + $0x18] sm:$0xff]  ;;  %v15485_v35 = vld [vmem:[#allocation5 + $0x30] sm:$0xff] }
 0x6ae   : > { %5694 = vrot.lane.b32.xlu1 %v5596_v47, %s12384_s24  ;;  %5690 = vrot.lane.b32.xlu0 %v5594_v48, %s12384_s24  ;;  %v5595_v22 = vld [vmem:[#allocation5 + $0x20] sm:$0xff]  ;;  %v15537_v24 = vld [vmem:[#allocation5 + $0x38] sm:$0xff]  ;;  %5548 = vst.msk [vmem:[#allocation3 + $0x30] sm:$0xff] %vm385_vm10, %v5594_v48  ;;  %5551 = vst.msk [vmem:[#allocation3 + $0x60] sm:$0xff] %vm385_vm10, %v15485_v35 }
 0x6af   : > { %v15542_v59 = vld [vmem:[#allocation5 + $0x50] sm:$0xff]  ;;  %v15544_v6 = vld [vmem:[#allocation5 + $0x48] sm:$0xff]  ;;  %v15546_v45 = vld [vmem:[#allocation5 + $0x60] sm:$0xff]  ;;  %5549 = vst.msk [vmem:[#allocation3 + $0x40] sm:$0xff] %vm385_vm10, %v5595_v22 }
 0x6b0   : > { %5552 = vst.msk [vmem:[#allocation3 + $0x70] sm:$0xff] %vm385_vm10, %v15537_v24  ;;  %v15551_v40 = vld [vmem:[#allocation5 + $0x68] sm:$0xff]  ;;  %5554 = vst.msk [vmem:[#allocation3 + $0x90] sm:$0xff] %vm385_vm10, %v15544_v6  ;;  %v15559_v54 = vld [vmem:[#allocation5 + $0x80] sm:$0xff] }
 0x6b1   : > { %5555 = vst.msk [vmem:[#allocation3 + $0xa0] sm:$0xff] %vm385_vm10, %v15542_v59  ;;  %5557 = vst.msk [vmem:[#allocation3 + $0xc0] sm:$0xff] %vm385_vm10, %v15546_v45  ;;  %v15561_v57 = vld [vmem:[#allocation5 + $0x78] sm:$0xff]  ;;  %v15563_v25 = vld [vmem:[#allocation5 + $0x90] sm:$0xff] }
 0x6b2   : > { %5558 = vst.msk [vmem:[#allocation3 + $0xd0] sm:$0xff] %vm385_vm10, %v15551_v40  ;;  %5696 = vrot.lane.b32.xlu1 %v15485_v35, %s12384_s24  ;;  %5692 = vrot.lane.b32.xlu0 %v5595_v22, %s12384_s24  ;;  %v5599_v36 = vld [vmem:[#allocation5 + $0x40] sm:$0xf]  ;;  %v15570_v29 = vld [vmem:[#allocation5 + $0x98] sm:$0xff]  ;;  %5560 = vst.msk [vmem:[#allocation3 + $0xf0] sm:$0xff] %vm385_vm10, %v15561_v57 }
 0x6b3   : > { %5561 = vst.msk [vmem:[#allocation3 + $0x100] sm:$0xff] %vm385_vm10, %v15559_v54  ;;  %5563 = vst.msk [vmem:[#allocation3 + $0x120] sm:$0xff] %vm385_vm10, %v15563_v25  ;;  %v15578_v10 = vld [vmem:[#allocation5 + $0xb0] sm:$0xff]  ;;  %v15580_v62 = vld [vmem:[#allocation5 + $0xa8] sm:$0xff] }
 0x6b4   : > { %v15582_v21 = vld [vmem:[#allocation5 + $0xc0] sm:$0xff]  ;;  %5564 = vst.msk [vmem:[#allocation3 + $0x130] sm:$0xff] %vm385_vm10, %v15570_v29  ;;  %v15586_v37 = vld [vmem:[#allocation5 + $0xc8] sm:$0xff]  ;;  %5566 = vst.msk [vmem:[#allocation3 + $0x150] sm:$0xff] %vm385_vm10, %v15580_v62 }
 0x6b5   : > { %5567 = vst.msk [vmem:[#allocation3 + $0x160] sm:$0xff] %vm385_vm10, %v15578_v10  ;;  %5569 = vst.msk [vmem:[#allocation3 + $0x180] sm:$0xff] %vm385_vm10, %v15582_v21  ;;  %v15594_v38 = vld [vmem:[#allocation5 + $0xe0] sm:$0xff]  ;;  %v15596_v14 = vld [vmem:[#allocation5 + $0xd8] sm:$0xff] }
 0x6b6   : > { %v15598_v61 = vld [vmem:[#allocation5 + $0xf0] sm:$0xff]  ;;  %5570 = vst.msk [vmem:[#allocation3 + $0x190] sm:$0xff] %vm385_vm10, %v15586_v37  ;;  %5700 = vrot.lane.b32.xlu1 %v5599_v36, %s12384_s24  ;;  %5698 = vrot.lane.b32.xlu0 %v15537_v24, %s12384_s24  ;;  %v15605_v17 = vld [vmem:[#allocation5 + $0xf8] sm:$0xff]  ;;  %5572 = vst.msk [vmem:[#allocation3 + $0x1b0] sm:$0xff] %vm385_vm10, %v15596_v14 }
 0x6b7   : > { %5573 = vst.msk [vmem:[#allocation3 + $0x1c0] sm:$0xff] %vm385_vm10, %v15594_v38  ;;  %5575 = vst.msk [vmem:[#allocation3 + $0x1e0] sm:$0xff] %vm385_vm10, %v15598_v61  ;;  %v15613_v26 = vld [vmem:[#allocation5 + $0x110] sm:$0xff]  ;;  %v15615_v63 = vld [vmem:[#allocation5 + $0x108] sm:$0xff] }
 0x6b8   : > { %v15617_v27 = vld [vmem:[#allocation5 + $0x120] sm:$0xff]  ;;  %5576 = vst.msk [vmem:[#allocation3 + $0x1f0] sm:$0xff] %vm385_vm10, %v15605_v17  ;;  %v15621_v28 = vld [vmem:[#allocation5 + $0x128] sm:$0xff]  ;;  %5578 = vst.msk [vmem:[#allocation3 + $0x210] sm:$0xff] %vm385_vm10, %v15615_v63 }
 0x6b9   : > { %5579 = vst.msk [vmem:[#allocation3 + $0x220] sm:$0xff] %vm385_vm10, %v15613_v26  ;;  %5581 = vst.msk [vmem:[#allocation3 + $0x240] sm:$0xff] %vm385_vm10, %v15617_v27  ;;  %v15629_v55 = vld [vmem:[#allocation5 + $0x140] sm:$0xff]  ;;  %v15631_v23 = vld [vmem:[#allocation5 + $0x138] sm:$0xff] }
 0x6ba   : > { %v15633_v20 = vld [vmem:[#allocation5 + $0x150] sm:$0xff]  ;;  %5582 = vst.msk [vmem:[#allocation3 + $0x250] sm:$0xff] %vm385_vm10, %v15621_v28  ;;  %5704 = vrot.lane.b32.xlu1 %v15542_v59, %s12384_s24  ;;  %5702 = vrot.lane.b32.xlu0 %v15544_v6, %s12384_s24  ;;  %v15641_v2 = vld [vmem:[#allocation5 + $0x158] sm:$0xff]  ;;  %5584 = vst.msk [vmem:[#allocation3 + $0x270] sm:$0xff] %vm385_vm10, %v15631_v23 }
 0x6bb   : > { %5585 = vst.msk [vmem:[#allocation3 + $0x280] sm:$0xff] %vm385_vm10, %v15629_v55  ;;  %5587 = vst.msk [vmem:[#allocation3 + $0x2a0] sm:$0xff] %vm385_vm10, %v15633_v20  ;;  %v5602_v50 = vld [vmem:[#allocation5 + $0x58] sm:$0xf]  ;;  %v15649_v60 = vld [vmem:[#allocation5 + $0x170] sm:$0xff] }
 0x6bc   : > { %v15651_v39 = vld [vmem:[#allocation5 + $0x168] sm:$0xff]  ;;  %5588 = vst.msk [vmem:[#allocation3 + $0x2b0] sm:$0xff] %vm385_vm10, %v15641_v2  ;;  %5591 = vst.msk [vmem:[#allocation3 + $0x2e0] sm:$0xff] %vm385_vm10, %v15649_v60  ;;  %v5499_v4 = vld [vmem:[#allocation5 + $0x10] sm:$0xf] }
 0x6bd   : > { %5590 = vst.msk [vmem:[#allocation3 + $0x2d0] sm:$0xff] %vm385_vm10, %v15651_v39  ;;  %v5497_v46 = vld [vmem:[#allocation5] sm:$0xff]  ;;  %v5605_v31 = vld [vmem:[#allocation5 + $0x70] sm:$0xf]  ;;  %v5498_v51 = vld [vmem:[#allocation5 + $0x8] sm:$0xff] }
 0x6be   : > { %5708 = vrot.lane.b32.xlu1 %v15546_v45, %s12384_s24  ;;  %5706 = vrot.lane.b32.xlu0 %v5602_v50, %s12384_s24  ;;  %5547 = vst.msk [vmem:[#allocation3 + $0x20] sm:$0xf] %vm388_vm11, %v5499_v4  ;;  %v5502_v7 = vld [vmem:[#allocation5 + $0x28] sm:$0xf]  ;;  %v5505_v13 = vld [vmem:[#allocation5 + $0x40] sm:$0xf] }
 0x6bf   : > { %5545 = vst.msk [vmem:[#allocation3] sm:$0xff] %vm385_vm10, %v5497_v46  ;;  %5546 = vst.msk [vmem:[#allocation3 + $0x10] sm:$0xff] %vm385_vm10, %v5498_v51  ;;  %v5508_v8 = vld [vmem:[#allocation5 + $0x58] sm:$0xf]  ;;  %v5511_v34 = vld [vmem:[#allocation5 + $0x70] sm:$0xf] }
 0x6c0   : > { %5550 = vst.msk [vmem:[#allocation3 + $0x50] sm:$0xf] %vm388_vm11, %v5502_v7  ;;  %5553 = vst.msk [vmem:[#allocation3 + $0x80] sm:$0xf] %vm388_vm11, %v5505_v13  ;;  %v5514_v9 = vld [vmem:[#allocation5 + $0x88] sm:$0xf] }
 0x6c1   : > { %5556 = vst.msk [vmem:[#allocation3 + $0xb0] sm:$0xf] %vm388_vm11, %v5508_v8  ;;  %5559 = vst.msk [vmem:[#allocation3 + $0xe0] sm:$0xf] %vm388_vm11, %v5511_v34  ;;  %v5608_v18 = vld [vmem:[#allocation5 + $0x88] sm:$0xf] }
 0x6c2   : > { %5712 = vrot.lane.b32.xlu1 %v5605_v31, %s12384_s24  ;;  %5710 = vrot.lane.b32.xlu0 %v15551_v40, %s12384_s24  ;;  %5562 = vst.msk [vmem:[#allocation3 + $0x110] sm:$0xf] %vm388_vm11, %v5514_v9  ;;  %v5517_v11 = vld [vmem:[#allocation5 + $0xa0] sm:$0xf]  ;;  %v5520_v5 = vld [vmem:[#allocation5 + $0xb8] sm:$0xf] }
 0x6c3   : > { %5565 = vst.msk [vmem:[#allocation3 + $0x140] sm:$0xf] %vm388_vm11, %v5517_v11  ;;  %v5611_v1 = vld [vmem:[#allocation5 + $0xa0] sm:$0xf]  ;;  %5568 = vst.msk [vmem:[#allocation3 + $0x170] sm:$0xf] %vm388_vm11, %v5520_v5 }
 0x6c4   : > { %v5614_v3 = vld [vmem:[#allocation5 + $0xb8] sm:$0xf]  ;;  %v5523_v30 = vld [vmem:[#allocation5 + $0xd0] sm:$0xf]  ;;  %v5526_v58 = vld [vmem:[#allocation5 + $0xe8] sm:$0xf] }
 0x6c5   : > { %5571 = vst.msk [vmem:[#allocation3 + $0x1a0] sm:$0xf] %vm388_vm11, %v5523_v30  ;;  %v5617_v33 = vld [vmem:[#allocation5 + $0xd0] sm:$0xf]  ;;  %5574 = vst.msk [vmem:[#allocation3 + $0x1d0] sm:$0xf] %vm388_vm11, %v5526_v58 }
 0x6c6   : > { %5716 = vrot.lane.b32.xlu1 %v15559_v54, %s12384_s24  ;;  %5714 = vrot.lane.b32.xlu0 %v15561_v57, %s12384_s24  ;;  %v5620_v15 = vld [vmem:[#allocation5 + $0xe8] sm:$0xf]  ;;  %v5529_v0 = vld [vmem:[#allocation5 + $0x100] sm:$0xf]  ;;  %v5532_v12 = vld [vmem:[#allocation5 + $0x118] sm:$0xf] }
 0x6c7   : > { %5577 = vst.msk [vmem:[#allocation3 + $0x200] sm:$0xf] %vm388_vm11, %v5529_v0  ;;  %v5623_v32 = vld [vmem:[#allocation5 + $0x100] sm:$0xf]  ;;  %5580 = vst.msk [vmem:[#allocation3 + $0x230] sm:$0xf] %vm388_vm11, %v5532_v12 }
 0x6c8   : > { %v15706_v16 = vld [vmem:[#allocation5 + $0x198] sm:$0xff]  ;;  %v15713_v19 = vld [vmem:[#allocation5 + $0x1a0] sm:$0xff]  ;;  %v5535_v41 = vld [vmem:[#allocation5 + $0x130] sm:$0xf] }
 0x6c9   : > { %6554 = vst.msk [vmem:[#allocation3 + $0x278] sm:$0xff] %vm385_vm10, %v15706_v16  ;;  %6555 = vst.msk [vmem:[#allocation3 + $0x288] sm:$0xff] %vm385_vm10, %v15713_v19  ;;  %v5626_v52 = vld [vmem:[#allocation5 + $0x118] sm:$0xf]  ;;  %v5629_v53 = vld [vmem:[#allocation5 + $0x130] sm:$0xf] }
 0x6ca   : > { %5720 = vrot.lane.b32.xlu1 %v15563_v25, %s12384_s24  ;;  %5718 = vrot.lane.b32.xlu0 %v5608_v18, %s12384_s24  ;;  %5583 = vst.msk [vmem:[#allocation3 + $0x260] sm:$0xf] %vm388_vm11, %v5535_v41  ;;  %v5538_v56 = vld [vmem:[#allocation5 + $0x148] sm:$0xf]  ;;  %v5541_v44 = vld [vmem:[#allocation5 + $0x160] sm:$0xf] }
 0x6cb   : > { %5586 = vst.msk [vmem:[#allocation3 + $0x290] sm:$0xf] %vm388_vm11, %v5538_v56  ;;  %v5632_v43 = vld [vmem:[#allocation5 + $0x148] sm:$0xf]  ;;  %5589 = vst.msk [vmem:[#allocation3 + $0x2c0] sm:$0xf] %vm388_vm11, %v5541_v44 }
 0x6cc   : > { %v5635_v42 = vld [vmem:[#allocation5 + $0x160] sm:$0xf]  ;;  %v5544_v47 = vld [vmem:[#allocation5 + $0x178] sm:$0xf]  ;;  %v5641_v36 = vld [vmem:[#allocation5 + $0x190] sm:$0xf] }
 0x6cd   : > { %5592 = vst.msk [vmem:[#allocation3 + $0x2f0] sm:$0xf] %vm388_vm11, %v5544_v47  ;;  %v15745_v48 = vld [vmem:[#allocation5 + $0x180] sm:$0xff]  ;;  %v5638_v22 = vld [vmem:[#allocation5 + $0x178] sm:$0xf]  ;;  %v15750_v50 = vld [vmem:[#allocation5 + $0x188] sm:$0xff] }
 0x6ce   : > { %5724 = vrot.lane.b32.xlu1 %v5611_v1, %s12384_s24  ;;  %5722 = vrot.lane.b32.xlu0 %v15570_v29, %s12384_s24  ;;  %v5887_v4 = vld [vmem:[#allocation5 + $0x40] sm:$0xf]  ;;  %v5890_v46 = vld [vmem:[#allocation5 + $0x58] sm:$0xf]  ;;  %v5905_v30 = vld [vmem:[#allocation5 + $0xd0] sm:$0xf] }
 0x6cf   : > { %v5899_v8 = vld [vmem:[#allocation5 + $0xa0] sm:$0xf]  ;;  %v5902_v18 = vld [vmem:[#allocation5 + $0xb8] sm:$0xf]  ;;  %v15822_v47 = vld [vmem:[#allocation5 + $0x1b0] sm:$0xff] }
 0x6d0   : > { %v5911_v41 = vld [vmem:[#allocation5 + $0x100] sm:$0xf]  ;;  %6557 = vst.msk [vmem:[#allocation3 + $0x2a8] sm:$0xff] %vm385_vm10, %v15822_v47 }
 0x6d2   : > { %5728 = vrot.lane.b32.xlu1 %v15578_v10, %s12384_s24  ;;  %5726 = vrot.lane.b32.xlu0 %v15580_v62, %s12384_s24 }
 0x6d6   : > { %5732 = vrot.lane.b32.xlu1 %v15582_v21, %s12384_s24  ;;  %5730 = vrot.lane.b32.xlu0 %v5614_v3, %s12384_s24 }
 0x6da   : > { %5736 = vrot.lane.b32.xlu1 %v5617_v33, %s12384_s24  ;;  %5734 = vrot.lane.b32.xlu0 %v15586_v37, %s12384_s24 }
 0x6de   : > { %5740 = vrot.lane.b32.xlu1 %v15594_v38, %s12384_s24  ;;  %5738 = vrot.lane.b32.xlu0 %v15596_v14, %s12384_s24 }
 0x6e2   : > { %5744 = vrot.lane.b32.xlu1 %v15598_v61, %s12384_s24  ;;  %5742 = vrot.lane.b32.xlu0 %v5620_v15, %s12384_s24  ;;  %v5908_v15 = vld [vmem:[#allocation5 + $0xe8] sm:$0xf] }
 0x6e6   : > { %5748 = vrot.lane.b32.xlu1 %v5623_v32, %s12384_s24  ;;  %5746 = vrot.lane.b32.xlu0 %v15605_v17, %s12384_s24 }
 0x6ea   : > { %5752 = vrot.lane.b32.xlu1 %v15613_v26, %s12384_s24  ;;  %5750 = vrot.lane.b32.xlu0 %v15615_v63, %s12384_s24 }
 0x6ee   : > { %5756 = vrot.lane.b32.xlu1 %v15617_v27, %s12384_s24  ;;  %5754 = vrot.lane.b32.xlu0 %v5626_v52, %s12384_s24 }
 0x6f2   : > { %5760 = vrot.lane.b32.xlu1 %v5629_v53, %s12384_s24  ;;  %5758 = vrot.lane.b32.xlu0 %v15621_v28, %s12384_s24 }
 0x6f6   : > { %5764 = vrot.lane.b32.xlu1 %v15629_v55, %s12384_s24  ;;  %5762 = vrot.lane.b32.xlu0 %v15631_v23, %s12384_s24 }
 0x6fa   : > { %5768 = vrot.lane.b32.xlu1 %v15633_v20, %s12384_s24  ;;  %5766 = vrot.lane.b32.xlu0 %v5632_v43, %s12384_s24  ;;  %v5914_v43 = vld [vmem:[#allocation5 + $0x118] sm:$0xf] }
 0x6fe   : > { %5772 = vrot.lane.b32.xlu1 %v5635_v42, %s12384_s24  ;;  %5770 = vrot.lane.b32.xlu0 %v15641_v2, %s12384_s24 }
 0x702   : > { %5776 = vrot.lane.b32.xlu1 %v15649_v60, %s12384_s24  ;;  %5774 = vrot.lane.b32.xlu0 %v15651_v39, %s12384_s24 }
 0x706   : > { %5780 = vrot.lane.b32.xlu1 %v15745_v48, %s12384_s24  ;;  %5778 = vrot.lane.b32.xlu0 %v5638_v22, %s12384_s24 }
 0x70a   : > { %5784 = vrot.lane.b32.xlu1 %v5641_v36, %s12384_s24  ;;  %5782 = vrot.lane.b32.xlu0 %v15750_v50, %s12384_s24 }
 0x70e   : > { %5983 = vrot.lane.b32.xlu1 %v15537_v24, %s17829_s30  ;;  %5981 = vrot.lane.b32.xlu0 %v15485_v35, %s17829_s30  ;;  %v5893_v24 = vld [vmem:[#allocation5 + $0x70] sm:$0xf]  ;;  %v5896_v35 = vld [vmem:[#allocation5 + $0x88] sm:$0xf] }
 0x712   : > { %5987 = vrot.lane.b32.xlu1 %v15544_v6, %s17829_s30  ;;  %5985 = vrot.lane.b32.xlu0 %v5887_v4, %s17829_s30  ;;  %v15831_v4 = vld [vmem:[#allocation5 + $0x1b8] sm:$0xff] }
 0x713   : > { %6558 = vst.msk [vmem:[#allocation3 + $0x2b8] sm:$0xff] %vm385_vm10, %v15831_v4 }
 0x716   : > { %5991 = vrot.lane.b32.xlu1 %v5890_v46, %s17829_s30  ;;  %5989 = vrot.lane.b32.xlu0 %v15542_v59, %s17829_s30  ;;  %v5917_v46 = vld [vmem:[#allocation5 + $0x130] sm:$0xf] }
 0x71a   : > { %5995 = vrot.lane.b32.xlu1 %v15551_v40, %s17829_s30  ;;  %5993 = vrot.lane.b32.xlu0 %v15546_v45, %s17829_s30 }
 0x71e   : > { %5999 = vrot.lane.b32.xlu1 %v15561_v57, %s17829_s30  ;;  %5997 = vrot.lane.b32.xlu0 %v5893_v24, %s17829_s30 }
 0x720   : > { %v5695_v31 = vpop.permute.xlu1 %5694  ;;  %v5691_v51 = vpop.permute.xlu0 %5690 }
 0x721   : > { %5838 = vst.msk [vmem:[#allocation3 + $0x20] sm:$0xf] %vm5837_vm2, %v5695_v31  ;;  %v5920_v31 = vld [vmem:[#allocation5 + $0x148] sm:$0xf] }
 0x722   : > { %5835 = vst.msk [vmem:[#allocation3] sm:$0xff] %vm5834_vm3, %v5691_v51  ;;  %6003 = vrot.lane.b32.xlu1 %v5896_v35, %s17829_s30  ;;  %6001 = vrot.lane.b32.xlu0 %v15559_v54, %s17829_s30 }
 0x724   : > { %v5697_v7 = vpop.permute.xlu1 %5696  ;;  %v5693_v13 = vpop.permute.xlu0 %5692 }
 0x725   : > { %5839 = vst.msk [vmem:[#allocation3 + $0x30] sm:$0xff] %vm5834_vm3, %v5697_v7  ;;  %5836 = vst.msk [vmem:[#allocation3 + $0x10] sm:$0xff] %vm5834_vm3, %v5693_v13 }
 0x726   : > { %6007 = vrot.lane.b32.xlu1 %v15570_v29, %s17829_s30  ;;  %6005 = vrot.lane.b32.xlu0 %v15563_v25, %s17829_s30 }
 0x728   : > { %v5701_v34 = vpop.permute.xlu1 %5700  ;;  %v5699_v9 = vpop.permute.xlu0 %5698 }
 0x729   : > { %5841 = vst.msk [vmem:[#allocation3 + $0x50] sm:$0xf] %vm5837_vm2, %v5701_v34  ;;  %v5923_v34 = vld [vmem:[#allocation5 + $0x160] sm:$0xf] }
 0x72a   : > { %5840 = vst.msk [vmem:[#allocation3 + $0x40] sm:$0xff] %vm5834_vm3, %v5699_v9  ;;  %6011 = vrot.lane.b32.xlu1 %v15580_v62, %s17829_s30  ;;  %6009 = vrot.lane.b32.xlu0 %v5899_v8, %s17829_s30 }
 0x72c   : > { %v5705_v11 = vpop.permute.xlu1 %5704  ;;  %v5703_v1 = vpop.permute.xlu0 %5702 }
 0x72d   : > { %5843 = vst.msk [vmem:[#allocation3 + $0x70] sm:$0xff] %vm5834_vm3, %v5705_v11  ;;  %5842 = vst.msk [vmem:[#allocation3 + $0x60] sm:$0xff] %vm5834_vm3, %v5703_v1  ;;  %v5926_v11 = vld [vmem:[#allocation5 + $0x178] sm:$0xf] }
 0x72e   : > { %6015 = vrot.lane.b32.xlu1 %v5902_v18, %s17829_s30  ;;  %6013 = vrot.lane.b32.xlu0 %v15578_v10, %s17829_s30 }
 0x730   : > { %v5709_v5 = vpop.permute.xlu1 %5708  ;;  %v5707_v3 = vpop.permute.xlu0 %5706 }
 0x731   : > { %5845 = vst.msk [vmem:[#allocation3 + $0x90] sm:$0xff] %vm5834_vm3, %v5709_v5 }
 0x732   : > { %5844 = vst.msk [vmem:[#allocation3 + $0x80] sm:$0xf] %vm5837_vm2, %v5707_v3  ;;  %6019 = vrot.lane.b32.xlu1 %v15586_v37, %s17829_s30  ;;  %6017 = vrot.lane.b32.xlu0 %v15582_v21, %s17829_s30 }
 0x734   : > { %v5713_v33 = vpop.permute.xlu1 %5712  ;;  %v5711_v58 = vpop.permute.xlu0 %5710 }
 0x735   : > { %5847 = vst.msk [vmem:[#allocation3 + $0xb0] sm:$0xf] %vm5837_vm2, %v5713_v33  ;;  %v5929_v33 = vld [vmem:[#allocation5 + $0x190] sm:$0xf] }
 0x736   : > { %5846 = vst.msk [vmem:[#allocation3 + $0xa0] sm:$0xff] %vm5834_vm3, %v5711_v58  ;;  %6023 = vrot.lane.b32.xlu1 %v15596_v14, %s17829_s30  ;;  %6021 = vrot.lane.b32.xlu0 %v5905_v30, %s17829_s30 }
 0x738   : > { %v5717_v0 = vpop.permute.xlu1 %5716  ;;  %v5715_v32 = vpop.permute.xlu0 %5714 }
 0x739   : > { %5849 = vst.msk [vmem:[#allocation3 + $0xd0] sm:$0xff] %vm5834_vm3, %v5717_v0  ;;  %5848 = vst.msk [vmem:[#allocation3 + $0xc0] sm:$0xff] %vm5834_vm3, %v5715_v32  ;;  %v5932_v0 = vld [vmem:[#allocation5 + $0x1a8] sm:$0xf] }
 0x73a   : > { %6027 = vrot.lane.b32.xlu1 %v5908_v15, %s17829_s30  ;;  %6025 = vrot.lane.b32.xlu0 %v15594_v38, %s17829_s30 }
 0x73c   : > { %v5721_v12 = vpop.permute.xlu1 %5720  ;;  %v5719_v52 = vpop.permute.xlu0 %5718 }
 0x73d   : > { %5851 = vst.msk [vmem:[#allocation3 + $0xf0] sm:$0xff] %vm5834_vm3, %v5721_v12 }
 0x73e   : > { %5850 = vst.msk [vmem:[#allocation3 + $0xe0] sm:$0xf] %vm5837_vm2, %v5719_v52  ;;  %6031 = vrot.lane.b32.xlu1 %v15605_v17, %s17829_s30  ;;  %6029 = vrot.lane.b32.xlu0 %v15598_v61, %s17829_s30 }
 0x740   : > { %v5725_v53 = vpop.permute.xlu1 %5724  ;;  %v5723_v56 = vpop.permute.xlu0 %5722 }
 0x741   : > { %5853 = vst.msk [vmem:[#allocation3 + $0x110] sm:$0xf] %vm5837_vm2, %v5725_v53  ;;  %v6178_v53 = vld [vmem:[#allocation5 + $0x58] sm:$0xf] }
 0x742   : > { %5852 = vst.msk [vmem:[#allocation3 + $0x100] sm:$0xff] %vm5834_vm3, %v5723_v56  ;;  %6035 = vrot.lane.b32.xlu1 %v15615_v63, %s17829_s30  ;;  %6033 = vrot.lane.b32.xlu0 %v5911_v41, %s17829_s30 }
 0x744   : > { %v5729_v44 = vpop.permute.xlu1 %5728  ;;  %v5727_v42 = vpop.permute.xlu0 %5726 }
 0x745   : > { %5855 = vst.msk [vmem:[#allocation3 + $0x130] sm:$0xff] %vm5834_vm3, %v5729_v44  ;;  %5854 = vst.msk [vmem:[#allocation3 + $0x120] sm:$0xff] %vm5834_vm3, %v5727_v42  ;;  %v6181_v44 = vld [vmem:[#allocation5 + $0x70] sm:$0xf] }
 0x746   : > { %6039 = vrot.lane.b32.xlu1 %v5914_v43, %s17829_s30  ;;  %6037 = vrot.lane.b32.xlu0 %v15613_v26, %s17829_s30 }
 0x748   : > { %v5733_v22 = vpop.permute.xlu1 %5732  ;;  %v5731_v36 = vpop.permute.xlu0 %5730 }
 0x749   : > { %5857 = vst.msk [vmem:[#allocation3 + $0x150] sm:$0xff] %vm5834_vm3, %v5733_v22 }
 0x74a   : > { %5856 = vst.msk [vmem:[#allocation3 + $0x140] sm:$0xf] %vm5837_vm2, %v5731_v36  ;;  %6043 = vrot.lane.b32.xlu1 %v15621_v28, %s17829_s30  ;;  %6041 = vrot.lane.b32.xlu0 %v15617_v27, %s17829_s30 }
 0x74c   : > { %v5737_v24 = vpop.permute.xlu1 %5736  ;;  %v5735_v35 = vpop.permute.xlu0 %5734 }
 0x74d   : > { %5859 = vst.msk [vmem:[#allocation3 + $0x170] sm:$0xf] %vm5837_vm2, %v5737_v24 }
 0x74e   : > { %5858 = vst.msk [vmem:[#allocation3 + $0x160] sm:$0xff] %vm5834_vm3, %v5735_v35  ;;  %6047 = vrot.lane.b32.xlu1 %v15631_v23, %s17829_s30  ;;  %6045 = vrot.lane.b32.xlu0 %v5917_v46, %s17829_s30 }
 0x750   : > { %v5741_v51 = vpop.permute.xlu1 %5740  ;;  %v5739_v7 = vpop.permute.xlu0 %5738 }
 0x751   : > { %5861 = vst.msk [vmem:[#allocation3 + $0x190] sm:$0xff] %vm5834_vm3, %v5741_v51  ;;  %5860 = vst.msk [vmem:[#allocation3 + $0x180] sm:$0xff] %vm5834_vm3, %v5739_v7 }
 0x752   : > { %6051 = vrot.lane.b32.xlu1 %v5920_v31, %s17829_s30  ;;  %6049 = vrot.lane.b32.xlu0 %v15629_v55, %s17829_s30 }
 0x754   : > { %v5745_v13 = vpop.permute.xlu1 %5744  ;;  %v5743_v8 = vpop.permute.xlu0 %5742 }
 0x755   : > { %5863 = vst.msk [vmem:[#allocation3 + $0x1b0] sm:$0xff] %vm5834_vm3, %v5745_v13 }
 0x756   : > { %5862 = vst.msk [vmem:[#allocation3 + $0x1a0] sm:$0xf] %vm5837_vm2, %v5743_v8  ;;  %6055 = vrot.lane.b32.xlu1 %v15641_v2, %s17829_s30  ;;  %6053 = vrot.lane.b32.xlu0 %v15633_v20, %s17829_s30 }
 0x758   : > { %v5749_v9 = vpop.permute.xlu1 %5748  ;;  %v5747_v18 = vpop.permute.xlu0 %5746 }
 0x759   : > { %5865 = vst.msk [vmem:[#allocation3 + $0x1d0] sm:$0xf] %vm5837_vm2, %v5749_v9 }
 0x75a   : > { %5864 = vst.msk [vmem:[#allocation3 + $0x1c0] sm:$0xff] %vm5834_vm3, %v5747_v18  ;;  %6059 = vrot.lane.b32.xlu1 %v15651_v39, %s17829_s30  ;;  %6057 = vrot.lane.b32.xlu0 %v5923_v34, %s17829_s30 }
 0x75c   : > { %v5753_v1 = vpop.permute.xlu1 %5752  ;;  %v5751_v5 = vpop.permute.xlu0 %5750 }
 0x75d   : > { %5867 = vst.msk [vmem:[#allocation3 + $0x1f0] sm:$0xff] %vm5834_vm3, %v5753_v1  ;;  %5866 = vst.msk [vmem:[#allocation3 + $0x1e0] sm:$0xff] %vm5834_vm3, %v5751_v5 }
 0x75e   : > { %6063 = vrot.lane.b32.xlu1 %v5926_v11, %s17829_s30  ;;  %6061 = vrot.lane.b32.xlu0 %v15649_v60, %s17829_s30 }
 0x760   : > { %v5757_v3 = vpop.permute.xlu1 %5756  ;;  %v5755_v30 = vpop.permute.xlu0 %5754 }
 0x761   : > { %5869 = vst.msk [vmem:[#allocation3 + $0x210] sm:$0xff] %vm5834_vm3, %v5757_v3 }
 0x762   : > { %5868 = vst.msk [vmem:[#allocation3 + $0x200] sm:$0xf] %vm5837_vm2, %v5755_v30  ;;  %6067 = vrot.lane.b32.xlu1 %v15750_v50, %s17829_s30  ;;  %6065 = vrot.lane.b32.xlu0 %v15745_v48, %s17829_s30 }
 0x764   : > { %v5761_v58 = vpop.permute.xlu1 %5760  ;;  %v5759_v15 = vpop.permute.xlu0 %5758 }
 0x765   : > { %5871 = vst.msk [vmem:[#allocation3 + $0x230] sm:$0xf] %vm5837_vm2, %v5761_v58 }
 0x766   : > { %5870 = vst.msk [vmem:[#allocation3 + $0x220] sm:$0xff] %vm5834_vm3, %v5759_v15  ;;  %6071 = vrot.lane.b32.xlu1 %v15706_v16, %s17829_s30  ;;  %6069 = vrot.lane.b32.xlu0 %v5929_v33, %s17829_s30 }
 0x768   : > { %v5765_v32 = vpop.permute.xlu1 %5764  ;;  %v5763_v12 = vpop.permute.xlu0 %5762 }
 0x769   : > { %5873 = vst.msk [vmem:[#allocation3 + $0x250] sm:$0xff] %vm5834_vm3, %v5765_v32  ;;  %5872 = vst.msk [vmem:[#allocation3 + $0x240] sm:$0xff] %vm5834_vm3, %v5763_v12 }
 0x76a   : > { %6075 = vrot.lane.b32.xlu1 %v5932_v0, %s17829_s30  ;;  %6073 = vrot.lane.b32.xlu0 %v15713_v19, %s17829_s30 }
 0x76c   : > { %v5769_v52 = vpop.permute.xlu1 %5768  ;;  %v5767_v41 = vpop.permute.xlu0 %5766 }
 0x76d   : > { %5875 = vst.msk [vmem:[#allocation3 + $0x270] sm:$0xff] %vm5834_vm3, %v5769_v52 }
 0x76e   : > { %5874 = vst.msk [vmem:[#allocation3 + $0x260] sm:$0xf] %vm5837_vm2, %v5767_v41  ;;  %6274 = vrot.lane.b32.xlu1 %v15542_v59, %s17827_s14  ;;  %6272 = vrot.lane.b32.xlu0 %v15544_v6, %s17827_s14  ;;  %v6467_v41 = vld [vmem:[#allocation5 + $0x60] sm:$0xff] }
 0x76f   : > { %6515 = vst.msk [vmem:[#allocation3 + $0x8] sm:$0xff] %vm385_vm10, %v6467_v41 }
 0x770   : > { %v5773_v56 = vpop.permute.xlu1 %5772  ;;  %v5771_v43 = vpop.permute.xlu0 %5770 }
 0x771   : > { %5877 = vst.msk [vmem:[#allocation3 + $0x290] sm:$0xf] %vm5837_vm2, %v5773_v56  ;;  %v6471_v56 = vld [vmem:[#allocation5 + $0x80] sm:$0xff] }
 0x772   : > { %5876 = vst.msk [vmem:[#allocation3 + $0x280] sm:$0xff] %vm5834_vm3, %v5771_v43  ;;  %6278 = vrot.lane.b32.xlu1 %v15546_v45, %s17827_s14  ;;  %6276 = vrot.lane.b32.xlu0 %v6178_v53, %s17827_s14  ;;  %v6184_v45 = vld [vmem:[#allocation5 + $0x88] sm:$0xf]  ;;  %v6469_v53 = vld [vmem:[#allocation5 + $0x70] sm:$0xf] }
 0x773   : > { %v6472_v43 = vld [vmem:[#allocation5 + $0x88] sm:$0xf]  ;;  %6517 = vst.msk [vmem:[#allocation3 + $0x28] sm:$0xf] %vm388_vm11, %v6469_v53 }
 0x774   : > { %v5777_v42 = vpop.permute.xlu1 %5776  ;;  %v5775_v22 = vpop.permute.xlu0 %5774  ;;  %6519 = vst.msk [vmem:[#allocation3 + $0x48] sm:$0xff] %vm385_vm10, %v6471_v56 }
 0x775   : > { %5879 = vst.msk [vmem:[#allocation3 + $0x2b0] sm:$0xff] %vm5834_vm3, %v5777_v42  ;;  %5878 = vst.msk [vmem:[#allocation3 + $0x2a0] sm:$0xff] %vm5834_vm3, %v5775_v22  ;;  %v6475_v42 = vld [vmem:[#allocation5 + $0xa0] sm:$0xf]  ;;  %v6476_v22 = vld [vmem:[#allocation5 + $0xa8] sm:$0xff] }
 0x776   : > { %6282 = vrot.lane.b32.xlu1 %v6181_v44, %s17827_s14  ;;  %6280 = vrot.lane.b32.xlu0 %v15551_v40, %s17827_s14  ;;  %v6187_v40 = vld [vmem:[#allocation5 + $0xa0] sm:$0xf]  ;;  %v6474_v44 = vld [vmem:[#allocation5 + $0x98] sm:$0xff]  ;;  %6520 = vst.msk [vmem:[#allocation3 + $0x58] sm:$0xf] %vm388_vm11, %v6472_v43 }
 0x777   : > { %6522 = vst.msk [vmem:[#allocation3 + $0x78] sm:$0xff] %vm385_vm10, %v6474_v44  ;;  %6524 = vst.msk [vmem:[#allocation3 + $0x98] sm:$0xff] %vm385_vm10, %v6476_v22 }
 0x778   : > { %v5781_v59 = vpop.permute.xlu1 %5780  ;;  %v5779_v6 = vpop.permute.xlu0 %5778  ;;  %6523 = vst.msk [vmem:[#allocation3 + $0x88] sm:$0xf] %vm388_vm11, %v6475_v42 }
 0x779   : > { %5881 = vst.msk [vmem:[#allocation3 + $0x2d0] sm:$0xff] %vm5834_vm3, %v5781_v59  ;;  %v6477_v59 = vld [vmem:[#allocation5 + $0xb0] sm:$0xff] }
 0x77a   : > { %5880 = vst.msk [vmem:[#allocation3 + $0x2c0] sm:$0xf] %vm5837_vm2, %v5779_v6  ;;  %6286 = vrot.lane.b32.xlu1 %v15559_v54, %s17827_s14  ;;  %6284 = vrot.lane.b32.xlu0 %v15561_v57, %s17827_s14  ;;  %v6478_v6 = vld [vmem:[#allocation5 + $0xb8] sm:$0xf] }
 0x77b   : > { %6525 = vst.msk [vmem:[#allocation3 + $0xa8] sm:$0xff] %vm385_vm10, %v6477_v59 }
 0x77c   : > { %v5785_v36 = vpop.permute.xlu1 %5784  ;;  %v5783_v46 = vpop.permute.xlu0 %5782  ;;  %6526 = vst.msk [vmem:[#allocation3 + $0xb8] sm:$0xf] %vm388_vm11, %v6478_v6 }
 0x77d   : > { %5883 = vst.msk [vmem:[#allocation3 + $0x2f0] sm:$0xf] %vm5837_vm2, %v5785_v36  ;;  %v6479_v36 = vld [vmem:[#allocation5 + $0xc0] sm:$0xff] }
 0x77e   : > { %5882 = vst.msk [vmem:[#allocation3 + $0x2e0] sm:$0xff] %vm5834_vm3, %v5783_v46  ;;  %6290 = vrot.lane.b32.xlu1 %v15563_v25, %s17827_s14  ;;  %6288 = vrot.lane.b32.xlu0 %v6184_v45, %s17827_s14  ;;  %v6190_v25 = vld [vmem:[#allocation5 + $0xb8] sm:$0xf]  ;;  %v6480_v46 = vld [vmem:[#allocation5 + $0xc8] sm:$0xff] }
 0x77f   : > { %6527 = vst.msk [vmem:[#allocation3 + $0xc8] sm:$0xff] %vm385_vm10, %v6479_v36  ;;  %6528 = vst.msk [vmem:[#allocation3 + $0xd8] sm:$0xff] %vm385_vm10, %v6480_v46 }
 0x780   : > { %v5984_v24 = vpop.permute.xlu1 %5983  ;;  %v5982_v35 = vpop.permute.xlu0 %5981 }
 0x781   : > { %6127 = vst.msk [vmem:[#allocation3 + $0x10] sm:$0xff] %vm6125_vm4, %v5984_v24  ;;  %6126 = vst.msk [vmem:[#allocation3] sm:$0xff] %vm6125_vm4, %v5982_v35  ;;  %v6220_v24 = vld [vmem:[#allocation5 + $0x1a8] sm:$0xf]  ;;  %v6482_v35 = vld [vmem:[#allocation5 + $0xd8] sm:$0xff] }
 0x782   : > { %6294 = vrot.lane.b32.xlu1 %v6187_v40, %s17827_s14  ;;  %6292 = vrot.lane.b32.xlu0 %v15570_v29, %s17827_s14  ;;  %v6193_v29 = vld [vmem:[#allocation5 + $0xd0] sm:$0xf]  ;;  %6530 = vst.msk [vmem:[#allocation3 + $0xf8] sm:$0xff] %vm385_vm10, %v6482_v35 }
 0x783   : > { %v6481_v40 = vld [vmem:[#allocation5 + $0xd0] sm:$0xf] }
 0x784   : > { %v5988_v54 = vpop.permute.xlu1 %5987  ;;  %v5986_v57 = vpop.permute.xlu0 %5985  ;;  %6529 = vst.msk [vmem:[#allocation3 + $0xe8] sm:$0xf] %vm388_vm11, %v6481_v40 }
 0x785   : > { %6130 = vst.msk [vmem:[#allocation3 + $0x30] sm:$0xff] %vm6125_vm4, %v5988_v54  ;;  %v6483_v54 = vld [vmem:[#allocation5 + $0xe0] sm:$0xff] }
 0x786   : > { %6129 = vst.msk [vmem:[#allocation3 + $0x20] sm:$0xf] %vm6128_vm5, %v5986_v57  ;;  %6298 = vrot.lane.b32.xlu1 %v15578_v10, %s17827_s14  ;;  %6296 = vrot.lane.b32.xlu0 %v15580_v62, %s17827_s14  ;;  %v6484_v57 = vld [vmem:[#allocation5 + $0xe8] sm:$0xf] }
 0x787   : > { %6531 = vst.msk [vmem:[#allocation3 + $0x108] sm:$0xff] %vm385_vm10, %v6483_v54 }
 0x788   : > { %v5992_v31 = vpop.permute.xlu1 %5991  ;;  %v5990_v51 = vpop.permute.xlu0 %5989  ;;  %6532 = vst.msk [vmem:[#allocation3 + $0x118] sm:$0xf] %vm388_vm11, %v6484_v57 }
 0x789   : > { %6132 = vst.msk [vmem:[#allocation3 + $0x50] sm:$0xf] %vm6128_vm5, %v5992_v31  ;;  %v6486_v31 = vld [vmem:[#allocation5 + $0xf8] sm:$0xff] }
 0x78a   : > { %6131 = vst.msk [vmem:[#allocation3 + $0x40] sm:$0xff] %vm6125_vm4, %v5990_v51  ;;  %6302 = vrot.lane.b32.xlu1 %v15582_v21, %s17827_s14  ;;  %6300 = vrot.lane.b32.xlu0 %v6190_v25, %s17827_s14  ;;  %v6196_v21 = vld [vmem:[#allocation5 + $0xe8] sm:$0xf]  ;;  %v6485_v25 = vld [vmem:[#allocation5 + $0xf0] sm:$0xff]  ;;  %v6487_v51 = vld [vmem:[#allocation5 + $0x100] sm:$0xf] }
 0x78b   : > { %6533 = vst.msk [vmem:[#allocation3 + $0x128] sm:$0xff] %vm385_vm10, %v6485_v25  ;;  %6534 = vst.msk [vmem:[#allocation3 + $0x138] sm:$0xff] %vm385_vm10, %v6486_v31 }
 0x78c   : > { %v5996_v7 = vpop.permute.xlu1 %5995  ;;  %v5994_v13 = vpop.permute.xlu0 %5993  ;;  %6535 = vst.msk [vmem:[#allocation3 + $0x148] sm:$0xf] %vm388_vm11, %v6487_v51 }
 0x78d   : > { %6134 = vst.msk [vmem:[#allocation3 + $0x70] sm:$0xff] %vm6125_vm4, %v5996_v7  ;;  %6133 = vst.msk [vmem:[#allocation3 + $0x60] sm:$0xff] %vm6125_vm4, %v5994_v13  ;;  %v6489_v7 = vld [vmem:[#allocation5 + $0x110] sm:$0xff]  ;;  %v6490_v13 = vld [vmem:[#allocation5 + $0x118] sm:$0xf] }
 0x78e   : > { %6306 = vrot.lane.b32.xlu1 %v6193_v29, %s17827_s14  ;;  %6304 = vrot.lane.b32.xlu0 %v15586_v37, %s17827_s14  ;;  %v6199_v37 = vld [vmem:[#allocation5 + $0x100] sm:$0xf]  ;;  %v6488_v29 = vld [vmem:[#allocation5 + $0x108] sm:$0xff]  ;;  %6537 = vst.msk [vmem:[#allocation3 + $0x168] sm:$0xff] %vm385_vm10, %v6489_v7 }
 0x78f   : > { %6536 = vst.msk [vmem:[#allocation3 + $0x158] sm:$0xff] %vm385_vm10, %v6488_v29 }
 0x790   : > { %v6000_v10 = vpop.permute.xlu1 %5999  ;;  %v5998_v62 = vpop.permute.xlu0 %5997  ;;  %6538 = vst.msk [vmem:[#allocation3 + $0x178] sm:$0xf] %vm388_vm11, %v6490_v13 }
 0x791   : > { %6136 = vst.msk [vmem:[#allocation3 + $0x90] sm:$0xff] %vm6125_vm4, %v6000_v10  ;;  %v6491_v10 = vld [vmem:[#allocation5 + $0x120] sm:$0xff] }
 0x792   : > { %6135 = vst.msk [vmem:[#allocation3 + $0x80] sm:$0xf] %vm6128_vm5, %v5998_v62  ;;  %6310 = vrot.lane.b32.xlu1 %v15594_v38, %s17827_s14  ;;  %6308 = vrot.lane.b32.xlu0 %v15596_v14, %s17827_s14  ;;  %v6492_v62 = vld [vmem:[#allocation5 + $0x128] sm:$0xff] }
 0x793   : > { %6539 = vst.msk [vmem:[#allocation3 + $0x188] sm:$0xff] %vm385_vm10, %v6491_v10  ;;  %6540 = vst.msk [vmem:[#allocation3 + $0x198] sm:$0xff] %vm385_vm10, %v6492_v62 }
 0x794   : > { %v6004_v8 = vpop.permute.xlu1 %6003  ;;  %v6002_v34 = vpop.permute.xlu0 %6001 }
 0x795   : > { %6138 = vst.msk [vmem:[#allocation3 + $0xb0] sm:$0xf] %vm6128_vm5, %v6004_v8  ;;  %v6223_v8 = vld [vmem:[#allocation5 + $0x1c0] sm:$0xf] }
 0x796   : > { %6137 = vst.msk [vmem:[#allocation3 + $0xa0] sm:$0xff] %vm6125_vm4, %v6002_v34  ;;  %6314 = vrot.lane.b32.xlu1 %v15598_v61, %s17827_s14  ;;  %6312 = vrot.lane.b32.xlu0 %v6196_v21, %s17827_s14  ;;  %v6202_v61 = vld [vmem:[#allocation5 + $0x118] sm:$0xf]  ;;  %v6493_v21 = vld [vmem:[#allocation5 + $0x130] sm:$0xf] }
 0x797   : > { %v6494_v34 = vld [vmem:[#allocation5 + $0x138] sm:$0xff]  ;;  %6541 = vst.msk [vmem:[#allocation3 + $0x1a8] sm:$0xf] %vm388_vm11, %v6493_v21 }
 0x798   : > { %v6008_v9 = vpop.permute.xlu1 %6007  ;;  %v6006_v18 = vpop.permute.xlu0 %6005  ;;  %6542 = vst.msk [vmem:[#allocation3 + $0x1b8] sm:$0xff] %vm385_vm10, %v6494_v34 }
 0x799   : > { %6140 = vst.msk [vmem:[#allocation3 + $0xd0] sm:$0xff] %vm6125_vm4, %v6008_v9  ;;  %6139 = vst.msk [vmem:[#allocation3 + $0xc0] sm:$0xff] %vm6125_vm4, %v6006_v18  ;;  %v6496_v9 = vld [vmem:[#allocation5 + $0x148] sm:$0xf]  ;;  %v6497_v18 = vld [vmem:[#allocation5 + $0x150] sm:$0xff] }
 0x79a   : > { %6318 = vrot.lane.b32.xlu1 %v6199_v37, %s17827_s14  ;;  %6316 = vrot.lane.b32.xlu0 %v15605_v17, %s17827_s14  ;;  %v6205_v17 = vld [vmem:[#allocation5 + $0x130] sm:$0xf]  ;;  %v6495_v37 = vld [vmem:[#allocation5 + $0x140] sm:$0xff]  ;;  %6544 = vst.msk [vmem:[#allocation3 + $0x1d8] sm:$0xf] %vm388_vm11, %v6496_v9 }
 0x79b   : > { %6543 = vst.msk [vmem:[#allocation3 + $0x1c8] sm:$0xff] %vm385_vm10, %v6495_v37  ;;  %6545 = vst.msk [vmem:[#allocation3 + $0x1e8] sm:$0xff] %vm385_vm10, %v6497_v18 }
 0x79c   : > { %v6012_v38 = vpop.permute.xlu1 %6011  ;;  %v6010_v14 = vpop.permute.xlu0 %6009 }
 0x79d   : > { %6142 = vst.msk [vmem:[#allocation3 + $0xf0] sm:$0xff] %vm6125_vm4, %v6012_v38  ;;  %v6498_v38 = vld [vmem:[#allocation5 + $0x158] sm:$0xff] }
 0x79e   : > { %6141 = vst.msk [vmem:[#allocation3 + $0xe0] sm:$0xf] %vm6128_vm5, %v6010_v14  ;;  %6322 = vrot.lane.b32.xlu1 %v15613_v26, %s17827_s14  ;;  %6320 = vrot.lane.b32.xlu0 %v15615_v63, %s17827_s14  ;;  %v6499_v14 = vld [vmem:[#allocation5 + $0x160] sm:$0xf] }
 0x79f   : > { %6546 = vst.msk [vmem:[#allocation3 + $0x1f8] sm:$0xff] %vm385_vm10, %v6498_v38 }
 0x7a0   : > { %v6016_v11 = vpop.permute.xlu1 %6015  ;;  %v6014_v1 = vpop.permute.xlu0 %6013  ;;  %6547 = vst.msk [vmem:[#allocation3 + $0x208] sm:$0xf] %vm388_vm11, %v6499_v14 }
 0x7a1   : > { %6144 = vst.msk [vmem:[#allocation3 + $0x110] sm:$0xf] %vm6128_vm5, %v6016_v11  ;;  %v6501_v11 = vld [vmem:[#allocation5 + $0x170] sm:$0xff] }
 0x7a2   : > { %6143 = vst.msk [vmem:[#allocation3 + $0x100] sm:$0xff] %vm6125_vm4, %v6014_v1  ;;  %6326 = vrot.lane.b32.xlu1 %v15617_v27, %s17827_s14  ;;  %6324 = vrot.lane.b32.xlu0 %v6202_v61, %s17827_s14  ;;  %v6208_v27 = vld [vmem:[#allocation5 + $0x148] sm:$0xf]  ;;  %v6502_v1 = vld [vmem:[#allocation5 + $0x178] sm:$0xf] }
 0x7a3   : > { %v6500_v61 = vld [vmem:[#allocation5 + $0x168] sm:$0xff]  ;;  %6549 = vst.msk [vmem:[#allocation3 + $0x228] sm:$0xff] %vm385_vm10, %v6501_v11 }
 0x7a4   : > { %v6020_v5 = vpop.permute.xlu1 %6019  ;;  %v6018_v3 = vpop.permute.xlu0 %6017  ;;  %6548 = vst.msk [vmem:[#allocation3 + $0x218] sm:$0xff] %vm385_vm10, %v6500_v61 }
 0x7a5   : > { %6146 = vst.msk [vmem:[#allocation3 + $0x130] sm:$0xff] %vm6125_vm4, %v6020_v5  ;;  %6145 = vst.msk [vmem:[#allocation3 + $0x120] sm:$0xff] %vm6125_vm4, %v6018_v3  ;;  %v6503_v5 = vld [vmem:[#allocation5 + $0x180] sm:$0xff]  ;;  %v6504_v3 = vld [vmem:[#allocation5 + $0x188] sm:$0xff] }
 0x7a6   : > { %6330 = vrot.lane.b32.xlu1 %v6205_v17, %s17827_s14  ;;  %6328 = vrot.lane.b32.xlu0 %v15621_v28, %s17827_s14  ;;  %v6211_v28 = vld [vmem:[#allocation5 + $0x160] sm:$0xf]  ;;  %6550 = vst.msk [vmem:[#allocation3 + $0x238] sm:$0xf] %vm388_vm11, %v6502_v1 }
 0x7a7   : > { %6551 = vst.msk [vmem:[#allocation3 + $0x248] sm:$0xff] %vm385_vm10, %v6503_v5  ;;  %6552 = vst.msk [vmem:[#allocation3 + $0x258] sm:$0xff] %vm385_vm10, %v6504_v3 }
 0x7a8   : > { %v6024_v26 = vpop.permute.xlu1 %6023  ;;  %v6022_v63 = vpop.permute.xlu0 %6021 }
 0x7a9   : > { %6148 = vst.msk [vmem:[#allocation3 + $0x150] sm:$0xff] %vm6125_vm4, %v6024_v26  ;;  %v6505_v26 = vld [vmem:[#allocation5 + $0x190] sm:$0xf] }
 0x7aa   : > { %6147 = vst.msk [vmem:[#allocation3 + $0x140] sm:$0xf] %vm6128_vm5, %v6022_v63  ;;  %6334 = vrot.lane.b32.xlu1 %v15629_v55, %s17827_s14  ;;  %6332 = vrot.lane.b32.xlu0 %v15631_v23, %s17827_s14  ;;  %v6508_v63 = vld [vmem:[#allocation5 + $0x1a8] sm:$0xf] }
 0x7ab   : > { %6553 = vst.msk [vmem:[#allocation3 + $0x268] sm:$0xf] %vm388_vm11, %v6505_v26  ;;  %6556 = vst.msk [vmem:[#allocation3 + $0x298] sm:$0xf] %vm388_vm11, %v6508_v63 }
 0x7ac   : > { %v6028_v30 = vpop.permute.xlu1 %6027  ;;  %v6026_v33 = vpop.permute.xlu0 %6025 }
 0x7ad   : > { %6150 = vst.msk [vmem:[#allocation3 + $0x170] sm:$0xf] %vm6128_vm5, %v6028_v30  ;;  %v6512_v30 = vld [vmem:[#allocation5 + $0x1c8] sm:$0xff] }
 0x7ae   : > { %6149 = vst.msk [vmem:[#allocation3 + $0x160] sm:$0xff] %vm6125_vm4, %v6026_v33  ;;  %6338 = vrot.lane.b32.xlu1 %v15633_v20, %s17827_s14  ;;  %6336 = vrot.lane.b32.xlu0 %v6208_v27, %s17827_s14  ;;  %v6214_v20 = vld [vmem:[#allocation5 + $0x178] sm:$0xf]  ;;  %v6511_v27 = vld [vmem:[#allocation5 + $0x1c0] sm:$0xf]  ;;  %v6513_v33 = vld [vmem:[#allocation5 + $0x1d0] sm:$0xff] }
 0x7af   : > { %6559 = vst.msk [vmem:[#allocation3 + $0x2c8] sm:$0xf] %vm388_vm11, %v6511_v27 }
 0x7b0   : > { %v6032_v58 = vpop.permute.xlu1 %6031  ;;  %v6030_v15 = vpop.permute.xlu0 %6029  ;;  %6560 = vst.msk [vmem:[#allocation3 + $0x2d8] sm:$0xff] %vm385_vm10, %v6512_v30  ;;  %6561 = vst.msk [vmem:[#allocation3 + $0x2e8] sm:$0xff] %vm385_vm10, %v6513_v33 }
 0x7b1   : > { %6152 = vst.msk [vmem:[#allocation3 + $0x190] sm:$0xff] %vm6125_vm4, %v6032_v58  ;;  %6151 = vst.msk [vmem:[#allocation3 + $0x180] sm:$0xff] %vm6125_vm4, %v6030_v15 }
 0x7b2   : > { %6342 = vrot.lane.b32.xlu1 %v6211_v28, %s17827_s14  ;;  %6340 = vrot.lane.b32.xlu0 %v15641_v2, %s17827_s14  ;;  %v6217_v2 = vld [vmem:[#allocation5 + $0x190] sm:$0xf]  ;;  %v6514_v28 = vld [vmem:[#allocation5 + $0x1d8] sm:$0xf] }
 0x7b3   : > { %6562 = vst.msk [vmem:[#allocation3 + $0x2f8] sm:$0xf] %vm388_vm11, %v6514_v28 }
 0x7b4   : > { %v6036_v55 = vpop.permute.xlu1 %6035  ;;  %v6034_v23 = vpop.permute.xlu0 %6033 }
 0x7b5   : > { %6154 = vst.msk [vmem:[#allocation3 + $0x1b0] sm:$0xff] %vm6125_vm4, %v6036_v55 }
 0x7b6   : > { %6153 = vst.msk [vmem:[#allocation3 + $0x1a0] sm:$0xf] %vm6128_vm5, %v6034_v23  ;;  %6346 = vrot.lane.b32.xlu1 %v15649_v60, %s17827_s14  ;;  %6344 = vrot.lane.b32.xlu0 %v15651_v39, %s17827_s14  ;;  %v6468_v60 = vld [vmem:[#allocation5 + $0x68] sm:$0xff]  ;;  %v6470_v39 = vld [vmem:[#allocation5 + $0x78] sm:$0xff] }
 0x7b7   : > { %6516 = vst.msk [vmem:[#allocation3 + $0x18] sm:$0xff] %vm385_vm10, %v6468_v60  ;;  %6518 = vst.msk [vmem:[#allocation3 + $0x38] sm:$0xff] %vm385_vm10, %v6470_v39 }
 0x7b8   : > { %v6040_v0 = vpop.permute.xlu1 %6039  ;;  %v6038_v32 = vpop.permute.xlu0 %6037 }
 0x7b9   : > { %6156 = vst.msk [vmem:[#allocation3 + $0x1d0] sm:$0xf] %vm6128_vm5, %v6040_v0 }
 0x7ba   : > { %6155 = vst.msk [vmem:[#allocation3 + $0x1c0] sm:$0xff] %vm6125_vm4, %v6038_v32  ;;  %6350 = vrot.lane.b32.xlu1 %v15745_v48, %s17827_s14  ;;  %6348 = vrot.lane.b32.xlu0 %v6214_v20, %s17827_s14  ;;  %v6473_v48 = vld [vmem:[#allocation5 + $0x90] sm:$0xff] }
 0x7bb   : > { %6521 = vst.msk [vmem:[#allocation3 + $0x68] sm:$0xff] %vm385_vm10, %v6473_v48 }
 0x7bc   : > { %v6044_v12 = vpop.permute.xlu1 %6043  ;;  %v6042_v52 = vpop.permute.xlu0 %6041 }
 0x7bd   : > { %6158 = vst.msk [vmem:[#allocation3 + $0x1f0] sm:$0xff] %vm6125_vm4, %v6044_v12  ;;  %6157 = vst.msk [vmem:[#allocation3 + $0x1e0] sm:$0xff] %vm6125_vm4, %v6042_v52 }
 0x7be   : > { %6354 = vrot.lane.b32.xlu1 %v6217_v2, %s17827_s14  ;;  %6352 = vrot.lane.b32.xlu0 %v15750_v50, %s17827_s14 }
 0x7c0   : > { %v6048_v45 = vpop.permute.xlu1 %6047  ;;  %v6046_v50 = vpop.permute.xlu0 %6045 }
 0x7c1   : > { %6160 = vst.msk [vmem:[#allocation3 + $0x210] sm:$0xff] %vm6125_vm4, %v6048_v45 }
 0x7c2   : > { %6159 = vst.msk [vmem:[#allocation3 + $0x200] sm:$0xf] %vm6128_vm5, %v6046_v50  ;;  %6358 = vrot.lane.b32.xlu1 %v15713_v19, %s17827_s14  ;;  %6356 = vrot.lane.b32.xlu0 %v15706_v16, %s17827_s14 }
 0x7c4   : > { %v6052_v19 = vpop.permute.xlu1 %6051  ;;  %v6050_v16 = vpop.permute.xlu0 %6049 }
 0x7c5   : > { %6162 = vst.msk [vmem:[#allocation3 + $0x230] sm:$0xf] %vm6128_vm5, %v6052_v19 }
 0x7c6   : > { %6161 = vst.msk [vmem:[#allocation3 + $0x220] sm:$0xff] %vm6125_vm4, %v6050_v16  ;;  %6362 = vrot.lane.b32.xlu1 %v15822_v47, %s17827_s14  ;;  %6360 = vrot.lane.b32.xlu0 %v6220_v24, %s17827_s14 }
 0x7c8   : > { %v6056_v47 = vpop.permute.xlu1 %6055  ;;  %v6054_v17 = vpop.permute.xlu0 %6053 }
 0x7c9   : > { %6164 = vst.msk [vmem:[#allocation3 + $0x250] sm:$0xff] %vm6125_vm4, %v6056_v47  ;;  %6163 = vst.msk [vmem:[#allocation3 + $0x240] sm:$0xff] %vm6125_vm4, %v6054_v17 }
 0x7ca   : > { %6366 = vrot.lane.b32.xlu1 %v6223_v8, %s17827_s14  ;;  %6364 = vrot.lane.b32.xlu0 %v15831_v4, %s17827_s14 }
 0x7cc   : > { %v6060_v58 = vpop.permute.xlu1 %6059  ;;  %v6058_v15 = vpop.permute.xlu0 %6057 }
 0x7cd   : > { %6166 = vst.msk [vmem:[#allocation3 + $0x270] sm:$0xff] %vm6125_vm4, %v6060_v58 }
 0x7ce   : > { %6165 = vst.msk [vmem:[#allocation3 + $0x260] sm:$0xf] %vm6128_vm5, %v6058_v15 }
 0x7d0   : > { %v6064_v55 = vpop.permute.xlu1 %6063  ;;  %v6062_v4 = vpop.permute.xlu0 %6061 }
 0x7d1   : > { %6168 = vst.msk [vmem:[#allocation3 + $0x290] sm:$0xf] %vm6128_vm5, %v6064_v55 }
 0x7d2   : > { %6167 = vst.msk [vmem:[#allocation3 + $0x280] sm:$0xff] %vm6125_vm4, %v6062_v4 }
 0x7d4   : > { %v6068_v23 = vpop.permute.xlu1 %6067  ;;  %v6066_v20 = vpop.permute.xlu0 %6065 }
 0x7d5   : > { %6170 = vst.msk [vmem:[#allocation3 + $0x2b0] sm:$0xff] %vm6125_vm4, %v6068_v23  ;;  %6169 = vst.msk [vmem:[#allocation3 + $0x2a0] sm:$0xff] %vm6125_vm4, %v6066_v20 }
 0x7d8   : > { %v6072_v0 = vpop.permute.xlu1 %6071  ;;  %v6070_v32 = vpop.permute.xlu0 %6069 }
 0x7d9   : > { %6172 = vst.msk [vmem:[#allocation3 + $0x2d0] sm:$0xff] %vm6125_vm4, %v6072_v0 }
 0x7da   : > { %6171 = vst.msk [vmem:[#allocation3 + $0x2c0] sm:$0xf] %vm6128_vm5, %v6070_v32 }
 0x7dc   : > { %v6076_v2 = vpop.permute.xlu1 %6075  ;;  %v6074_v12 = vpop.permute.xlu0 %6073 }
 0x7dd   : > { %6174 = vst.msk [vmem:[#allocation3 + $0x2f0] sm:$0xf] %vm6128_vm5, %v6076_v2 }
 0x7de   : > { %6173 = vst.msk [vmem:[#allocation3 + $0x2e0] sm:$0xff] %vm6125_vm4, %v6074_v12 }
 0x7e0   : > { %v6275_v52 = vpop.permute.xlu1 %6274  ;;  %v6273_v41 = vpop.permute.xlu0 %6272 }
 0x7e1   : > { %6418 = vst.msk [vmem:[#allocation3 + $0x10] sm:$0xff] %vm6416_vm6, %v6275_v52  ;;  %6417 = vst.msk [vmem:[#allocation3] sm:$0xff] %vm6416_vm6, %v6273_v41 }
 0x7e4   : > { %v6279_v60 = vpop.permute.xlu1 %6278  ;;  %v6277_v53 = vpop.permute.xlu0 %6276 }
 0x7e5   : > { %6421 = vst.msk [vmem:[#allocation3 + $0x30] sm:$0xff] %vm6416_vm6, %v6279_v60 }
 0x7e6   : > { %6420 = vst.msk [vmem:[#allocation3 + $0x20] sm:$0xf] %vm6419_vm7, %v6277_v53 }
 0x7e8   : > { %v6283_v39 = vpop.permute.xlu1 %6282  ;;  %v6281_v56 = vpop.permute.xlu0 %6280 }
 0x7e9   : > { %6423 = vst.msk [vmem:[#allocation3 + $0x50] sm:$0xf] %vm6419_vm7, %v6283_v39 }
 0x7ea   : > { %6422 = vst.msk [vmem:[#allocation3 + $0x40] sm:$0xff] %vm6416_vm6, %v6281_v56 }
 0x7ec   : > { %v6287_v43 = vpop.permute.xlu1 %6286  ;;  %v6285_v48 = vpop.permute.xlu0 %6284 }
 0x7ed   : > { %6425 = vst.msk [vmem:[#allocation3 + $0x70] sm:$0xff] %vm6416_vm6, %v6287_v43  ;;  %6424 = vst.msk [vmem:[#allocation3 + $0x60] sm:$0xff] %vm6416_vm6, %v6285_v48 }
 0x7f0   : > { %v6291_v44 = vpop.permute.xlu1 %6290  ;;  %v6289_v42 = vpop.permute.xlu0 %6288 }
 0x7f1   : > { %6427 = vst.msk [vmem:[#allocation3 + $0x90] sm:$0xff] %vm6416_vm6, %v6291_v44 }
 0x7f2   : > { %6426 = vst.msk [vmem:[#allocation3 + $0x80] sm:$0xf] %vm6419_vm7, %v6289_v42 }
 0x7f4   : > { %v6295_v22 = vpop.permute.xlu1 %6294  ;;  %v6293_v59 = vpop.permute.xlu0 %6292 }
 0x7f5   : > { %6429 = vst.msk [vmem:[#allocation3 + $0xb0] sm:$0xf] %vm6419_vm7, %v6295_v22 }
 0x7f6   : > { %6428 = vst.msk [vmem:[#allocation3 + $0xa0] sm:$0xff] %vm6416_vm6, %v6293_v59 }
 0x7f8   : > { %v6299_v6 = vpop.permute.xlu1 %6298  ;;  %v6297_v45 = vpop.permute.xlu0 %6296 }
 0x7f9   : > { %6431 = vst.msk [vmem:[#allocation3 + $0xd0] sm:$0xff] %vm6416_vm6, %v6299_v6  ;;  %6430 = vst.msk [vmem:[#allocation3 + $0xc0] sm:$0xff] %vm6416_vm6, %v6297_v45 }
 0x7fc   : > { %v6303_v50 = vpop.permute.xlu1 %6302  ;;  %v6301_v36 = vpop.permute.xlu0 %6300 }
 0x7fd   : > { %6433 = vst.msk [vmem:[#allocation3 + $0xf0] sm:$0xff] %vm6416_vm6, %v6303_v50 }
 0x7fe   : > { %6432 = vst.msk [vmem:[#allocation3 + $0xe0] sm:$0xf] %vm6419_vm7, %v6301_v36 }
 0x800   : > { %v6307_v46 = vpop.permute.xlu1 %6306  ;;  %v6305_v40 = vpop.permute.xlu0 %6304 }
 0x801   : > { %6435 = vst.msk [vmem:[#allocation3 + $0x110] sm:$0xf] %vm6419_vm7, %v6307_v46 }
 0x802   : > { %6434 = vst.msk [vmem:[#allocation3 + $0x100] sm:$0xff] %vm6416_vm6, %v6305_v40 }
 0x804   : > { %v6311_v24 = vpop.permute.xlu1 %6310  ;;  %v6309_v35 = vpop.permute.xlu0 %6308 }
 0x805   : > { %6437 = vst.msk [vmem:[#allocation3 + $0x130] sm:$0xff] %vm6416_vm6, %v6311_v24  ;;  %6436 = vst.msk [vmem:[#allocation3 + $0x120] sm:$0xff] %vm6416_vm6, %v6309_v35 }
 0x808   : > { %v6315_v54 = vpop.permute.xlu1 %6314  ;;  %v6313_v57 = vpop.permute.xlu0 %6312 }
 0x809   : > { %6439 = vst.msk [vmem:[#allocation3 + $0x150] sm:$0xff] %vm6416_vm6, %v6315_v54 }
 0x80a   : > { %6438 = vst.msk [vmem:[#allocation3 + $0x140] sm:$0xf] %vm6419_vm7, %v6313_v57 }
 0x80c   : > { %v6319_v25 = vpop.permute.xlu1 %6318  ;;  %v6317_v31 = vpop.permute.xlu0 %6316 }
 0x80d   : > { %6441 = vst.msk [vmem:[#allocation3 + $0x170] sm:$0xf] %vm6419_vm7, %v6319_v25 }
 0x80e   : > { %6440 = vst.msk [vmem:[#allocation3 + $0x160] sm:$0xff] %vm6416_vm6, %v6317_v31 }
 0x810   : > { %v6323_v51 = vpop.permute.xlu1 %6322  ;;  %v6321_v29 = vpop.permute.xlu0 %6320 }
 0x811   : > { %6443 = vst.msk [vmem:[#allocation3 + $0x190] sm:$0xff] %vm6416_vm6, %v6323_v51  ;;  %6442 = vst.msk [vmem:[#allocation3 + $0x180] sm:$0xff] %vm6416_vm6, %v6321_v29 }
 0x814   : > { %v6327_v7 = vpop.permute.xlu1 %6326  ;;  %v6325_v13 = vpop.permute.xlu0 %6324 }
 0x815   : > { %6445 = vst.msk [vmem:[#allocation3 + $0x1b0] sm:$0xff] %vm6416_vm6, %v6327_v7 }
 0x816   : > { %6444 = vst.msk [vmem:[#allocation3 + $0x1a0] sm:$0xf] %vm6419_vm7, %v6325_v13 }
 0x818   : > { %v6331_v19 = vpop.permute.xlu1 %6330  ;;  %v6329_v16 = vpop.permute.xlu0 %6328 }
 0x819   : > { %6447 = vst.msk [vmem:[#allocation3 + $0x1d0] sm:$0xf] %vm6419_vm7, %v6331_v19 }
 0x81a   : > { %6446 = vst.msk [vmem:[#allocation3 + $0x1c0] sm:$0xff] %vm6416_vm6, %v6329_v16 }
 0x81c   : > { %v6335_v10 = vpop.permute.xlu1 %6334  ;;  %v6333_v62 = vpop.permute.xlu0 %6332 }
 0x81d   : > { %6449 = vst.msk [vmem:[#allocation3 + $0x1f0] sm:$0xff] %vm6416_vm6, %v6335_v10  ;;  %6448 = vst.msk [vmem:[#allocation3 + $0x1e0] sm:$0xff] %vm6416_vm6, %v6333_v62 }
 0x820   : > { %v6339_v21 = vpop.permute.xlu1 %6338  ;;  %v6337_v8 = vpop.permute.xlu0 %6336 }
 0x821   : > { %6451 = vst.msk [vmem:[#allocation3 + $0x210] sm:$0xff] %vm6416_vm6, %v6339_v21 }
 0x822   : > { %6450 = vst.msk [vmem:[#allocation3 + $0x200] sm:$0xf] %vm6419_vm7, %v6337_v8 }
 0x824   : > { %v6343_v34 = vpop.permute.xlu1 %6342  ;;  %v6341_v37 = vpop.permute.xlu0 %6340 }
 0x825   : > { %6453 = vst.msk [vmem:[#allocation3 + $0x230] sm:$0xf] %vm6419_vm7, %v6343_v34 }
 0x826   : > { %6452 = vst.msk [vmem:[#allocation3 + $0x220] sm:$0xff] %vm6416_vm6, %v6341_v37 }
 0x828   : > { %v6347_v9 = vpop.permute.xlu1 %6346  ;;  %v6345_v18 = vpop.permute.xlu0 %6344 }
 0x829   : > { %6455 = vst.msk [vmem:[#allocation3 + $0x250] sm:$0xff] %vm6416_vm6, %v6347_v9  ;;  %6454 = vst.msk [vmem:[#allocation3 + $0x240] sm:$0xff] %vm6416_vm6, %v6345_v18 }
 0x82c   : > { %v6351_v38 = vpop.permute.xlu1 %6350  ;;  %v6349_v14 = vpop.permute.xlu0 %6348 }
 0x82d   : > { %6457 = vst.msk [vmem:[#allocation3 + $0x270] sm:$0xff] %vm6416_vm6, %v6351_v38 }
 0x82e   : > { %6456 = vst.msk [vmem:[#allocation3 + $0x260] sm:$0xf] %vm6419_vm7, %v6349_v14 }
 0x830   : > { %v6355_v61 = vpop.permute.xlu1 %6354  ;;  %v6353_v11 = vpop.permute.xlu0 %6352 }
 0x831   : > { %6459 = vst.msk [vmem:[#allocation3 + $0x290] sm:$0xf] %vm6419_vm7, %v6355_v61 }
 0x832   : > { %6458 = vst.msk [vmem:[#allocation3 + $0x280] sm:$0xff] %vm6416_vm6, %v6353_v11 }
 0x834   : > { %v6359_v1 = vpop.permute.xlu1 %6358  ;;  %v6357_v47 = vpop.permute.xlu0 %6356 }
 0x835   : > { %6461 = vst.msk [vmem:[#allocation3 + $0x2b0] sm:$0xff] %vm6416_vm6, %v6359_v1  ;;  %6460 = vst.msk [vmem:[#allocation3 + $0x2a0] sm:$0xff] %vm6416_vm6, %v6357_v47 }
 0x838   : > { %v6363_v17 = vpop.permute.xlu1 %6362  ;;  %v6361_v5 = vpop.permute.xlu0 %6360 }
 0x839   : > { %6463 = vst.msk [vmem:[#allocation3 + $0x2d0] sm:$0xff] %vm6416_vm6, %v6363_v17 }
 0x83a   : > { %6462 = vst.msk [vmem:[#allocation3 + $0x2c0] sm:$0xf] %vm6419_vm7, %v6361_v5 }
 0x83c   : > { %v6367_v3 = vpop.permute.xlu1 %6366  ;;  %v6365_v26 = vpop.permute.xlu0 %6364 }
 0x83d   : > { %6465 = vst.msk [vmem:[#allocation3 + $0x2f0] sm:$0xf] %vm6419_vm7, %v6367_v3 }
 0x83e   : > { %6464 = vst.msk [vmem:[#allocation3 + $0x2e0] sm:$0xff] %vm6416_vm6, %v6365_v26 }
 0x83f LB: >> { %v16119_v63 = vld [vmem:[%s17817_s3 + $0x88] sm:$0xff]   ;;  %v17835_v27 = vmov 0   ;;  %v16126_v30 = vld [vmem:[%s17817_s3 + $0x38] sm:$0xff]   ;;  %v16132_v33 = vld [vmem:[%s17817_s3 + $0x80] sm:$0xff]   ;;  %s11585_s14 = smul.u32 96, %s12375_s15  ;;  %s11224_s22 = sshll.u32 %s12375_s15, 4  ;;  %s12375_s15 = sphi %s16111_s15, %s6568_s15  }
 0x840   : >> { %6713 = vmatprep.subr.bf16.mxu0 %v17835_v27  ;;  %6816 = vmatprep.subr.bf16.mxu1 %v17835_v27  ;;  %v16139_v28 = vld [vmem:[%s17817_s3 + $0x30] sm:$0xff]   ;;  %v16146_v58 = vld [vmem:[%s17817_s3 + $0x78] sm:$0xff]   ;;  %v16153_v15 = vld [vmem:[%s17817_s3 + $0x28] sm:$0xff]   ;;  %s6568_s15 = sadd.s32 1, %s12375_s15  }
 0x841   : >> { %6714 = vmatpush1.bf16.msra.mxu0 %v16119_v63  ;;  %6817 = vmatpush1.bf16.msra.mxu1 %v16126_v30  ;;  %v16160_v55 = vld [vmem:[%s17817_s3 + $0x70] sm:$0xff]   ;;  %v16167_v4 = vld [vmem:[%s17817_s3 + $0x20] sm:$0xff]   ;;  %v16175_v23 = vld [vmem:[%s17817_s3 + $0x68] sm:$0xff]   ;;  %s16199_s25 = scalar_lea.vmem [#allocation3], %s11585_s14  ;;  %p6565_p12 = scmp.ge.s32.totalorder %s6568_s15, 8  }
 0x842   : >> { %6715 = vmatprep.subr.bf16.mxu0 %v17835_v27  ;;  %6818 = vmatprep.subr.bf16.mxu1 %v17835_v27  ;;  %v16182_v20 = vld [vmem:[%s17817_s3 + $0x18] sm:$0xff]   ;;  %v16189_v0 = vld [vmem:[%s17817_s3 + $0x60] sm:$0xff]   ;;  %v16196_v32 = vld [vmem:[%s17817_s3 + $0x10] sm:$0xff]   ;;  %s17868_s15 = smov (%p6565_p12), 64   ;;  %s16884_s16 = smov (%p6565_p12), 0  }
 0x843   : >> { %v16215_v43 = vld [vmem:[%s17817_s3 + $0x58] sm:$0xff]   ;;  %v16224_v44 = vld [vmem:[%s17817_s3 + $0x8] sm:$0xff]   ;;  %v16238_v36 = vld [vmem:[%s17817_s3 + $0x50] sm:$0xff]  }
 0x844   : >> { %v16246_v40 = vld [vmem:[%s17817_s3] sm:$0xff]   ;;  %v16253_v54 = vld [vmem:[%s17817_s3 + $0x98] sm:$0xff]   ;;  %v16266_v51 = vld [vmem:[%s17817_s3 + $0x48] sm:$0xff]  }
 0x845   : >> { %6716 = vmatpush1.bf16.msra.mxu0 %v16132_v33  ;;  %6819 = vmatpush1.bf16.msra.mxu1 %v16139_v28  ;;  %v6574_v2 = vld [vmem:[%s16199_s25 + $0x8] sm:$0xff]  ;;  %v6576_v12 = vld [vmem:[%s16199_s25 + $0x18] sm:$0xff]  ;;  %v6573_v53 = vld [vmem:[%s16199_s25] sm:$0xff] }
 0x846   : >> { %6717 = vmatprep.subr.bf16.mxu0 %v17835_v27  ;;  %6820 = vmatprep.subr.bf16.mxu1 %v17835_v27  ;;  %v6578_v52 = vld [vmem:[%s16199_s25 + $0x28] sm:$0xf]  ;;  %v16204_v41 = vpack.c.bf16 %v6576_v12, %v6574_v2  ;;  %v6575_v39 = vld [vmem:[%s16199_s25 + $0x10] sm:$0xff]  ;;  %v6577_v56 = vld [vmem:[%s16199_s25 + $0x20] sm:$0xf] }
 0x847   : >> { %v16206_v60 = vpack.c.bf16 %v6578_v52, %v6578_v52  ;;  %v16217_v48 = vpack.c.bf16 %v6575_v39, %v6573_v53  ;;  %v16232_v6 = vpack.c.bf16 %v6577_v56, %v6577_v56  ;;  %v16273_v7 = vld [vmem:[%s17817_s3 + $0x90] sm:$0xff]   ;;  %v16285_v8 = vld [vmem:[%s17817_s3 + $0x40] sm:$0xff]   ;;  %v16295_v18 = vld [vmem:[%s17817_s3 + $0xd8] sm:$0xff]  }
 0x848   : >> { %v6638_v42 = vshrl.u32 %v16204_v41, 16  ;;  %v6640_v22 = vshll.u32 %v16204_v41, 16  ;;  %11116 = vmatprep.mubr.msk.bf16.mxu1 %vm385_vm10, %v16204_v41  ;;  %v6886_v34 = vrot.slane %v16204_v41, 1  ;;  %v16302_v61 = vld [vmem:[%s17817_s3 + $0x128] sm:$0xff]   ;;  %v16311_v1 = vld [vmem:[%s17817_s3 + $0xd0] sm:$0xff]   ;;  %v16319_v17 = vld [vmem:[%s17817_s3 + $0x120] sm:$0xff]  }
 0x849   : >> { %6718 = vmatpush1.bf16.msra.mxu0 %v16146_v58  ;;  %6821 = vmatpush1.bf16.msra.mxu1 %v16153_v15  ;;  %v6645_v59 = vshll.u32 %v16206_v60, 16  ;;  %v17834_v46 = vshll.u32 %v16217_v48, 16  ;;  %v17833_v35 = vshll.u32 %v16232_v6, 16  ;;  %v6626_v25 = vshrl.u32 %v16217_v48, 16  ;;  %17850 = vst [vmem:[#allocation12_spill] sm:$0xff] %v16319_v17  ;;  %v16330_v26 = vld [vmem:[%s17817_s3 + $0xc8] sm:$0xff]  }
 0x84a   : >> { %6719 = vmatprep.subr.bf16.mxu0 %v17835_v27  ;;  %6822 = vmatprep.subr.bf16.mxu1 %v17835_v27  ;;  %v6642_v45 = vrot.slane %v6640_v22, 1  ;;  %v7030_v29 = vshrl.u32 %v16206_v60, 16  ;;  %v7027_v19 = vrot.slane %v6638_v42, 1  ;;  %v7028_v16 = vrot.slane %v6640_v22, 2  ;;  %v16340_v12 = vld [vmem:[%s17817_s3 + $0x118] sm:$0xff]   ;;  %v16347_v52 = vld [vmem:[%s17817_s3 + $0xc0] sm:$0xff]  }
 0x84b   : >> { %v6647_v50 = vrot.slane %v6645_v59, 1  ;;  %v6630_v31 = vrot.slane %v17834_v46, 1  ;;  %v6635_v13 = vrot.slane %v17833_v35, 1  ;;  %v7033_v21 = vrot.slane %v6645_v59, 2  ;;  %17851 = vst [vmem:[#allocation13_spill] sm:$0xff] %v16340_v12  ;;  %v16354_v53 = vld [vmem:[%s17817_s3 + $0x110] sm:$0xff]  }
 0x84c   : >> { %v6643_v24 = vor.u32 %v6642_v45, %v6638_v42  ;;  %v7032_v62 = vrot.slane %v7030_v29, 1  ;;  %v6887_v37 = vrot.slane %v16206_v60, 1  ;;  %v7029_v38 = vor.u32 %v7028_v16, %v7027_v19  ;;  %17852 = vst [vmem:[#allocation14_spill] sm:$0xff] %v16354_v53  ;;  %v16361_v39 = vld [vmem:[%s17817_s3 + $0xb8] sm:$0xff]   ;;  %v16368_v56 = vld [vmem:[%s17817_s3 + $0x108] sm:$0xff]   ;;  %v16375_v42 = vld [vmem:[%s17817_s3 + $0xb0] sm:$0xff]  }
 0x84d   : >> { %6720 = vmatpush1.bf16.msra.mxu0 %v16160_v55  ;;  %6823 = vmatpush1.bf16.msra.mxu1 %v16167_v4  ;;  %v6631_v10 = vor.u32 %v6630_v31, %v6626_v25  ;;  %v7165_v5 = vrot.slane %v16217_v48, 2  ;;  %v7166_v3 = vrot.slane %v16232_v6, 2  ;;  %17853 = vst [vmem:[#allocation15_spill] sm:$0xff] %v16368_v56  ;;  %v16380_v22 = vld [vmem:[%s17817_s3 + $0x100] sm:$0xff]   ;;  %v11214_v59 = vld [vmem:[%s16199_s25 + $0x38] sm:$0xff]  ;;  %v11216_v45 = vld [vmem:[%s16199_s25 + $0x48] sm:$0xff] }
 0x84e   : >> { %6721 = vmatprep.subr.bf16.mxu0 %v17835_v27  ;;  %6824 = vmatprep.subr.bf16.mxu1 %v17835_v27  ;;  %v6648_v57 = vsel %vm4649_vm14, %v6643_v24, %v6647_v50  ;;  %v7034_v14 = vor.u32 %v7033_v21, %v7032_v62  ;;  %v6888_v11 = vsel %vm4825_vm15, %v6886_v34, %v6887_v37  ;;  %v11218_v50 = vld [vmem:[%s16199_s25 + $0x58] sm:$0xf]  ;;  %v11213_v24 = vld [vmem:[%s16199_s25 + $0x30] sm:$0xff]  ;;  %v16395_v29 = vld [vmem:[%s17817_s3 + $0xa8] sm:$0xff]   ;;  %v7021_v21 = vshrl.u32 %v16232_v6, 16 }
 0x84f   : >> { %11105 = vmatprep.mubr.msk.bf16.mxu0 %vm385_vm10, %v6648_v57  ;;  %v6636_v9 = vsel %vm4649_vm14, %v6631_v10, %v6635_v13  ;;  %v16333_v2 = vsel %vm5011_vm1, %v7165_v5, %v7166_v3  ;;  %17854 = vst [vmem:[#allocation16_spill] sm:$0xff] %v16380_v22  ;;  %v11215_v57 = vld [vmem:[%s16199_s25 + $0x40] sm:$0xff]  ;;  %v11217_v31 = vld [vmem:[%s16199_s25 + $0x50] sm:$0xf]  ;;  %v16397_v13 = vpack.c.bf16 %v11216_v45, %v11214_v59  ;;  %v16406_v16 = vld [vmem:[%s17817_s3 + $0xf8] sm:$0xff]   ;;  %s10308_s25 = scalar_lea.vmem [#allocation6], %s11224_s22 }
 0x850   : >> { %v7035_v47 = vsel %vm4914_vm0, %v7029_v38, %v7034_v14  ;;  %v16399_v19 = vpack.c.bf16 %v11218_v50, %v11218_v50  ;;  %17855 = vst [vmem:[#allocation17_spill] sm:$0xff] %v16406_v16  ;;  %v16408_v10 = vpack.c.bf16 %v11215_v57, %v11213_v24  ;;  %v16410_v62 = vpack.c.bf16 %v11217_v31, %v11217_v31  ;;  %v16418_v34 = vld [vmem:[%s17817_s3 + $0xa0] sm:$0xff]  }
 0x851   : >> { %6722 = vmatpush1.bf16.msra.mxu0 %v16175_v23  ;;  %6825 = vmatpush1.bf16.msra.mxu1 %v16182_v20  ;;  %v7314_v37 = vshrl.u32 %v16397_v13, 16 }
 0x852   : >> { %6723 = vmatprep.subr.bf16.mxu0 %v17835_v27  ;;  %6826 = vmatprep.subr.bf16.mxu1 %v17835_v27  ;;  %v7321_v38 = vshll.u32 %v16399_v19, 16  ;;  %v7482_v14 = vshrl.u32 %v16399_v19, 16  ;;  %v17842_v5 = vshll.u32 %v16408_v10, 16  ;;  %v17841_v3 = vshll.u32 %v16410_v62, 16 }
 0x853   : >> { %v7473_v59 = vshrl.u32 %v16410_v62, 16  ;;  %v7479_v45 = vrot.slane %v7314_v37, 1 }
 0x854   : >> { %v7484_v24 = vrot.slane %v7482_v14, 1  ;;  %v7485_v57 = vrot.slane %v7321_v38, 2  ;;  %v7471_v49 = vrot.slane %v17842_v5, 2  ;;  %v7476_v46 = vrot.slane %v17841_v3, 2  ;;  %v16457_v3 = vld [vmem:[%s17817_s3 + $0x138] sm:$0xff]  }
 0x855   : >> { %6724 = vmatpush1.bf16.msra.mxu0 %v16189_v0  ;;  %6827 = vmatpush1.bf16.msra.mxu1 %v16196_v32  ;;  %v7475_v35 = vrot.slane %v7473_v59, 1  ;;  %v7018_v14 = vrot.slane %v6626_v25, 1  ;;  %v17857_v59 = vmov 0   ;;  %v7023_v5 = vrot.slane %v7021_v21, 1 }
 0x856   : >> { %6725 = vmatprep.subr.bf16.mxu0 %v17835_v27  ;;  %6828 = vmatprep.subr.bf16.mxu1 %v17835_v27  ;;  %v6883_v21 = vrot.slane %v16217_v48, 1 }
 0x857   : >> { %v7477_v25 = vor.u32 %v7476_v46, %v7475_v35  ;;  %v16481_v35 = vld [vmem:[%s17817_s3 + $0x130] sm:$0xff]  }
 0x859   : >> { %6726 = vmatpush1.bf16.msra.mxu0 %v16215_v43  ;;  %6829 = vmatpush1.bf16.msra.mxu1 %v16224_v44 }
 0x85a   : >> { %6727 = vmatprep.subr.bf16.mxu0 %v17835_v27  ;;  %6830 = vmatprep.subr.bf16.mxu1 %v17835_v27 }
 0x85d   : >> { %6728 = vmatpush1.bf16.msra.mxu0 %v16238_v36  ;;  %6831 = vmatpush1.bf16.msra.mxu1 %v16246_v40 }
 0x85e   : >> { %6741 = vmatprep.subr.bf16.mxu0 %v17835_v27  ;;  %6844 = vmatprep.subr.bf16.mxu1 %v17835_v27 }
 0x861   : >> { %6742 = vmatpush2.bf16.msra.mxu0 %v16253_v54  ;;  %6845 = vmatpush2.bf16.msra.mxu1 %v16266_v51 }
 0x862   : >> { %6743 = vmatprep.subr.bf16.mxu0 %v17835_v27  ;;  %6846 = vmatprep.subr.bf16.mxu1 %v17835_v27 }
 0x865   : >> { %6744 = vmatpush2.bf16.msra.mxu0 %v16273_v7  ;;  %6847 = vmatpush2.bf16.msra.mxu1 %v16285_v8 }
 0x866   : >> { %6953 = vmatprep.subr.bf16.mxu0 %v17835_v27  ;;  %7100 = vmatprep.subr.bf16.mxu1 %v17835_v27 }
 0x868   : >> { %6746 = vmatmul.mubr.bf16.vlgmr.msra.gmra.mxu0 %v6636_v9  ;;  %6849 = vmatmul.mubr.bf16.vlgmr.msra.gmra.mxu1 %v16217_v48  ;;  %v7316_v9 = vshll.u32 %v16397_v13, 16 }
 0x869   : >> { %6954 = vmatpush1.bf16.msra.mxu0 %v16295_v18  ;;  %7101 = vmatpush1.bf16.msra.mxu1 %v16302_v61 }
 0x86a   : >> { %6955 = vmatprep.subr.bf16.mxu0 %v17835_v27  ;;  %7102 = vmatprep.subr.bf16.mxu1 %v17835_v27  ;;  %v7480_v50 = vrot.slane %v7316_v9, 2  ;;  %v7318_v46 = vrot.slane %v7316_v9, 1 }
 0x86b   : >> { %11147 = vmatprep.mubr.msk.bf16.mxu0 %vm385_vm10, %v6888_v11  ;;  %11178 = vmatprep.mubr.msk.bf16.mxu1 %vm385_vm10, %v7035_v47  ;;  %v16429_v11 = vld [vmem:[%s17817_s3 + $0xf0] sm:$0xff]   ;;  %v17838_v47 = vshrl.u32 %v16408_v10, 16 }
 0x86c   : >> { %v7319_v9 = vor.u32 %v7318_v46, %v7314_v37 }
 0x86d   : >> { %6956 = vmatpush1.bf16.msra.mxu0 %v16311_v1  ;;  %7103 = vmatpush1.bf16.msra.mxu1 %v16319_v17  ;;  %v7470_v31 = vrot.slane %v17838_v47, 1 }
 0x86e   : >> { %6957 = vmatprep.subr.bf16.mxu0 %v17835_v27  ;;  %7104 = vmatprep.subr.bf16.mxu1 %v17835_v27 }
 0x86f   : >> { %v7472_v17 = vor.u32 %v7471_v49, %v7470_v31  ;;  %v6884_v49 = vrot.slane %v16232_v6, 1  ;;  %v17861_v31 = vshll.u32 %v16410_v62, 16 }
 0x871   : >> { %6958 = vmatpush1.bf16.msra.mxu0 %v16330_v26  ;;  %7105 = vmatpush1.bf16.msra.mxu1 %v16340_v12 }
 0x872   : >> { %6959 = vmatprep.subr.bf16.mxu0 %v17835_v27  ;;  %7106 = vmatprep.subr.bf16.mxu1 %v17835_v27 }
 0x875   : >> { %6960 = vmatpush1.bf16.msra.mxu0 %v16347_v52  ;;  %7107 = vmatpush1.bf16.msra.mxu1 %v16354_v53  ;;  %v17858_v53 = vshll.u32 %v16232_v6, 16  ;;  %v6885_v6 = vsel %vm4825_vm15, %v6883_v21, %v6884_v49  ;;  %v7421_v21 = vrot.slane %v16399_v19, 1 }
 0x876   : >> { %6961 = vmatprep.subr.bf16.mxu0 %v17835_v27  ;;  %7108 = vmatprep.subr.bf16.mxu1 %v17835_v27 }
 0x877   : >> { %v7024_v12 = vrot.slane %v17858_v53, 2 }
 0x879   : >> { %6962 = vmatpush1.bf16.msra.mxu0 %v16361_v39  ;;  %7109 = vmatpush1.bf16.msra.mxu1 %v16368_v56  ;;  %v7486_v56 = vor.u32 %v7485_v57, %v7484_v24  ;;  %v7025_v53 = vor.u32 %v7024_v12, %v7023_v5  ;;  %v7323_v24 = vrot.slane %v7321_v38, 1  ;;  %v16514_v38 = vld [vmem:[%s17817_s3 + $0x168] sm:$0xff]  }
 0x87a   : >> { %6963 = vmatprep.subr.bf16.mxu0 %v17835_v27  ;;  %7110 = vmatprep.subr.bf16.mxu1 %v17835_v27 }
 0x87b   : >> { %v7324_v37 = vsel %vm4649_vm14, %v7319_v9, %v7323_v24 }
 0x87d   : >> { %6964 = vmatpush1.bf16.msra.mxu0 %v16375_v42  ;;  %7111 = vmatpush1.bf16.msra.mxu1 %v16380_v22  ;;  %v7481_v22 = vor.u32 %v7480_v50, %v7479_v45  ;;  %v16466_v45 = vsel %vm4914_vm0, %v7472_v17, %v7477_v25  ;;  %v16472_v50 = vld [vmem:[%s17817_s3 + $0xe0] sm:$0xff]   ;;  %v7420_v25 = vrot.slane %v16397_v13, 1 }
 0x87e   : >> { %6965 = vmatprep.subr.bf16.mxu0 %v17835_v27  ;;  %7112 = vmatprep.subr.bf16.mxu1 %v17835_v27 }
 0x87f   : >> { %v7422_v49 = vsel %vm4825_vm15, %v7420_v25, %v7421_v21  ;;  %v11210_v21 = vld [vmem:[%s17818_s4] ss:$0 sm:$0xff] }
 0x881   : >> { %6966 = vmatpush1.bf16.msra.mxu0 %v16395_v29  ;;  %7113 = vmatpush1.bf16.msra.mxu1 %v16406_v16  ;;  %v17856_v16 = vshll.u32 %v16217_v48, 16  ;;  %v7169_v48 = vrot.slane %v16206_v60, 2  ;;  %v16502_v60 = vld [vmem:[%s17817_s3 + $0x170] sm:$0xff]  }
 0x882   : >> { %6967 = vmatprep.subr.bf16.mxu0 %v17835_v27  ;;  %7114 = vmatprep.subr.bf16.mxu1 %v17835_v27  ;;  %v16446_v27 = vld [vmem:[%s17817_s3 + $0xe8] sm:$0xff]  }
 0x883   : >> { %v7019_v47 = vrot.slane %v17856_v16, 2  ;;  %v16463_v16 = vsel %vm4914_vm0, %v7481_v22, %v7486_v56  ;;  %v7168_v56 = vrot.slane %v16204_v41, 2  ;;  %v16491_v22 = vld [vmem:[%s17817_s3 + $0x178] sm:$0xff]  }
 0x885   : >> { %6968 = vmatpush1.bf16.msra.mxu0 %v16418_v34  ;;  %7115 = vmatpush1.bf16.msra.mxu1 %v16429_v11  ;;  %v7020_v17 = vor.u32 %v7019_v47, %v7018_v14  ;;  %v7170_v41 = vsel %vm5011_vm1, %v7168_v56, %v7169_v48  ;;  %v17859_v47 = vshll.u32 %v16408_v10, 16  ;;  %v7311_v14 = vrot.slane %v17861_v31, 1 }
 0x886   : >> { %6981 = vmatprep.subr.bf16.mxu0 %v17857_v59  ;;  %7128 = vmatprep.subr.bf16.mxu1 %v17857_v59 }
 0x887   : >> { %v7026_v12 = vsel %vm4914_vm0, %v7020_v17, %v7025_v53  ;;  %v7306_v5 = vrot.slane %v17859_v47, 1 }
 0x889   : >> { %6982 = vmatpush2.bf16.msra.mxu0 %v16446_v27  ;;  %7129 = vmatpush2.bf16.msra.mxu1 %v16457_v3 }
 0x88a   : >> { %6983 = vmatprep.subr.bf16.mxu0 %v17857_v59  ;;  %7130 = vmatprep.subr.bf16.mxu1 %v17857_v59 }
 0x88d   : >> { %6984 = vmatpush2.bf16.msra.mxu0 %v16472_v50  ;;  %7131 = vmatpush2.bf16.msra.mxu1 %v16481_v35 }
 0x88e   : >> { %7235 = vmatprep.subr.bf16.mxu0 %v17857_v59  ;;  %7329 = vmatprep.subr.bf16.mxu1 %v17857_v59 }
 0x890   : >> { %6986 = vmatmul.mubr.bf16.vlgmr.msra.gmra.mxu0 %v6885_v6  ;;  %7133 = vmatmul.mubr.bf16.vlgmr.msra.gmra.mxu1 %v7026_v12 }
 0x891   : >> { %7236 = vmatpush1.bf16.msra.mxu0 %v16491_v22  ;;  %7330 = vmatpush1.bf16.msra.mxu1 %v16119_v63  ;;  %v16523_v63 = vld [vmem:[%s17817_s3 + $0x160] sm:$0xff]  }
 0x892   : >> { %7237 = vmatprep.subr.bf16.mxu0 %v17857_v59  ;;  %7331 = vmatprep.subr.bf16.mxu1 %v17857_v59 }
 0x893   : >> { %11209 = vmatprep.mubr.msk.bf16.mxu0 %vm385_vm10, %v7170_v41  ;;  %11219 = vmatprep.mubr.msk.bf16.mxu1 %vm385_vm10, %v7324_v37 }
 0x895   : >> { %7238 = vmatpush1.bf16.msra.mxu0 %v16502_v60  ;;  %7332 = vmatpush1.bf16.msra.mxu1 %v16132_v33  ;;  %v16532_v33 = vld [vmem:[%s17817_s3 + $0x158] sm:$0xff]  }
 0x896   : >> { %7239 = vmatprep.subr.bf16.mxu0 %v17857_v59  ;;  %7333 = vmatprep.subr.bf16.mxu1 %v17857_v59 }
 0x899   : >> { %7240 = vmatpush1.bf16.msra.mxu0 %v16514_v38  ;;  %7334 = vmatpush1.bf16.msra.mxu1 %v16146_v58  ;;  %v16541_v58 = vld [vmem:[%s17817_s3 + $0x150] sm:$0xff]  }
 0x89a   : >> { %7241 = vmatprep.subr.bf16.mxu0 %v17857_v59  ;;  %7335 = vmatprep.subr.bf16.mxu1 %v17857_v59 }
 0x89d   : >> { %7242 = vmatpush1.bf16.msra.mxu0 %v16523_v63  ;;  %7336 = vmatpush1.bf16.msra.mxu1 %v16160_v55  ;;  %v16550_v55 = vld [vmem:[%s17817_s3 + $0x148] sm:$0xff]  }
 0x89e   : >> { %7243 = vmatprep.subr.bf16.mxu0 %v17857_v59  ;;  %7337 = vmatprep.subr.bf16.mxu1 %v17857_v59 }
 0x8a1   : >> { %7244 = vmatpush1.bf16.msra.mxu0 %v16532_v33  ;;  %7338 = vmatpush1.bf16.msra.mxu1 %v16175_v23  ;;  %v16559_v23 = vld [vmem:[%s17817_s3 + $0x140] sm:$0xff]  }
 0x8a2   : >> { %7245 = vmatprep.subr.bf16.mxu0 %v17857_v59  ;;  %7339 = vmatprep.subr.bf16.mxu1 %v17857_v59 }
 0x8a5   : >> { %7246 = vmatpush1.bf16.msra.mxu0 %v16541_v58  ;;  %7340 = vmatpush1.bf16.msra.mxu1 %v16189_v0  ;;  %v16568_v0 = vld [vmem:[%s17817_s3 + $0x188] sm:$0xff]  }
 0x8a6   : >> { %7247 = vmatprep.subr.bf16.mxu0 %v17857_v59  ;;  %7341 = vmatprep.subr.bf16.mxu1 %v17857_v59 }
 0x8a9   : >> { %7248 = vmatpush1.bf16.msra.mxu0 %v16550_v55  ;;  %7342 = vmatpush1.bf16.msra.mxu1 %v16215_v43  ;;  %v16579_v43 = vld [vmem:[%s17817_s3 + $0x180] sm:$0xff]  }
 0x8aa   : >> { %7249 = vmatprep.subr.bf16.mxu0 %v17857_v59  ;;  %7343 = vmatprep.subr.bf16.mxu1 %v17857_v59 }
 0x8ad   : >> { %7250 = vmatpush1.bf16.msra.mxu0 %v16559_v23  ;;  %7344 = vmatpush1.bf16.msra.mxu1 %v16238_v36  ;;  %v17860_v36 = vshrl.u32 %v16408_v10, 16 }
 0x8ae   : >> { %7263 = vmatprep.subr.bf16.mxu0 %v17857_v59  ;;  %7357 = vmatprep.subr.bf16.mxu1 %v17857_v59 }
 0x8af   : >> { %v7307_v57 = vor.u32 %v7306_v5, %v17860_v36 }
 0x8b1   : >> { %7264 = vmatpush2.bf16.msra.mxu0 %v16568_v0  ;;  %7358 = vmatpush2.bf16.msra.mxu1 %v16253_v54  ;;  %v7312_v54 = vsel %vm4649_vm14, %v7307_v57, %v7311_v14 }
 0x8b2   : >> { %7265 = vmatprep.subr.bf16.mxu0 %v17857_v59  ;;  %7359 = vmatprep.subr.bf16.mxu1 %v17857_v59 }
 0x8b5   : >> { %7266 = vmatpush2.bf16.msra.mxu0 %v16579_v43  ;;  %7360 = vmatpush2.bf16.msra.mxu1 %v16273_v7  ;;  %v17866_v7 = vld [vmem:[#allocation16_spill] sm:$0xff] }
 0x8b6   : >> { %7372 = vmatprep.subr.bf16.mxu0 %v17857_v59  ;;  %7427 = vmatprep.subr.bf16.mxu1 %v17857_v59 }
 0x8b8   : >> { %7268 = vmatmul.mubr.bf16.vlgmr.msra.gmra.mxu0 %v16333_v2  ;;  %7362 = vmatmul.mubr.bf16.vlgmr.msra.gmra.mxu1 %v7312_v54 }
 0x8b9   : >> { %7373 = vmatpush1.bf16.msra.mxu0 %v16126_v30  ;;  %7428 = vmatpush1.bf16.msra.mxu1 %v16295_v18  ;;  %v7417_v30 = vrot.slane %v16408_v10, 1  ;;  %v7535_v18 = vrot.slane %v16408_v10, 2 }
 0x8ba   : >> { %7374 = vmatprep.subr.bf16.mxu0 %v17857_v59  ;;  %7429 = vmatprep.subr.bf16.mxu1 %v17857_v59 }
 0x8bb   : >> { %11220 = vmatprep.mubr.msk.bf16.mxu0 %vm385_vm10, %v16397_v13  ;;  %11221 = vmatprep.mubr.msk.bf16.mxu1 %vm385_vm10, %v7422_v49 }
 0x8bd   : >> { %7375 = vmatpush1.bf16.msra.mxu0 %v16139_v28  ;;  %7430 = vmatpush1.bf16.msra.mxu1 %v16311_v1  ;;  %v7418_v28 = vrot.slane %v16410_v62, 1 }
 0x8be   : >> { %7376 = vmatprep.subr.bf16.mxu0 %v17857_v59  ;;  %7431 = vmatprep.subr.bf16.mxu1 %v17857_v59 }
 0x8c1   : >> { %7377 = vmatpush1.bf16.msra.mxu0 %v16153_v15  ;;  %7432 = vmatpush1.bf16.msra.mxu1 %v16330_v26  ;;  %v7538_v15 = vrot.slane %v16397_v13, 2 }
 0x8c2   : >> { %7378 = vmatprep.subr.bf16.mxu0 %v17857_v59  ;;  %7433 = vmatprep.subr.bf16.mxu1 %v17857_v59 }
 0x8c5   : >> { %7379 = vmatpush1.bf16.msra.mxu0 %v16167_v4  ;;  %7434 = vmatpush1.bf16.msra.mxu1 %v16347_v52  ;;  %v7539_v4 = vrot.slane %v16399_v19, 2 }
 0x8c6   : >> { %7380 = vmatprep.subr.bf16.mxu0 %v17857_v59  ;;  %7435 = vmatprep.subr.bf16.mxu1 %v17857_v59 }
 0x8c9   : >> { %7381 = vmatpush1.bf16.msra.mxu0 %v16182_v20  ;;  %7436 = vmatpush1.bf16.msra.mxu1 %v16361_v39  ;;  %v7419_v20 = vsel %vm4825_vm15, %v7417_v30, %v7418_v28 }
 0x8ca   : >> { %7382 = vmatprep.subr.bf16.mxu0 %v17857_v59  ;;  %7437 = vmatprep.subr.bf16.mxu1 %v17857_v59 }
 0x8cd   : >> { %7383 = vmatpush1.bf16.msra.mxu0 %v16196_v32  ;;  %7438 = vmatpush1.bf16.msra.mxu1 %v16375_v42  ;;  %v17862_v32 = vld [vmem:[#allocation12_spill] sm:$0xff] }
 0x8ce   : >> { %7384 = vmatprep.subr.bf16.mxu0 %v17857_v59  ;;  %7439 = vmatprep.subr.bf16.mxu1 %v17857_v59 }
 0x8d1   : >> { %7385 = vmatpush1.bf16.msra.mxu0 %v16224_v44  ;;  %7440 = vmatpush1.bf16.msra.mxu1 %v16395_v29  ;;  %v17863_v44 = vld [vmem:[#allocation13_spill] sm:$0xff] }
 0x8d2   : >> { %7386 = vmatprep.subr.bf16.mxu0 %v17857_v59  ;;  %7441 = vmatprep.subr.bf16.mxu1 %v17857_v59 }
 0x8d5   : >> { %7387 = vmatpush1.bf16.msra.mxu0 %v16246_v40  ;;  %7442 = vmatpush1.bf16.msra.mxu1 %v16418_v34  ;;  %v17864_v40 = vld [vmem:[#allocation14_spill] sm:$0xff] }
 0x8d6   : >> { %7400 = vmatprep.subr.bf16.mxu0 %v17857_v59  ;;  %7455 = vmatprep.subr.bf16.mxu1 %v17857_v59 }
 0x8d9   : >> { %7401 = vmatpush2.bf16.msra.mxu0 %v16266_v51  ;;  %7456 = vmatpush2.bf16.msra.mxu1 %v16446_v27  ;;  %v7540_v27 = vsel %vm5011_vm1, %v7538_v15, %v7539_v4  ;;  %v17865_v51 = vld [vmem:[#allocation15_spill] sm:$0xff] }
 0x8da   : >> { %7402 = vmatprep.subr.bf16.mxu0 %v17857_v59  ;;  %7457 = vmatprep.subr.bf16.mxu1 %v17857_v59 }
 0x8dd   : >> { %7403 = vmatpush2.bf16.msra.mxu0 %v16285_v8  ;;  %7458 = vmatpush2.bf16.msra.mxu1 %v16472_v50  ;;  %v17867_v8 = vld [vmem:[#allocation17_spill] sm:$0xff] }
 0x8de   : >> { %7492 = vmatprep.subr.bf16.mxu0 %v17857_v59  ;;  %7545 = vmatprep.subr.bf16.mxu1 %v17857_v59 }
 0x8e0   : >> { %7405 = vmatmul.mubr.bf16.vlgmr.msra.gmra.mxu0 %v16408_v10  ;;  %7460 = vmatmul.mubr.bf16.vlgmr.msra.gmra.mxu1 %v7419_v20 }
 0x8e1   : >> { %7493 = vmatpush1.bf16.msra.mxu0 %v16302_v61  ;;  %7546 = vmatpush1.bf16.msra.mxu1 %v16491_v22  ;;  %v7536_v61 = vrot.slane %v16410_v62, 2 }
 0x8e2   : >> { %7494 = vmatprep.subr.bf16.mxu0 %v17857_v59  ;;  %7547 = vmatprep.subr.bf16.mxu1 %v17857_v59 }
 0x8e3   : >> { %11222 = vmatprep.mubr.msk.bf16.mxu0 %vm385_vm10, %v16463_v16  ;;  %11223 = vmatprep.mubr.msk.bf16.mxu1 %vm385_vm10, %v7540_v27  ;;  %v7537_v1 = vsel %vm5011_vm1, %v7535_v18, %v7536_v61 }
 0x8e5   : >> { %7495 = vmatpush1.bf16.msra.mxu0 %v17862_v32  ;;  %7548 = vmatpush1.bf16.msra.mxu1 %v16502_v60 }
 0x8e6   : >> { %7496 = vmatprep.subr.bf16.mxu0 %v17857_v59  ;;  %7549 = vmatprep.subr.bf16.mxu1 %v17857_v59 }
 0x8e9   : >> { %7497 = vmatpush1.bf16.msra.mxu0 %v17863_v44  ;;  %7550 = vmatpush1.bf16.msra.mxu1 %v16514_v38 }
 0x8ea   : >> { %7498 = vmatprep.subr.bf16.mxu0 %v17857_v59  ;;  %7551 = vmatprep.subr.bf16.mxu1 %v17857_v59 }
 0x8ed   : >> { %7499 = vmatpush1.bf16.msra.mxu0 %v17864_v40  ;;  %7552 = vmatpush1.bf16.msra.mxu1 %v16523_v63 }
 0x8ee   : >> { %7500 = vmatprep.subr.bf16.mxu0 %v17857_v59  ;;  %7553 = vmatprep.subr.bf16.mxu1 %v17857_v59 }
 0x8f1   : >> { %7501 = vmatpush1.bf16.msra.mxu0 %v17865_v51  ;;  %7554 = vmatpush1.bf16.msra.mxu1 %v16532_v33 }
 0x8f2   : >> { %7502 = vmatprep.subr.bf16.mxu0 %v17857_v59  ;;  %7555 = vmatprep.subr.bf16.mxu1 %v17857_v59 }
 0x8f5   : >> { %7503 = vmatpush1.bf16.msra.mxu0 %v17866_v7  ;;  %7556 = vmatpush1.bf16.msra.mxu1 %v16541_v58 }
 0x8f6   : >> { %7504 = vmatprep.subr.bf16.mxu0 %v17857_v59  ;;  %7557 = vmatprep.subr.bf16.mxu1 %v17857_v59 }
 0x8f9   : >> { %7505 = vmatpush1.bf16.msra.mxu0 %v17867_v8  ;;  %7558 = vmatpush1.bf16.msra.mxu1 %v16550_v55 }
 0x8fa   : >> { %7506 = vmatprep.subr.bf16.mxu0 %v17857_v59  ;;  %7559 = vmatprep.subr.bf16.mxu1 %v17857_v59 }
 0x8fd   : >> { %7507 = vmatpush1.bf16.msra.mxu0 %v16429_v11  ;;  %7560 = vmatpush1.bf16.msra.mxu1 %v16559_v23 }
 0x8fe   : >> { %7520 = vmatprep.subr.bf16.mxu0 %v17857_v59  ;;  %7573 = vmatprep.subr.bf16.mxu1 %v17857_v59 }
 0x901   : >> { %7521 = vmatpush2.bf16.msra.mxu0 %v16457_v3  ;;  %7574 = vmatpush2.bf16.msra.mxu1 %v16568_v0 }
 0x902   : >> { %7522 = vmatprep.subr.bf16.mxu0 %v17857_v59  ;;  %7575 = vmatprep.subr.bf16.mxu1 %v17857_v59 }
 0x905   : >> { %7523 = vmatpush2.bf16.msra.mxu0 %v16481_v35  ;;  %7576 = vmatpush2.bf16.msra.mxu1 %v16579_v43 }
 0x908   : >> { %7525 = vmatmul.mubr.bf16.vlgmr.msra.gmra.mxu0 %v16466_v45  ;;  %7578 = vmatmul.mubr.bf16.vlgmr.msra.gmra.mxu1 %v7537_v1 }
 0x928   : >> { %v6747_v26 = vpop.f32.mrf.mxu0  ;;  %v6850_v2 = vpop.f32.mrf.mxu1 }
 0x929   : >> { %v6851_v52 = vadd.f32 %v6850_v2, %v6747_v26 }
 0x92a   : >> { %v6749_v39 = vpop.f32.mrf.mxu0  ;;  %v6852_v42 = vpop.f32.mrf.mxu1 }
 0x92c   : >> { %v6750_v29 = vpop.f32.mrf.mxu0  ;;  %v6853_v13 = vpop.f32.mrf.mxu1 }
 0x92d   : >> { %v6854_v19 = vadd.f32 %v6853_v13, %v6750_v29 }
 0x92e   : >> { %v6752_v10 = vpop.f32.mrf.mxu0  ;;  %v6855_v62 = vpop.f32.mrf.mxu1 }
 0x950   : >> { %v6987_v34 = vpop.f32.mrf.mxu0  ;;  %v7134_v3 = vpop.f32.mrf.mxu1 }
 0x951   : >> { %v6994_v11 = vadd.f32 %v6987_v34, %v6851_v52 }
 0x952   : >> { %v6989_v59 = vpop.f32.mrf.mxu0  ;;  %v7136_v50 = vpop.f32.mrf.mxu1 }
 0x953   : >> { %v7141_v16 = vadd.f32 %v7134_v3, %v6994_v11 }
 0x954   : >> { %v6990_v46 = vpop.f32.mrf.mxu0  ;;  %v7137_v45 = vpop.f32.mrf.mxu1 }
 0x955   : >> { %v6995_v35 = vadd.f32 %v6990_v46, %v6854_v19 }
 0x956   : >> { %v6992_v17 = vpop.f32.mrf.mxu0  ;;  %v7139_v56 = vpop.f32.mrf.mxu1 }
 0x957   : >> { %v7142_v53 = vadd.f32 %v7137_v45, %v6995_v35 }
 0x978   : >> { %v7269_v48 = vpop.f32.mrf.mxu0  ;;  %v7363_v22 = vpop.f32.mrf.mxu1 }
 0x979   : >> { %v7276_v6 = vadd.f32 %v7269_v48, %v7141_v16 }
 0x97a   : >> { %v7271_v9 = vpop.f32.mrf.mxu0  ;;  %v7365_v24 = vpop.f32.mrf.mxu1 }
 0x97b   : >> { %v7285_v4 = vadd.f32 %v11210_v21, %v7276_v6 }
 0x97c   : >> { %v7272_v12 = vpop.f32.mrf.mxu0  ;;  %v7366_v60 = vpop.f32.mrf.mxu1 }
 0x97d   : >> { %v7277_v41 = vadd.f32 %v7272_v12, %v7142_v53 }
 0x97e   : >> { %v7274_v37 = vpop.f32.mrf.mxu0  ;;  %v7368_v38 = vpop.f32.mrf.mxu1 }
 0x97f   : >> { %v7286_v8 = vadd.f32 %v11210_v21, %v7277_v41 }
 0x9a0   : >> { %v7406_v63 = vpop.f32.mrf.mxu0  ;;  %v7461_v33 = vpop.f32.mrf.mxu1 }
 0x9a1   : >> { %v7407_v43 = vadd.f32 %v7406_v63, %v7363_v22 }
 0x9a2   : >> { %v7408_v58 = vpop.f32.mrf.mxu0  ;;  %v7463_v55 = vpop.f32.mrf.mxu1 }
 0x9a3   : >> { %v7468_v36 = vadd.f32 %v7461_v33, %v7407_v43 }
 0x9a4   : >> { %v7409_v23 = vpop.f32.mrf.mxu0  ;;  %v7464_v0 = vpop.f32.mrf.mxu1 }
 0x9a5   : >> { %v7410_v57 = vadd.f32 %v7409_v23, %v7366_v60 }
 0x9a6   : >> { %v7411_v47 = vpop.f32.mrf.mxu0  ;;  %v7466_v5 = vpop.f32.mrf.mxu1 }
 0x9a7   : >> { %v7469_v49 = vadd.f32 %v7464_v0, %v7410_v57 }
 0x9c8   : >> { %v7526_v31 = vpop.f32.mrf.mxu0  ;;  %v7579_v25 = vpop.f32.mrf.mxu1 }
 0x9c9   : >> { %v7533_v14 = vadd.f32 %v7526_v31, %v7468_v36 }
 0x9ca   : >> { %v7528_v54 = vpop.f32.mrf.mxu0  ;;  %v7581_v28 = vpop.f32.mrf.mxu1 }
 0x9cb   : >> { %v7586_v30 = vadd.f32 %v7579_v25, %v7533_v14 }
 0x9cc   : >> { %v7529_v15 = vpop.f32.mrf.mxu0  ;;  %v7582_v32 = vpop.f32.mrf.mxu1 }
 0x9cd   : >> { %v7588_v20 = vadd.f32 %v11210_v21, %v7586_v30  ;;  %v7534_v27 = vadd.f32 %v7529_v15, %v7469_v49 }
 0x9ce   : >> { %v7531_v44 = vpop.f32.mrf.mxu0  ;;  %v7584_v7 = vpop.f32.mrf.mxu1 }
 0x9cf   : >> { %v7590_v40 = vmax.f32 %v7285_v4, %v7588_v20  ;;  %v7587_v51 = vadd.f32 %v7582_v32, %v7534_v27 }
 0x9d1   : >> { %7592 = vst.msk [vmem:[#allocation8] sm:$0xff] %vm385_vm10, %v7590_v40  ;;  %v7589_v18 = vadd.f32 %v11210_v21, %v7587_v51 }
 0x9d3   : >> { %v7591_v61 = vmax.f32 %v7286_v8, %v7589_v18 }
 0x9d5   : >> { %7593 = vst.msk [vmem:[#allocation8 + $0x8] sm:$0xff] %vm385_vm10, %v7591_v61 }
 0x9db   : > { %6567 = sbr.rel (!%p6565_p12) target bundleno = 2111 (0x83f), region = 184 }
 0x9dc   : >> { %v7594_v1 = vld [vmem:[#allocation8] ss:$2 sm:$0xff]  ;;  %v7596_v26 = vld [vmem:[#allocation8 + $0x1] ss:$2 sm:$0xff] }
 0x9dd   : >> { %v7597_v2 = vmax.f32 %v7594_v1, %v7596_v26 }
 0x9df   : >> { %11225 = vst.msk [vmem:[%s10308_s25 + $0x22] sm:$0xff] %vm385_vm10, %v7597_v2 }
 0x9e6   : > { %v16702_v52 = vld [vmem:[#allocation6 + $0x20] sm:$0xff]  ;;  %v7635_v39 = vld [vmem:[#allocation6 + $0x10] sm:$0xff]  ;;  %v7638_v29 = vld [vmem:[#allocation6 + $0x28] sm:$0xf] }
 0x9e7   : > { %7671 = vrot.lane.b32.xlu1 %v16702_v52, %s12384_s24  ;;  %7667 = vrot.lane.b32.xlu0 %v7635_v39, %s12384_s24  ;;  %v16707_v42 = vld [vmem:[#allocation6 + $0x30] sm:$0xff]  ;;  %7620 = vst.msk [vmem:[#allocation4 + $0x20] sm:$0xff] %vm385_vm10, %v7635_v39  ;;  %7622 = vst.msk [vmem:[#allocation4 + $0x40] sm:$0xff] %vm385_vm10, %v16702_v52  ;;  %v7636_v13 = vld [vmem:[#allocation6 + $0x18] sm:$0xf] }
 0x9e8   : > { %v16712_v19 = vld [vmem:[#allocation6 + $0x40] sm:$0xff]  ;;  %7624 = vst.msk [vmem:[#allocation4 + $0x60] sm:$0xff] %vm385_vm10, %v16707_v42  ;;  %v16716_v10 = vld [vmem:[#allocation6 + $0x50] sm:$0xff]  ;;  %v7640_v3 = vld [vmem:[#allocation6 + $0x38] sm:$0xf] }
 0x9e9   : > { %v16718_v62 = vld [vmem:[#allocation6 + $0x60] sm:$0xff]  ;;  %7626 = vst.msk [vmem:[#allocation4 + $0x80] sm:$0xff] %vm385_vm10, %v16712_v19  ;;  %7942 = vst.msk [vmem:[#allocation4 + $0x8] sm:$0xff] %vm385_vm10, %v16712_v19  ;;  %v16724_v34 = vld [vmem:[#allocation6 + $0x70] sm:$0xff] }
 0x9ea   : > { %7628 = vst.msk [vmem:[#allocation4 + $0xa0] sm:$0xff] %vm385_vm10, %v16716_v10  ;;  %7630 = vst.msk [vmem:[#allocation4 + $0xc0] sm:$0xff] %vm385_vm10, %v16718_v62  ;;  %v16736_v11 = vld [vmem:[#allocation6 + $0x80] sm:$0xff]  ;;  %v16744_v59 = vld [vmem:[#allocation6 + $0x90] sm:$0xff] }
 0x9eb   : > { %7944 = vst.msk [vmem:[#allocation4 + $0x28] sm:$0xff] %vm385_vm10, %v16716_v10  ;;  %7946 = vst.msk [vmem:[#allocation4 + $0x48] sm:$0xff] %vm385_vm10, %v16718_v62  ;;  %7673 = vrot.lane.b32.xlu1 %v7638_v29, %s12384_s24  ;;  %7669 = vrot.lane.b32.xlu0 %v7636_v13, %s12384_s24  ;;  %v7642_v16 = vld [vmem:[#allocation6 + $0x48] sm:$0xf]  ;;  %v16751_v50 = vld [vmem:[#allocation6 + $0xa0] sm:$0xff] }
 0x9ec   : > { %7632 = vst.msk [vmem:[#allocation4 + $0xe0] sm:$0xff] %vm385_vm10, %v16724_v34  ;;  %7948 = vst.msk [vmem:[#allocation4 + $0x68] sm:$0xff] %vm385_vm10, %v16724_v34  ;;  %v7602_v46 = vld [vmem:[#allocation6] sm:$0xff]  ;;  %v7605_v35 = vld [vmem:[#allocation6 + $0x18] sm:$0xf] }
 0x9ed   : > { %7950 = vst.msk [vmem:[#allocation4 + $0x88] sm:$0xff] %vm385_vm10, %v16736_v11  ;;  %7952 = vst.msk [vmem:[#allocation4 + $0xa8] sm:$0xff] %vm385_vm10, %v16744_v59  ;;  %v7603_v45 = vld [vmem:[#allocation6 + $0x8] sm:$0xf]  ;;  %v7609_v53 = vld [vmem:[#allocation6 + $0x38] sm:$0xf] }
 0x9ee   : > { %7618 = vst.msk [vmem:[#allocation4] sm:$0xff] %vm385_vm10, %v7602_v46  ;;  %v7607_v17 = vld [vmem:[#allocation6 + $0x28] sm:$0xf]  ;;  %7954 = vst.msk [vmem:[#allocation4 + $0xc8] sm:$0xff] %vm385_vm10, %v16751_v50  ;;  %v7613_v48 = vld [vmem:[#allocation6 + $0x58] sm:$0xf] }
 0x9ef   : > { %7677 = vrot.lane.b32.xlu1 %v7640_v3, %s12384_s24  ;;  %7675 = vrot.lane.b32.xlu0 %v16707_v42, %s12384_s24  ;;  %7621 = vst.msk [vmem:[#allocation4 + $0x30] sm:$0xf] %vm388_vm11, %v7605_v35  ;;  %7619 = vst.msk [vmem:[#allocation4 + $0x10] sm:$0xf] %vm388_vm11, %v7603_v45  ;;  %v7611_v56 = vld [vmem:[#allocation6 + $0x48] sm:$0xf] }
 0x9f0   : > { %7623 = vst.msk [vmem:[#allocation4 + $0x50] sm:$0xf] %vm388_vm11, %v7607_v17  ;;  %7625 = vst.msk [vmem:[#allocation4 + $0x70] sm:$0xf] %vm388_vm11, %v7609_v53  ;;  %v7615_v6 = vld [vmem:[#allocation6 + $0x68] sm:$0xf] }
 0x9f1   : > { %v7644_v22 = vld [vmem:[#allocation6 + $0x58] sm:$0xf]  ;;  %7627 = vst.msk [vmem:[#allocation4 + $0x90] sm:$0xf] %vm388_vm11, %v7611_v56  ;;  %7629 = vst.msk [vmem:[#allocation4 + $0xb0] sm:$0xf] %vm388_vm11, %v7613_v48 }
 0x9f2   : > { %7631 = vst.msk [vmem:[#allocation4 + $0xd0] sm:$0xf] %vm388_vm11, %v7615_v6  ;;  %v7617_v9 = vld [vmem:[#allocation6 + $0x78] sm:$0xf]  ;;  %v7646_v24 = vld [vmem:[#allocation6 + $0x68] sm:$0xf] }
 0x9f3   : > { %7681 = vrot.lane.b32.xlu1 %v7642_v16, %s12384_s24  ;;  %7679 = vrot.lane.b32.xlu0 %v16712_v19, %s12384_s24  ;;  %7633 = vst.msk [vmem:[#allocation4 + $0xf0] sm:$0xf] %vm388_vm11, %v7617_v9  ;;  %v7648_v12 = vld [vmem:[#allocation6 + $0x78] sm:$0xf]  ;;  %v7650_v41 = vld [vmem:[#allocation6 + $0x88] sm:$0xf] }
 0x9f4   : > { %v7733_v60 = vld [vmem:[#allocation6 + $0x28] sm:$0xf]  ;;  %v7735_v37 = vld [vmem:[#allocation6 + $0x38] sm:$0xf]  ;;  %v7940_v30 = vld [vmem:[#allocation6 + $0xb0] sm:$0xff] }
 0x9f5   : > { %v7737_v38 = vld [vmem:[#allocation6 + $0x48] sm:$0xf]  ;;  %v7739_v63 = vld [vmem:[#allocation6 + $0x58] sm:$0xf]  ;;  %7956 = vst.msk [vmem:[#allocation4 + $0xe8] sm:$0xff] %vm385_vm10, %v7940_v30 }
 0x9f6   : > { %v7741_v33 = vld [vmem:[#allocation6 + $0x68] sm:$0xf]  ;;  %v7743_v58 = vld [vmem:[#allocation6 + $0x78] sm:$0xf] }
 0x9f7   : > { %7685 = vrot.lane.b32.xlu1 %v7644_v22, %s12384_s24  ;;  %7683 = vrot.lane.b32.xlu0 %v16716_v10, %s12384_s24  ;;  %v7745_v55 = vld [vmem:[#allocation6 + $0x88] sm:$0xf]  ;;  %v7747_v23 = vld [vmem:[#allocation6 + $0x98] sm:$0xf] }
 0x9f8   : > { %v7830_v0 = vld [vmem:[#allocation6 + $0x38] sm:$0xf]  ;;  %v7832_v47 = vld [vmem:[#allocation6 + $0x48] sm:$0xf] }
 0x9f9   : > { %v7834_v5 = vld [vmem:[#allocation6 + $0x58] sm:$0xf]  ;;  %v7836_v43 = vld [vmem:[#allocation6 + $0x68] sm:$0xf] }
 0x9fa   : > { %v7838_v36 = vld [vmem:[#allocation6 + $0x78] sm:$0xf]  ;;  %v7927_v57 = vld [vmem:[#allocation6 + $0x48] sm:$0xf] }
 0x9fb   : > { %7689 = vrot.lane.b32.xlu1 %v7646_v24, %s12384_s24  ;;  %7687 = vrot.lane.b32.xlu0 %v16718_v62, %s12384_s24  ;;  %v7929_v31 = vld [vmem:[#allocation6 + $0x58] sm:$0xf]  ;;  %v7931_v14 = vld [vmem:[#allocation6 + $0x68] sm:$0xf]  ;;  %7943 = vst.msk [vmem:[#allocation4 + $0x18] sm:$0xf] %vm388_vm11, %v7927_v57 }
 0x9fc   : > { %v7933_v25 = vld [vmem:[#allocation6 + $0x78] sm:$0xf]  ;;  %v7935_v21 = vld [vmem:[#allocation6 + $0x88] sm:$0xf]  ;;  %7945 = vst.msk [vmem:[#allocation4 + $0x38] sm:$0xf] %vm388_vm11, %v7929_v31 }
 0x9fd   : > { %v7937_v54 = vld [vmem:[#allocation6 + $0x98] sm:$0xf]  ;;  %7947 = vst.msk [vmem:[#allocation4 + $0x58] sm:$0xf] %vm388_vm11, %v7931_v14  ;;  %v7939_v49 = vld [vmem:[#allocation6 + $0xa8] sm:$0xf] }
 0x9fe   : > { %v7941_v28 = vld [vmem:[#allocation6 + $0xb8] sm:$0xf]  ;;  %7949 = vst.msk [vmem:[#allocation4 + $0x78] sm:$0xf] %vm388_vm11, %v7933_v25  ;;  %7951 = vst.msk [vmem:[#allocation4 + $0x98] sm:$0xf] %vm388_vm11, %v7935_v21 }
 0x9ff   : > { %7693 = vrot.lane.b32.xlu1 %v7648_v12, %s12384_s24  ;;  %7691 = vrot.lane.b32.xlu0 %v16724_v34, %s12384_s24  ;;  %7953 = vst.msk [vmem:[#allocation4 + $0xb8] sm:$0xf] %vm388_vm11, %v7937_v54  ;;  %v7840_v15 = vld [vmem:[#allocation6 + $0x88] sm:$0xf]  ;;  %7955 = vst.msk [vmem:[#allocation4 + $0xd8] sm:$0xf] %vm388_vm11, %v7939_v49 }
 0xa00   : > { %7957 = vst.msk [vmem:[#allocation4 + $0xf8] sm:$0xf] %vm388_vm11, %v7941_v28  ;;  %v7842_v4 = vld [vmem:[#allocation6 + $0x98] sm:$0xf]  ;;  %v7844_v20 = vld [vmem:[#allocation6 + $0xa8] sm:$0xf] }
 0xa03   : > { %7697 = vrot.lane.b32.xlu1 %v7650_v41, %s12384_s24  ;;  %7695 = vrot.lane.b32.xlu0 %v16736_v11, %s12384_s24  ;;  %s17869_s24 = smov 96  }
 0xa07   : > { %7766 = vrot.lane.b32.xlu1 %v7733_v60, %s17868_s15  ;;  %7764 = vrot.lane.b32.xlu0 %v16702_v52, %s17868_s15 }
 0xa0b   : > { %7770 = vrot.lane.b32.xlu1 %v7735_v37, %s17868_s15  ;;  %7768 = vrot.lane.b32.xlu0 %v16707_v42, %s17868_s15 }
 0xa0f   : > { %7774 = vrot.lane.b32.xlu1 %v7737_v38, %s17868_s15  ;;  %7772 = vrot.lane.b32.xlu0 %v16712_v19, %s17868_s15 }
 0xa13   : > { %7778 = vrot.lane.b32.xlu1 %v7739_v63, %s17868_s15  ;;  %7776 = vrot.lane.b32.xlu0 %v16716_v10, %s17868_s15 }
 0xa17   : > { %7782 = vrot.lane.b32.xlu1 %v7741_v33, %s17868_s15  ;;  %7780 = vrot.lane.b32.xlu0 %v16718_v62, %s17868_s15 }
 0xa1b   : > { %7786 = vrot.lane.b32.xlu1 %v7743_v58, %s17868_s15  ;;  %7784 = vrot.lane.b32.xlu0 %v16724_v34, %s17868_s15 }
 0xa1f   : > { %7790 = vrot.lane.b32.xlu1 %v7745_v55, %s17868_s15  ;;  %7788 = vrot.lane.b32.xlu0 %v16736_v11, %s17868_s15 }
 0xa23   : > { %7794 = vrot.lane.b32.xlu1 %v7747_v23, %s17868_s15  ;;  %7792 = vrot.lane.b32.xlu0 %v16744_v59, %s17868_s15 }
 0xa27   : > { %7863 = vrot.lane.b32.xlu1 %v7830_v0, %s17869_s24  ;;  %7861 = vrot.lane.b32.xlu0 %v16707_v42, %s17869_s24 }
 0xa2b   : > { %7867 = vrot.lane.b32.xlu1 %v7832_v47, %s17869_s24  ;;  %7865 = vrot.lane.b32.xlu0 %v16712_v19, %s17869_s24 }
 0xa2f   : > { %7871 = vrot.lane.b32.xlu1 %v7834_v5, %s17869_s24  ;;  %7869 = vrot.lane.b32.xlu0 %v16716_v10, %s17869_s24 }
 0xa33   : > { %7875 = vrot.lane.b32.xlu1 %v7836_v43, %s17869_s24  ;;  %7873 = vrot.lane.b32.xlu0 %v16718_v62, %s17869_s24 }
 0xa37   : > { %7879 = vrot.lane.b32.xlu1 %v7838_v36, %s17869_s24  ;;  %7877 = vrot.lane.b32.xlu0 %v16724_v34, %s17869_s24 }
 0xa3b   : > { %7883 = vrot.lane.b32.xlu1 %v7840_v15, %s17869_s24  ;;  %7881 = vrot.lane.b32.xlu0 %v16736_v11, %s17869_s24 }
 0xa3f   : > { %7887 = vrot.lane.b32.xlu1 %v7842_v4, %s17869_s24  ;;  %7885 = vrot.lane.b32.xlu0 %v16744_v59, %s17869_s24 }
 0xa43   : > { %7891 = vrot.lane.b32.xlu1 %v7844_v20, %s17869_s24  ;;  %7889 = vrot.lane.b32.xlu0 %v16751_v50, %s17869_s24 }
 0xa59   : > { %v7672_v27 = vpop.permute.xlu1 %7671  ;;  %v7668_v32 = vpop.permute.xlu0 %7667 }
 0xa5a   : > { %7717 = vst.msk [vmem:[#allocation4 + $0x20] sm:$0xff] %vm5834_vm3, %v7672_v27  ;;  %7715 = vst.msk [vmem:[#allocation4] sm:$0xff] %vm5834_vm3, %v7668_v32 }
 0xa5d   : > { %v7674_v44 = vpop.permute.xlu1 %7673  ;;  %v7670_v40 = vpop.permute.xlu0 %7669 }
 0xa5e   : > { %7718 = vst.msk [vmem:[#allocation4 + $0x30] sm:$0xf] %vm5837_vm2, %v7674_v44  ;;  %7716 = vst.msk [vmem:[#allocation4 + $0x10] sm:$0xf] %vm5837_vm2, %v7670_v40 }
 0xa61   : > { %v7678_v51 = vpop.permute.xlu1 %7677  ;;  %v7676_v7 = vpop.permute.xlu0 %7675 }
 0xa62   : > { %7720 = vst.msk [vmem:[#allocation4 + $0x50] sm:$0xf] %vm5837_vm2, %v7678_v51 }
 0xa63   : > { %7719 = vst.msk [vmem:[#allocation4 + $0x40] sm:$0xff] %vm5834_vm3, %v7676_v7 }
 0xa65   : > { %v7682_v8 = vpop.permute.xlu1 %7681  ;;  %v7680_v18 = vpop.permute.xlu0 %7679 }
 0xa66   : > { %7722 = vst.msk [vmem:[#allocation4 + $0x70] sm:$0xf] %vm5837_vm2, %v7682_v8 }
 0xa67   : > { %7721 = vst.msk [vmem:[#allocation4 + $0x60] sm:$0xff] %vm5834_vm3, %v7680_v18 }
 0xa69   : > { %v7686_v61 = vpop.permute.xlu1 %7685  ;;  %v7684_v1 = vpop.permute.xlu0 %7683 }
 0xa6a   : > { %7724 = vst.msk [vmem:[#allocation4 + $0x90] sm:$0xf] %vm5837_vm2, %v7686_v61 }
 0xa6b   : > { %7723 = vst.msk [vmem:[#allocation4 + $0x80] sm:$0xff] %vm5834_vm3, %v7684_v1 }
 0xa6d   : > { %v7690_v26 = vpop.permute.xlu1 %7689  ;;  %v7688_v2 = vpop.permute.xlu0 %7687 }
 0xa6e   : > { %7726 = vst.msk [vmem:[#allocation4 + $0xb0] sm:$0xf] %vm5837_vm2, %v7690_v26 }
 0xa6f   : > { %7725 = vst.msk [vmem:[#allocation4 + $0xa0] sm:$0xff] %vm5834_vm3, %v7688_v2 }
 0xa71   : > { %v7694_v52 = vpop.permute.xlu1 %7693  ;;  %v7692_v39 = vpop.permute.xlu0 %7691 }
 0xa72   : > { %7728 = vst.msk [vmem:[#allocation4 + $0xd0] sm:$0xf] %vm5837_vm2, %v7694_v52 }
 0xa73   : > { %7727 = vst.msk [vmem:[#allocation4 + $0xc0] sm:$0xff] %vm5834_vm3, %v7692_v39 }
 0xa75   : > { %v7698_v42 = vpop.permute.xlu1 %7697  ;;  %v7696_v29 = vpop.permute.xlu0 %7695 }
 0xa76   : > { %7730 = vst.msk [vmem:[#allocation4 + $0xf0] sm:$0xf] %vm5837_vm2, %v7698_v42 }
 0xa77   : > { %7729 = vst.msk [vmem:[#allocation4 + $0xe0] sm:$0xff] %vm5834_vm3, %v7696_v29 }
 0xa79   : > { %v7767_v13 = vpop.permute.xlu1 %7766  ;;  %v7765_v19 = vpop.permute.xlu0 %7764 }
 0xa7a   : > { %7813 = vst.msk [vmem:[#allocation4 + $0x10] sm:$0xf] %vm6128_vm5, %v7767_v13 }
 0xa7b   : > { %7812 = vst.msk [vmem:[#allocation4] sm:$0xff] %vm6125_vm4, %v7765_v19 }
 0xa7d   : > { %v7771_v10 = vpop.permute.xlu1 %7770  ;;  %v7769_v62 = vpop.permute.xlu0 %7768 }
 0xa7e   : > { %7815 = vst.msk [vmem:[#allocation4 + $0x30] sm:$0xf] %vm6128_vm5, %v7771_v10 }
 0xa7f   : > { %7814 = vst.msk [vmem:[#allocation4 + $0x20] sm:$0xff] %vm6125_vm4, %v7769_v62 }
 0xa81   : > { %v7775_v34 = vpop.permute.xlu1 %7774  ;;  %v7773_v11 = vpop.permute.xlu0 %7772 }
 0xa82   : > { %7817 = vst.msk [vmem:[#allocation4 + $0x50] sm:$0xf] %vm6128_vm5, %v7775_v34 }
 0xa83   : > { %7816 = vst.msk [vmem:[#allocation4 + $0x40] sm:$0xff] %vm6125_vm4, %v7773_v11 }
 0xa85   : > { %v7779_v3 = vpop.permute.xlu1 %7778  ;;  %v7777_v59 = vpop.permute.xlu0 %7776 }
 0xa86   : > { %7819 = vst.msk [vmem:[#allocation4 + $0x70] sm:$0xf] %vm6128_vm5, %v7779_v3 }
 0xa87   : > { %7818 = vst.msk [vmem:[#allocation4 + $0x60] sm:$0xff] %vm6125_vm4, %v7777_v59 }
 0xa89   : > { %v7783_v16 = vpop.permute.xlu1 %7782  ;;  %v7781_v50 = vpop.permute.xlu0 %7780 }
 0xa8a   : > { %7821 = vst.msk [vmem:[#allocation4 + $0x90] sm:$0xf] %vm6128_vm5, %v7783_v16 }
 0xa8b   : > { %7820 = vst.msk [vmem:[#allocation4 + $0x80] sm:$0xff] %vm6125_vm4, %v7781_v50 }
 0xa8d   : > { %v7787_v46 = vpop.permute.xlu1 %7786  ;;  %v7785_v35 = vpop.permute.xlu0 %7784 }
 0xa8e   : > { %7823 = vst.msk [vmem:[#allocation4 + $0xb0] sm:$0xf] %vm6128_vm5, %v7787_v46 }
 0xa8f   : > { %7822 = vst.msk [vmem:[#allocation4 + $0xa0] sm:$0xff] %vm6125_vm4, %v7785_v35 }
 0xa91   : > { %v7791_v45 = vpop.permute.xlu1 %7790  ;;  %v7789_v17 = vpop.permute.xlu0 %7788 }
 0xa92   : > { %7825 = vst.msk [vmem:[#allocation4 + $0xd0] sm:$0xf] %vm6128_vm5, %v7791_v45 }
 0xa93   : > { %7824 = vst.msk [vmem:[#allocation4 + $0xc0] sm:$0xff] %vm6125_vm4, %v7789_v17 }
 0xa95   : > { %v7795_v53 = vpop.permute.xlu1 %7794  ;;  %v7793_v56 = vpop.permute.xlu0 %7792 }
 0xa96   : > { %7827 = vst.msk [vmem:[#allocation4 + $0xf0] sm:$0xf] %vm6128_vm5, %v7795_v53 }
 0xa97   : > { %7826 = vst.msk [vmem:[#allocation4 + $0xe0] sm:$0xff] %vm6125_vm4, %v7793_v56 }
 0xa99   : > { %v7864_v48 = vpop.permute.xlu1 %7863  ;;  %v7862_v6 = vpop.permute.xlu0 %7861 }
 0xa9a   : > { %7910 = vst.msk [vmem:[#allocation4 + $0x10] sm:$0xf] %vm6419_vm7, %v7864_v48 }
 0xa9b   : > { %7909 = vst.msk [vmem:[#allocation4] sm:$0xff] %vm6416_vm6, %v7862_v6 }
 0xa9d   : > { %v7868_v22 = vpop.permute.xlu1 %7867  ;;  %v7866_v9 = vpop.permute.xlu0 %7865 }
 0xa9e   : > { %7912 = vst.msk [vmem:[#allocation4 + $0x30] sm:$0xf] %vm6419_vm7, %v7868_v22 }
 0xa9f   : > { %7911 = vst.msk [vmem:[#allocation4 + $0x20] sm:$0xff] %vm6416_vm6, %v7866_v9 }
 0xaa1   : > { %v7872_v24 = vpop.permute.xlu1 %7871  ;;  %v7870_v12 = vpop.permute.xlu0 %7869 }
 0xaa2   : > { %7914 = vst.msk [vmem:[#allocation4 + $0x50] sm:$0xf] %vm6419_vm7, %v7872_v24 }
 0xaa3   : > { %7913 = vst.msk [vmem:[#allocation4 + $0x40] sm:$0xff] %vm6416_vm6, %v7870_v12 }
 0xaa5   : > { %v7876_v41 = vpop.permute.xlu1 %7875  ;;  %v7874_v60 = vpop.permute.xlu0 %7873 }
 0xaa6   : > { %7916 = vst.msk [vmem:[#allocation4 + $0x70] sm:$0xf] %vm6419_vm7, %v7876_v41 }
 0xaa7   : > { %7915 = vst.msk [vmem:[#allocation4 + $0x60] sm:$0xff] %vm6416_vm6, %v7874_v60 }
 0xaa9   : > { %v7880_v37 = vpop.permute.xlu1 %7879  ;;  %v7878_v38 = vpop.permute.xlu0 %7877 }
 0xaaa   : > { %7918 = vst.msk [vmem:[#allocation4 + $0x90] sm:$0xf] %vm6419_vm7, %v7880_v37 }
 0xaab   : > { %7917 = vst.msk [vmem:[#allocation4 + $0x80] sm:$0xff] %vm6416_vm6, %v7878_v38 }
 0xaad   : > { %v7884_v63 = vpop.permute.xlu1 %7883  ;;  %v7882_v33 = vpop.permute.xlu0 %7881 }
 0xaae   : > { %7920 = vst.msk [vmem:[#allocation4 + $0xb0] sm:$0xf] %vm6419_vm7, %v7884_v63 }
 0xaaf   : > { %7919 = vst.msk [vmem:[#allocation4 + $0xa0] sm:$0xff] %vm6416_vm6, %v7882_v33 }
 0xab1   : > { %v7888_v58 = vpop.permute.xlu1 %7887  ;;  %v7886_v55 = vpop.permute.xlu0 %7885 }
 0xab2   : > { %7922 = vst.msk [vmem:[#allocation4 + $0xd0] sm:$0xf] %vm6419_vm7, %v7888_v58 }
 0xab3   : > { %7921 = vst.msk [vmem:[#allocation4 + $0xc0] sm:$0xff] %vm6416_vm6, %v7886_v55 }
 0xab5   : > { %v7892_v23 = vpop.permute.xlu1 %7891  ;;  %v7890_v0 = vpop.permute.xlu0 %7889 }
 0xab6   : > { %7924 = vst.msk [vmem:[#allocation4 + $0xf0] sm:$0xf] %vm6419_vm7, %v7892_v23 }
 0xab7   : > { %7923 = vst.msk [vmem:[#allocation4 + $0xe0] sm:$0xff] %vm6416_vm6, %v7890_v0 }
 0xab8 LB: >> { %v16892_v47 = vld [vmem:[%s17819_s5 + $0x88] sm:$0xff]   ;;  %v12389_v5 = vmov 0   ;;  %v16899_v43 = vld [vmem:[%s17819_s5 + $0x38] sm:$0xff]   ;;  %v16905_v36 = vld [vmem:[%s17819_s5 + $0x80] sm:$0xff]   ;;  %s11587_s13 = sshll.u32 %s12379_s16, 6  ;;  %vm8898_vm8 = vcmask 523264   ;;  %s12379_s16 = sphi %s16884_s16, %s7963_s16  }
 0xab9   : >> { %8095 = vmatprep.subr.bf16.mxu0 %v12389_v5  ;;  %8198 = vmatprep.subr.bf16.mxu1 %v12389_v5  ;;  %v16912_v57 = vld [vmem:[%s17819_s5 + $0x30] sm:$0xff]   ;;  %v16919_v31 = vld [vmem:[%s17819_s5 + $0x78] sm:$0xff]   ;;  %v16926_v14 = vld [vmem:[%s17819_s5 + $0x28] sm:$0xff]   ;;  %s16977_s22 = scalar_lea.vmem [#allocation4], %s11587_s13  ;;  %s11376_s13 = sshll.u32 %s12379_s16, 2  ;;  %vm8906_vm9 = vcmask 519168  }
 0xaba   : >> { %8096 = vmatpush1.bf16.msra.mxu0 %v16892_v47  ;;  %8199 = vmatpush1.bf16.msra.mxu1 %v16899_v43  ;;  %v16933_v25 = vld [vmem:[%s17819_s5 + $0x70] sm:$0xff]   ;;  %v16940_v21 = vld [vmem:[%s17819_s5 + $0x20] sm:$0xff]   ;;  %v16947_v54 = vld [vmem:[%s17819_s5 + $0x68] sm:$0xff]   ;;  %s8905_s15 = scalar_lea.vmem [#allocation7], %s11376_s13  ;;  %s7963_s16 = sadd.s32 1, %s12379_s16  }
 0xabb   : >> { %8097 = vmatprep.subr.bf16.mxu0 %v12389_v5  ;;  %8200 = vmatprep.subr.bf16.mxu1 %v12389_v5  ;;  %v16955_v49 = vld [vmem:[%s17819_s5 + $0x18] sm:$0xff]   ;;  %v16962_v30 = vld [vmem:[%s17819_s5 + $0x60] sm:$0xff]   ;;  %v16969_v28 = vld [vmem:[%s17819_s5 + $0x10] sm:$0xff]   ;;  %p7960_p13 = scmp.ge.s32.totalorder %s7963_s16, 4  }
 0xabc   : >> { %v16975_v15 = vld [vmem:[%s17819_s5 + $0x58] sm:$0xff]   ;;  %v16991_v51 = vld [vmem:[%s17819_s5 + $0x8] sm:$0xff]   ;;  %v17003_v1 = vld [vmem:[%s17819_s5 + $0x50] sm:$0xff]   ;;  %vm12390_vm11 = vmmov (%p7960_p13), 0   ;;  %s10264_s25 = sshll.u32 (%p7960_p13), %s15220_s29, 4  ;;  %s17872_s12 = sand.u32 (%p7960_p13), 1, %s12359_s18   ;;  %s17772_s25 = int_to_ptr.vmem [resolvable:$true] %s10264_s25 }
 0xabd   : >> { %v17010_v26 = vld [vmem:[%s17819_s5] sm:$0xff]   ;;  %v17019_v39 = vld [vmem:[%s17819_s5 + $0x98] sm:$0xff]   ;;  %v17026_v42 = vld [vmem:[%s17819_s5 + $0x48] sm:$0xff]   ;;  %s10252_s30 = scalar_lea.sflag (%p7960_p13), [#allocation10], %s17872_s12  ;;  %s12295_s14 = scalar_lea.vmem (%p7960_p13), %s17772_s25, 16 }
 0xabe   : >> { %8098 = vmatpush1.bf16.msra.mxu0 %v16905_v36  ;;  %8201 = vmatpush1.bf16.msra.mxu1 %v16912_v57  ;;  %v7969_v4 = vld [vmem:[%s16977_s22 + $0x8] sm:$0xff]  ;;  %v7971_v20 = vld [vmem:[%s16977_s22 + $0x18] sm:$0xf]  ;;  %v7968_v44 = vld [vmem:[%s16977_s22] sm:$0xff]  ;;  %p12296_p0 = scmp.ne.s32.totalorder (%p7960_p13), %s17772_s25, %s12295_s14 }
 0xabf   : >> { %8099 = vmatprep.subr.bf16.mxu0 %v12389_v5  ;;  %8202 = vmatprep.subr.bf16.mxu1 %v12389_v5  ;;  %v16981_v27 = vpack.c.bf16 %v7971_v20, %v7969_v4  ;;  %v7973_v32 = vpack.c.bf16 %v7969_v4, %v7969_v4  ;;  %v7970_v40 = vld [vmem:[%s16977_s22 + $0x10] sm:$0xf]  ;;  %v17043_v10 = vld [vmem:[%s17819_s5 + $0x40] sm:$0xff]   ;;  %v7972_v3 = vpack.c.bf16 %v7968_v44, %v7968_v44  ;;  %v17052_v59 = vld [vmem:[%s17819_s5 + $0xd8] sm:$0xff]  }
 0xac0   : >> { %v16997_v61 = vpack.c.bf16 %v7970_v40, %v7968_v44  ;;  %v17036_v19 = vld [vmem:[%s17819_s5 + $0x90] sm:$0xff]   ;;  %v17059_v16 = vld [vmem:[%s17819_s5 + $0x128] sm:$0xff]   ;;  %v17074_v45 = vld [vmem:[%s17819_s5 + $0x120] sm:$0xff]   ;;  %p12297_p1 = pnand (%p7960_p13), %p12296_p0, %p12490_p5 }
 0xac1   : >> { %v8025_v7 = vshrl.u32 %v16981_v27, 16  ;;  %v8027_v8 = vshll.u32 %v16981_v27, 16  ;;  %11270 = vmatprep.mubr.msk.bf16.mxu1 %vm385_vm10, %v7973_v32  ;;  %v8262_v50 = vrot.slane %v16981_v27, 1  ;;  %v17067_v35 = vld [vmem:[%s17819_s5 + $0xd0] sm:$0xff]   ;;  %v17083_v17 = vld [vmem:[%s17819_s5 + $0xc8] sm:$0xff]   ;;  %v17090_v53 = vld [vmem:[%s17819_s5 + $0x118] sm:$0xff]  }
 0xac2   : >> { %8100 = vmatpush1.bf16.msra.mxu0 %v16919_v31  ;;  %8203 = vmatpush1.bf16.msra.mxu1 %v16926_v14  ;;  %v8020_v52 = vshll.u32 %v16997_v61, 16  ;;  %v8018_v29 = vshrl.u32 %v16997_v61, 16  ;;  %v17097_v56 = vld [vmem:[%s17819_s5 + $0xc0] sm:$0xff]   ;;  %v17104_v48 = vld [vmem:[%s17819_s5 + $0x110] sm:$0xff]   ;;  %v17111_v6 = vld [vmem:[%s17819_s5 + $0xb8] sm:$0xff]   ;;  %p12298_p2 = pneg (%p7960_p13), %p12297_p1 }
 0xac3   : >> { %8101 = vmatprep.subr.bf16.mxu0 %v12389_v5  ;;  %8204 = vmatprep.subr.bf16.mxu1 %v12389_v5  ;;  %v8029_v18 = vrot.slane %v8027_v8, 1  ;;  %v8392_v62 = vrot.slane %v8025_v7, 1  ;;  %v8393_v11 = vrot.slane %v8027_v8, 2  ;;  %v17118_v22 = vld [vmem:[%s17819_s5 + $0x108] sm:$0xff]   ;;  %v17125_v9 = vld [vmem:[%s17819_s5 + $0xb0] sm:$0xff]   ;;  %v17132_v24 = vld [vmem:[%s17819_s5 + $0x100] sm:$0xff]  }
 0xac4   : >> { %v8022_v13 = vrot.slane %v8020_v52, 1  ;;  %v17136_v12 = vld [vmem:[%s16977_s22 + $0x28] sm:$0xff]  ;;  %v11370_v41 = vld [vmem:[%s16977_s22 + $0x38] sm:$0xf]  ;;  %v17140_v60 = vld [vmem:[%s16977_s22 + $0x20] sm:$0xff] }
 0xac5   : >> { %v8030_v2 = vor.u32 %v8029_v18, %v8025_v7  ;;  %v8394_v46 = vor.u32 %v8393_v11, %v8392_v62  ;;  %v11369_v37 = vld [vmem:[%s16977_s22 + $0x30] sm:$0xf]  ;;  %v17147_v38 = vld [vmem:[%s17819_s5 + $0xa8] sm:$0xff]   ;;  %v17154_v63 = vld [vmem:[%s17819_s5 + $0xf8] sm:$0xff]   ;;  %v17157_v33 = vpack.c.bf16 %v11370_v41, %v17136_v12  ;;  %s11582_s22 = sshll.u32 (%p7960_p13), %s12473_s21, 4  ;;  %s12391_s21 = smov (%p7960_p13), [#allocation9]  }
 0xac6   : >> { %8102 = vmatpush1.bf16.msra.mxu0 %v16933_v25  ;;  %8205 = vmatpush1.bf16.msra.mxu1 %v16940_v21  ;;  %v8023_v34 = vor.u32 %v8022_v13, %v8018_v29  ;;  %v17161_v58 = vpack.c.bf16 %v11369_v37, %v17140_v60  ;;  %v17167_v55 = vld [vmem:[%s17819_s5 + $0xa0] sm:$0xff]   ;;  %v17174_v23 = vld [vmem:[%s17819_s5 + $0xf0] sm:$0xff]   ;;  %v17189_v7 = vld [vmem:[%s17819_s5 + $0xe8] sm:$0xff]   ;;  %v8522_v37 = vrot.slane %v16981_v27, 2  ;;  %s17770_s24 = scalar_lea.hbm (%p7960_p13), %s17825_s11, %s11582_s22  ;;  %s12299_s16 = sshll.u32 (%p7960_p13), %s12391_s21, 4  ;;  %s12300_s16 = int_to_ptr.vmem [resolvable:$false] %s12299_s16 }
 0xac7   : >> { %8103 = vmatprep.subr.bf16.mxu0 %v12389_v5  ;;  %8206 = vmatprep.subr.bf16.mxu1 %v12389_v5  ;;  %v8656_v0 = vshrl.u32 %v17157_v33, 16  ;;  %v8658_v4 = vshll.u32 %v17157_v33, 16  ;;  %v17217_v11 = vld [vmem:[%s17819_s5 + $0xe0] sm:$0xff]   ;;  %v17255_v27 = vld [vmem:[%s17819_s5 + $0x168] sm:$0xff]   ;;  %s12301_s22 = scalar_lea.vmem (%p7960_p13), %s12300_s16, 32  ;;  %p12302_p3 = scmp.lt.s32.totalorder (%p7960_p13), %s17772_s25, %s12300_s16 }
 0xac8   : >> { %11259 = vmatprep.mubr.msk.bf16.mxu0 %vm385_vm10, %v8030_v2  ;;  %v8649_v20 = vshrl.u32 %v17161_v58, 16  ;;  %v8651_v32 = vshll.u32 %v17161_v58, 16  ;;  %v17204_v2 = vld [vmem:[%s17819_s5 + $0x138] sm:$0xff]   ;;  %p12303_p4 = scmp.lt.s32.totalorder (%p7960_p13), %s12301_s22, %s12295_s14 }
 0xac9   : >> { %v17181_v44 = vrot.slane %v8656_v0, 1  ;;  %v17183_v40 = vrot.slane %v8658_v4, 2 }
 0xaca   : >> { %8104 = vmatpush1.bf16.msra.mxu0 %v16947_v54  ;;  %8207 = vmatpush1.bf16.msra.mxu1 %v16955_v49  ;;  %v17193_v8 = vrot.slane %v8649_v20, 1  ;;  %v17197_v18 = vrot.slane %v8651_v32, 2  ;;  %p12304_p7 = por (%p7960_p13), %p12303_p4, %p12302_p3 }
 0xacb   : >> { %8105 = vmatprep.subr.bf16.mxu0 %v12389_v5  ;;  %8208 = vmatprep.subr.bf16.mxu1 %v12389_v5  ;;  %v8803_v13 = vor.u32 %v17183_v40, %v17181_v44 }
 0xacc   : > { %p12305_p8 = pnand (%p7960_p13), %p12304_p7, %p12298_p2 }
 0xace   : >> { %8106 = vmatpush1.bf16.msra.mxu0 %v16962_v30  ;;  %8209 = vmatpush1.bf16.msra.mxu1 %v16969_v28 }
 0xacf   : >> { %8107 = vmatprep.subr.bf16.mxu0 %v12389_v5  ;;  %8210 = vmatprep.subr.bf16.mxu1 %v12389_v5 }
 0xad2   : >> { %8108 = vmatpush1.bf16.msra.mxu0 %v16975_v15  ;;  %8211 = vmatpush1.bf16.msra.mxu1 %v16991_v51 }
 0xad3   : >> { %8109 = vmatprep.subr.bf16.mxu0 %v12389_v5  ;;  %8212 = vmatprep.subr.bf16.mxu1 %v12389_v5 }
 0xad6   : >> { %8110 = vmatpush1.bf16.msra.mxu0 %v17003_v1  ;;  %8213 = vmatpush1.bf16.msra.mxu1 %v17010_v26 }
 0xad7   : >> { %8123 = vmatprep.subr.bf16.mxu0 %v12389_v5  ;;  %8226 = vmatprep.subr.bf16.mxu1 %v12389_v5 }
 0xada   : >> { %8124 = vmatpush2.bf16.msra.mxu0 %v17019_v39  ;;  %8227 = vmatpush2.bf16.msra.mxu1 %v17026_v42 }
 0xadb   : >> { %8125 = vmatprep.subr.bf16.mxu0 %v12389_v5  ;;  %8228 = vmatprep.subr.bf16.mxu1 %v12389_v5 }
 0xade   : >> { %8126 = vmatpush2.bf16.msra.mxu0 %v17036_v19  ;;  %8229 = vmatpush2.bf16.msra.mxu1 %v17043_v10 }
 0xadf   : >> { %8327 = vmatprep.subr.bf16.mxu0 %v12389_v5  ;;  %8459 = vmatprep.subr.bf16.mxu1 %v12389_v5 }
 0xae1   : >> { %8128 = vmatmul.mubr.bf16.vlgmr.msra.gmra.mxu0 %v8023_v34  ;;  %8231 = vmatmul.mubr.bf16.vlgmr.msra.gmra.mxu1 %v7972_v3  ;;  %v8389_v34 = vrot.slane %v8018_v29, 1  ;;  %v8390_v3 = vrot.slane %v8020_v52, 2  ;;  %v8261_v29 = vrot.slane %v16997_v61, 1  ;;  %v17234_v52 = vld [vmem:[%s17819_s5 + $0x178] sm:$0xff]  }
 0xae2   : >> { %8328 = vmatpush1.bf16.msra.mxu0 %v17052_v59  ;;  %8460 = vmatpush1.bf16.msra.mxu1 %v17059_v16 }
 0xae3   : >> { %8329 = vmatprep.subr.bf16.mxu0 %v12389_v5  ;;  %8461 = vmatprep.subr.bf16.mxu1 %v12389_v5  ;;  %v8391_v41 = vor.u32 %v8390_v3, %v8389_v34 }
 0xae4   : >> { %11301 = vmatprep.mubr.msk.bf16.mxu0 %vm385_vm10, %v8262_v50  ;;  %11332 = vmatprep.mubr.msk.bf16.mxu1 %vm385_vm10, %v8394_v46  ;;  %v17226_v50 = vld [vmem:[%s17819_s5 + $0x130] sm:$0xff]   ;;  %v8660_v46 = vrot.slane %v8658_v4, 1 }
 0xae5   : >> { %v17244_v4 = vld [vmem:[%s17819_s5 + $0x170] sm:$0xff]  }
 0xae6   : >> { %8330 = vmatpush1.bf16.msra.mxu0 %v17067_v35  ;;  %8462 = vmatpush1.bf16.msra.mxu1 %v17074_v45  ;;  %v8661_v62 = vor.u32 %v8660_v46, %v8656_v0  ;;  %v8653_v0 = vrot.slane %v8651_v32, 1  ;;  %v8752_v32 = vrot.slane %v17157_v33, 1  ;;  %v11364_v46 = vld [vmem:[%s17820_s6] ss:$0 sm:$0xff] }
 0xae7   : >> { %8331 = vmatprep.subr.bf16.mxu0 %v12389_v5  ;;  %8463 = vmatprep.subr.bf16.mxu1 %v12389_v5 }
 0xaea   : >> { %8332 = vmatpush1.bf16.msra.mxu0 %v17083_v17  ;;  %8464 = vmatpush1.bf16.msra.mxu1 %v17090_v53 }
 0xaeb   : >> { %8333 = vmatprep.subr.bf16.mxu0 %v12389_v5  ;;  %8465 = vmatprep.subr.bf16.mxu1 %v12389_v5 }
 0xaee   : >> { %8334 = vmatpush1.bf16.msra.mxu0 %v17097_v56  ;;  %8466 = vmatpush1.bf16.msra.mxu1 %v17104_v48 }
 0xaef   : >> { %8335 = vmatprep.subr.bf16.mxu0 %v12389_v5  ;;  %8467 = vmatprep.subr.bf16.mxu1 %v12389_v5 }
 0xaf2   : >> { %8336 = vmatpush1.bf16.msra.mxu0 %v17111_v6  ;;  %8468 = vmatpush1.bf16.msra.mxu1 %v17118_v22 }
 0xaf3   : >> { %8337 = vmatprep.subr.bf16.mxu0 %v12389_v5  ;;  %8469 = vmatprep.subr.bf16.mxu1 %v12389_v5 }
 0xaf6   : >> { %8338 = vmatpush1.bf16.msra.mxu0 %v17125_v9  ;;  %8470 = vmatpush1.bf16.msra.mxu1 %v17132_v24 }
 0xaf7   : >> { %8339 = vmatprep.subr.bf16.mxu0 %v12389_v5  ;;  %8471 = vmatprep.subr.bf16.mxu1 %v12389_v5 }
 0xafa   : >> { %8340 = vmatpush1.bf16.msra.mxu0 %v17147_v38  ;;  %8472 = vmatpush1.bf16.msra.mxu1 %v17154_v63 }
 0xafb   : >> { %8341 = vmatprep.subr.bf16.mxu0 %v12389_v5  ;;  %8473 = vmatprep.subr.bf16.mxu1 %v12389_v5 }
 0xafe   : >> { %8342 = vmatpush1.bf16.msra.mxu0 %v17167_v55  ;;  %8474 = vmatpush1.bf16.msra.mxu1 %v17174_v23 }
 0xaff   : >> { %8355 = vmatprep.subr.bf16.mxu0 %v12389_v5  ;;  %8487 = vmatprep.subr.bf16.mxu1 %v12389_v5 }
 0xb02   : >> { %8356 = vmatpush2.bf16.msra.mxu0 %v17189_v7  ;;  %8488 = vmatpush2.bf16.msra.mxu1 %v17204_v2 }
 0xb03   : >> { %8357 = vmatprep.subr.bf16.mxu0 %v12389_v5  ;;  %8489 = vmatprep.subr.bf16.mxu1 %v12389_v5 }
 0xb06   : >> { %8358 = vmatpush2.bf16.msra.mxu0 %v17217_v11  ;;  %8490 = vmatpush2.bf16.msra.mxu1 %v17226_v50 }
 0xb07   : >> { %8587 = vmatprep.subr.bf16.mxu0 %v12389_v5  ;;  %8666 = vmatprep.subr.bf16.mxu1 %v12389_v5 }
 0xb09   : >> { %8360 = vmatmul.mubr.bf16.vlgmr.msra.gmra.mxu0 %v8261_v29  ;;  %8492 = vmatmul.mubr.bf16.vlgmr.msra.gmra.mxu1 %v8391_v41 }
 0xb0a   : >> { %8588 = vmatpush1.bf16.msra.mxu0 %v17234_v52  ;;  %8667 = vmatpush1.bf16.msra.mxu1 %v16892_v47  ;;  %v17264_v47 = vld [vmem:[%s17819_s5 + $0x160] sm:$0xff]  }
 0xb0b   : >> { %8589 = vmatprep.subr.bf16.mxu0 %v12389_v5  ;;  %8668 = vmatprep.subr.bf16.mxu1 %v12389_v5 }
 0xb0c   : >> { %11363 = vmatprep.mubr.msk.bf16.mxu0 %vm385_vm10, %v8522_v37  ;;  %11371 = vmatprep.mubr.msk.bf16.mxu1 %vm385_vm10, %v8661_v62  ;;  %v8654_v62 = vor.u32 %v8653_v0, %v8649_v20 }
 0xb0e   : >> { %8590 = vmatpush1.bf16.msra.mxu0 %v17244_v4  ;;  %8669 = vmatpush1.bf16.msra.mxu1 %v16905_v36  ;;  %v17273_v36 = vld [vmem:[%s17819_s5 + $0x158] sm:$0xff]  }
 0xb0f   : >> { %8591 = vmatprep.subr.bf16.mxu0 %v12389_v5  ;;  %8670 = vmatprep.subr.bf16.mxu1 %v12389_v5 }
 0xb12   : >> { %8592 = vmatpush1.bf16.msra.mxu0 %v17255_v27  ;;  %8671 = vmatpush1.bf16.msra.mxu1 %v16919_v31  ;;  %v17282_v31 = vld [vmem:[%s17819_s5 + $0x150] sm:$0xff]  }
 0xb13   : >> { %8593 = vmatprep.subr.bf16.mxu0 %v12389_v5  ;;  %8672 = vmatprep.subr.bf16.mxu1 %v12389_v5 }
 0xb16   : >> { %8594 = vmatpush1.bf16.msra.mxu0 %v17264_v47  ;;  %8673 = vmatpush1.bf16.msra.mxu1 %v16933_v25  ;;  %v17291_v25 = vld [vmem:[%s17819_s5 + $0x148] sm:$0xff]  }
 0xb17   : >> { %8595 = vmatprep.subr.bf16.mxu0 %v12389_v5  ;;  %8674 = vmatprep.subr.bf16.mxu1 %v12389_v5 }
 0xb1a   : >> { %8596 = vmatpush1.bf16.msra.mxu0 %v17273_v36  ;;  %8675 = vmatpush1.bf16.msra.mxu1 %v16947_v54  ;;  %v17300_v54 = vld [vmem:[%s17819_s5 + $0x140] sm:$0xff]  }
 0xb1b   : >> { %8597 = vmatprep.subr.bf16.mxu0 %v12389_v5  ;;  %8676 = vmatprep.subr.bf16.mxu1 %v12389_v5 }
 0xb1e   : >> { %8598 = vmatpush1.bf16.msra.mxu0 %v17282_v31  ;;  %8677 = vmatpush1.bf16.msra.mxu1 %v16962_v30  ;;  %v17309_v30 = vld [vmem:[%s17819_s5 + $0x188] sm:$0xff]  }
 0xb1f   : >> { %8599 = vmatprep.subr.bf16.mxu0 %v12389_v5  ;;  %8678 = vmatprep.subr.bf16.mxu1 %v12389_v5 }
 0xb22   : >> { %8600 = vmatpush1.bf16.msra.mxu0 %v17291_v25  ;;  %8679 = vmatpush1.bf16.msra.mxu1 %v16975_v15  ;;  %v17318_v15 = vld [vmem:[%s17819_s5 + $0x180] sm:$0xff]  }
 0xb23   : >> { %8601 = vmatprep.subr.bf16.mxu0 %v12389_v5  ;;  %8680 = vmatprep.subr.bf16.mxu1 %v12389_v5 }
 0xb26   : >> { %8602 = vmatpush1.bf16.msra.mxu0 %v17300_v54  ;;  %8681 = vmatpush1.bf16.msra.mxu1 %v17003_v1  ;;  %v8521_v1 = vrot.slane %v16997_v61, 2 }
 0xb27   : >> { %8615 = vmatprep.subr.bf16.mxu0 %v12389_v5  ;;  %8694 = vmatprep.subr.bf16.mxu1 %v12389_v5 }
 0xb2a   : >> { %8616 = vmatpush2.bf16.msra.mxu0 %v17309_v30  ;;  %8695 = vmatpush2.bf16.msra.mxu1 %v17019_v39  ;;  %v8645_v39 = vpack.c.bf16 %v17136_v12, %v17136_v12 }
 0xb2b   : >> { %8617 = vmatprep.subr.bf16.mxu0 %v12389_v5  ;;  %8696 = vmatprep.subr.bf16.mxu1 %v12389_v5 }
 0xb2e   : >> { %8618 = vmatpush2.bf16.msra.mxu0 %v17318_v15  ;;  %8697 = vmatpush2.bf16.msra.mxu1 %v17036_v19 }
 0xb2f   : >> { %8709 = vmatprep.subr.bf16.mxu0 %v12389_v5  ;;  %8757 = vmatprep.subr.bf16.mxu1 %v12389_v5 }
 0xb31   : >> { %8620 = vmatmul.mubr.bf16.vlgmr.msra.gmra.mxu0 %v8521_v1  ;;  %8699 = vmatmul.mubr.bf16.vlgmr.msra.gmra.mxu1 %v8654_v62  ;;  %v17871_v1 = vmov (%p7960_p13), 0.0   ;;  %v12227_v62 = vld [vmem:[%s17821_s7 + $0x18] sm:$0xff] (%p7960_p13)  }
 0xb32   : >> { %8710 = vmatpush1.bf16.msra.mxu0 %v16899_v43  ;;  %8758 = vmatpush1.bf16.msra.mxu1 %v17052_v59  ;;  %v8644_v43 = vpack.c.bf16 %v17140_v60, %v17140_v60 }
 0xb33   : >> { %8711 = vmatprep.subr.bf16.mxu0 %v12389_v5  ;;  %8759 = vmatprep.subr.bf16.mxu1 %v12389_v5 }
 0xb34   : >> { %11372 = vmatprep.mubr.msk.bf16.mxu0 %vm385_vm10, %v8645_v39  ;;  %11373 = vmatprep.mubr.msk.bf16.mxu1 %vm385_vm10, %v8752_v32  ;;  %v12228_v39 = vld [vmem:[%s17821_s7 + $0x38] sm:$0xff] (%p7960_p13)   ;;  %v12229_v32 = vld [vmem:[%s17821_s7 + $0x10] sm:$0xff] (%p7960_p13)  }
 0xb36   : >> { %8712 = vmatpush1.bf16.msra.mxu0 %v16912_v57  ;;  %8760 = vmatpush1.bf16.msra.mxu1 %v17067_v35  ;;  %v8751_v57 = vrot.slane %v17161_v58, 1 }
 0xb37   : >> { %8713 = vmatprep.subr.bf16.mxu0 %v12389_v5  ;;  %8761 = vmatprep.subr.bf16.mxu1 %v12389_v5 }
 0xb3a   : >> { %8714 = vmatpush1.bf16.msra.mxu0 %v16926_v14  ;;  %8762 = vmatpush1.bf16.msra.mxu1 %v17083_v17  ;;  %v8850_v14 = vrot.slane %v17157_v33, 2 }
 0xb3b   : >> { %8715 = vmatprep.subr.bf16.mxu0 %v12389_v5  ;;  %8763 = vmatprep.subr.bf16.mxu1 %v12389_v5 }
 0xb3e   : >> { %8716 = vmatpush1.bf16.msra.mxu0 %v16940_v21  ;;  %8764 = vmatpush1.bf16.msra.mxu1 %v17097_v56  ;;  %v8849_v21 = vrot.slane %v17161_v58, 2 }
 0xb3f   : >> { %8717 = vmatprep.subr.bf16.mxu0 %v12389_v5  ;;  %8765 = vmatprep.subr.bf16.mxu1 %v12389_v5 }
 0xb42   : >> { %8718 = vmatpush1.bf16.msra.mxu0 %v16955_v49  ;;  %8766 = vmatpush1.bf16.msra.mxu1 %v17111_v6  ;;  %v17870_v49 = vor.u32 %v17197_v18, %v17193_v8 }
 0xb43   : >> { %8719 = vmatprep.subr.bf16.mxu0 %v12389_v5  ;;  %8767 = vmatprep.subr.bf16.mxu1 %v12389_v5 }
 0xb46   : >> { %8720 = vmatpush1.bf16.msra.mxu0 %v16969_v28  ;;  %8768 = vmatpush1.bf16.msra.mxu1 %v17125_v9 }
 0xb47   : >> { %8721 = vmatprep.subr.bf16.mxu0 %v12389_v5  ;;  %8769 = vmatprep.subr.bf16.mxu1 %v12389_v5 }
 0xb4a   : >> { %8722 = vmatpush1.bf16.msra.mxu0 %v16991_v51  ;;  %8770 = vmatpush1.bf16.msra.mxu1 %v17147_v38 }
 0xb4b   : >> { %8723 = vmatprep.subr.bf16.mxu0 %v12389_v5  ;;  %8771 = vmatprep.subr.bf16.mxu1 %v12389_v5 }
 0xb4e   : >> { %8724 = vmatpush1.bf16.msra.mxu0 %v17010_v26  ;;  %8772 = vmatpush1.bf16.msra.mxu1 %v17167_v55 }
 0xb4f   : >> { %8737 = vmatprep.subr.bf16.mxu0 %v12389_v5  ;;  %8785 = vmatprep.subr.bf16.mxu1 %v12389_v5 }
 0xb52   : >> { %8738 = vmatpush2.bf16.msra.mxu0 %v17026_v42  ;;  %8786 = vmatpush2.bf16.msra.mxu1 %v17189_v7 }
 0xb53   : >> { %8739 = vmatprep.subr.bf16.mxu0 %v12389_v5  ;;  %8787 = vmatprep.subr.bf16.mxu1 %v12389_v5 }
 0xb56   : >> { %8740 = vmatpush2.bf16.msra.mxu0 %v17043_v10  ;;  %8788 = vmatpush2.bf16.msra.mxu1 %v17217_v11 }
 0xb57   : >> { %8808 = vmatprep.subr.bf16.mxu0 %v12389_v5  ;;  %8855 = vmatprep.subr.bf16.mxu1 %v12389_v5 }
 0xb59   : >> { %8742 = vmatmul.mubr.bf16.vlgmr.msra.gmra.mxu0 %v8644_v43  ;;  %8790 = vmatmul.mubr.bf16.vlgmr.msra.gmra.mxu1 %v8751_v57  ;;  %v12230_v43 = vld [vmem:[%s17821_s7 + $0x30] sm:$0xff] (%p7960_p13)   ;;  %v12231_v57 = vld [vmem:[%s17821_s7 + $0x8] sm:$0xff] (%p7960_p13)  }
 0xb5a   : >> { %8809 = vmatpush1.bf16.msra.mxu0 %v17059_v16  ;;  %8856 = vmatpush1.bf16.msra.mxu1 %v17234_v52 }
 0xb5b   : >> { %8810 = vmatprep.subr.bf16.mxu0 %v12389_v5  ;;  %8857 = vmatprep.subr.bf16.mxu1 %v12389_v5 }
 0xb5c   : >> { %11374 = vmatprep.mubr.msk.bf16.mxu0 %vm385_vm10, %v8803_v13  ;;  %11375 = vmatprep.mubr.msk.bf16.mxu1 %vm385_vm10, %v8850_v14  ;;  %v12232_v14 = vld [vmem:[%s17821_s7 + $0x28] sm:$0xff] (%p7960_p13)  }
 0xb5e   : >> { %8811 = vmatpush1.bf16.msra.mxu0 %v17074_v45  ;;  %8858 = vmatpush1.bf16.msra.mxu1 %v17244_v4 }
 0xb5f   : >> { %8812 = vmatprep.subr.bf16.mxu0 %v12389_v5  ;;  %8859 = vmatprep.subr.bf16.mxu1 %v12389_v5 }
 0xb62   : >> { %8813 = vmatpush1.bf16.msra.mxu0 %v17090_v53  ;;  %8860 = vmatpush1.bf16.msra.mxu1 %v17255_v27 }
 0xb63   : >> { %8814 = vmatprep.subr.bf16.mxu0 %v12389_v5  ;;  %8861 = vmatprep.subr.bf16.mxu1 %v12389_v5 }
 0xb66   : >> { %8815 = vmatpush1.bf16.msra.mxu0 %v17104_v48  ;;  %8862 = vmatpush1.bf16.msra.mxu1 %v17264_v47 }
 0xb67   : >> { %8816 = vmatprep.subr.bf16.mxu0 %v12389_v5  ;;  %8863 = vmatprep.subr.bf16.mxu1 %v12389_v5 }
 0xb6a   : >> { %8817 = vmatpush1.bf16.msra.mxu0 %v17118_v22  ;;  %8864 = vmatpush1.bf16.msra.mxu1 %v17273_v36 }
 0xb6b   : >> { %8818 = vmatprep.subr.bf16.mxu0 %v12389_v5  ;;  %8865 = vmatprep.subr.bf16.mxu1 %v12389_v5 }
 0xb6e   : >> { %8819 = vmatpush1.bf16.msra.mxu0 %v17132_v24  ;;  %8866 = vmatpush1.bf16.msra.mxu1 %v17282_v31 }
 0xb6f   : >> { %8820 = vmatprep.subr.bf16.mxu0 %v12389_v5  ;;  %8867 = vmatprep.subr.bf16.mxu1 %v12389_v5 }
 0xb72   : >> { %8821 = vmatpush1.bf16.msra.mxu0 %v17154_v63  ;;  %8868 = vmatpush1.bf16.msra.mxu1 %v17291_v25 }
 0xb73   : >> { %8822 = vmatprep.subr.bf16.mxu0 %v12389_v5  ;;  %8869 = vmatprep.subr.bf16.mxu1 %v12389_v5 }
 0xb76   : >> { %8823 = vmatpush1.bf16.msra.mxu0 %v17174_v23  ;;  %8870 = vmatpush1.bf16.msra.mxu1 %v17300_v54 }
 0xb77   : >> { %8836 = vmatprep.subr.bf16.mxu0 %v12389_v5  ;;  %8883 = vmatprep.subr.bf16.mxu1 %v12389_v5 }
 0xb7a   : >> { %8837 = vmatpush2.bf16.msra.mxu0 %v17204_v2  ;;  %8884 = vmatpush2.bf16.msra.mxu1 %v17309_v30 }
 0xb7b   : >> { %8838 = vmatprep.subr.bf16.mxu0 %v12389_v5  ;;  %8885 = vmatprep.subr.bf16.mxu1 %v12389_v5 }
 0xb7e   : >> { %8839 = vmatpush2.bf16.msra.mxu0 %v17226_v50  ;;  %8886 = vmatpush2.bf16.msra.mxu1 %v17318_v15 }
 0xb7f   : > { %11824 = vmatprep.subr.bf16.mxu0 (%p7960_p13), %v17871_v1  ;;  %11836 = vmatprep.subr.bf16.mxu1 (%p7960_p13), %v17871_v1 }
 0xb81   : >> { %8841 = vmatmul.mubr.bf16.vlgmr.msra.gmra.mxu0 %v17870_v49  ;;  %8888 = vmatmul.mubr.bf16.vlgmr.msra.gmra.mxu1 %v8849_v21  ;;  %v12233_v21 = vld [vmem:[%s17821_s7] sm:$0xff] (%p7960_p13)  }
 0xb82   : > { %11832 = vmatprep.mubr.msk.bf16.mxu0 (%p7960_p13), %vm12390_vm11, %v17871_v1  ;;  %11844 = vmatprep.mubr.msk.bf16.mxu1 (%p7960_p13), %vm12390_vm11, %v17871_v1  ;;  %v12234_v49 = vld [vmem:[%s17821_s7 + $0x20] sm:$0xff] (%p7960_p13)  }
 0xb83   : > { %11825 = vmatpush3.bf16.msra.mxu0 (%p7960_p13), %v12227_v62  ;;  %11837 = vmatpush3.bf16.msra.mxu1 (%p7960_p13), %v12228_v39  ;;  %v12270_v62 = vld [vmem:[%s17821_s7 + $0x170] sm:$0xff] (%p7960_p13)   ;;  %v12271_v39 = vld [vmem:[%s17821_s7 + $0x148] sm:$0xff] (%p7960_p13)  }
 0xb84   : > { %11826 = vmatprep.subr.bf16.mxu0 (%p7960_p13), %v17871_v1  ;;  %11838 = vmatprep.subr.bf16.mxu1 (%p7960_p13), %v17871_v1 }
 0xb87   : > { %11827 = vmatpush3.bf16.msra.mxu0 (%p7960_p13), %v12229_v32  ;;  %11839 = vmatpush3.bf16.msra.mxu1 (%p7960_p13), %v12230_v43  ;;  %v12272_v32 = vld [vmem:[%s17821_s7 + $0x168] sm:$0xff] (%p7960_p13)   ;;  %v12273_v43 = vld [vmem:[%s17821_s7 + $0x140] sm:$0xff] (%p7960_p13)  }
 0xb88   : > { %11828 = vmatprep.subr.bf16.mxu0 (%p7960_p13), %v17871_v1  ;;  %11840 = vmatprep.subr.bf16.mxu1 (%p7960_p13), %v17871_v1 }
 0xb8b   : > { %11829 = vmatpush3.bf16.msra.mxu0 (%p7960_p13), %v12231_v57  ;;  %11841 = vmatpush3.bf16.msra.mxu1 (%p7960_p13), %v12232_v14  ;;  %v12274_v14 = vld [vmem:[%s17821_s7 + $0x160] sm:$0xff] (%p7960_p13)  }
 0xb8c   : > { %11830 = vmatprep.subr.bf16.mxu0 (%p7960_p13), %v17871_v1  ;;  %11842 = vmatprep.subr.bf16.mxu1 (%p7960_p13), %v17871_v1 }
 0xb8f   : > { %11831 = vmatpush3.bf16.msra.mxu0 (%p7960_p13), %v12233_v21  ;;  %11843 = vmatpush3.bf16.msra.mxu1 (%p7960_p13), %v12234_v49 }
 0xb90   : > { %11848 = vmatprep.subr.bf16.mxu0 (%p7960_p13), %v17871_v1  ;;  %11860 = vmatprep.subr.bf16.mxu1 (%p7960_p13), %v17871_v1 }
 0xba1   : >> { %v8129_v28 = vpop.f32.mrf.mxu0  ;;  %v8232_v51 = vpop.f32.mrf.mxu1 }
 0xba2   : >> { %v8233_v61 = vadd.f32 %v8232_v51, %v8129_v28 }
 0xba3   : >> { %v8131_v26 = vpop.f32.mrf.mxu0  ;;  %v8234_v42 = vpop.f32.mrf.mxu1 }
 0xba4   : > { %v12235_v42 = vld [vmem:[%s17821_s7 + $0x58] sm:$0xff] (%p7960_p13)  }
 0xba5   : >> { %v8132_v19 = vpop.f32.mrf.mxu0  ;;  %v8235_v10 = vpop.f32.mrf.mxu1 }
 0xba6   : > { %v12236_v19 = vld [vmem:[%s17821_s7 + $0x78] sm:$0xff] (%p7960_p13)   ;;  %v12237_v10 = vld [vmem:[%s17821_s7 + $0x50] sm:$0xff] (%p7960_p13)  }
 0xba7   : >> { %v8133_v59 = vpop.f32.mrf.mxu0  ;;  %v8236_v5 = vpop.f32.mrf.mxu1 }
 0xba8   : > { %v12238_v59 = vld [vmem:[%s17821_s7 + $0x70] sm:$0xff] (%p7960_p13)   ;;  %v12239_v5 = vld [vmem:[%s17821_s7 + $0x48] sm:$0xff] (%p7960_p13)  }
 0xbc9   : >> { %v8361_v16 = vpop.f32.mrf.mxu0  ;;  %v8493_v45 = vpop.f32.mrf.mxu1 }
 0xbca   : >> { %v8367_v35 = vadd.f32 %v8361_v16, %v8233_v61  ;;  %v12240_v16 = vld [vmem:[%s17821_s7 + $0x68] sm:$0xff] (%p7960_p13)  }
 0xbcb   : >> { %v8363_v17 = vpop.f32.mrf.mxu0  ;;  %v8495_v56 = vpop.f32.mrf.mxu1 }
 0xbcc   : >> { %v8499_v53 = vadd.f32 %v8493_v45, %v8367_v35  ;;  %v12241_v35 = vld [vmem:[%s17821_s7 + $0x40] sm:$0xff] (%p7960_p13)  }
 0xbcd   : >> { %v8364_v48 = vpop.f32.mrf.mxu0  ;;  %v8496_v6 = vpop.f32.mrf.mxu1  ;;  %v12242_v45 = vld [vmem:[%s17821_s7 + $0x60] sm:$0xff] (%p7960_p13)  }
 0xbce   : > { %v12243_v6 = vld [vmem:[%s17821_s7 + $0x98] sm:$0xff] (%p7960_p13)  }
 0xbcf   : >> { %v8365_v22 = vpop.f32.mrf.mxu0  ;;  %v8497_v9 = vpop.f32.mrf.mxu1 }
 0xbd0   : > { %v12244_v22 = vld [vmem:[%s17821_s7 + $0xb8] sm:$0xff] (%p7960_p13)   ;;  %v12245_v9 = vld [vmem:[%s17821_s7 + $0x90] sm:$0xff] (%p7960_p13)  }
 0xbf1   : >> { %v8621_v24 = vpop.f32.mrf.mxu0  ;;  %v8700_v60 = vpop.f32.mrf.mxu1 }
 0xbf2   : >> { %v8627_v12 = vadd.f32 %v8621_v24, %v8499_v53  ;;  %v12246_v24 = vld [vmem:[%s17821_s7 + $0xb0] sm:$0xff] (%p7960_p13)  }
 0xbf3   : >> { %v8623_v38 = vpop.f32.mrf.mxu0  ;;  %v8702_v63 = vpop.f32.mrf.mxu1 }
 0xbf4   : >> { %v8635_v27 = vadd.f32 %v11364_v46, %v8627_v12  ;;  %v12247_v12 = vld [vmem:[%s17821_s7 + $0x88] sm:$0xff] (%p7960_p13)   ;;  %v12249_v38 = vld [vmem:[%s17821_s7 + $0x80] sm:$0xff] (%p7960_p13)  }
 0xbf5   : >> { %v8624_v33 = vpop.f32.mrf.mxu0  ;;  %v8703_v58 = vpop.f32.mrf.mxu1  ;;  %v12250_v63 = vld [vmem:[%s17821_s7 + $0xa0] sm:$0xff] (%p7960_p13)  }
 0xbf7   : >> { %v8625_v55 = vpop.f32.mrf.mxu0  ;;  %v8704_v23 = vpop.f32.mrf.mxu1 }
 0xc19   : >> { %v8743_v20 = vpop.f32.mrf.mxu0  ;;  %v8791_v44 = vpop.f32.mrf.mxu1 }
 0xc1a   : >> { %v8744_v34 = vadd.f32 %v8743_v20, %v8700_v60  ;;  %v12248_v60 = vld [vmem:[%s17821_s7 + $0xa8] sm:$0xff] (%p7960_p13)   ;;  %v12251_v20 = vld [vmem:[%s17821_s7 + $0xd8] sm:$0xff] (%p7960_p13)  }
 0xc1b   : >> { %v8745_v40 = vpop.f32.mrf.mxu0  ;;  %v8793_v7 = vpop.f32.mrf.mxu1 }
 0xc1c   : >> { %v8797_v11 = vadd.f32 %v8791_v44, %v8744_v34  ;;  %v12252_v44 = vld [vmem:[%s17821_s7 + $0xf8] sm:$0xff] (%p7960_p13)   ;;  %v12253_v40 = vld [vmem:[%s17821_s7 + $0xd0] sm:$0xff] (%p7960_p13)  }
 0xc1d   : >> { %v8746_v8 = vpop.f32.mrf.mxu0  ;;  %v8794_v18 = vpop.f32.mrf.mxu1  ;;  %v12254_v7 = vld [vmem:[%s17821_s7 + $0xf0] sm:$0xff] (%p7960_p13)  }
 0xc1e   : > { %v12255_v8 = vld [vmem:[%s17821_s7 + $0xc8] sm:$0xff] (%p7960_p13)  }
 0xc1f   : >> { %v8747_v2 = vpop.f32.mrf.mxu0  ;;  %v8795_v13 = vpop.f32.mrf.mxu1  ;;  %v12256_v18 = vld [vmem:[%s17821_s7 + $0xe8] sm:$0xff] (%p7960_p13)  }
 0xc20   : > { %v12257_v2 = vld [vmem:[%s17821_s7 + $0xc0] sm:$0xff] (%p7960_p13)  }
 0xc21   : > { %v12258_v13 = vld [vmem:[%s17821_s7 + $0xe0] sm:$0xff] (%p7960_p13)  }
 0xc41   : >> { %v8842_v3 = vpop.f32.mrf.mxu0  ;;  %v8889_v29 = vpop.f32.mrf.mxu1 }
 0xc42   : >> { %v8848_v50 = vadd.f32 %v8842_v3, %v8797_v11 }
 0xc43   : >> { %v8844_v41 = vpop.f32.mrf.mxu0  ;;  %v8891_v37 = vpop.f32.mrf.mxu1 }
 0xc44   : >> { %v8895_v52 = vadd.f32 %v8889_v29, %v8848_v50  ;;  %v12259_v29 = vld [vmem:[%s17821_s7 + $0x118] sm:$0xff] (%p7960_p13)   ;;  %v12261_v41 = vld [vmem:[%s17821_s7 + $0x110] sm:$0xff] (%p7960_p13)   ;;  %v12263_v37 = vld [vmem:[%s17821_s7 + $0x108] sm:$0xff] (%p7960_p13)  }
 0xc45   : >> { %v8845_v4 = vpop.f32.mrf.mxu0  ;;  %v8892_v36 = vpop.f32.mrf.mxu1 }
 0xc46   : >> { %v8896_v47 = vadd.f32 %v11364_v46, %v8895_v52  ;;  %v12260_v46 = vld [vmem:[%s17821_s7 + $0x138] sm:$0xff] (%p7960_p13)   ;;  %v12262_v52 = vld [vmem:[%s17821_s7 + $0x130] sm:$0xff] (%p7960_p13)   ;;  %v12264_v4 = vld [vmem:[%s17821_s7 + $0x128] sm:$0xff] (%p7960_p13)  }
 0xc47   : >> { %v8846_v31 = vpop.f32.mrf.mxu0  ;;  %v8893_v54 = vpop.f32.mrf.mxu1  ;;  %v12266_v36 = vld [vmem:[%s17821_s7 + $0x120] sm:$0xff] (%p7960_p13)  }
 0xc48   : >> { %v8897_v25 = vmax.f32 %v8635_v27, %v8896_v47  ;;  %v12265_v27 = vld [vmem:[%s17821_s7 + $0x100] sm:$0xff] (%p7960_p13)  }
 0xc4a   : >> { %8899 = vst.msk [vmem:[#allocation8] sm:$0xff] %vm8898_vm8, %v8897_v25 }
 0xc50   : > { %7962 = sbr.rel (!%p7960_p13) target bundleno = 2744 (0xab8), region = 195 }
 0xc51   : >> { %v8900_v30 = vld [vmem:[#allocation8] ss:$2 sm:$0xf]  ;;  %v8902_v15 = vld [vmem:[#allocation8 + $0x1] ss:$2 sm:$0xf] }
 0xc52   : >> { %v8903_v0 = vmax.f32 %v8900_v30, %v8902_v15  ;;  %v12267_v30 = vld [vmem:[%s17821_s7 + $0x158] sm:$0xff] (%p7960_p13)  }
 0xc53   : > { %v12268_v15 = vld [vmem:[%s17821_s7 + $0x178] sm:$0xff] (%p7960_p13)  }
 0xc54   : >> { %8907 = vst.msk [vmem:[%s8905_s15] sm:$0xf] %vm8906_vm9, %v8903_v0  ;;  %v12269_v0 = vld [vmem:[%s17821_s7 + $0x150] sm:$0xff] (%p7960_p13)  }
 0xc5b   : > { %v8909_v28 = vld [vmem:[#allocation7] sm:$0x1]  ;;  %v8988_v51 = vld [vmem:[#allocation7 + $0x1] sm:$0x1]  ;;  %v9067_v17 = vld [vmem:[#allocation7 + $0x2] sm:$0x1] }
 0xc5c   : > { %v8910_v61 = vpack.c.bf16 %v8909_v28, %v8909_v28  ;;  %v8989_v26 = vpack.c.bf16 %v8988_v51, %v8988_v51  ;;  %v9146_v53 = vld [vmem:[#allocation7 + $0x3] sm:$0x1]  ;;  %v9068_v56 = vpack.c.bf16 %v9067_v17, %v9067_v17  ;;  %v9225_v33 = vld [vmem:[#allocation7 + $0x4] sm:$0x1]  ;;  %v9304_v58 = vld [vmem:[#allocation7 + $0x5] sm:$0x1] }
 0xc5d   : > { %v9147_v48 = vpack.c.bf16 %v9146_v53, %v9146_v53  ;;  %v9226_v55 = vpack.c.bf16 %v9225_v33, %v9225_v33  ;;  %v9305_v23 = vpack.c.bf16 %v9304_v58, %v9304_v58  ;;  %v9383_v34 = vld [vmem:[#allocation7 + $0x6] sm:$0x1]  ;;  %v9462_v11 = vld [vmem:[#allocation7 + $0x7] sm:$0x1]  ;;  %v9541_v47 = vld [vmem:[#allocation7 + $0x8] sm:$0x1] }
 0xc5e   : > { %11833 = vmatmul.mubr.msk.bf16.vlgmr.msra.gmra.mxu0 %vm8898_vm8, %v8910_v61  ;;  %11845 = vmatmul.mubr.msk.bf16.vlgmr.msra.gmra.mxu1 %vm8898_vm8, %v8989_v26  ;;  %v9384_v3 = vpack.c.bf16 %v9383_v34, %v9383_v34  ;;  %v9463_v50 = vpack.c.bf16 %v9462_v11, %v9462_v11  ;;  %v9620_v31 = vld [vmem:[#allocation7 + $0x9] sm:$0x1]  ;;  %v9542_v25 = vpack.c.bf16 %v9541_v47, %v9541_v47  ;;  %v9699_v57 = vld [vmem:[#allocation7 + $0xa] sm:$0x1]  ;;  %v9778_v21 = vld [vmem:[#allocation7 + $0xb] sm:$0x1] }
 0xc5f   : > { %11849 = vmatpush3.bf16.msra.mxu0 %v12235_v42  ;;  %11861 = vmatpush3.bf16.msra.mxu1 %v12236_v19  ;;  %v9621_v54 = vpack.c.bf16 %v9620_v31, %v9620_v31  ;;  %v9700_v49 = vpack.c.bf16 %v9699_v57, %v9699_v57  ;;  %v9779_v28 = vpack.c.bf16 %v9778_v21, %v9778_v21  ;;  %v12275_v51 = vld [vmem:[%s17821_s7 + $0x198] sm:$0xff]   ;;  %v12277_v26 = vld [vmem:[%s17821_s7 + $0x190] sm:$0xff]   ;;  %v12279_v19 = vld [vmem:[%s17821_s7 + $0x188] sm:$0xff]  }
 0xc60   : > { %11850 = vmatprep.subr.bf16.mxu0 %v17871_v1  ;;  %11862 = vmatprep.subr.bf16.mxu1 %v17871_v1  ;;  %v12276_v61 = vld [vmem:[%s17821_s7 + $0x1b8] sm:$0xff]   ;;  %v12278_v42 = vld [vmem:[%s17821_s7 + $0x1b0] sm:$0xff]  }
 0xc61   : > { %11856 = vmatprep.mubr.msk.bf16.mxu0 %vm12390_vm11, %v17871_v1  ;;  %11868 = vmatprep.mubr.msk.bf16.mxu1 %vm12390_vm11, %v17871_v1  ;;  %v12283_v53 = vld [vmem:[%s17821_s7 + $0x1d8] sm:$0xff]  }
 0xc62   : > { %v12291_v58 = vld [vmem:[%s17823_s9 + $0x18] sm:$0xff]  }
 0xc63   : > { %11851 = vmatpush3.bf16.msra.mxu0 %v12237_v10  ;;  %11863 = vmatpush3.bf16.msra.mxu1 %v12238_v59  ;;  %v12280_v10 = vld [vmem:[%s17821_s7 + $0x1a8] sm:$0xff]   ;;  %v12281_v59 = vld [vmem:[%s17821_s7 + $0x180] sm:$0xff]  }
 0xc64   : > { %11852 = vmatprep.subr.bf16.mxu0 %v17871_v1  ;;  %11864 = vmatprep.subr.bf16.mxu1 %v17871_v1 }
 0xc67   : > { %11853 = vmatpush3.bf16.msra.mxu0 %v12239_v5  ;;  %11865 = vmatpush3.bf16.msra.mxu1 %v12240_v16  ;;  %v9857_v5 = vld [vmem:[#allocation7 + $0xc] sm:$0x1]  ;;  %v12282_v16 = vld [vmem:[%s17821_s7 + $0x1a0] sm:$0xff]  }
 0xc68   : > { %11854 = vmatprep.subr.bf16.mxu0 %v17871_v1  ;;  %11866 = vmatprep.subr.bf16.mxu1 %v17871_v1 }
 0xc6b   : > { %11855 = vmatpush3.bf16.msra.mxu0 %v12241_v35  ;;  %11867 = vmatpush3.bf16.msra.mxu1 %v12242_v45  ;;  %v9936_v35 = vld [vmem:[#allocation7 + $0xd] sm:$0x1]  ;;  %v9858_v45 = vpack.c.bf16 %v9857_v5, %v9857_v5 }
 0xc6c   : > { %11872 = vmatprep.subr.bf16.mxu0 %v17871_v1  ;;  %11884 = vmatprep.subr.bf16.mxu1 %v17871_v1  ;;  %v9937_v17 = vpack.c.bf16 %v9936_v35, %v9936_v35 }
 0xc6e   : > { %11857 = vmatmul.mubr.msk.bf16.vlgmr.msra.gmra.mxu0 %vm8898_vm8, %v9068_v56  ;;  %11869 = vmatmul.mubr.msk.bf16.vlgmr.msra.gmra.mxu1 %vm8898_vm8, %v9147_v48  ;;  %v12284_v56 = vld [vmem:[%s17821_s7 + $0x1f8] sm:$0xff]   ;;  %v12285_v48 = vld [vmem:[%s17821_s7 + $0x1d0] sm:$0xff]  }
 0xc6f   : > { %11873 = vmatpush3.bf16.msra.mxu0 %v12243_v6  ;;  %11885 = vmatpush3.bf16.msra.mxu1 %v12244_v22  ;;  %v12286_v6 = vld [vmem:[%s17821_s7 + $0x1f0] sm:$0xff]   ;;  %v12287_v22 = vld [vmem:[%s17821_s7 + $0x1c8] sm:$0xff]  }
 0xc70   : > { %11874 = vmatprep.subr.bf16.mxu0 %v17871_v1  ;;  %11886 = vmatprep.subr.bf16.mxu1 %v17871_v1 }
 0xc71   : > { %11880 = vmatprep.mubr.msk.bf16.mxu0 %vm12390_vm11, %v17871_v1  ;;  %11892 = vmatprep.mubr.msk.bf16.mxu1 %vm12390_vm11, %v17871_v1 }
 0xc73   : > { %11875 = vmatpush3.bf16.msra.mxu0 %v12245_v9  ;;  %11887 = vmatpush3.bf16.msra.mxu1 %v12246_v24  ;;  %v12288_v9 = vld [vmem:[%s17821_s7 + $0x1e8] sm:$0xff]   ;;  %v12289_v24 = vld [vmem:[%s17821_s7 + $0x1c0] sm:$0xff]  }
 0xc74   : > { %11876 = vmatprep.subr.bf16.mxu0 %v17871_v1  ;;  %11888 = vmatprep.subr.bf16.mxu1 %v17871_v1 }
 0xc77   : > { %11877 = vmatpush3.bf16.msra.mxu0 %v12247_v12  ;;  %11889 = vmatpush3.bf16.msra.mxu1 %v12248_v60  ;;  %v10015_v12 = vld [vmem:[#allocation7 + $0xe] sm:$0x1]  ;;  %v12290_v60 = vld [vmem:[%s17821_s7 + $0x1e0] sm:$0xff]  }
 0xc78   : > { %11878 = vmatprep.subr.bf16.mxu0 %v17871_v1  ;;  %11890 = vmatprep.subr.bf16.mxu1 %v17871_v1 }
 0xc7b   : > { %11879 = vmatpush3.bf16.msra.mxu0 %v12249_v38  ;;  %11891 = vmatpush3.bf16.msra.mxu1 %v12250_v63  ;;  %v10094_v38 = vld [vmem:[#allocation7 + $0xf] sm:$0x1]  ;;  %v10016_v63 = vpack.c.bf16 %v10015_v12, %v10015_v12 }
 0xc7c   : > { %11896 = vmatprep.subr.bf16.mxu0 %v17871_v1  ;;  %11908 = vmatprep.subr.bf16.mxu1 %v17871_v1  ;;  %v10095_v33 = vpack.c.bf16 %v10094_v38, %v10094_v38 }
 0xc7e   : > { %11881 = vmatmul.mubr.msk.bf16.vlgmr.msra.gmra.mxu0 %vm8898_vm8, %v9226_v55  ;;  %11893 = vmatmul.mubr.msk.bf16.vlgmr.msra.gmra.mxu1 %vm8898_vm8, %v9305_v23  ;;  %v12292_v55 = vld [vmem:[%s17823_s9 + $0x10] sm:$0xff]   ;;  %v12293_v23 = vld [vmem:[%s17823_s9 + $0x8] sm:$0xff]  }
 0xc7f   : > { %11897 = vmatpush3.bf16.msra.mxu0 %v12251_v20  ;;  %11909 = vmatpush3.bf16.msra.mxu1 %v12252_v44  ;;  %v12294_v20 = vld [vmem:[%s17823_s9] sm:$0xff]  }
 0xc80   : > { %11898 = vmatprep.subr.bf16.mxu0 %v17871_v1  ;;  %11910 = vmatprep.subr.bf16.mxu1 %v17871_v1  ;;  %v8908_v44 = vld [vmem:[%s17822_s8] sm:$0x1] }
 0xc81   : > { %11904 = vmatprep.mubr.msk.bf16.mxu0 %vm12390_vm11, %v17871_v1  ;;  %11916 = vmatprep.mubr.msk.bf16.mxu1 %vm12390_vm11, %v17871_v1 }
 0xc83   : > { %11899 = vmatpush3.bf16.msra.mxu0 %v12253_v40  ;;  %11911 = vmatpush3.bf16.msra.mxu1 %v12254_v7 }
 0xc84   : > { %11900 = vmatprep.subr.bf16.mxu0 %v17871_v1  ;;  %11912 = vmatprep.subr.bf16.mxu1 %v17871_v1 }
 0xc87   : > { %11901 = vmatpush3.bf16.msra.mxu0 %v12255_v8  ;;  %11913 = vmatpush3.bf16.msra.mxu1 %v12256_v18 }
 0xc88   : > { %11902 = vmatprep.subr.bf16.mxu0 %v17871_v1  ;;  %11914 = vmatprep.subr.bf16.mxu1 %v17871_v1 }
 0xc8b   : > { %11903 = vmatpush3.bf16.msra.mxu0 %v12257_v2  ;;  %11915 = vmatpush3.bf16.msra.mxu1 %v12258_v13 }
 0xc8c   : > { %11920 = vmatprep.subr.bf16.mxu0 %v17871_v1  ;;  %11932 = vmatprep.subr.bf16.mxu1 %v17871_v1 }
 0xc8e   : > { %11905 = vmatmul.mubr.msk.bf16.vlgmr.msra.gmra.mxu0 %vm8898_vm8, %v9384_v3  ;;  %11917 = vmatmul.mubr.msk.bf16.vlgmr.msra.gmra.mxu1 %vm8898_vm8, %v9463_v50 }
 0xc8f   : > { %11921 = vmatpush3.bf16.msra.mxu0 %v12259_v29  ;;  %11933 = vmatpush3.bf16.msra.mxu1 %v12260_v46 }
 0xc90   : > { %11922 = vmatprep.subr.bf16.mxu0 %v17871_v1  ;;  %11934 = vmatprep.subr.bf16.mxu1 %v17871_v1 }
 0xc91   : > { %11928 = vmatprep.mubr.msk.bf16.mxu0 %vm12390_vm11, %v17871_v1  ;;  %11940 = vmatprep.mubr.msk.bf16.mxu1 %vm12390_vm11, %v17871_v1 }
 0xc93   : > { %11923 = vmatpush3.bf16.msra.mxu0 %v12261_v41  ;;  %11935 = vmatpush3.bf16.msra.mxu1 %v12262_v52 }
 0xc94   : > { %11924 = vmatprep.subr.bf16.mxu0 %v17871_v1  ;;  %11936 = vmatprep.subr.bf16.mxu1 %v17871_v1 }
 0xc97   : > { %11925 = vmatpush3.bf16.msra.mxu0 %v12263_v37  ;;  %11937 = vmatpush3.bf16.msra.mxu1 %v12264_v4 }
 0xc98   : > { %11926 = vmatprep.subr.bf16.mxu0 %v17871_v1  ;;  %11938 = vmatprep.subr.bf16.mxu1 %v17871_v1 }
 0xc9b   : > { %11927 = vmatpush3.bf16.msra.mxu0 %v12265_v27  ;;  %11939 = vmatpush3.bf16.msra.mxu1 %v12266_v36 }
 0xc9c   : > { %11944 = vmatprep.subr.bf16.mxu0 %v17871_v1  ;;  %11956 = vmatprep.subr.bf16.mxu1 %v17871_v1 }
 0xc9e   : > { %11929 = vmatmul.mubr.msk.bf16.vlgmr.msra.gmra.mxu0 %vm8898_vm8, %v9542_v25  ;;  %11941 = vmatmul.mubr.msk.bf16.vlgmr.msra.gmra.mxu1 %vm8898_vm8, %v9621_v54 }
 0xc9f   : > { %11945 = vmatpush3.bf16.msra.mxu0 %v12267_v30  ;;  %11957 = vmatpush3.bf16.msra.mxu1 %v12268_v15 }
 0xca0   : > { %11946 = vmatprep.subr.bf16.mxu0 %v17871_v1  ;;  %11958 = vmatprep.subr.bf16.mxu1 %v17871_v1 }
 0xca1   : > { %11952 = vmatprep.mubr.msk.bf16.mxu0 %vm12390_vm11, %v17871_v1  ;;  %11964 = vmatprep.mubr.msk.bf16.mxu1 %vm12390_vm11, %v17871_v1 }
 0xca3   : > { %11947 = vmatpush3.bf16.msra.mxu0 %v12269_v0  ;;  %11959 = vmatpush3.bf16.msra.mxu1 %v12270_v62 }
 0xca4   : > { %11948 = vmatprep.subr.bf16.mxu0 %v17871_v1  ;;  %11960 = vmatprep.subr.bf16.mxu1 %v17871_v1 }
 0xca7   : > { %11949 = vmatpush3.bf16.msra.mxu0 %v12271_v39  ;;  %11961 = vmatpush3.bf16.msra.mxu1 %v12272_v32 }
 0xca8   : > { %11950 = vmatprep.subr.bf16.mxu0 %v17871_v1  ;;  %11962 = vmatprep.subr.bf16.mxu1 %v17871_v1 }
 0xcab   : > { %11951 = vmatpush3.bf16.msra.mxu0 %v12273_v43  ;;  %11963 = vmatpush3.bf16.msra.mxu1 %v12274_v14 }
 0xcac   : > { %11968 = vmatprep.subr.bf16.mxu0 %v17871_v1  ;;  %11980 = vmatprep.subr.bf16.mxu1 %v17871_v1 }
 0xcae   : > { %11953 = vmatmul.mubr.msk.bf16.vlgmr.msra.gmra.mxu0 %vm8898_vm8, %v9700_v49  ;;  %11965 = vmatmul.mubr.msk.bf16.vlgmr.msra.gmra.mxu1 %vm8898_vm8, %v9779_v28 }
 0xcaf   : > { %11969 = vmatpush3.bf16.msra.mxu0 %v12275_v51  ;;  %11981 = vmatpush3.bf16.msra.mxu1 %v12276_v61 }
 0xcb0   : > { %11970 = vmatprep.subr.bf16.mxu0 %v17871_v1  ;;  %11982 = vmatprep.subr.bf16.mxu1 %v17871_v1 }
 0xcb1   : > { %11976 = vmatprep.mubr.msk.bf16.mxu0 %vm12390_vm11, %v17871_v1  ;;  %11988 = vmatprep.mubr.msk.bf16.mxu1 %vm12390_vm11, %v17871_v1 }
 0xcb3   : > { %11971 = vmatpush3.bf16.msra.mxu0 %v12277_v26  ;;  %11983 = vmatpush3.bf16.msra.mxu1 %v12278_v42 }
 0xcb4   : > { %11972 = vmatprep.subr.bf16.mxu0 %v17871_v1  ;;  %11984 = vmatprep.subr.bf16.mxu1 %v17871_v1 }
 0xcb7   : > { %11973 = vmatpush3.bf16.msra.mxu0 %v12279_v19  ;;  %11985 = vmatpush3.bf16.msra.mxu1 %v12280_v10 }
 0xcb8   : > { %11974 = vmatprep.subr.bf16.mxu0 %v17871_v1  ;;  %11986 = vmatprep.subr.bf16.mxu1 %v17871_v1 }
 0xcbb   : > { %11975 = vmatpush3.bf16.msra.mxu0 %v12281_v59  ;;  %11987 = vmatpush3.bf16.msra.mxu1 %v12282_v16 }
 0xcbc   : > { %11992 = vmatprep.subr.bf16.mxu0 %v17871_v1  ;;  %12004 = vmatprep.subr.bf16.mxu1 %v17871_v1 }
 0xcbe   : > { %11977 = vmatmul.mubr.msk.bf16.vlgmr.msra.gmra.mxu0 %vm8898_vm8, %v9858_v45  ;;  %11989 = vmatmul.mubr.msk.bf16.vlgmr.msra.gmra.mxu1 %vm8898_vm8, %v9937_v17 }
 0xcbf   : > { %11993 = vmatpush3.bf16.msra.mxu0 %v12283_v53  ;;  %12005 = vmatpush3.bf16.msra.mxu1 %v12284_v56 }
 0xcc0   : > { %11994 = vmatprep.subr.bf16.mxu0 %v17871_v1  ;;  %12006 = vmatprep.subr.bf16.mxu1 %v17871_v1 }
 0xcc1   : > { %12000 = vmatprep.mubr.msk.bf16.mxu0 %vm12390_vm11, %v17871_v1  ;;  %12012 = vmatprep.mubr.msk.bf16.mxu1 %vm12390_vm11, %v17871_v1 }
 0xcc3   : > { %11995 = vmatpush3.bf16.msra.mxu0 %v12285_v48  ;;  %12007 = vmatpush3.bf16.msra.mxu1 %v12286_v6 }
 0xcc4   : > { %11996 = vmatprep.subr.bf16.mxu0 %v17871_v1  ;;  %12008 = vmatprep.subr.bf16.mxu1 %v17871_v1 }
 0xcc7   : > { %11997 = vmatpush3.bf16.msra.mxu0 %v12287_v22  ;;  %12009 = vmatpush3.bf16.msra.mxu1 %v12288_v9 }
 0xcc8   : > { %11998 = vmatprep.subr.bf16.mxu0 %v17871_v1  ;;  %12010 = vmatprep.subr.bf16.mxu1 %v17871_v1 }
 0xccb   : > { %11999 = vmatpush3.bf16.msra.mxu0 %v12289_v24  ;;  %12011 = vmatpush3.bf16.msra.mxu1 %v12290_v60 }
 0xccc   : > { %12016 = vmatprep.subr.bf16.mxu0 %v17871_v1 }
 0xcce   : > { %12001 = vmatmul.mubr.msk.bf16.vlgmr.msra.gmra.mxu0 %vm8898_vm8, %v10016_v63  ;;  %12013 = vmatmul.mubr.msk.bf16.vlgmr.msra.gmra.mxu1 %vm8898_vm8, %v10095_v33 }
 0xccf   : > { %12024 = vmatprep.mubr.msk.bf16.mxu0 %vm12390_vm11, %v17871_v1  ;;  %12017 = vmatpush3.bf16.msra.mxu0 %v12291_v58 }
 0xcd0   : > { %12018 = vmatprep.subr.bf16.mxu0 %v17871_v1 }
 0xcd3   : > { %12019 = vmatpush3.bf16.msra.mxu0 %v12292_v55 }
 0xcd4   : > { %12020 = vmatprep.subr.bf16.mxu0 %v17871_v1 }
 0xcd7   : > { %12021 = vmatpush3.bf16.msra.mxu0 %v12293_v23 }
 0xcd8   : > { %12022 = vmatprep.subr.bf16.mxu0 %v17871_v1 }
 0xcdb   : > { %12023 = vmatpush3.bf16.msra.mxu0 %v12294_v20 }
 0xd1e   : > { %v8981_v40 = vpop.f32.mrf.mxu0  ;;  %v9060_v8 = vpop.f32.mrf.mxu1 }
 0xd1f   : > { %v8987_v7 = vadd.f32 %v8981_v40, %v8908_v44 }
 0xd20   : > { %v11834_v18 = vpop.f32.mrf.mxu0  ;;  %v11846_v13 = vpop.f32.mrf.mxu1 }
 0xd21   : > { %v9066_v2 = vadd.f32 %v9060_v8, %v8987_v7 }
 0xd22   : > { %v8984_v34 = vpop.f32.mrf.mxu0  ;;  %v9063_v11 = vpop.f32.mrf.mxu1 }
 0xd24   : > { %v11835_v3 = vpop.f32.mrf.mxu0  ;;  %v11847_v50 = vpop.f32.mrf.mxu1 }
 0xd2e   : > { %v9139_v1 = vpop.f32.mrf.mxu0  ;;  %v9218_v46 = vpop.f32.mrf.mxu1 }
 0xd2f   : > { %v9145_v29 = vadd.f32 %v9139_v1, %v9066_v2 }
 0xd30   : > { %v11858_v41 = vpop.f32.mrf.mxu0  ;;  %v11870_v37 = vpop.f32.mrf.mxu1 }
 0xd31   : > { %v9224_v52 = vadd.f32 %v9218_v46, %v9145_v29 }
 0xd32   : > { %v9142_v4 = vpop.f32.mrf.mxu0  ;;  %v9221_v27 = vpop.f32.mrf.mxu1 }
 0xd33   : > { %v10182_v27 = vld [vmem:[%s17824_s10] sm:$0x1] }
 0xd34   : > { %v11859_v47 = vpop.f32.mrf.mxu0  ;;  %v11871_v36 = vpop.f32.mrf.mxu1 }
 0xd3e   : > { %v9297_v31 = vpop.f32.mrf.mxu0  ;;  %v9376_v25 = vpop.f32.mrf.mxu1 }
 0xd3f   : > { %v9303_v53 = vadd.f32 %v9297_v31, %v9224_v52 }
 0xd40   : > { %v11882_v54 = vpop.f32.mrf.mxu0  ;;  %v11894_v30 = vpop.f32.mrf.mxu1 }
 0xd41   : > { %v9382_v9 = vadd.f32 %v9376_v25, %v9303_v53 }
 0xd42   : > { %v9300_v15 = vpop.f32.mrf.mxu0  ;;  %v9379_v0 = vpop.f32.mrf.mxu1 }
 0xd44   : > { %v11883_v62 = vpop.f32.mrf.mxu0  ;;  %v11895_v39 = vpop.f32.mrf.mxu1 }
 0xd4e   : > { %v9455_v32 = vpop.f32.mrf.mxu0  ;;  %v9534_v43 = vpop.f32.mrf.mxu1 }
 0xd4f   : > { %v9461_v12 = vadd.f32 %v9455_v32, %v9382_v9 }
 0xd50   : > { %v11906_v57 = vpop.f32.mrf.mxu0  ;;  %v11918_v14 = vpop.f32.mrf.mxu1 }
 0xd51   : > { %v9540_v60 = vadd.f32 %v9534_v43, %v9461_v12 }
 0xd52   : > { %v9458_v21 = vpop.f32.mrf.mxu0  ;;  %v9537_v49 = vpop.f32.mrf.mxu1 }
 0xd54   : > { %v11907_v28 = vpop.f32.mrf.mxu0  ;;  %v11919_v51 = vpop.f32.mrf.mxu1 }
 0xd5e   : > { %v9613_v61 = vpop.f32.mrf.mxu0  ;;  %v9692_v26 = vpop.f32.mrf.mxu1 }
 0xd5f   : > { %v9619_v38 = vadd.f32 %v9613_v61, %v9540_v60 }
 0xd60   : > { %v11930_v42 = vpop.f32.mrf.mxu0  ;;  %v11942_v19 = vpop.f32.mrf.mxu1 }
 0xd61   : > { %v9698_v55 = vadd.f32 %v9692_v26, %v9619_v38 }
 0xd62   : > { %v9616_v10 = vpop.f32.mrf.mxu0  ;;  %v9695_v59 = vpop.f32.mrf.mxu1 }
 0xd64   : > { %v11931_v5 = vpop.f32.mrf.mxu0  ;;  %v11943_v16 = vpop.f32.mrf.mxu1 }
 0xd6e   : > { %v9771_v35 = vpop.f32.mrf.mxu0  ;;  %v9850_v45 = vpop.f32.mrf.mxu1 }
 0xd6f   : > { %v9777_v44 = vadd.f32 %v9771_v35, %v9698_v55 }
 0xd70   : > { %v11954_v17 = vpop.f32.mrf.mxu0  ;;  %v11966_v56 = vpop.f32.mrf.mxu1 }
 0xd71   : > { %v9856_v18 = vadd.f32 %v9850_v45, %v9777_v44 }
 0xd72   : > { %v9774_v48 = vpop.f32.mrf.mxu0  ;;  %v9853_v6 = vpop.f32.mrf.mxu1 }
 0xd74   : > { %v11955_v22 = vpop.f32.mrf.mxu0  ;;  %v11967_v24 = vpop.f32.mrf.mxu1 }
 0xd7e   : > { %v9929_v63 = vpop.f32.mrf.mxu0  ;;  %v10008_v33 = vpop.f32.mrf.mxu1 }
 0xd7f   : > { %v9935_v2 = vadd.f32 %v9929_v63, %v9856_v18 }
 0xd80   : > { %v11978_v58 = vpop.f32.mrf.mxu0  ;;  %v11990_v23 = vpop.f32.mrf.mxu1 }
 0xd81   : > { %v10014_v13 = vadd.f32 %v10008_v33, %v9935_v2 }
 0xd82   : > { %v9932_v20 = vpop.f32.mrf.mxu0  ;;  %v10011_v40 = vpop.f32.mrf.mxu1 }
 0xd84   : > { %v11979_v7 = vpop.f32.mrf.mxu0  ;;  %v11991_v8 = vpop.f32.mrf.mxu1 }
 0xd8e   : > { %v10087_v34 = vpop.f32.mrf.mxu0  ;;  %v10166_v3 = vpop.f32.mrf.mxu1 }
 0xd8f   : > { %v10093_v11 = vadd.f32 %v10087_v34, %v10014_v13 }
 0xd90   : > { %v12002_v50 = vpop.f32.mrf.mxu0  ;;  %v12014_v29 = vpop.f32.mrf.mxu1 }
 0xd91   : > { %v10172_v1 = vadd.f32 %v10166_v3, %v10093_v11 }
 0xd92   : > { %v10090_v46 = vpop.f32.mrf.mxu0  ;;  %v10169_v52 = vpop.f32.mrf.mxu1 }
 0xd93   : > { %v10173_v41 = vpack.c.bf16 %v10172_v1, %v10172_v1 }
 0xd94   : > { %v12003_v37 = vpop.f32.mrf.mxu0  ;;  %v12015_v4 = vpop.f32.mrf.mxu1 }
 0xd95   : > { %12025 = vmatmul.mubr.msk.bf16.vlgmr.msra.gmra.mxu0 %vm8898_vm8, %v10173_v41 }
 0xe55   : > { %v10244_v47 = vpop.f32.mrf.mxu0 }
 0xe56   : > { %v10245_v36 = vadd.f32 %v10244_v47, %v10182_v27 }
 0xe57   : > { %v12026_v31 = vpop.f32.mrf.mxu0 }
 0xe58   : > { %10250 = vst [vmem:[%s15220_s29] sm:$0x1] %v10245_v36 }
 0xe59   : > { %v10247_v25 = vpop.f32.mrf.mxu0 }
 0xe5a   : > { %12308 = shalt.err (!%p12305_p8)
}
 0xe5b   : > { %s12309_s29 = scalar_lea.hbm %s17770_s24, 16  ;;  %s12313_s12 = scalar_lea.hbm %s17825_s11, 32 }
 0xe5c   : > { %p12310_p9 = scmp.ne.s32.totalorder %s17770_s24, %s12309_s29  ;;  %p12314_p12 = scmp.lt.s32.totalorder %s17770_s24, %s17825_s11 }
 0xe5d   : > { %p12315_p13 = scmp.lt.s32.totalorder %s12313_s12, %s12309_s29 }
 0xe5e   : > { %p12311_p10 = pnand %p12310_p9, %p12490_p5 }
 0xe5f   : > { %p12316_p0 = por %p12315_p13, %p12314_p12 }
 0xe60   : > { %p12312_p11 = pneg %p12311_p10 }
 0xe62   : > { %p12317_p1 = pnand %p12316_p0, %p12312_p11 }
 0xe64   : > { %12320 = shalt.err (!%p12317_p1)
}
 0xe65   : > { %12039 = dma.vmem_to_hbm [thread:$0]  (%p12490_p5), %s17772_s25, 16, %s17770_s24, %s10252_s30   ;;  %v12027_v54 = vpop.f32.mrf.mxu0 }
 0xe66 PF: > { %p12045_p2 = scmp.ge.s32.totalorder %s12367_s20, 2  ;;  %s10276_s14 = sand.u32 1, %s12355_s17  }
 0xe67   : > { %s10277_s0 = scalar_lea.sflag [#allocation10], %s10276_s14 }
 0xe68   : > { %p12042_p3 = pnand %p12045_p2, %p12494_p6 }
 0xe6a   : > { %p12043_p4 = pneg %p12042_p3 }
 0xe6c   : > { %12350 = dma.done.wait (%p12043_p4), %s10277_s0, 16  }
 0xe6d   : > { %12352 = vsyncadd (%p12043_p4), %s10277_s0, 4294967280  ;;  %p21_p7 = scmp.ge.s32.totalorder %s12477_s23, 4   ;;  %s17873_s17 = smov %s12359_s18 }
 0xe6e   : > { %s17874_s18 = smov %s12363_s19  ;;  %s17875_s19 = smov %s12488_s26 }
 0xe6f   : > { %s17876_s20 = smov %s12477_s23  ;;  %23 = sbr.rel (!%p21_p7) target bundleno = 5 (0x5), region = 206 }
 0xe74   :  { %10281 = vsyncpa [#allocation10], 1 }
 0xe75   :  { %10283 = vsyncpa [#allocation10 + $0x1], 1 }

</bundles_post_ra>
